<compile_context>
chip_gen: v7x
topology: tpu7x:2x2x1
jax: 0.10.0
libtpu: 0.0.40
codegen_flags: <defaults>
</compile_context>

<pallas_src>
import functools

import jax
import jax.numpy as jnp
from jax import lax
from jax.experimental import pallas as pl
from jax.experimental.pallas import tpu as pltpu

_VMEM_LIMIT = 32 * 1024 * 1024  # safe scoped-VMEM value on v5e / v6e / v7x


def _cparams(**kw):
    return pltpu.CompilerParams(**kw)


def _pick_tile_h(H, halo):
    """Largest row-block that divides H, is >= halo, and leaves >=4 (else >=2)
    grid steps for pipelining / megacore."""
    lo = max(2, halo)
    for min_steps in (4, 2):
        for t in (16, 8, 4, 2):
            if t >= lo and H % t == 0 and H // t >= min_steps:
                return t
    return H  # fall back: whole image in one step


# ---------------------------------------------------------------------------
# Kernels
# ---------------------------------------------------------------------------
def fused_1x1_kernel(x_ref, w_ref, b_ref, o_ref):
    # x: [TILE_M, Cin], w: [Cin, c1+c2+c3], b: [1, c1+c2+c3]
    # Single lane-dense output slab; sliced into branches downstream.
    o_ref[...] = (
        jnp.dot(x_ref[...], w_ref[...], preferred_element_type=jnp.float32)
        + b_ref[...]
    )


def conv_kernel(x_ref, w_ref, b_ref, o_ref, *, K, TILE_H, H, W):
    # "same" KxK conv on a TILE_H-row output block.
    # x_ref: [B, H, W, Cr]   full (small) reduced activation, VMEM resident
    # w_ref: [K*K*Cr, Cout]  resident
    # b_ref: [1, Cout]
    # o_ref: [B, TILE_H, W, Cout] output row block
    p = K // 2
    row0 = pl.program_id(0) * TILE_H
    B = x_ref.shape[0]
    Cr = x_ref.shape[-1]
    Cout = o_ref.shape[-1]

    mid = x_ref[:, pl.ds(row0, TILE_H)]                       # (B, TILE_H, W, Cr)

    # Vertical halo rows (zero padding); clamp the VMEM slice start and mask
    # rows whose absolute index falls outside [0, H).
    top = x_ref[:, pl.ds(jnp.maximum(row0 - p, 0), p)]        # (B, p, W, Cr)
    top_ids = (row0 - p) + lax.broadcasted_iota(jnp.int32, top.shape, 1)
    top = jnp.where(top_ids >= 0, top, 0.0)
    bot = x_ref[:, pl.ds(jnp.minimum(row0 + TILE_H, H - p), p)]
    bot_ids = (row0 + TILE_H) + lax.broadcasted_iota(jnp.int32, bot.shape, 1)
    bot = jnp.where(bot_ids < H, bot, 0.0)

    slab = jnp.concatenate([top, mid, bot], axis=1)           # (B, TILE_H+2p, W, Cr)
    zcol = jnp.zeros((B, TILE_H + 2 * p, p, Cr), slab.dtype)  # horizontal zero halo
    slab = jnp.concatenate([zcol, slab, zcol], axis=2)        # (B, TILE_H+2p, W+2p, Cr)

    # im2col once -> ONE MXU matmul with contracting dim K*K*Cr.
    cols = []
    for dy in range(K):
        for dx in range(K):
            cols.append(slab[:, dy:dy + TILE_H, dx:dx + W, :])
    patches = jnp.concatenate(cols, axis=-1)                  # (B, TILE_H, W, K*K*Cr)
    patches = patches.reshape(B * TILE_H * W, K * K * Cr)
    y = jnp.dot(patches, w_ref[...], preferred_element_type=jnp.float32)
    y = y + b_ref[...]
    o_ref[...] = y.reshape(B, TILE_H, W, Cout)


def pool_proj_kernel(x_ref, w_ref, b_ref, o_ref, *, TILE_H, H, W):
    # 3x3 stride-1 maxpool ("same", -inf padding) fused with the 1x1 proj,
    # on a TILE_H-row output block.  Input is the full activation, resident.
    row0 = pl.program_id(0) * TILE_H
    B = x_ref.shape[0]
    Cin = x_ref.shape[-1]
    Cout = o_ref.shape[-1]
    neg = jnp.float32(-jnp.inf)

    mid = x_ref[:, pl.ds(row0, TILE_H)]                       # rows h
    top = x_ref[:, pl.ds(jnp.maximum(row0 - 1, 0), 1)]        # row row0-1 (clamped)
    top_ids = (row0 - 1) + lax.broadcasted_iota(jnp.int32, top.shape, 1)
    top = jnp.where(top_ids >= 0, top, neg)
    bot = x_ref[:, pl.ds(jnp.minimum(row0 + TILE_H, H - 1), 1)]
    bot_ids = (row0 + TILE_H) + lax.broadcasted_iota(jnp.int32, bot.shape, 1)
    bot = jnp.where(bot_ids < H, bot, neg)

    up = jnp.concatenate([top, mid[:, :TILE_H - 1]], axis=1)  # rows h-1
    dn = jnp.concatenate([mid[:, 1:], bot], axis=1)           # rows h+1
    vmax = jnp.maximum(jnp.maximum(up, mid), dn)              # (B, TILE_H, W, Cin)

    ncol = jnp.full((B, TILE_H, 1, Cin), neg, dtype=vmax.dtype)
    hpad = jnp.concatenate([ncol, vmax, ncol], axis=2)        # (B, TILE_H, W+2, Cin)
    pooled = jnp.maximum(jnp.maximum(hpad[:, :, 0:W], hpad[:, :, 1:W + 1]),
                         hpad[:, :, 2:W + 2])                 # (B, TILE_H, W, Cin)

    y = jnp.dot(pooled.reshape(B * TILE_H * W, Cin), w_ref[...],
                preferred_element_type=jnp.float32)
    y = y + b_ref[...]
    o_ref[...] = y.reshape(B, TILE_H, W, Cout)


# ---------------------------------------------------------------------------
# Pallas wrappers
# ---------------------------------------------------------------------------
def fused_1x1(x_flat, w_cat, b_cat, tile_m=512):
    M, Cin = x_flat.shape
    Csum = w_cat.shape[-1]
    tm = min(tile_m, M)
    while tm > 8 and pl.cdiv(M, tm) < 4:   # keep >=4 grid steps when possible
        tm //= 2
    tm = max(8, (tm // 8) * 8)
    grid_m = pl.cdiv(M, tm)
    flops = 2 * M * Cin * Csum
    nbytes = 4 * (M * Cin + Cin * Csum + Csum + M * Csum)
    return pl.pallas_call(
        fused_1x1_kernel,
        grid=(grid_m,),
        in_specs=[
            pl.BlockSpec((tm, Cin), lambda i: (i, 0)),
            pl.BlockSpec((Cin, Csum), lambda i: (0, 0)),
            pl.BlockSpec((1, Csum), lambda i: (0, 0)),
        ],
        out_specs=pl.BlockSpec((tm, Csum), lambda i: (i, 0)),
        out_shape=jax.ShapeDtypeStruct((M, Csum), jnp.float32),
        compiler_params=_cparams(dimension_semantics=("parallel",),
                                 vmem_limit_bytes=_VMEM_LIMIT),
        cost_estimate=pl.CostEstimate(flops=flops, transcendentals=0,
                                      bytes_accessed=nbytes),
    )(x_flat, w_cat, b_cat)


def conv_kxk(r_nhwc, w_hwio, b, K):
    # KxK "same" conv over TILE_H-row output blocks; input/weights resident.
    # TODO(synk): for very large activations, switch the resident input to a
    # manually DMA'd (TILE_H + K - 1)-row slab (memory_space=pl.ANY) to bound
    # VMEM; at inception-sized reduced activations residency is cheaper.
    B, H, W, Cr = r_nhwc.shape
    Cout = w_hwio.shape[-1]
    p = K // 2
    TILE_H = _pick_tile_h(H, p)
    w2d = w_hwio.reshape(K * K * Cr, Cout)
    b2 = b.reshape(1, Cout)
    kern = functools.partial(conv_kernel, K=K, TILE_H=TILE_H, H=H, W=W)
    flops = 2 * B * H * W * K * K * Cr * Cout
    nbytes = 4 * (B * H * W * Cr + K * K * Cr * Cout + Cout + B * H * W * Cout)
    return pl.pallas_call(
        kern,
        grid=(H // TILE_H,),
        in_specs=[
            pl.BlockSpec((B, H, W, Cr), lambda i: (0, 0, 0, 0)),       # resident
            pl.BlockSpec((K * K * Cr, Cout), lambda i: (0, 0)),        # resident
            pl.BlockSpec((1, Cout), lambda i: (0, 0)),
        ],
        out_specs=pl.BlockSpec((B, TILE_H, W, Cout), lambda i: (0, i, 0, 0)),
        out_shape=jax.ShapeDtypeStruct((B, H, W, Cout), jnp.float32),
        compiler_params=_cparams(dimension_semantics=("parallel",),
                                 vmem_limit_bytes=_VMEM_LIMIT),
        cost_estimate=pl.CostEstimate(flops=flops, transcendentals=0,
                                      bytes_accessed=nbytes),
    )(r_nhwc, w2d, b2)


def maxpool_proj(x_nhwc, w, b):
    B, H, W, Cin = x_nhwc.shape
    Cout = w.shape[-1]
    TILE_H = _pick_tile_h(H, 1)
    b2 = b.reshape(1, Cout)
    kern = functools.partial(pool_proj_kernel, TILE_H=TILE_H, H=H, W=W)
    flops = 2 * B * H * W * Cin * Cout
    nbytes = 4 * (B * H * W * Cin + Cin * Cout + Cout + B * H * W * Cout)
    return pl.pallas_call(
        kern,
        grid=(H // TILE_H,),
        in_specs=[
            pl.BlockSpec((B, H, W, Cin), lambda i: (0, 0, 0, 0)),      # resident
            pl.BlockSpec((Cin, Cout), lambda i: (0, 0)),
            pl.BlockSpec((1, Cout), lambda i: (0, 0)),
        ],
        out_specs=pl.BlockSpec((B, TILE_H, W, Cout), lambda i: (0, i, 0, 0)),
        out_shape=jax.ShapeDtypeStruct((B, H, W, Cout), jnp.float32),
        compiler_params=_cparams(dimension_semantics=("parallel",),
                                 vmem_limit_bytes=_VMEM_LIMIT),
        cost_estimate=pl.CostEstimate(flops=flops, transcendentals=0,
                                      bytes_accessed=nbytes),
    )(x_nhwc, w, b2)


# ---------------------------------------------------------------------------
# InceptionModule forward (NCHW in / NCHW out, matching the PyTorch module)
# ---------------------------------------------------------------------------
def inception_forward(x_nchw, params):
    x = jnp.transpose(x_nchw, (0, 2, 3, 1))      # NCHW -> NHWC
    B, H, W, Cin = x.shape
    c1 = params["w1"].shape[-1]
    c2 = params["w2r"].shape[-1]
    c3 = params["w3r"].shape[-1]

    # Fused 1x1: branch1 + 3x3-reduce + 5x5-reduce share the same input ->
    # one lane-dense matmul, one HBM pass.
    w_cat = jnp.concatenate([params["w1"], params["w2r"], params["w3r"]], axis=1)
    b_cat = jnp.concatenate([params["b1"], params["b2r"], params["b3r"]]).reshape(1, -1)
    slab = fused_1x1(x.reshape(B * H * W, Cin), w_cat, b_cat)
    b1 = slab[:, :c1].reshape(B, H, W, c1)
    r2 = slab[:, c1:c1 + c2].reshape(B, H, W, c2)
    r3 = slab[:, c1 + c2:].reshape(B, H, W, c3)

    b2 = conv_kxk(r2, params["w2"], params["b2"], K=3)
    b3 = conv_kxk(r3, params["w3"], params["b3"], K=5)
    b4 = maxpool_proj(x, params["w4"], params["b4"])

    # TODO(synk): write each branch straight into its channel slice of a
    # shared (B,H,W,Ctot) buffer once the branch widths are 128-lane aligned;
    # a partial-lane out BlockSpec at these channel counts would violate the
    # (8,128) rule, so the concat + NCHW transpose stay in XLA for now.
    out = jnp.concatenate([b1, b2, b3, b4], axis=-1)
    return jnp.transpose(out, (0, 3, 1, 2))      # NHWC -> NCHW


# ---------------------------------------------------------------------------
# Deterministic parameter init + pure-JAX reference for validation
# ---------------------------------------------------------------------------
def init_params(key, in_channels, out1x1, red3x3, out3x3, red5x5, out5x5, pool_proj):
    ks = jax.random.split(key, 12)

    def w(k, shape):
        return jax.random.normal(k, shape, jnp.float32) * 0.1

    return {
        "w1":  w(ks[0], (in_channels, out1x1)),      "b1":  w(ks[1], (out1x1,)),
        "w2r": w(ks[2], (in_channels, red3x3)),      "b2r": w(ks[3], (red3x3,)),
        "w2":  w(ks[4], (3, 3, red3x3, out3x3)),     "b2":  w(ks[5], (out3x3,)),
        "w3r": w(ks[6], (in_channels, red5x5)),      "b3r": w(ks[7], (red5x5,)),
        "w3":  w(ks[8], (5, 5, red5x5, out5x5)),     "b3":  w(ks[9], (out5x5,)),
        "w4":  w(ks[10], (in_channels, pool_proj)),  "b4":  w(ks[11], (pool_proj,)),
    }


def reference_forward(x_nchw, params):
    x = jnp.transpose(x_nchw, (0, 2, 3, 1))
    dn = ("NHWC", "HWIO", "NHWC")

    def conv(inp, w_hwio, b, pad):
        return jax.lax.conv_general_dilated(
            inp, w_hwio, (1, 1), [(pad, pad), (pad, pad)], dimension_numbers=dn
        ) + b

    b1 = conv(x, params["w1"][None, None], params["b1"], 0)
    r2 = conv(x, params["w2r"][None, None], params["b2r"], 0)
    b2 = conv(r2, params["w2"], params["b2"], 1)
    r3 = conv(x, params["w3r"][None, None], params["b3r"], 0)
    b3 = conv(r3, params["w3"], params["b3"], 2)
    pooled = jax.lax.reduce_window(
        x, -jnp.inf, jax.lax.max, (1, 3, 3, 1), (1, 1, 1, 1), "SAME"
    )
    b4 = conv(pooled, params["w4"][None, None], params["b4"], 0)
    out = jnp.concatenate([b1, b2, b3, b4], axis=-1)
    return jnp.transpose(out, (0, 3, 1, 2))


if __name__ == "__main__":
    key = jax.random.PRNGKey(0)
    k_x, k_p = jax.random.split(key)

    B, Cin, H, W = 2, 4, 16, 16
    out1x1, red3x3, out3x3, red5x5, out5x5, pool_proj_ch = 8, 4, 8, 4, 8, 8

    x = jax.random.normal(k_x, (B, Cin, H, W), jnp.float32)
    params = init_params(k_p, Cin, out1x1, red3x3, out3x3, red5x5, out5x5,
                         pool_proj_ch)

    fwd = jax.jit(inception_forward)
    out = jax.block_until_ready(fwd(x, params))

    expected_channels = out1x1 + out3x3 + out5x5 + pool_proj_ch
    assert out.shape == (B, expected_channels, H, W), out.shape

    ref = jax.block_until_ready(reference_forward(x, params))
    assert jnp.allclose(out, ref, atol=1e-4, rtol=1e-4), float(
        jnp.max(jnp.abs(out - ref))
    )

    print("KERNEL_OK")
</pallas_src>

<mosaic_0001>
module attributes {stable_mosaic.version = 11 : i64} {
  func.func @fused_1x1_kernel(%arg0: i32, %arg1: memref<128x4xf32, #tpu.memory_space<vmem>>, %arg2: memref<4x16xf32, #tpu.memory_space<vmem>>, %arg3: memref<1x16xf32, #tpu.memory_space<vmem>>, %arg4: memref<128x16xf32, #tpu.memory_space<vmem>>) attributes {dimension_semantics = [#tpu.dimension_semantics<parallel>], iteration_bounds = array<i64: 4>, scalar_prefetch = 0 : i64, scratch_operands = 0 : i64, tpu.core_type = #tpu.core_type<tc>, window_params = [{transform_indices = @transform_0, window_bounds = array<i64: 128, 4>}, {pipeline_mode = #tpu.pipeline_mode<synchronous>, transform_indices = @transform_1, window_bounds = array<i64: 4, 16>}, {pipeline_mode = #tpu.pipeline_mode<synchronous>, transform_indices = @transform_2, window_bounds = array<i64: 1, 16>}, {transform_indices = @transform_3, window_bounds = array<i64: 128, 16>}]} {
    %c0 = arith.constant 0 : index
    %c0_0 = arith.constant 0 : index
    %0 = vector.load %arg1[%c0, %c0_0] : memref<128x4xf32, #tpu.memory_space<vmem>>, vector<128x4xf32>
    %c0_1 = arith.constant 0 : index
    %c0_2 = arith.constant 0 : index
    %1 = vector.load %arg2[%c0_1, %c0_2] : memref<4x16xf32, #tpu.memory_space<vmem>>, vector<4x16xf32>
    %cst = arith.constant dense<0.000000e+00> : vector<128x16xf32>
    %2 = tpu.matmul %0, %1, %cst {dimension_numbers = #tpu.dot_dimension_numbers<[1], [0], [0], [1], [0, 0, 1, 1], [], []>} : vector<128x4xf32>, vector<4x16xf32>, vector<128x16xf32> -> vector<128x16xf32>
    %c0_3 = arith.constant 0 : index
    %c0_4 = arith.constant 0 : index
    %3 = vector.load %arg3[%c0_3, %c0_4] : memref<1x16xf32, #tpu.memory_space<vmem>>, vector<1x16xf32>
    %4 = vector.broadcast %3 : vector<1x16xf32> to vector<128x16xf32>
    %5 = arith.addf %2, %4 : vector<128x16xf32>
    %c0_5 = arith.constant 0 : index
    %c0_6 = arith.constant 0 : index
    %6 = vector.load %arg4[%c0_5, %c0_6] : memref<128x16xf32, #tpu.memory_space<vmem>>, vector<128x16xf32>
    tpu.vector_store %arg4[%c0_5, %c0_6], %5 {strides = array<i32>} : memref<128x16xf32, #tpu.memory_space<vmem>>, vector<128x16xf32>,
    return
  }
  func.func @transform_0(%arg0: i32) -> (i32, i32) {
    %c0_i32 = arith.constant 0 : i32
    %c0_i32_0 = arith.constant 0 : i32
    return %arg0, %c0_i32 : i32, i32
  }
  func.func @transform_1(%arg0: i32) -> (i32, i32) {
    %c0_i32 = arith.constant 0 : i32
    %c0_i32_0 = arith.constant 0 : i32
    %c0_i32_1 = arith.constant 0 : i32
    return %c0_i32, %c0_i32_0 : i32, i32
  }
  func.func @transform_2(%arg0: i32) -> (i32, i32) {
    %c0_i32 = arith.constant 0 : i32
    %c0_i32_0 = arith.constant 0 : i32
    %c0_i32_1 = arith.constant 0 : i32
    return %c0_i32, %c0_i32_0 : i32, i32
  }
  func.func @transform_3(%arg0: i32) -> (i32, i32) {
    %c0_i32 = arith.constant 0 : i32
    %c0_i32_0 = arith.constant 0 : i32
    return %arg0, %c0_i32 : i32, i32
  }
}

module attributes {stable_mosaic.version = 11 : i64} {
  func.func @conv_kernel(%arg0: i32, %arg1: memref<2x16x16x4xf32, #tpu.memory_space<vmem>>, %arg2: memref<100x8xf32, #tpu.memory_space<vmem>>, %arg3: memref<1x8xf32, #tpu.memory_space<vmem>>, %arg4: memref<2x4x16x8xf32, #tpu.memory_space<vmem>>) attributes {dimension_semantics = [#tpu.dimension_semantics<parallel>], iteration_bounds = array<i64: 4>, scalar_prefetch = 0 : i64, scratch_operands = 0 : i64, tpu.core_type = #tpu.core_type<tc>, window_params = [{pipeline_mode = #tpu.pipeline_mode<synchronous>, transform_indices = @transform_0, window_bounds = array<i64: 2, 16, 16, 4>}, {pipeline_mode = #tpu.pipeline_mode<synchronous>, transform_indices = @transform_1, window_bounds = array<i64: 100, 8>}, {pipeline_mode = #tpu.pipeline_mode<synchronous>, transform_indices = @transform_2, window_bounds = array<i64: 1, 8>}, {transform_indices = @transform_3, window_bounds = array<i64: 2, 4, 16, 8>}]} {
    %c4_i32 = arith.constant 4 : i32
    %0 = arith.muli %arg0, %c4_i32 : i32
    %c0 = arith.constant 0 : index
    %1 = arith.index_cast %0 : i32 to index
    %c0_0 = arith.constant 0 : index
    %c0_1 = arith.constant 0 : index
    %2 = vector.load %arg1[%c0, %1, %c0_0, %c0_1] : memref<2x16x16x4xf32, #tpu.memory_space<vmem>>, vector<2x4x16x4xf32>
    %c2_i32 = arith.constant 2 : i32
    %3 = arith.subi %0, %c2_i32 : i32
    %c0_i32 = arith.constant 0 : i32
    %4 = arith.maxsi %3, %c0_i32 : i32
    %c0_2 = arith.constant 0 : index
    %5 = arith.index_cast %4 : i32 to index
    %c0_3 = arith.constant 0 : index
    %c0_4 = arith.constant 0 : index
    %6 = vector.load %arg1[%c0_2, %5, %c0_3, %c0_4] : memref<2x16x16x4xf32, #tpu.memory_space<vmem>>, vector<2x2x16x4xf32>
    %c2_i32_5 = arith.constant 2 : i32
    %7 = arith.subi %0, %c2_i32_5 : i32
    %8 = tpu.iota {dimensions = array<i32: 1>} : vector<2x2x16x4xi32>
    %9 = vector.broadcast %7 : i32 to vector<2x2x16x4xi32>
    %10 = arith.addi %9, %8 : vector<2x2x16x4xi32>
    %c0_i32_6 = arith.constant 0 : i32
    %11 = vector.broadcast %c0_i32_6 : i32 to vector<2x2x16x4xi32>
    %12 = arith.cmpi sge, %10, %11 : vector<2x2x16x4xi32>
    %cst = arith.constant 0.000000e+00 : f32
    %13 = vector.broadcast %cst : f32 to vector<2x2x16x4xf32>
    %14 = arith.select %12, %6, %13 : vector<2x2x16x4xi1>, vector<2x2x16x4xf32>
    %c4_i32_7 = arith.constant 4 : i32
    %15 = arith.addi %0, %c4_i32_7 : i32
    %c14_i32 = arith.constant 14 : i32
    %16 = arith.minsi %15, %c14_i32 : i32
    %c0_8 = arith.constant 0 : index
    %17 = arith.index_cast %16 : i32 to index
    %c0_9 = arith.constant 0 : index
    %c0_10 = arith.constant 0 : index
    %18 = vector.load %arg1[%c0_8, %17, %c0_9, %c0_10] : memref<2x16x16x4xf32, #tpu.memory_space<vmem>>, vector<2x2x16x4xf32>
    %c4_i32_11 = arith.constant 4 : i32
    %19 = arith.addi %0, %c4_i32_11 : i32
    %20 = tpu.iota {dimensions = array<i32: 1>} : vector<2x2x16x4xi32>
    %21 = vector.broadcast %19 : i32 to vector<2x2x16x4xi32>
    %22 = arith.addi %21, %20 : vector<2x2x16x4xi32>
    %c16_i32 = arith.constant 16 : i32
    %23 = vector.broadcast %c16_i32 : i32 to vector<2x2x16x4xi32>
    %24 = arith.cmpi slt, %22, %23 : vector<2x2x16x4xi32>
    %cst_12 = arith.constant 0.000000e+00 : f32
    %25 = vector.broadcast %cst_12 : f32 to vector<2x2x16x4xf32>
    %26 = arith.select %24, %18, %25 : vector<2x2x16x4xi1>, vector<2x2x16x4xf32>
    %27 = tpu.concatenate %14, %2, %26 in 1 : vector<2x2x16x4xf32>, vector<2x4x16x4xf32>, vector<2x2x16x4xf32> -> vector<2x8x16x4xf32>
    %cst_13 = arith.constant 0.000000e+00 : f32
    %28 = vector.broadcast %cst_13 : f32 to vector<2x8x2x4xf32>
    %29 = tpu.concatenate %28, %27, %28 in 2 : vector<2x8x2x4xf32>, vector<2x8x16x4xf32>, vector<2x8x2x4xf32> -> vector<2x8x20x4xf32>
    %30 = vector.extract_strided_slice %29 {offsets = [0, 0, 0, 0], sizes = [2, 4, 16, 4], strides = [1, 1, 1, 1]} : vector<2x8x20x4xf32> to vector<2x4x16x4xf32>
    %31 = vector.extract_strided_slice %29 {offsets = [0, 0, 1, 0], sizes = [2, 4, 16, 4], strides = [1, 1, 1, 1]} : vector<2x8x20x4xf32> to vector<2x4x16x4xf32>
    %32 = vector.extract_strided_slice %29 {offsets = [0, 0, 2, 0], sizes = [2, 4, 16, 4], strides = [1, 1, 1, 1]} : vector<2x8x20x4xf32> to vector<2x4x16x4xf32>
    %33 = vector.extract_strided_slice %29 {offsets = [0, 0, 3, 0], sizes = [2, 4, 16, 4], strides = [1, 1, 1, 1]} : vector<2x8x20x4xf32> to vector<2x4x16x4xf32>
    %34 = vector.extract_strided_slice %29 {offsets = [0, 0, 4, 0], sizes = [2, 4, 16, 4], strides = [1, 1, 1, 1]} : vector<2x8x20x4xf32> to vector<2x4x16x4xf32>
    %35 = vector.extract_strided_slice %29 {offsets = [0, 1, 0, 0], sizes = [2, 4, 16, 4], strides = [1, 1, 1, 1]} : vector<2x8x20x4xf32> to vector<2x4x16x4xf32>
    %36 = vector.extract_strided_slice %29 {offsets = [0, 1, 1, 0], sizes = [2, 4, 16, 4], strides = [1, 1, 1, 1]} : vector<2x8x20x4xf32> to vector<2x4x16x4xf32>
    %37 = vector.extract_strided_slice %29 {offsets = [0, 1, 2, 0], sizes = [2, 4, 16, 4], strides = [1, 1, 1, 1]} : vector<2x8x20x4xf32> to vector<2x4x16x4xf32>
    %38 = vector.extract_strided_slice %29 {offsets = [0, 1, 3, 0], sizes = [2, 4, 16, 4], strides = [1, 1, 1, 1]} : vector<2x8x20x4xf32> to vector<2x4x16x4xf32>
    %39 = vector.extract_strided_slice %29 {offsets = [0, 1, 4, 0], sizes = [2, 4, 16, 4], strides = [1, 1, 1, 1]} : vector<2x8x20x4xf32> to vector<2x4x16x4xf32>
    %40 = vector.extract_strided_slice %29 {offsets = [0, 2, 0, 0], sizes = [2, 4, 16, 4], strides = [1, 1, 1, 1]} : vector<2x8x20x4xf32> to vector<2x4x16x4xf32>
    %41 = vector.extract_strided_slice %29 {offsets = [0, 2, 1, 0], sizes = [2, 4, 16, 4], strides = [1, 1, 1, 1]} : vector<2x8x20x4xf32> to vector<2x4x16x4xf32>
    %42 = vector.extract_strided_slice %29 {offsets = [0, 2, 2, 0], sizes = [2, 4, 16, 4], strides = [1, 1, 1, 1]} : vector<2x8x20x4xf32> to vector<2x4x16x4xf32>
    %43 = vector.extract_strided_slice %29 {offsets = [0, 2, 3, 0], sizes = [2, 4, 16, 4], strides = [1, 1, 1, 1]} : vector<2x8x20x4xf32> to vector<2x4x16x4xf32>
    %44 = vector.extract_strided_slice %29 {offsets = [0, 2, 4, 0], sizes = [2, 4, 16, 4], strides = [1, 1, 1, 1]} : vector<2x8x20x4xf32> to vector<2x4x16x4xf32>
    %45 = vector.extract_strided_slice %29 {offsets = [0, 3, 0, 0], sizes = [2, 4, 16, 4], strides = [1, 1, 1, 1]} : vector<2x8x20x4xf32> to vector<2x4x16x4xf32>
    %46 = vector.extract_strided_slice %29 {offsets = [0, 3, 1, 0], sizes = [2, 4, 16, 4], strides = [1, 1, 1, 1]} : vector<2x8x20x4xf32> to vector<2x4x16x4xf32>
    %47 = vector.extract_strided_slice %29 {offsets = [0, 3, 2, 0], sizes = [2, 4, 16, 4], strides = [1, 1, 1, 1]} : vector<2x8x20x4xf32> to vector<2x4x16x4xf32>
    %48 = vector.extract_strided_slice %29 {offsets = [0, 3, 3, 0], sizes = [2, 4, 16, 4], strides = [1, 1, 1, 1]} : vector<2x8x20x4xf32> to vector<2x4x16x4xf32>
    %49 = vector.extract_strided_slice %29 {offsets = [0, 3, 4, 0], sizes = [2, 4, 16, 4], strides = [1, 1, 1, 1]} : vector<2x8x20x4xf32> to vector<2x4x16x4xf32>
    %50 = vector.extract_strided_slice %29 {offsets = [0, 4, 0, 0], sizes = [2, 4, 16, 4], strides = [1, 1, 1, 1]} : vector<2x8x20x4xf32> to vector<2x4x16x4xf32>
    %51 = vector.extract_strided_slice %29 {offsets = [0, 4, 1, 0], sizes = [2, 4, 16, 4], strides = [1, 1, 1, 1]} : vector<2x8x20x4xf32> to vector<2x4x16x4xf32>
    %52 = vector.extract_strided_slice %29 {offsets = [0, 4, 2, 0], sizes = [2, 4, 16, 4], strides = [1, 1, 1, 1]} : vector<2x8x20x4xf32> to vector<2x4x16x4xf32>
    %53 = vector.extract_strided_slice %29 {offsets = [0, 4, 3, 0], sizes = [2, 4, 16, 4], strides = [1, 1, 1, 1]} : vector<2x8x20x4xf32> to vector<2x4x16x4xf32>
    %54 = vector.extract_strided_slice %29 {offsets = [0, 4, 4, 0], sizes = [2, 4, 16, 4], strides = [1, 1, 1, 1]} : vector<2x8x20x4xf32> to vector<2x4x16x4xf32>
    %55 = tpu.concatenate %30, %31, %32, %33, %34, %35, %36, %37, %38, %39, %40, %41, %42, %43, %44, %45 in 3 : vector<2x4x16x4xf32>, vector<2x4x16x4xf32>, vector<2x4x16x4xf32>, vector<2x4x16x4xf32>, vector<2x4x16x4xf32>, vector<2x4x16x4xf32>, vector<2x4x16x4xf32>, vector<2x4x16x4xf32>, vector<2x4x16x4xf32>, vector<2x4x16x4xf32>, vector<2x4x16x4xf32>, vector<2x4x16x4xf32>, vector<2x4x16x4xf32>, vector<2x4x16x4xf32>, vector<2x4x16x4xf32>, vector<2x4x16x4xf32> -> vector<2x4x16x64xf32>
    %56 = tpu.concatenate %46, %47, %48, %49, %50, %51, %52, %53, %54 in 3 : vector<2x4x16x4xf32>, vector<2x4x16x4xf32>, vector<2x4x16x4xf32>, vector<2x4x16x4xf32>, vector<2x4x16x4xf32>, vector<2x4x16x4xf32>, vector<2x4x16x4xf32>, vector<2x4x16x4xf32>, vector<2x4x16x4xf32> -> vector<2x4x16x36xf32>
    %57 = tpu.concatenate %55, %56 in 3 : vector<2x4x16x64xf32>, vector<2x4x16x36xf32> -> vector<2x4x16x100xf32>
    %58 = vector.shape_cast %57 : vector<2x4x16x100xf32> to vector<128x100xf32>
    %c0_14 = arith.constant 0 : index
    %c0_15 = arith.constant 0 : index
    %59 = vector.load %arg2[%c0_14, %c0_15] : memref<100x8xf32, #tpu.memory_space<vmem>>, vector<100x8xf32>
    %cst_16 = arith.constant dense<0.000000e+00> : vector<128x8xf32>
    %60 = tpu.matmul %58, %59, %cst_16 {dimension_numbers = #tpu.dot_dimension_numbers<[1], [0], [0], [1], [0, 0, 1, 1], [], []>} : vector<128x100xf32>, vector<100x8xf32>, vector<128x8xf32> -> vector<128x8xf32>
    %c0_17 = arith.constant 0 : index
    %c0_18 = arith.constant 0 : index
    %61 = vector.load %arg3[%c0_17, %c0_18] : memref<1x8xf32, #tpu.memory_space<vmem>>, vector<1x8xf32>
    %62 = vector.broadcast %61 : vector<1x8xf32> to vector<128x8xf32>
    %63 = arith.addf %60, %62 : vector<128x8xf32>
    %64 = vector.shape_cast %63 : vector<128x8xf32> to vector<2x4x16x8xf32>
    %c0_19 = arith.constant 0 : index
    %c0_20 = arith.constant 0 : index
    %c0_21 = arith.constant 0 : index
    %c0_22 = arith.constant 0 : index
    %65 = vector.load %arg4[%c0_19, %c0_20, %c0_21, %c0_22] : memref<2x4x16x8xf32, #tpu.memory_space<vmem>>, vector<2x4x16x8xf32>
    tpu.vector_store %arg4[%c0_19, %c0_20, %c0_21, %c0_22], %64 {strides = array<i32>} : memref<2x4x16x8xf32, #tpu.memory_space<vmem>>, vector<2x4x16x8xf32>,
    return
  }
  func.func @transform_0(%arg0: i32) -> (i32, i32, i32, i32) {
    %c0_i32 = arith.constant 0 : i32
    %c0_i32_0 = arith.constant 0 : i32
    %c0_i32_1 = arith.constant 0 : i32
    %c0_i32_2 = arith.constant 0 : i32
    %c0_i32_3 = arith.constant 0 : i32
    return %c0_i32, %c0_i32_0, %c0_i32_1, %c0_i32_2 : i32, i32, i32, i32
  }
  func.func @transform_1(%arg0: i32) -> (i32, i32) {
    %c0_i32 = arith.constant 0 : i32
    %c0_i32_0 = arith.constant 0 : i32
    %c0_i32_1 = arith.constant 0 : i32
    return %c0_i32, %c0_i32_0 : i32, i32
  }
  func.func @transform_2(%arg0: i32) -> (i32, i32) {
    %c0_i32 = arith.constant 0 : i32
    %c0_i32_0 = arith.constant 0 : i32
    %c0_i32_1 = arith.constant 0 : i32
    return %c0_i32, %c0_i32_0 : i32, i32
  }
  func.func @transform_3(%arg0: i32) -> (i32, i32, i32, i32) {
    %c0_i32 = arith.constant 0 : i32
    %c0_i32_0 = arith.constant 0 : i32
    %c0_i32_1 = arith.constant 0 : i32
    %c0_i32_2 = arith.constant 0 : i32
    return %c0_i32, %arg0, %c0_i32_0, %c0_i32_1 : i32, i32, i32, i32
  }
}

module attributes {stable_mosaic.version = 11 : i64} {
  func.func @conv_kernel(%arg0: i32, %arg1: memref<2x16x16x4xf32, #tpu.memory_space<vmem>>, %arg2: memref<36x8xf32, #tpu.memory_space<vmem>>, %arg3: memref<1x8xf32, #tpu.memory_space<vmem>>, %arg4: memref<2x4x16x8xf32, #tpu.memory_space<vmem>>) attributes {dimension_semantics = [#tpu.dimension_semantics<parallel>], iteration_bounds = array<i64: 4>, scalar_prefetch = 0 : i64, scratch_operands = 0 : i64, tpu.core_type = #tpu.core_type<tc>, window_params = [{pipeline_mode = #tpu.pipeline_mode<synchronous>, transform_indices = @transform_0, window_bounds = array<i64: 2, 16, 16, 4>}, {pipeline_mode = #tpu.pipeline_mode<synchronous>, transform_indices = @transform_1, window_bounds = array<i64: 36, 8>}, {pipeline_mode = #tpu.pipeline_mode<synchronous>, transform_indices = @transform_2, window_bounds = array<i64: 1, 8>}, {transform_indices = @transform_3, window_bounds = array<i64: 2, 4, 16, 8>}]} {
    %c4_i32 = arith.constant 4 : i32
    %0 = arith.muli %arg0, %c4_i32 : i32
    %c0 = arith.constant 0 : index
    %1 = arith.index_cast %0 : i32 to index
    %c0_0 = arith.constant 0 : index
    %c0_1 = arith.constant 0 : index
    %2 = vector.load %arg1[%c0, %1, %c0_0, %c0_1] : memref<2x16x16x4xf32, #tpu.memory_space<vmem>>, vector<2x4x16x4xf32>
    %c1_i32 = arith.constant 1 : i32
    %3 = arith.subi %0, %c1_i32 : i32
    %c0_i32 = arith.constant 0 : i32
    %4 = arith.maxsi %3, %c0_i32 : i32
    %c0_2 = arith.constant 0 : index
    %5 = arith.index_cast %4 : i32 to index
    %c0_3 = arith.constant 0 : index
    %c0_4 = arith.constant 0 : index
    %6 = vector.load %arg1[%c0_2, %5, %c0_3, %c0_4] : memref<2x16x16x4xf32, #tpu.memory_space<vmem>>, vector<2x1x16x4xf32>
    %c1_i32_5 = arith.constant 1 : i32
    %7 = arith.subi %0, %c1_i32_5 : i32
    %8 = tpu.iota {dimensions = array<i32: 1>} : vector<2x1x16x4xi32>
    %9 = vector.broadcast %7 : i32 to vector<2x1x16x4xi32>
    %10 = arith.addi %9, %8 : vector<2x1x16x4xi32>
    %c0_i32_6 = arith.constant 0 : i32
    %11 = vector.broadcast %c0_i32_6 : i32 to vector<2x1x16x4xi32>
    %12 = arith.cmpi sge, %10, %11 : vector<2x1x16x4xi32>
    %cst = arith.constant 0.000000e+00 : f32
    %13 = vector.broadcast %cst : f32 to vector<2x1x16x4xf32>
    %14 = arith.select %12, %6, %13 : vector<2x1x16x4xi1>, vector<2x1x16x4xf32>
    %c4_i32_7 = arith.constant 4 : i32
    %15 = arith.addi %0, %c4_i32_7 : i32
    %c15_i32 = arith.constant 15 : i32
    %16 = arith.minsi %15, %c15_i32 : i32
    %c0_8 = arith.constant 0 : index
    %17 = arith.index_cast %16 : i32 to index
    %c0_9 = arith.constant 0 : index
    %c0_10 = arith.constant 0 : index
    %18 = vector.load %arg1[%c0_8, %17, %c0_9, %c0_10] : memref<2x16x16x4xf32, #tpu.memory_space<vmem>>, vector<2x1x16x4xf32>
    %c4_i32_11 = arith.constant 4 : i32
    %19 = arith.addi %0, %c4_i32_11 : i32
    %20 = tpu.iota {dimensions = array<i32: 1>} : vector<2x1x16x4xi32>
    %21 = vector.broadcast %19 : i32 to vector<2x1x16x4xi32>
    %22 = arith.addi %21, %20 : vector<2x1x16x4xi32>
    %c16_i32 = arith.constant 16 : i32
    %23 = vector.broadcast %c16_i32 : i32 to vector<2x1x16x4xi32>
    %24 = arith.cmpi slt, %22, %23 : vector<2x1x16x4xi32>
    %cst_12 = arith.constant 0.000000e+00 : f32
    %25 = vector.broadcast %cst_12 : f32 to vector<2x1x16x4xf32>
    %26 = arith.select %24, %18, %25 : vector<2x1x16x4xi1>, vector<2x1x16x4xf32>
    %27 = tpu.concatenate %14, %2, %26 in 1 : vector<2x1x16x4xf32>, vector<2x4x16x4xf32>, vector<2x1x16x4xf32> -> vector<2x6x16x4xf32>
    %cst_13 = arith.constant 0.000000e+00 : f32
    %28 = vector.broadcast %cst_13 : f32 to vector<2x6x1x4xf32>
    %29 = tpu.concatenate %28, %27, %28 in 2 : vector<2x6x1x4xf32>, vector<2x6x16x4xf32>, vector<2x6x1x4xf32> -> vector<2x6x18x4xf32>
    %30 = vector.extract_strided_slice %29 {offsets = [0, 0, 0, 0], sizes = [2, 4, 16, 4], strides = [1, 1, 1, 1]} : vector<2x6x18x4xf32> to vector<2x4x16x4xf32>
    %31 = vector.extract_strided_slice %29 {offsets = [0, 0, 1, 0], sizes = [2, 4, 16, 4], strides = [1, 1, 1, 1]} : vector<2x6x18x4xf32> to vector<2x4x16x4xf32>
    %32 = vector.extract_strided_slice %29 {offsets = [0, 0, 2, 0], sizes = [2, 4, 16, 4], strides = [1, 1, 1, 1]} : vector<2x6x18x4xf32> to vector<2x4x16x4xf32>
    %33 = vector.extract_strided_slice %29 {offsets = [0, 1, 0, 0], sizes = [2, 4, 16, 4], strides = [1, 1, 1, 1]} : vector<2x6x18x4xf32> to vector<2x4x16x4xf32>
    %34 = vector.extract_strided_slice %29 {offsets = [0, 1, 1, 0], sizes = [2, 4, 16, 4], strides = [1, 1, 1, 1]} : vector<2x6x18x4xf32> to vector<2x4x16x4xf32>
    %35 = vector.extract_strided_slice %29 {offsets = [0, 1, 2, 0], sizes = [2, 4, 16, 4], strides = [1, 1, 1, 1]} : vector<2x6x18x4xf32> to vector<2x4x16x4xf32>
    %36 = vector.extract_strided_slice %29 {offsets = [0, 2, 0, 0], sizes = [2, 4, 16, 4], strides = [1, 1, 1, 1]} : vector<2x6x18x4xf32> to vector<2x4x16x4xf32>
    %37 = vector.extract_strided_slice %29 {offsets = [0, 2, 1, 0], sizes = [2, 4, 16, 4], strides = [1, 1, 1, 1]} : vector<2x6x18x4xf32> to vector<2x4x16x4xf32>
    %38 = vector.extract_strided_slice %29 {offsets = [0, 2, 2, 0], sizes = [2, 4, 16, 4], strides = [1, 1, 1, 1]} : vector<2x6x18x4xf32> to vector<2x4x16x4xf32>
    %39 = tpu.concatenate %30, %31, %32, %33, %34, %35, %36, %37, %38 in 3 : vector<2x4x16x4xf32>, vector<2x4x16x4xf32>, vector<2x4x16x4xf32>, vector<2x4x16x4xf32>, vector<2x4x16x4xf32>, vector<2x4x16x4xf32>, vector<2x4x16x4xf32>, vector<2x4x16x4xf32>, vector<2x4x16x4xf32> -> vector<2x4x16x36xf32>
    %40 = vector.shape_cast %39 : vector<2x4x16x36xf32> to vector<128x36xf32>
    %c0_14 = arith.constant 0 : index
    %c0_15 = arith.constant 0 : index
    %41 = vector.load %arg2[%c0_14, %c0_15] : memref<36x8xf32, #tpu.memory_space<vmem>>, vector<36x8xf32>
    %cst_16 = arith.constant dense<0.000000e+00> : vector<128x8xf32>
    %42 = tpu.matmul %40, %41, %cst_16 {dimension_numbers = #tpu.dot_dimension_numbers<[1], [0], [0], [1], [0, 0, 1, 1], [], []>} : vector<128x36xf32>, vector<36x8xf32>, vector<128x8xf32> -> vector<128x8xf32>
    %c0_17 = arith.constant 0 : index
    %c0_18 = arith.constant 0 : index
    %43 = vector.load %arg3[%c0_17, %c0_18] : memref<1x8xf32, #tpu.memory_space<vmem>>, vector<1x8xf32>
    %44 = vector.broadcast %43 : vector<1x8xf32> to vector<128x8xf32>
    %45 = arith.addf %42, %44 : vector<128x8xf32>
    %46 = vector.shape_cast %45 : vector<128x8xf32> to vector<2x4x16x8xf32>
    %c0_19 = arith.constant 0 : index
    %c0_20 = arith.constant 0 : index
    %c0_21 = arith.constant 0 : index
    %c0_22 = arith.constant 0 : index
    %47 = vector.load %arg4[%c0_19, %c0_20, %c0_21, %c0_22] : memref<2x4x16x8xf32, #tpu.memory_space<vmem>>, vector<2x4x16x8xf32>
    tpu.vector_store %arg4[%c0_19, %c0_20, %c0_21, %c0_22], %46 {strides = array<i32>} : memref<2x4x16x8xf32, #tpu.memory_space<vmem>>, vector<2x4x16x8xf32>,
    return
  }
  func.func @transform_0(%arg0: i32) -> (i32, i32, i32, i32) {
    %c0_i32 = arith.constant 0 : i32
    %c0_i32_0 = arith.constant 0 : i32
    %c0_i32_1 = arith.constant 0 : i32
    %c0_i32_2 = arith.constant 0 : i32
    %c0_i32_3 = arith.constant 0 : i32
    return %c0_i32, %c0_i32_0, %c0_i32_1, %c0_i32_2 : i32, i32, i32, i32
  }
  func.func @transform_1(%arg0: i32) -> (i32, i32) {
    %c0_i32 = arith.constant 0 : i32
    %c0_i32_0 = arith.constant 0 : i32
    %c0_i32_1 = arith.constant 0 : i32
    return %c0_i32, %c0_i32_0 : i32, i32
  }
  func.func @transform_2(%arg0: i32) -> (i32, i32) {
    %c0_i32 = arith.constant 0 : i32
    %c0_i32_0 = arith.constant 0 : i32
    %c0_i32_1 = arith.constant 0 : i32
    return %c0_i32, %c0_i32_0 : i32, i32
  }
  func.func @transform_3(%arg0: i32) -> (i32, i32, i32, i32) {
    %c0_i32 = arith.constant 0 : i32
    %c0_i32_0 = arith.constant 0 : i32
    %c0_i32_1 = arith.constant 0 : i32
    %c0_i32_2 = arith.constant 0 : i32
    return %c0_i32, %arg0, %c0_i32_0, %c0_i32_1 : i32, i32, i32, i32
  }
}

module attributes {stable_mosaic.version = 11 : i64} {
  func.func @pool_proj_kernel(%arg0: i32, %arg1: memref<2x16x16x4xf32, #tpu.memory_space<vmem>>, %arg2: memref<4x8xf32, #tpu.memory_space<vmem>>, %arg3: memref<1x8xf32, #tpu.memory_space<vmem>>, %arg4: memref<2x4x16x8xf32, #tpu.memory_space<vmem>>) attributes {dimension_semantics = [#tpu.dimension_semantics<parallel>], iteration_bounds = array<i64: 4>, scalar_prefetch = 0 : i64, scratch_operands = 0 : i64, tpu.core_type = #tpu.core_type<tc>, window_params = [{pipeline_mode = #tpu.pipeline_mode<synchronous>, transform_indices = @transform_0, window_bounds = array<i64: 2, 16, 16, 4>}, {pipeline_mode = #tpu.pipeline_mode<synchronous>, transform_indices = @transform_1, window_bounds = array<i64: 4, 8>}, {pipeline_mode = #tpu.pipeline_mode<synchronous>, transform_indices = @transform_2, window_bounds = array<i64: 1, 8>}, {transform_indices = @transform_3, window_bounds = array<i64: 2, 4, 16, 8>}]} {
    %c4_i32 = arith.constant 4 : i32
    %0 = arith.muli %arg0, %c4_i32 : i32
    %c0 = arith.constant 0 : index
    %1 = arith.index_cast %0 : i32 to index
    %c0_0 = arith.constant 0 : index
    %c0_1 = arith.constant 0 : index
    %2 = vector.load %arg1[%c0, %1, %c0_0, %c0_1] : memref<2x16x16x4xf32, #tpu.memory_space<vmem>>, vector<2x4x16x4xf32>
    %c1_i32 = arith.constant 1 : i32
    %3 = arith.subi %0, %c1_i32 : i32
    %c0_i32 = arith.constant 0 : i32
    %4 = arith.maxsi %3, %c0_i32 : i32
    %c0_2 = arith.constant 0 : index
    %5 = arith.index_cast %4 : i32 to index
    %c0_3 = arith.constant 0 : index
    %c0_4 = arith.constant 0 : index
    %6 = vector.load %arg1[%c0_2, %5, %c0_3, %c0_4] : memref<2x16x16x4xf32, #tpu.memory_space<vmem>>, vector<2x1x16x4xf32>
    %c1_i32_5 = arith.constant 1 : i32
    %7 = arith.subi %0, %c1_i32_5 : i32
    %8 = tpu.iota {dimensions = array<i32: 1>} : vector<2x1x16x4xi32>
    %9 = vector.broadcast %7 : i32 to vector<2x1x16x4xi32>
    %10 = arith.addi %9, %8 : vector<2x1x16x4xi32>
    %c0_i32_6 = arith.constant 0 : i32
    %11 = vector.broadcast %c0_i32_6 : i32 to vector<2x1x16x4xi32>
    %12 = arith.cmpi sge, %10, %11 : vector<2x1x16x4xi32>
    %cst = arith.constant 0xFF800000 : f32
    %13 = vector.broadcast %cst : f32 to vector<2x1x16x4xf32>
    %14 = arith.select %12, %6, %13 : vector<2x1x16x4xi1>, vector<2x1x16x4xf32>
    %c4_i32_7 = arith.constant 4 : i32
    %15 = arith.addi %0, %c4_i32_7 : i32
    %c15_i32 = arith.constant 15 : i32
    %16 = arith.minsi %15, %c15_i32 : i32
    %c0_8 = arith.constant 0 : index
    %17 = arith.index_cast %16 : i32 to index
    %c0_9 = arith.constant 0 : index
    %c0_10 = arith.constant 0 : index
    %18 = vector.load %arg1[%c0_8, %17, %c0_9, %c0_10] : memref<2x16x16x4xf32, #tpu.memory_space<vmem>>, vector<2x1x16x4xf32>
    %c4_i32_11 = arith.constant 4 : i32
    %19 = arith.addi %0, %c4_i32_11 : i32
    %20 = tpu.iota {dimensions = array<i32: 1>} : vector<2x1x16x4xi32>
    %21 = vector.broadcast %19 : i32 to vector<2x1x16x4xi32>
    %22 = arith.addi %21, %20 : vector<2x1x16x4xi32>
    %c16_i32 = arith.constant 16 : i32
    %23 = vector.broadcast %c16_i32 : i32 to vector<2x1x16x4xi32>
    %24 = arith.cmpi slt, %22, %23 : vector<2x1x16x4xi32>
    %cst_12 = arith.constant 0xFF800000 : f32
    %25 = vector.broadcast %cst_12 : f32 to vector<2x1x16x4xf32>
    %26 = arith.select %24, %18, %25 : vector<2x1x16x4xi1>, vector<2x1x16x4xf32>
    %27 = vector.extract_strided_slice %2 {offsets = [0, 0, 0, 0], sizes = [2, 3, 16, 4], strides = [1, 1, 1, 1]} : vector<2x4x16x4xf32> to vector<2x3x16x4xf32>
    %28 = tpu.concatenate %14, %27 in 1 : vector<2x1x16x4xf32>, vector<2x3x16x4xf32> -> vector<2x4x16x4xf32>
    %29 = vector.extract_strided_slice %2 {offsets = [0, 1, 0, 0], sizes = [2, 3, 16, 4], strides = [1, 1, 1, 1]} : vector<2x4x16x4xf32> to vector<2x3x16x4xf32>
    %30 = tpu.concatenate %29, %26 in 1 : vector<2x3x16x4xf32>, vector<2x1x16x4xf32> -> vector<2x4x16x4xf32>
    %31 = arith.maximumf %28, %2 : vector<2x4x16x4xf32>
    %32 = arith.maximumf %31, %30 : vector<2x4x16x4xf32>
    %cst_13 = arith.constant 0xFF800000 : f32
    %33 = vector.broadcast %cst_13 : f32 to vector<2x4x1x4xf32>
    %34 = tpu.concatenate %33, %32, %33 in 2 : vector<2x4x1x4xf32>, vector<2x4x16x4xf32>, vector<2x4x1x4xf32> -> vector<2x4x18x4xf32>
    %35 = vector.extract_strided_slice %34 {offsets = [0, 0, 0, 0], sizes = [2, 4, 16, 4], strides = [1, 1, 1, 1]} : vector<2x4x18x4xf32> to vector<2x4x16x4xf32>
    %36 = vector.extract_strided_slice %34 {offsets = [0, 0, 1, 0], sizes = [2, 4, 16, 4], strides = [1, 1, 1, 1]} : vector<2x4x18x4xf32> to vector<2x4x16x4xf32>
    %37 = arith.maximumf %35, %36 : vector<2x4x16x4xf32>
    %38 = vector.extract_strided_slice %34 {offsets = [0, 0, 2, 0], sizes = [2, 4, 16, 4], strides = [1, 1, 1, 1]} : vector<2x4x18x4xf32> to vector<2x4x16x4xf32>
    %39 = arith.maximumf %37, %38 : vector<2x4x16x4xf32>
    %40 = vector.shape_cast %39 : vector<2x4x16x4xf32> to vector<128x4xf32>
    %c0_14 = arith.constant 0 : index
    %c0_15 = arith.constant 0 : index
    %41 = vector.load %arg2[%c0_14, %c0_15] : memref<4x8xf32, #tpu.memory_space<vmem>>, vector<4x8xf32>
    %cst_16 = arith.constant dense<0.000000e+00> : vector<128x8xf32>
    %42 = tpu.matmul %40, %41, %cst_16 {dimension_numbers = #tpu.dot_dimension_numbers<[1], [0], [0], [1], [0, 0, 1, 1], [], []>} : vector<128x4xf32>, vector<4x8xf32>, vector<128x8xf32> -> vector<128x8xf32>
    %c0_17 = arith.constant 0 : index
    %c0_18 = arith.constant 0 : index
    %43 = vector.load %arg3[%c0_17, %c0_18] : memref<1x8xf32, #tpu.memory_space<vmem>>, vector<1x8xf32>
    %44 = vector.broadcast %43 : vector<1x8xf32> to vector<128x8xf32>
    %45 = arith.addf %42, %44 : vector<128x8xf32>
    %46 = vector.shape_cast %45 : vector<128x8xf32> to vector<2x4x16x8xf32>
    %c0_19 = arith.constant 0 : index
    %c0_20 = arith.constant 0 : index
    %c0_21 = arith.constant 0 : index
    %c0_22 = arith.constant 0 : index
    %47 = vector.load %arg4[%c0_19, %c0_20, %c0_21, %c0_22] : memref<2x4x16x8xf32, #tpu.memory_space<vmem>>, vector<2x4x16x8xf32>
    tpu.vector_store %arg4[%c0_19, %c0_20, %c0_21, %c0_22], %46 {strides = array<i32>} : memref<2x4x16x8xf32, #tpu.memory_space<vmem>>, vector<2x4x16x8xf32>,
    return
  }
  func.func @transform_0(%arg0: i32) -> (i32, i32, i32, i32) {
    %c0_i32 = arith.constant 0 : i32
    %c0_i32_0 = arith.constant 0 : i32
    %c0_i32_1 = arith.constant 0 : i32
    %c0_i32_2 = arith.constant 0 : i32
    %c0_i32_3 = arith.constant 0 : i32
    return %c0_i32, %c0_i32_0, %c0_i32_1, %c0_i32_2 : i32, i32, i32, i32
  }
  func.func @transform_1(%arg0: i32) -> (i32, i32) {
    %c0_i32 = arith.constant 0 : i32
    %c0_i32_0 = arith.constant 0 : i32
    %c0_i32_1 = arith.constant 0 : i32
    return %c0_i32, %c0_i32_0 : i32, i32
  }
  func.func @transform_2(%arg0: i32) -> (i32, i32) {
    %c0_i32 = arith.constant 0 : i32
    %c0_i32_0 = arith.constant 0 : i32
    %c0_i32_1 = arith.constant 0 : i32
    return %c0_i32, %c0_i32_0 : i32, i32
  }
  func.func @transform_3(%arg0: i32) -> (i32, i32, i32, i32) {
    %c0_i32 = arith.constant 0 : i32
    %c0_i32_0 = arith.constant 0 : i32
    %c0_i32_1 = arith.constant 0 : i32
    %c0_i32_2 = arith.constant 0 : i32
    return %c0_i32, %arg0, %c0_i32_0, %c0_i32_1 : i32, i32, i32, i32
  }
}

</mosaic_0001>

<bundles_post_ra>
// kernel: inception_forward.4
= control target key start
LH: loop header
LB: loop body
LE: loop exit
PB: predicated region body
PF: predicated region fallthrough
CT: control target
= control target key end

     0   :  { %s579_s12 = smov 0   ;;  %s659_s0 = inlined_call_operand.vmem [shape: f32[512,4], index: 0, kind: input, shape index: {}]   ;;  %s660_s1 = inlined_call_operand.vmem [shape: f32[4,16], index: 1, kind: input, shape index: {}]   ;;  %s661_s2 = inlined_call_operand.vmem [shape: f32[1,16], index: 2, kind: input, shape index: {}]   ;;  %s662_s3 = inlined_call_operand.vmem [shape: f32[512,16], index: 3, kind: output, shape index: {}]  }
   0x1 LB: > { %s469_s13 = sadd.s32 4294967295, %s557_s12   ;;  %p473_p0 = scmp.ge.s32.totalorder %s557_s12, 1  ;;  %s557_s12 = sphi %s579_s12, %s13_s12  }
   0x2   : > { %p138_p1 = scmp.lt.s32.totalorder %s557_s12, 5 }
   0x4   : > { %p139_p2 = pnand %p473_p0, %p138_p1 }
   0x5   : > { %v190_v0 = vld [vmem:[%s660_s1] sm:$0xf] (!%p139_p2)  ;;  %vm247_vm0 = vcmask (!%p139_p2), 1043456   ;;  %s474_s16 = sshll.u32 (!%p139_p2), %s469_s13, 4  ;;  %vm198_vm1 = vcmask (!%p139_p2), 31744   ;;  %vm396_vm2 = vcmask (!%p139_p2), 130048  }
   0x6   : > { %142 = sbr.rel (%p139_p2) target bundleno = 247 (0xf7), region = 32  ;;  %515 = vmatprep.subr.msk.mxu0 (!%p139_p2), %vm247_vm0, %v190_v0  ;;  %541 = vmatprep.subr.msk.mxu1 (!%p139_p2), %vm247_vm0, %v190_v0  ;;  %p163_p3 = scmp.lt.s32.totalorder (!%p139_p2), %s474_s16, 63  ;;  %v478_v17 = vld [vmem:[%s661_s2] ss:$0 sm:$0xff] (!%p139_p2) }
   0x7   : > { %516 = vmatpush3.msk.msra.mxu0 (!%p139_p2), %vm247_vm0, %v190_v0  ;;  %542 = vmatpush3.msk.msra.mxu1 (!%p139_p2), %vm247_vm0, %v190_v0 }
   0xd   : > { %s664_s16 = smov (!%p163_p3, %s474_s16), 63 }
   0xe   : > { %s475_s17 = sshll.u32 %s664_s16, 3 }
   0xf   : > { %s166_s20 = scalar_lea.vmem %s659_s0, %s475_s17  ;;  %s622_s25 = scalar_lea.vmem %s662_s3, %s475_s17 }
  0x10   : > { %v174_v1 = vld [vmem:[%s166_s20] sm:$0xff]  ;;  %v175_v3 = vld [vmem:[%s166_s20 + $0x8] sm:$0xff]  ;;  %v176_v5 = vld [vmem:[%s166_s20 + $0x10] sm:$0xff] }
  0x11   : > { %v182_v2 = vld [vmem:[%s166_s20 + $0x40] sm:$0xff]  ;;  %517 = vmatprep.mubr.msk.f32.mxu0 %vm198_vm1, %v174_v1  ;;  %v183_v4 = vld [vmem:[%s166_s20 + $0x48] sm:$0xff]  ;;  %v184_v6 = vld [vmem:[%s166_s20 + $0x50] sm:$0xff] }
  0x12   : > { %529 = vmatprep.mubr.msk.f32.mxu1 %vm198_vm1, %v182_v2  ;;  %518 = vmatmul.mubr.msk.f32.vlgmr.msra.gmra.mrb[0].mxu0 %vm198_vm1, %v175_v3  ;;  %v177_v7 = vld [vmem:[%s166_s20 + $0x18] sm:$0xff]  ;;  %v178_v9 = vld [vmem:[%s166_s20 + $0x20] sm:$0xff]  ;;  %v179_v11 = vld [vmem:[%s166_s20 + $0x28] sm:$0xff] }
  0x13   : > { %530 = vmatmul.mubr.msk.f32.vlgmr.msra.gmra.mrb[0].mxu1 %vm198_vm1, %v183_v4  ;;  %520 = vmatprep.mubr.msk.f32.mxu0 %vm198_vm1, %v176_v5  ;;  %v185_v8 = vld [vmem:[%s166_s20 + $0x58] sm:$0xff]  ;;  %v186_v10 = vld [vmem:[%s166_s20 + $0x60] sm:$0xff]  ;;  %v187_v12 = vld [vmem:[%s166_s20 + $0x68] sm:$0xff] }
  0x14   : > { %532 = vmatprep.mubr.msk.f32.mxu1 %vm198_vm1, %v184_v6  ;;  %v180_v13 = vld [vmem:[%s166_s20 + $0x30] sm:$0xff]  ;;  %v181_v15 = vld [vmem:[%s166_s20 + $0x38] sm:$0xff] }
  0x15   : > { %v188_v14 = vld [vmem:[%s166_s20 + $0x70] sm:$0xff]  ;;  %v189_v16 = vld [vmem:[%s166_s20 + $0x78] sm:$0xff] }
  0x16   : > { %521 = vmatmul.mubr.msk.f32.gmra.mrb[2].mxu0 %vm198_vm1, %v177_v7 }
  0x17   : > { %533 = vmatmul.mubr.msk.f32.gmra.mrb[2].mxu1 %vm198_vm1, %v185_v8  ;;  %523 = vmatprep.mubr.msk.f32.mxu0 %vm198_vm1, %v178_v9 }
  0x18   : > { %535 = vmatprep.mubr.msk.f32.mxu1 %vm198_vm1, %v186_v10 }
  0x1a   : > { %524 = vmatmul.mubr.msk.f32.gmra.mrb[4].mxu0 %vm198_vm1, %v179_v11 }
  0x1b   : > { %536 = vmatmul.mubr.msk.f32.gmra.mrb[4].mxu1 %vm198_vm1, %v187_v12  ;;  %526 = vmatprep.mubr.msk.f32.mxu0 %vm198_vm1, %v180_v13 }
  0x1c   : > { %538 = vmatprep.mubr.msk.f32.mxu1 %vm198_vm1, %v188_v14 }
  0x1e   : > { %527 = vmatmul.mubr.msk.f32.gmra.mrb[6].mxu0 %vm198_vm1, %v181_v15 }
  0x1f   : > { %539 = vmatmul.mubr.msk.f32.gmra.mrb[6].mxu1 %vm198_vm1, %v189_v16 }
  0xe5   : > { %v519_v18 = vpop.f32.mrb[0].mxu0 }
  0xe6   : > { %v531_v19 = vpop.f32.mrb[0].mxu1  ;;  %v323_v20 = vadd.f32 %v519_v18, %v478_v17  ;;  %v317_v22 = vpop.f32.mrb[1].mxu0 }
  0xe7   : > { %v363_v21 = vadd.f32 %v531_v19, %v478_v17  ;;  %v357_v23 = vpop.f32.mrb[1].mxu1  ;;  %v318_v24 = vadd.f32 %v478_v17, %v317_v22 }
  0xe8   : > { %v358_v25 = vadd.f32 %v478_v17, %v357_v23  ;;  %398 = vst.msk [vmem:[%s622_s25 + $0x8] sm:$0xff] %vm396_vm2, %v323_v20 }
  0xe9   : > { %406 = vst.msk [vmem:[%s622_s25 + $0x48] sm:$0xff] %vm396_vm2, %v363_v21  ;;  %397 = vst.msk [vmem:[%s622_s25] sm:$0xff] %vm396_vm2, %v318_v24  ;;  %v522_v26 = vpop.f32.mrb[2].mxu0 }
  0xea   : > { %405 = vst.msk [vmem:[%s622_s25 + $0x40] sm:$0xff] %vm396_vm2, %v358_v25  ;;  %v534_v27 = vpop.f32.mrb[2].mxu1  ;;  %v333_v28 = vadd.f32 %v522_v26, %v478_v17  ;;  %v327_v30 = vpop.f32.mrb[3].mxu0 }
  0xeb   : > { %v373_v29 = vadd.f32 %v534_v27, %v478_v17  ;;  %v367_v31 = vpop.f32.mrb[3].mxu1  ;;  %v328_v32 = vadd.f32 %v478_v17, %v327_v30 }
  0xec   : > { %v368_v33 = vadd.f32 %v478_v17, %v367_v31  ;;  %400 = vst.msk [vmem:[%s622_s25 + $0x18] sm:$0xff] %vm396_vm2, %v333_v28 }
  0xed   : > { %408 = vst.msk [vmem:[%s622_s25 + $0x58] sm:$0xff] %vm396_vm2, %v373_v29  ;;  %399 = vst.msk [vmem:[%s622_s25 + $0x10] sm:$0xff] %vm396_vm2, %v328_v32  ;;  %v525_v34 = vpop.f32.mrb[4].mxu0 }
  0xee   : > { %407 = vst.msk [vmem:[%s622_s25 + $0x50] sm:$0xff] %vm396_vm2, %v368_v33  ;;  %v537_v35 = vpop.f32.mrb[4].mxu1  ;;  %v343_v36 = vadd.f32 %v525_v34, %v478_v17  ;;  %v337_v38 = vpop.f32.mrb[5].mxu0 }
  0xef   : > { %v383_v37 = vadd.f32 %v537_v35, %v478_v17  ;;  %v377_v39 = vpop.f32.mrb[5].mxu1  ;;  %v338_v40 = vadd.f32 %v478_v17, %v337_v38 }
  0xf0   : > { %v378_v41 = vadd.f32 %v478_v17, %v377_v39  ;;  %402 = vst.msk [vmem:[%s622_s25 + $0x28] sm:$0xff] %vm396_vm2, %v343_v36 }
  0xf1   : > { %410 = vst.msk [vmem:[%s622_s25 + $0x68] sm:$0xff] %vm396_vm2, %v383_v37  ;;  %401 = vst.msk [vmem:[%s622_s25 + $0x20] sm:$0xff] %vm396_vm2, %v338_v40  ;;  %v528_v42 = vpop.f32.mrb[6].mxu0 }
  0xf2   : > { %409 = vst.msk [vmem:[%s622_s25 + $0x60] sm:$0xff] %vm396_vm2, %v378_v41  ;;  %v540_v43 = vpop.f32.mrb[6].mxu1  ;;  %v353_v44 = vadd.f32 %v528_v42, %v478_v17  ;;  %v347_v46 = vpop.f32.mrb[7].mxu0 }
  0xf3   : > { %v393_v45 = vadd.f32 %v540_v43, %v478_v17  ;;  %v387_v47 = vpop.f32.mrb[7].mxu1  ;;  %v348_v48 = vadd.f32 %v478_v17, %v347_v46 }
  0xf4   : > { %v388_v49 = vadd.f32 %v478_v17, %v387_v47  ;;  %404 = vst.msk [vmem:[%s622_s25 + $0x38] sm:$0xff] %vm396_vm2, %v353_v44 }
  0xf5   : > { %412 = vst.msk [vmem:[%s622_s25 + $0x78] sm:$0xff] %vm396_vm2, %v393_v45  ;;  %403 = vst.msk [vmem:[%s622_s25 + $0x30] sm:$0xff] %vm396_vm2, %v348_v48 }
  0xf6   : > { %411 = vst.msk [vmem:[%s622_s25 + $0x70] sm:$0xff] %vm396_vm2, %v388_v49 }
  0xf7 PF: > { %s13_s12 = sadd.s32 1, %s557_s12  }
  0xf8   : > { %p10_p4 = scmp.ge.s32.totalorder %s13_s12, 6  }
  0xfa   :  { %12 = sbr.rel (!%p10_p4) target bundleno = 1 (0x1), region = 62 }

// kernel: inception_forward.7
= control target key start
LH: loop header
LB: loop body
LE: loop exit
PB: predicated region body
PF: predicated region fallthrough
CT: control target
= control target key end

     0   :  { %s990_s12 = smov 0   ;;  %s992_s13 = smov 0   ;;  %s1345_s0 = inlined_call_operand.vmem [shape: f32[2,16,16,4], index: 0, kind: input, shape index: {}]   ;;  %s1346_s1 = inlined_call_operand.vmem [shape: f32[4,8], index: 1, kind: input, shape index: {}]   ;;  %s1347_s2 = inlined_call_operand.vmem [shape: f32[1,8], index: 2, kind: input, shape index: {}]   ;;  %s1348_s3 = inlined_call_operand.vmem [shape: f32[2,16,16,8], index: 3, kind: output, shape index: {}]  }
   0x1   :  { %s994_s14 = smov 0  }
   0x2 LB: > { %s1003_s15 = sadd.s32 4294967295, %s968_s14   ;;  %s1005_s16 = sadd.s32 1, %s968_s14   ;;  %s968_s14 = sphi %s994_s14, %s1356_s14   ;;  %s964_s13 = sphi %s992_s13, %s1355_s13   ;;  %s960_s12 = sphi %s990_s12, %s1354_s12  }
   0x3   : > { %s80_s17 = ssub.s32 %s968_s14, %s1005_s16  ;;  %s83_s18 = sadd.s32 1, %s964_s13 }
   0x4   : > { %p81_p0 = scmp.eq.s32.totalorder %s80_s17, 0  ;;  %p93_p1 = scmp.ne.s32.totalorder %s964_s13, %s960_s12 }
   0x5   : > { %p94_p2 = scmp.eq.s32.totalorder %s1003_s15, 3  ;;  %p843_p3 = scmp.ge.s32.totalorder %s968_s14, 1 }
   0x6   : > { %s1013_s19 = scalar_select %p81_p0, %s964_s13, %s83_s18  }
   0x7   : > { %p1015_p4 = por %p94_p2, %p93_p1  ;;  %p127_p5 = scmp.lt.s32.totalorder %s968_s14, 5 }
   0x9   : > { %p128_p6 = pnand %p843_p3, %p127_p5 }
   0xa   : > { %v470_v0 = vld [vmem:[%s1346_s1] sm:$0xf] (!%p128_p6)  ;;  %vm527_vm0 = vcmask (!%p128_p6), 1043456   ;;  %s845_s23 = sshll.u32 (!%p128_p6), %s1003_s15, 2  ;;  %s874_s24 = sshll.u32 (!%p128_p6), %s1003_s15, 6  ;;  %vm243_vm1 = vcmask (!%p128_p6), 1040384  }
   0xb   : > { %131 = sbr.rel (%p128_p6) target bundleno = 293 (0x125), region = 32  ;;  %894 = vmatprep.subr.msk.mxu0 (!%p128_p6), %vm527_vm0, %v470_v0  ;;  %920 = vmatprep.subr.msk.mxu1 (!%p128_p6), %vm527_vm0, %v470_v0  ;;  %s1029_s27 = scalar_lea.vmem (!%p128_p6), %s1345_s0, %s874_s24  ;;  %vm324_vm3 = vcmask (!%p128_p6), 1046528   ;;  %vm397_vm4 = vcmask (!%p128_p6), 1045504   ;;  %vm478_vm5 = vcmask (!%p128_p6), 31744   ;;  %vm676_vm7 = vcmask (!%p128_p6), 64512  }
   0xc   : > { %s847_s28 = sadd.s32 (!%p128_p6), 4294967295, %s845_s23  ;;  %895 = vmatpush3.msk.msra.mxu0 (!%p128_p6), %vm527_vm0, %v470_v0  ;;  %921 = vmatpush3.msk.msra.mxu1 (!%p128_p6), %vm527_vm0, %v470_v0  ;;  %v149_v1 = vld [vmem:[%s1029_s27] sm:$0xff] (!%p128_p6)  ;;  %v150_v2 = vld [vmem:[%s1029_s27 + $0x8] sm:$0xff] (!%p128_p6)  ;;  %v1034_v3 = vld [vmem:[%s1029_s27 + $0x10] sm:$0xff] (!%p128_p6)  ;;  %s1045_s29 = sadd.s32 (!%p128_p6), 4, %s845_s23 }
   0xd   : > { %p166_p7 = scmp.gt.s32.totalorder (!%p128_p6), %s847_s28, 0  ;;  %v174_v4 = vstv (!%p128_p6), %s847_s28  ;;  %v1037_v5 = vld [vmem:[%s1029_s27 + $0x18] sm:$0xff] (!%p128_p6)  ;;  %v1040_v6 = vld [vmem:[%s1029_s27 + $0x20] sm:$0xff] (!%p128_p6)  ;;  %v1043_v7 = vld [vmem:[%s1029_s27 + $0x28] sm:$0xff] (!%p128_p6)  ;;  %v197_v8 = vmax.f32 (!%p128_p6), %v149_v1, %v1034_v3  ;;  %p181_p8 = scmp.lt.s32.totalorder (!%p128_p6), %s1045_s29, 15 }
   0xe   : > { %v198_v9 = vmax.f32 (!%p128_p6), %v150_v2, %v1037_v5  ;;  %v199_v10 = vmax.f32 (!%p128_p6), %v1034_v3, %v1040_v6  ;;  %v200_v11 = vmax.f32 (!%p128_p6), %v1037_v5, %v1043_v7  ;;  %v157_v12 = vld [vmem:[%s1029_s27 + $0x100] sm:$0xff] (!%p128_p6)  ;;  %v158_v13 = vld [vmem:[%s1029_s27 + $0x108] sm:$0xff] (!%p128_p6)  ;;  %v159_v14 = vld [vmem:[%s1029_s27 + $0x110] sm:$0xff] (!%p128_p6)  ;;  %vm1056_vm2 = vcmp.ge.s32.totalorder (!%p128_p6), %v174_v4, 0  ;;  %s142_s14 = sand.u32 (!%p128_p6), 1, %s960_s12  }
   0xf   : > { %v160_v16 = vld [vmem:[%s1029_s27 + $0x118] sm:$0xff] (!%p128_p6)  ;;  %v1062_v17 = vld [vmem:[%s1029_s27 + $0x120] sm:$0xff] (!%p128_p6)  ;;  %v1065_v18 = vld [vmem:[%s1029_s27 + $0x128] sm:$0xff] (!%p128_p6)  ;;  %v205_v19 = vmax.f32 (!%p128_p6), %v157_v12, %v159_v14  ;;  %v213_v20 = vmax.f32 (!%p128_p6), %v197_v8, %v1040_v6  ;;  %v189_v21 = vstv (!%p128_p6), %s1045_s29  ;;  %s844_s17 = sshll.u32 (!%p128_p6), %s142_s14, 7 }
  0x10   : > { %v206_v22 = vmax.f32 (!%p128_p6), %v158_v13, %v160_v16  ;;  %v207_v23 = vmax.f32 (!%p128_p6), %v159_v14, %v1062_v17  ;;  %v208_v24 = vmax.f32 (!%p128_p6), %v160_v16, %v1065_v18  ;;  %v1072_v25 = vmax.f32 (!%p128_p6), %v198_v9, %v1043_v7  ;;  %v1075_v26 = vld [vmem:[%s1029_s27 + $0x30] sm:$0xff] (!%p128_p6)  ;;  %v1078_v27 = vld [vmem:[%s1029_s27 + $0x38] sm:$0xff] (!%p128_p6)  ;;  %s1260_s22 = scalar_lea.vmem (!%p128_p6), [#allocation2], %s844_s17 }
  0x11   : > { %v1081_v28 = vld [vmem:[%s1029_s27 + $0x130] sm:$0xff] (!%p128_p6)  ;;  %v247_v29 = vrot.slane (!%p128_p6), %v213_v20, 7  ;;  %v1087_v30 = vmax.f32 (!%p128_p6), %v205_v19, %v1062_v17  ;;  %v1090_v31 = vmax.f32 (!%p128_p6), %v199_v10, %v1075_v26  ;;  %v1093_v32 = vmax.f32 (!%p128_p6), %v200_v11, %v1078_v27  ;;  %v1096_v33 = vld [vmem:[%s1029_s27 + $0x138] sm:$0xff] (!%p128_p6) }
  0x12   : > { %s1358_s28 = smov (!%p166_p7, %s847_s28), 0  ;;  %v248_v37 = vrot.slane %v1072_v25, 7  ;;  %v1100_v38 = vmax.f32 %v206_v22, %v1065_v18  ;;  %v1103_v39 = vmax.f32 %v207_v23, %v1081_v28  ;;  %v1106_v40 = vmax.f32 %v208_v24, %v1096_v33  ;;  %s1301_s25 = scalar_lea.vmem (%p1015_p4), %s1348_s3, %s874_s24 }
  0x13   : > { %s848_s30 = sshll.u32 %s1358_s28, 4  ;;  %v293_v45 = vsel %vm243_vm1, -inf, %v247_v29  ;;  %v259_v60 = vrot.slane %v1087_v30, 7  ;;  %vm1157_vm6 = vcmp.lt.s32.totalorder %v189_v21, 16 }
  0x14   : > { %s169_s6 = scalar_lea.vmem %s1345_s0, %s848_s30  ;;  %v1120_v51 = vsel %vm243_vm1, %v247_v29, %v248_v37  ;;  %v330_v52 = vrot.slane %v293_v45, 1  ;;  %v403_v53 = vrot.slane %v293_v45, 2  ;;  %v260_v61 = vrot.slane %v1100_v38, 7 }
  0x15   : > { %v170_v34 = vld [vmem:[%s169_s6] sm:$0xff]  ;;  %v171_v35 = vld [vmem:[%s169_s6 + $0x8] sm:$0xff]  ;;  %v331_v57 = vrot.slane %v1120_v51, 1  ;;  %v404_v59 = vrot.slane %v1120_v51, 2  ;;  %s1150_s7 = scalar_select %p181_p8, %s1045_s29, 15 }
  0x16   : > { %v172_v36 = vld [vmem:[%s169_s6 + $0x100] sm:$0xff]  ;;  %v176_v41 = vsel %vm1056_vm2, %v170_v34, -inf  ;;  %v177_v42 = vsel %vm1056_vm2, %v171_v35, -inf  ;;  %v173_v43 = vld [vmem:[%s169_s6 + $0x108] sm:$0xff] }
  0x17   : > { %v178_v44 = vsel %vm1056_vm2, %v172_v36, -inf  ;;  %v195_v46 = vmax.f32 %v176_v41, %v149_v1  ;;  %v196_v47 = vmax.f32 %v177_v42, %v150_v2  ;;  %v179_v48 = vsel %vm1056_vm2, %v173_v43, -inf  ;;  %s849_s8 = sshll.u32 %s1150_s7, 4 }
  0x18   : > { %v203_v49 = vmax.f32 %v178_v44, %v157_v12  ;;  %v204_v50 = vmax.f32 %v179_v48, %v158_v13  ;;  %v332_v1 = vsel %vm324_vm3, %v330_v52, %v331_v57  ;;  %v405_v4 = vsel %vm397_vm4, %v403_v53, %v404_v59  ;;  %s1180_s11 = scalar_lea.vmem %s1345_s0, %s849_s8 }
  0x19   : > { %v211_v54 = vmax.f32 %v195_v46, %v1034_v3  ;;  %v212_v55 = vmax.f32 %v196_v47, %v1037_v5  ;;  %v383_v3 = vmax.f32 %v293_v45, %v332_v1  ;;  %v1135_v5 = vsel %vm243_vm1, %v259_v60, %v260_v61 }
  0x1a   : > { %v219_v56 = vmax.f32 %v203_v49, %v159_v14  ;;  %v220_v58 = vmax.f32 %v204_v50, %v160_v16  ;;  %v351_v21 = vrot.slane %v1135_v5, 1  ;;  %v301_v1 = vsel %vm243_vm1, %v248_v37, -inf }
  0x1b   : > { %v244_v62 = vrot.slane %v211_v54, 7  ;;  %v245_v63 = vrot.slane %v212_v55, 7  ;;  %v456_v53 = vmax.f32 %v383_v3, %v405_v4  ;;  %v297_v54 = vsel %vm243_vm1, -inf, %v259_v60 }
  0x1c   : > { %v256_v0 = vrot.slane %v219_v56, 7  ;;  %v257_v2 = vrot.slane %v220_v58, 7  ;;  %v406_v3 = vrot.slane %v301_v1, 2  ;;  %v305_v4 = vsel %vm243_vm1, %v260_v61, -inf }
  0x1d   : > { %v246_v8 = vsel %vm243_vm1, %v244_v62, %v245_v63  ;;  %v292_v9 = vsel %vm243_vm1, -inf, %v244_v62  ;;  %v300_v11 = vsel %vm243_vm1, %v245_v63, -inf  ;;  %v350_v62 = vrot.slane %v297_v54, 1 }
  0x1e   : > { %v296_v10 = vsel %vm243_vm1, -inf, %v256_v0  ;;  %v325_v12 = vrot.slane %v292_v9, 1  ;;  %v326_v13 = vrot.slane %v246_v8, 1  ;;  %v398_v14 = vrot.slane %v292_v9, 2 }
  0x1f   : > { %v399_v15 = vrot.slane %v246_v8, 2  ;;  %v258_v16 = vsel %vm243_vm1, %v256_v0, %v257_v2  ;;  %v345_v19 = vrot.slane %v296_v10, 1  ;;  %v418_v20 = vrot.slane %v296_v10, 2 }
  0x20   : > { %v328_v22 = vrot.slane %v300_v11, 1  ;;  %v327_v23 = vsel %vm324_vm3, %v325_v12, %v326_v13  ;;  %v346_v29 = vrot.slane %v258_v16, 1  ;;  %v419_v30 = vrot.slane %v258_v16, 2 }
  0x21   : > { %v400_v24 = vsel %vm397_vm4, %v398_v14, %v399_v15  ;;  %v381_v34 = vmax.f32 %v292_v9, %v327_v23  ;;  %v401_v36 = vrot.slane %v300_v11, 2  ;;  %v304_v38 = vsel %vm243_vm1, %v257_v2, -inf  ;;  %v185_v23 = vld [vmem:[%s1180_s11] sm:$0xff] }
  0x22   : > { %v329_v35 = vsel %vm324_vm3, %v326_v13, %v328_v22  ;;  %v347_v41 = vsel %vm324_vm3, %v345_v19, %v346_v29  ;;  %v420_v42 = vsel %vm397_vm4, %v418_v20, %v419_v30  ;;  %v348_v44 = vrot.slane %v304_v38, 1 }
  0x23   : > { %v382_v43 = vmax.f32 %v246_v8, %v329_v35  ;;  %v454_v45 = vmax.f32 %v381_v34, %v400_v24  ;;  %v389_v46 = vmax.f32 %v296_v10, %v347_v41  ;;  %v402_v47 = vsel %vm397_vm4, %v399_v15, %v401_v36  ;;  %v186_v24 = vld [vmem:[%s1180_s11 + $0x8] sm:$0xff] }
  0x24   : > { %v421_v48 = vrot.slane %v304_v38, 2  ;;  %v349_v52 = vsel %vm324_vm3, %v346_v29, %v348_v44  ;;  %v423_v63 = vrot.slane %v297_v54, 2  ;;  %v424_v0 = vrot.slane %v1135_v5, 2 }
  0x25   : > { %v455_v50 = vmax.f32 %v382_v43, %v402_v47  ;;  %896 = vmatprep.mubr.msk.f32.mxu0 %vm478_vm5, %v454_v45  ;;  %v462_v55 = vmax.f32 %v389_v46, %v420_v42  ;;  %v390_v56 = vmax.f32 %v258_v16, %v349_v52  ;;  %v333_v2 = vrot.slane %v301_v1, 1 }
  0x26   : > { %v422_v58 = vsel %vm397_vm4, %v419_v30, %v421_v48  ;;  %v352_v8 = vsel %vm324_vm3, %v350_v62, %v351_v21  ;;  %v425_v9 = vsel %vm397_vm4, %v423_v63, %v424_v0  ;;  %v353_v10 = vrot.slane %v305_v4, 1  ;;  %v187_v62 = vld [vmem:[%s1180_s11 + $0x100] sm:$0xff] }
  0x27   : > { %897 = vmatmul.mubr.msk.f32.vlgmr.msra.gmra.mrb[0].mxu0 %vm478_vm5, %v455_v50  ;;  %908 = vmatprep.mubr.msk.f32.mxu1 %vm478_vm5, %v462_v55  ;;  %v463_v60 = vmax.f32 %v390_v56, %v422_v58  ;;  %v426_v11 = vrot.slane %v305_v4, 2  ;;  %v391_v25 = vmax.f32 %v297_v54, %v352_v8  ;;  %v334_v37 = vsel %vm324_vm3, %v331_v57, %v333_v2 }
  0x28   : > { %899 = vmatprep.mubr.msk.f32.mxu0 %vm478_vm5, %v456_v53  ;;  %v407_v61 = vsel %vm397_vm4, %v404_v59, %v406_v3  ;;  %v250_v12 = vrot.slane %v1090_v31, 7  ;;  %v384_v13 = vmax.f32 %v1120_v51, %v334_v37  ;;  %v354_v14 = vsel %vm324_vm3, %v351_v21, %v353_v10 }
  0x29   : > { %909 = vmatmul.mubr.msk.f32.vlgmr.msra.gmra.mrb[0].mxu1 %vm478_vm5, %v463_v60  ;;  %v427_v15 = vsel %vm397_vm4, %v424_v0, %v426_v11  ;;  %v251_v16 = vrot.slane %v1093_v32, 7  ;;  %v464_v19 = vmax.f32 %v391_v25, %v425_v9  ;;  %v392_v20 = vmax.f32 %v1135_v5, %v354_v14  ;;  %v188_v60 = vld [vmem:[%s1180_s11 + $0x108] sm:$0xff] }
  0x2a   : > { %v294_v22 = vsel %vm243_vm1, -inf, %v250_v12  ;;  %v262_v57 = vrot.slane %v1103_v39, 7  ;;  %v457_v59 = vmax.f32 %v384_v13, %v407_v61  ;;  %v263_v32 = vrot.slane %v1106_v40, 7 }
  0x2b   : > { %v252_v31 = vsel %vm243_vm1, %v250_v12, %v251_v16  ;;  %v335_v29 = vrot.slane %v294_v22, 1  ;;  %v408_v51 = vrot.slane %v294_v22, 2  ;;  %911 = vmatprep.mubr.msk.f32.mxu1 %vm478_vm5, %v464_v19  ;;  %v465_v30 = vmax.f32 %v392_v20, %v427_v15 }
  0x2c   : > { %v336_v34 = vrot.slane %v252_v31, 1  ;;  %v409_v35 = vrot.slane %v252_v31, 2  ;;  %900 = vmatmul.mubr.msk.f32.gmra.mrb[2].mxu0 %vm478_vm5, %v457_v59  ;;  %v298_v5 = vsel %vm243_vm1, -inf, %v262_v57  ;;  %v302_v39 = vsel %vm243_vm1, %v251_v16, -inf }
  0x2d   : > { %v191_v36 = vsel %vm1157_vm6, %v185_v23, -inf  ;;  %v192_v38 = vsel %vm1157_vm6, %v186_v24, -inf  ;;  %912 = vmatmul.mubr.msk.f32.gmra.mrb[2].mxu1 %vm478_vm5, %v465_v30  ;;  %v264_v40 = vsel %vm243_vm1, %v262_v57, %v263_v32  ;;  %v355_v43 = vrot.slane %v298_v5, 1 }
  0x2e   : > { %v337_v41 = vsel %vm324_vm3, %v335_v29, %v336_v34  ;;  %v410_v42 = vsel %vm397_vm4, %v408_v51, %v409_v35  ;;  %v356_v45 = vrot.slane %v264_v40, 1  ;;  %v428_v46 = vrot.slane %v298_v5, 2 }
  0x2f   : > { %v385_v44 = vmax.f32 %v294_v22, %v337_v41  ;;  %v429_v47 = vrot.slane %v264_v40, 2  ;;  %v338_v48 = vrot.slane %v302_v39, 1  ;;  %v411_v50 = vrot.slane %v302_v39, 2 }
  0x30   : > { %v306_v52 = vsel %vm243_vm1, %v263_v32, -inf  ;;  %v201_v53 = vmax.f32 %v1040_v6, %v1075_v26  ;;  %v357_v55 = vsel %vm324_vm3, %v355_v43, %v356_v45  ;;  %v202_v6 = vmax.f32 %v1043_v7, %v1078_v27 }
  0x31   : > { %v458_v54 = vmax.f32 %v385_v44, %v410_v42  ;;  %v430_v56 = vsel %vm397_vm4, %v428_v46, %v429_v47  ;;  %v358_v58 = vrot.slane %v306_v52, 1  ;;  %v393_v21 = vmax.f32 %v298_v5, %v357_v55 }
  0x32   : > { %v339_v63 = vsel %vm324_vm3, %v336_v34, %v338_v48  ;;  %v412_v0 = vsel %vm397_vm4, %v409_v35, %v411_v50  ;;  %v431_v1 = vrot.slane %v306_v52, 2  ;;  %v217_v26 = vmax.f32 %v201_v53, %v191_v36 }
  0x33   : > { %902 = vmatprep.mubr.msk.f32.mxu0 %vm478_vm5, %v458_v54  ;;  %v386_v2 = vmax.f32 %v252_v31, %v339_v63  ;;  %v359_v3 = vsel %vm324_vm3, %v356_v45, %v358_v58  ;;  %v466_v4 = vmax.f32 %v393_v21, %v430_v56  ;;  %v193_v10 = vsel %vm1157_vm6, %v187_v62, -inf  ;;  %v850_v54 = vld [vmem:[%s1347_s2] ss:$0 sm:$0xff] }
  0x34   : > { %v394_v8 = vmax.f32 %v264_v40, %v359_v3  ;;  %v432_v9 = vsel %vm397_vm4, %v429_v47, %v431_v1  ;;  %v218_v25 = vmax.f32 %v202_v6, %v192_v38  ;;  %v253_v37 = vrot.slane %v217_v26, 7 }
  0x35   : > { %v459_v11 = vmax.f32 %v386_v2, %v412_v0  ;;  %v194_v61 = vsel %vm1157_vm6, %v188_v60, -inf  ;;  %914 = vmatprep.mubr.msk.f32.mxu1 %vm478_vm5, %v466_v4  ;;  %v209_v7 = vmax.f32 %v1062_v17, %v1081_v28  ;;  %v210_v27 = vmax.f32 %v1065_v18, %v1096_v33 }
  0x36   : > { %v467_v12 = vmax.f32 %v394_v8, %v432_v9  ;;  %v254_v13 = vrot.slane %v218_v25, 7  ;;  %v295_v14 = vsel %vm243_vm1, -inf, %v253_v37 }
  0x37   : > { %903 = vmatmul.mubr.msk.f32.gmra.mrb[4].mxu0 %vm478_vm5, %v459_v11  ;;  %v340_v15 = vrot.slane %v295_v14, 1  ;;  %v413_v16 = vrot.slane %v295_v14, 2  ;;  %v225_v49 = vmax.f32 %v209_v7, %v193_v10  ;;  %v226_v19 = vmax.f32 %v210_v27, %v194_v61 }
  0x38   : > { %915 = vmatmul.mubr.msk.f32.gmra.mrb[4].mxu1 %vm478_vm5, %v467_v12  ;;  %v255_v20 = vsel %vm243_vm1, %v253_v37, %v254_v13  ;;  %v303_v22 = vsel %vm243_vm1, %v254_v13, -inf }
  0x39   : > { %v341_v57 = vrot.slane %v255_v20, 1  ;;  %v414_v17 = vrot.slane %v255_v20, 2  ;;  %v265_v28 = vrot.slane %v225_v49, 7  ;;  %v266_v23 = vrot.slane %v226_v19, 7 }
  0x3a   : > { %v343_v18 = vrot.slane %v303_v22, 1  ;;  %v416_v33 = vrot.slane %v303_v22, 2 }
  0x3b   : > { %v342_v24 = vsel %vm324_vm3, %v340_v15, %v341_v57  ;;  %v415_v59 = vsel %vm397_vm4, %v413_v16, %v414_v17  ;;  %v267_v31 = vsel %vm243_vm1, %v265_v28, %v266_v23  ;;  %v299_v29 = vsel %vm243_vm1, -inf, %v265_v28 }
  0x3c   : > { %v387_v51 = vmax.f32 %v295_v14, %v342_v24  ;;  %v360_v30 = vrot.slane %v299_v29, 1  ;;  %v361_v34 = vrot.slane %v267_v31, 1  ;;  %v433_v35 = vrot.slane %v299_v29, 2 }
  0x3d   : > { %v434_v32 = vrot.slane %v267_v31, 2  ;;  %v344_v5 = vsel %vm324_vm3, %v341_v57, %v343_v18  ;;  %v417_v39 = vsel %vm397_vm4, %v414_v17, %v416_v33  ;;  %v307_v36 = vsel %vm243_vm1, %v266_v23, -inf }
  0x3e   : > { %v460_v38 = vmax.f32 %v387_v51, %v415_v59  ;;  %v362_v41 = vsel %vm324_vm3, %v360_v30, %v361_v34  ;;  %v388_v42 = vmax.f32 %v255_v20, %v344_v5  ;;  %v363_v40 = vrot.slane %v307_v36, 1 }
  0x3f   : > { %v395_v43 = vmax.f32 %v299_v29, %v362_v41  ;;  %v435_v44 = vsel %vm397_vm4, %v433_v35, %v434_v32  ;;  %v436_v45 = vrot.slane %v307_v36, 2 }
  0x40   : > { %905 = vmatprep.mubr.msk.f32.mxu0 %vm478_vm5, %v460_v38  ;;  %v461_v46 = vmax.f32 %v388_v42, %v417_v39  ;;  %v364_v47 = vsel %vm324_vm3, %v361_v34, %v363_v40 }
  0x41   : > { %v468_v48 = vmax.f32 %v395_v43, %v435_v44  ;;  %v396_v50 = vmax.f32 %v267_v31, %v364_v47  ;;  %v437_v52 = vsel %vm397_vm4, %v434_v32, %v436_v45 }
  0x42   : > { %906 = vmatmul.mubr.msk.f32.gmra.mrb[6].mxu0 %vm478_vm5, %v461_v46 }
  0x43   : > { %917 = vmatprep.mubr.msk.f32.mxu1 %vm478_vm5, %v468_v48  ;;  %v469_v53 = vmax.f32 %v396_v50, %v437_v52 }
  0x45   : > { %918 = vmatmul.mubr.msk.f32.gmra.mrb[6].mxu1 %vm478_vm5, %v469_v53 }
  0xfa   : > { %v898_v55 = vpop.f32.mrb[0].mxu0 }
  0xfb   : > { %v603_v56 = vadd.f32 %v898_v55, %v850_v54  ;;  %v597_v58 = vpop.f32.mrb[1].mxu0 }
  0xfc   : > { %v598_v62 = vadd.f32 %v850_v54, %v597_v58  ;;  %v910_v21 = vpop.f32.mrb[0].mxu1 }
  0xfd   : > { %678 = vst.msk [vmem:[%s1260_s22 + $0x8] sm:$0xff] %vm676_vm7, %v603_v56  ;;  %v643_v63 = vadd.f32 %v910_v21, %v850_v54  ;;  %v637_v0 = vpop.f32.mrb[1].mxu1 }
  0xfe   : > { %677 = vst.msk [vmem:[%s1260_s22] sm:$0xff] %vm676_vm7, %v598_v62  ;;  %v638_v1 = vadd.f32 %v850_v54, %v637_v0 }
  0xff   : > { %686 = vst.msk [vmem:[%s1260_s22 + $0x48] sm:$0xff] %vm676_vm7, %v643_v63  ;;  %v901_v60 = vpop.f32.mrb[2].mxu0 }
 0x100   : > { %685 = vst.msk [vmem:[%s1260_s22 + $0x40] sm:$0xff] %vm676_vm7, %v638_v1  ;;  %v613_v2 = vadd.f32 %v901_v60, %v850_v54  ;;  %v913_v3 = vpop.f32.mrb[2].mxu1  ;;  %v607_v6 = vpop.f32.mrb[3].mxu0 }
 0x101   : > { %v653_v26 = vadd.f32 %v913_v3, %v850_v54  ;;  %v608_v4 = vadd.f32 %v850_v54, %v607_v6  ;;  %v647_v8 = vpop.f32.mrb[3].mxu1 }
 0x102   : > { %680 = vst.msk [vmem:[%s1260_s22 + $0x18] sm:$0xff] %vm676_vm7, %v613_v2  ;;  %v648_v9 = vadd.f32 %v850_v54, %v647_v8 }
 0x103   : > { %688 = vst.msk [vmem:[%s1260_s22 + $0x58] sm:$0xff] %vm676_vm7, %v653_v26  ;;  %679 = vst.msk [vmem:[%s1260_s22 + $0x10] sm:$0xff] %vm676_vm7, %v608_v4 }
 0x104   : > { %687 = vst.msk [vmem:[%s1260_s22 + $0x50] sm:$0xff] %vm676_vm7, %v648_v9  ;;  %v763_v17 = vld [vmem:[%s1260_s22 + $0x8] sm:$0xff] (%p1015_p4) }
 0x105   : > { %v761_v57 = vld [vmem:[%s1260_s22] sm:$0xff] (%p1015_p4)  ;;  %764 = vst [vmem:[%s1301_s25 + $0x8] sm:$0xff] (%p1015_p4), %v763_v17 }
 0x106   : > { %762 = vst [vmem:[%s1301_s25] sm:$0xff] (%p1015_p4), %v761_v57  ;;  %v779_v29 = vld [vmem:[%s1260_s22 + $0x48] sm:$0xff] (%p1015_p4) }
 0x107   : > { %v777_v31 = vld [vmem:[%s1260_s22 + $0x40] sm:$0xff] (%p1015_p4)  ;;  %780 = vst [vmem:[%s1301_s25 + $0x108] sm:$0xff] (%p1015_p4), %v779_v29 }
 0x108   : > { %778 = vst [vmem:[%s1301_s25 + $0x100] sm:$0xff] (%p1015_p4), %v777_v31 }
 0x109   : > { %v767_v23 = vld [vmem:[%s1260_s22 + $0x18] sm:$0xff] (%p1015_p4) }
 0x10a   : > { %v904_v10 = vpop.f32.mrb[4].mxu0  ;;  %v765_v28 = vld [vmem:[%s1260_s22 + $0x10] sm:$0xff] (%p1015_p4)  ;;  %768 = vst [vmem:[%s1301_s25 + $0x18] sm:$0xff] (%p1015_p4), %v767_v23  ;;  %v783_v30 = vld [vmem:[%s1260_s22 + $0x58] sm:$0xff] (%p1015_p4) }
 0x10b   : > { %v623_v11 = vadd.f32 %v904_v10, %v850_v54  ;;  %v916_v25 = vpop.f32.mrb[4].mxu1  ;;  %v617_v37 = vpop.f32.mrb[5].mxu0  ;;  %766 = vst [vmem:[%s1301_s25 + $0x10] sm:$0xff] (%p1015_p4), %v765_v28  ;;  %v781_v51 = vld [vmem:[%s1260_s22 + $0x50] sm:$0xff] (%p1015_p4)  ;;  %784 = vst [vmem:[%s1301_s25 + $0x118] sm:$0xff] (%p1015_p4), %v783_v30 }
 0x10c   : > { %v663_v61 = vadd.f32 %v916_v25, %v850_v54  ;;  %v618_v12 = vadd.f32 %v850_v54, %v617_v37  ;;  %v657_v7 = vpop.f32.mrb[5].mxu1  ;;  %782 = vst [vmem:[%s1301_s25 + $0x110] sm:$0xff] (%p1015_p4), %v781_v51 }
 0x10d   : > { %682 = vst.msk [vmem:[%s1260_s22 + $0x28] sm:$0xff] %vm676_vm7, %v623_v11  ;;  %v658_v27 = vadd.f32 %v850_v54, %v657_v7 }
 0x10e   : > { %690 = vst.msk [vmem:[%s1260_s22 + $0x68] sm:$0xff] %vm676_vm7, %v663_v61  ;;  %681 = vst.msk [vmem:[%s1260_s22 + $0x20] sm:$0xff] %vm676_vm7, %v618_v12 }
 0x10f   : > { %689 = vst.msk [vmem:[%s1260_s22 + $0x60] sm:$0xff] %vm676_vm7, %v658_v27 }
 0x114   : > { %v771_v33 = vld [vmem:[%s1260_s22 + $0x28] sm:$0xff] (%p1015_p4) }
 0x115   : > { %v907_v13 = vpop.f32.mrb[6].mxu0  ;;  %v769_v18 = vld [vmem:[%s1260_s22 + $0x20] sm:$0xff] (%p1015_p4)  ;;  %772 = vst [vmem:[%s1301_s25 + $0x28] sm:$0xff] (%p1015_p4), %v771_v33  ;;  %v787_v35 = vld [vmem:[%s1260_s22 + $0x68] sm:$0xff] (%p1015_p4) }
 0x116   : > { %v633_v14 = vadd.f32 %v907_v13, %v850_v54  ;;  %v627_v15 = vpop.f32.mrb[7].mxu0  ;;  %699 = sbr.rel (!%p1015_p4) target bundleno = 293 (0x125), region = 36  ;;  %770 = vst [vmem:[%s1301_s25 + $0x20] sm:$0xff] (%p1015_p4), %v769_v18  ;;  %v785_v34 = vld [vmem:[%s1260_s22 + $0x60] sm:$0xff] (%p1015_p4)  ;;  %788 = vst [vmem:[%s1301_s25 + $0x128] sm:$0xff] (%p1015_p4), %v787_v35 }
 0x117   : > { %v628_v16 = vadd.f32 %v850_v54, %v627_v15  ;;  %786 = vst [vmem:[%s1301_s25 + $0x120] sm:$0xff] (%p1015_p4), %v785_v34 }
 0x118   : > { %684 = vst.msk [vmem:[%s1260_s22 + $0x38] sm:$0xff] %vm676_vm7, %v633_v14  ;;  %v919_v49 = vpop.f32.mrb[6].mxu1 }
 0x119   : > { %v673_v19 = vadd.f32 %v919_v49, %v850_v54  ;;  %683 = vst.msk [vmem:[%s1260_s22 + $0x30] sm:$0xff] %vm676_vm7, %v628_v16  ;;  %v667_v20 = vpop.f32.mrb[7].mxu1 }
 0x11a   : > { %v668_v22 = vadd.f32 %v850_v54, %v667_v20 }
 0x11b   : > { %692 = vst.msk [vmem:[%s1260_s22 + $0x78] sm:$0xff] %vm676_vm7, %v673_v19 }
 0x11c   : > { %691 = vst.msk [vmem:[%s1260_s22 + $0x70] sm:$0xff] %vm676_vm7, %v668_v22 }
 0x11f   : > { %v775_v59 = vld [vmem:[%s1260_s22 + $0x38] sm:$0xff] }
 0x120   : > { %v773_v24 = vld [vmem:[%s1260_s22 + $0x30] sm:$0xff]  ;;  %776 = vst [vmem:[%s1301_s25 + $0x38] sm:$0xff] %v775_v59 }
 0x121   : > { %774 = vst [vmem:[%s1301_s25 + $0x30] sm:$0xff] %v773_v24 }
 0x122   : > { %v791_v5 = vld [vmem:[%s1260_s22 + $0x78] sm:$0xff] }
 0x123   : > { %v789_v32 = vld [vmem:[%s1260_s22 + $0x70] sm:$0xff]  ;;  %792 = vst [vmem:[%s1301_s25 + $0x138] sm:$0xff] %v791_v5 }
 0x124   : > { %790 = vst [vmem:[%s1301_s25 + $0x130] sm:$0xff] %v789_v32 }
 0x125 PF: > { %p10_p9 = scmp.ge.s32.totalorder %s1005_s16, 6   ;;  %s1354_s12 = smov %s964_s13 }
 0x126   : > { %s1355_s13 = smov %s1013_s19  ;;  %s1356_s14 = smov %s1005_s16 }
 0x127   :  { %12 = sbr.rel (!%p10_p9) target bundleno = 2 (0x2), region = 100 }

// kernel: inception_forward.5
= control target key start
LH: loop header
LB: loop body
LE: loop exit
PB: predicated region body
PF: predicated region fallthrough
CT: control target
= control target key end

     0   :  { %s1565_s12 = smov 0   ;;  %s1567_s13 = smov 0   ;;  %s2390_s0 = inlined_call_operand.vmem [shape: f32[2,16,16,4], index: 0, kind: input, shape index: {}]   ;;  %s2391_s1 = inlined_call_operand.vmem [shape: f32[36,8], index: 1, kind: input, shape index: {}]   ;;  %s2392_s2 = inlined_call_operand.vmem [shape: f32[1,8], index: 2, kind: input, shape index: {}]   ;;  %s2393_s3 = inlined_call_operand.vmem [shape: f32[2,16,16,8], index: 3, kind: output, shape index: {}]  }
   0x1   :  { %s1569_s14 = smov 0  }
   0x2 LB: > { %s1578_s15 = sadd.s32 4294967295, %s1535_s14   ;;  %s1580_s16 = sadd.s32 1, %s1535_s14   ;;  %s1535_s14 = sphi %s1569_s14, %s2412_s14   ;;  %s1531_s13 = sphi %s1567_s13, %s2411_s13   ;;  %s1527_s12 = sphi %s1565_s12, %s2410_s12  }
   0x3   : > { %s80_s17 = ssub.s32 %s1535_s14, %s1580_s16  ;;  %s83_s18 = sadd.s32 1, %s1531_s13 }
   0x4   : > { %p81_p0 = scmp.eq.s32.totalorder %s80_s17, 0  ;;  %p93_p1 = scmp.ne.s32.totalorder %s1531_s13, %s1527_s12 }
   0x5   : > { %p94_p2 = scmp.eq.s32.totalorder %s1578_s15, 3  ;;  %p1354_p3 = scmp.ge.s32.totalorder %s1535_s14, 1 }
   0x6   : > { %s1588_s19 = scalar_select %p81_p0, %s1531_s13, %s83_s18  }
   0x7   : > { %p1590_p4 = por %p94_p2, %p93_p1  ;;  %p127_p5 = scmp.lt.s32.totalorder %s1535_s14, 5 }
   0x9   : > { %p128_p6 = pnand %p1354_p3, %p127_p5 }
   0xb   : > { %131 = sbr.rel (%p128_p6) target bundleno = 622 (0x26e), region = 32 }
  0x12   : > { %s1385_s21 = sshll.u32 %s1578_s15, 6  ;;  %s1356_s25 = sshll.u32 %s1578_s15, 2  ;;  %vm219_vm0 = vcmask 1040384   ;;  %vm328_vm1 = vcmask 1046528   ;;  %vm417_vm2 = vcmask 1045504   ;;  %vm1039_vm3 = vcmask 1043456  }
  0x13   : > { %s1600_s24 = scalar_lea.vmem %s2390_s0, %s1385_s21  ;;  %s1358_s26 = sadd.s32 4294967295, %s1356_s25  ;;  %vm842_vm4 = vcmask 31744   ;;  %vm859_vm5 = vcmask 64512   ;;  %vm876_vm6 = vcmask 97280   ;;  %vm893_vm7 = vcmask 130048  }
  0x14   : > { %v1604_v0 = vld [vmem:[%s1600_s24 + $0x100] sm:$0xff]  ;;  %p166_p7 = scmp.gt.s32.totalorder %s1358_s26, 0  ;;  %p1489_p8 = scmp.ge.s32.totalorder %s1358_s26, 0  ;;  %v158_v34 = vld [vmem:[%s1600_s24 + $0x108] sm:$0xff]  ;;  %vm910_vm8 = vcmask 162816   ;;  %vm927_vm9 = vcmask 195584  }
  0x15   : > { %v1607_v1 = vld [vmem:[%s1600_s24] sm:$0xff]  ;;  %v241_v2 = vrot.slane %v1604_v0, 7  ;;  %s1537_s27 = smov 12   ;;  %s1538_s6 = smov 4   ;;  %v150_v35 = vld [vmem:[%s1600_s24 + $0x8] sm:$0xff]  ;;  %v242_v40 = vrot.slane %v158_v34, 7 }
  0x16   : > { %v223_v3 = vrot.slane %v1607_v1, 7  ;;  %s2414_s26 = smov (!%p166_p7, %s1358_s26), 0  ;;  %v224_v41 = vrot.slane %v150_v35, 7  ;;  %s1539_s7 = smov 8   ;;  %v978_v35 = vld [vmem:[%s2391_s1] sm:$0xff]  ;;  %vm944_vm10 = vcmask 228352  }
  0x17   : > { %v1614_v4 = vsel %vm219_vm0, 0.0, %v241_v2  ;;  %s1490_s28 = scalar_select %p1489_p8, 255, 0  ;;  %v1665_v44 = vsel %vm219_vm0, %v241_v2, %v242_v40  ;;  %v307_v52 = vsel %vm219_vm0, %v242_v40, 0.0  ;;  %v159_v2 = vld [vmem:[%s1600_s24 + $0x110] sm:$0xff]  ;;  %vm961_vm11 = vcmask 261120  }
  0x18   : > { %v1617_v5 = vsel %vm219_vm0, 0.0, %v223_v3  ;;  %524 = vrot.lane.b32.xlu1 %v1614_v4, %s1537_s27  ;;  %s1359_s29 = sshll.u32 %s2414_s26, 4  ;;  %v1668_v45 = vsel %vm219_vm0, %v223_v3, %v224_v41  ;;  %v354_v46 = vrot.slane %v1614_v4, 1  ;;  %v355_v47 = vrot.slane %v1665_v44, 1  ;;  %s1540_s8 = smov 16   ;;  %v151_v3 = vld [vmem:[%s1600_s24 + $0x10] sm:$0xff] }
  0x19   : > { %508 = vrot.lane.b32.xlu0 %v1617_v5, %s1537_s27  ;;  %s169_s5 = scalar_lea.vmem %s2390_s0, %s1359_s29  ;;  %v334_v48 = vrot.slane %v1617_v5, 1  ;;  %v335_v49 = vrot.slane %v1668_v45, 1  ;;  %v301_v53 = vsel %vm219_vm0, %v224_v41, 0.0  ;;  %v357_v54 = vrot.slane %v307_v52, 1  ;;  %s1541_s9 = smov 20   ;;  %v980_v41 = vld [vmem:[%s2391_s1 + $0x10] sm:$0xff] }
  0x1a   : > { %v1491_v6 = vld [vmem:[%s169_s5] sm:%s1490_s28]  ;;  %v1494_v8 = vld [vmem:[%s169_s5 + $0x8] sm:%s1490_s28]  ;;  %v356_v50 = vsel %vm328_vm1, %v354_v46, %v355_v47  ;;  %v337_v55 = vrot.slane %v301_v53, 1  ;;  %v443_v56 = vrot.slane %v1614_v4, 2  ;;  %v444_v57 = vrot.slane %v1665_v44, 2  ;;  %s1542_s10 = smov 24   ;;  %s2346_s23 = scalar_lea.vmem (%p1590_p4), %s2393_s3, %s1385_s21 }
  0x1b   : > { %v220_v7 = vrot.slane %v1491_v6, 7  ;;  %v221_v9 = vrot.slane %v1494_v8, 7  ;;  %v1497_v11 = vld [vmem:[%s169_s5 + $0x100] sm:%s1490_s28]  ;;  %v1500_v13 = vld [vmem:[%s169_s5 + $0x108] sm:%s1490_s28]  ;;  %v336_v51 = vsel %vm328_vm1, %v334_v48, %v335_v49  ;;  %v358_v58 = vsel %vm328_vm1, %v355_v47, %v357_v54  ;;  %s1543_s11 = smov 28   ;;  %s1544_s30 = smov 32  }
  0x1c   : > { %v238_v14 = vrot.slane %v1497_v11, 7  ;;  %v239_v17 = vrot.slane %v1500_v13, 7  ;;  %v338_v59 = vsel %vm328_vm1, %v335_v49, %v337_v55  ;;  %v423_v60 = vrot.slane %v1617_v5, 2  ;;  %v160_v13 = vld [vmem:[%s1600_s24 + $0x118] sm:$0xff]  ;;  %v982_v48 = vld [vmem:[%s2391_s1 + $0x20] sm:$0xf] }
  0x1d   : > { %v1627_v10 = vsel %vm219_vm0, 0.0, %v220_v7  ;;  %v1631_v15 = vsel %vm219_vm0, %v220_v7, %v221_v9  ;;  %v300_v16 = vsel %vm219_vm0, %v221_v9, 0.0  ;;  %v424_v61 = vrot.slane %v1668_v45, 2  ;;  %s1793_s14 = sadd.s32 4, %s1356_s25  ;;  %v153_v54 = vld [vmem:[%s1600_s24 + $0x20] sm:$0xff] }
  0x1e   : > { %v329_v12 = vrot.slane %v1627_v10, 1  ;;  %v330_v18 = vrot.slane %v1631_v15, 1  ;;  %v332_v19 = vrot.slane %v300_v16, 1  ;;  %v1636_v20 = vsel %vm219_vm0, 0.0, %v238_v14  ;;  %p181_p9 = scmp.lt.s32.totalorder %s1793_s14, 15  ;;  %p1501_p10 = scmp.lt.s32.totalorder %s1793_s14, 16 }
  0x1f   : > { %v1639_v21 = vsel %vm219_vm0, %v238_v14, %v239_v17  ;;  %v306_v22 = vsel %vm219_vm0, %v239_v17, 0.0  ;;  %v349_v23 = vrot.slane %v1636_v20, 1  ;;  %v418_v28 = vrot.slane %v1627_v10, 2  ;;  %v152_v14 = vld [vmem:[%s1600_s24 + $0x18] sm:$0xff] }
  0x20   : > { %v333_v24 = vsel %vm328_vm1, %v330_v18, %v332_v19  ;;  %v331_v25 = vsel %vm328_vm1, %v329_v12, %v330_v18  ;;  %v350_v26 = vrot.slane %v1639_v21, 1  ;;  %v352_v27 = vrot.slane %v306_v22, 1  ;;  %s1502_s17 = scalar_select %p1501_p10, 255, 0 }
  0x21   : > { %371 = vrot.lane.b32.xlu1 %v333_v24, %s1538_s6  ;;  %369 = vrot.lane.b32.xlu0 %v331_v25, %s1538_s6  ;;  %v419_v29 = vrot.slane %v1631_v15, 2  ;;  %v438_v32 = vrot.slane %v1636_v20, 2  ;;  %v439_v33 = vrot.slane %v1639_v21, 2  ;;  %v441_v38 = vrot.slane %v306_v22, 2 }
  0x22   : > { %v353_v30 = vsel %vm328_vm1, %v350_v26, %v352_v27  ;;  %v351_v31 = vsel %vm328_vm1, %v349_v23, %v350_v26  ;;  %v421_v39 = vrot.slane %v300_v16, 2  ;;  %v445_v62 = vsel %vm417_vm2, %v443_v56, %v444_v57 }
  0x23   : > { %v440_v36 = vsel %vm417_vm2, %v438_v32, %v439_v33  ;;  %v420_v37 = vsel %vm417_vm2, %v418_v28, %v419_v29  ;;  %v442_v42 = vsel %vm417_vm2, %v439_v33, %v441_v38  ;;  %v425_v63 = vsel %vm417_vm2, %v423_v60, %v424_v61 }
  0x24   : > { %v422_v43 = vsel %vm417_vm2, %v419_v29, %v421_v39  ;;  %v446_v0 = vrot.slane %v307_v52, 2  ;;  %v426_v1 = vrot.slane %v301_v53, 2  ;;  %v244_v8 = vrot.slane %v159_v2, 7  ;;  %v161_v53 = vld [vmem:[%s1600_s24 + $0x120] sm:$0xff] }
  0x25   : > { %387 = vrot.lane.b32.xlu1 %v353_v30, %s1538_s6  ;;  %385 = vrot.lane.b32.xlu0 %v351_v31, %s1538_s6  ;;  %v226_v9 = vrot.slane %v151_v3, 7  ;;  %v245_v16 = vrot.slane %v160_v13, 7  ;;  %v227_v17 = vrot.slane %v152_v14, 7  ;;  %v247_v55 = vrot.slane %v161_v53, 7 }
  0x26   : > { %v447_v6 = vsel %vm417_vm2, %v444_v57, %v446_v0  ;;  %v427_v7 = vsel %vm417_vm2, %v424_v61, %v426_v1  ;;  %v1711_v11 = vsel %vm219_vm0, 0.0, %v244_v8  ;;  %v229_v56 = vrot.slane %v153_v54, 7  ;;  %v162_v61 = vld [vmem:[%s1600_s24 + $0x128] sm:$0xff] }
  0x27   : > { %v1714_v12 = vsel %vm219_vm0, 0.0, %v226_v9  ;;  %v1725_v18 = vsel %vm219_vm0, %v244_v8, %v245_v16  ;;  %v1728_v19 = vsel %vm219_vm0, %v226_v9, %v227_v17  ;;  %v359_v22 = vrot.slane %v1711_v11, 1 }
  0x28   : > { %2400 = vst [vmem:[#allocation3_spill] sm:$0xff] %v1728_v19  ;;  %v360_v23 = vrot.slane %v1725_v18, 1  ;;  %v339_v24 = vrot.slane %v1714_v12, 1  ;;  %v340_v25 = vrot.slane %v1728_v19, 1  ;;  %v308_v28 = vsel %vm219_vm0, %v245_v16, 0.0 }
  0x29   : > { %474 = vrot.lane.b32.xlu1 %v440_v36, %s1539_s7  ;;  %458 = vrot.lane.b32.xlu0 %v420_v37, %s1539_s7  ;;  %v302_v29 = vsel %vm219_vm0, %v227_v17, 0.0  ;;  %v362_v30 = vrot.slane %v308_v28, 1  ;;  %v448_v32 = vrot.slane %v1711_v11, 2  ;;  %v449_v33 = vrot.slane %v1725_v18, 2  ;;  %v979_v36 = vld [vmem:[%s2391_s1 + $0x8] sm:$0xff] }
  0x2a   : > { %v361_v26 = vsel %vm328_vm1, %v359_v22, %v360_v23  ;;  %v341_v27 = vsel %vm328_vm1, %v339_v24, %v340_v25  ;;  %v342_v31 = vrot.slane %v302_v29, 1  ;;  %v428_v34 = vrot.slane %v1714_v12, 2 }
  0x2b   : > { %v363_v37 = vsel %vm328_vm1, %v360_v23, %v362_v30  ;;  %v429_v39 = vrot.slane %v1728_v19, 2  ;;  %v1443_v40 = vpack.c.bf16 %v979_v36, %v978_v35  ;;  %v451_v49 = vrot.slane %v308_v28, 2 }
  0x2c   : > { %v343_v38 = vsel %vm328_vm1, %v340_v25, %v342_v31  ;;  %v1811_v60 = vsel %vm219_vm0, 0.0, %v229_v56  ;;  %v248_v1 = vrot.slane %v162_v61, 7  ;;  %vm990_vm12 = vcmask 293888  }
  0x2d   : > { %476 = vrot.lane.b32.xlu1 %v442_v42, %s1539_s7  ;;  %460 = vrot.lane.b32.xlu0 %v422_v43, %s1539_s7  ;;  %v981_v42 = vld [vmem:[%s2391_s1 + $0x18] sm:$0xff]  ;;  %v450_v43 = vsel %vm417_vm2, %v448_v32, %v449_v33  ;;  %v430_v46 = vsel %vm417_vm2, %v428_v34, %v429_v39  ;;  %2402 = vst [vmem:[#allocation5_spill] sm:$0xff] %v1811_v60  ;;  %v344_v14 = vrot.slane %v1811_v60, 1 }
  0x2e   : > { %1444 = vmatprep.subr.bf16.mxu0 %v1443_v40  ;;  %1451 = vmatprep.subr.bf16.mxu1 %v1443_v40  ;;  %v1447_v47 = vpack.c.bf16 %v981_v42, %v980_v41 }
  0x2f   : > { %1446 = vmatpush3.bf16.msra.mxu0 %v1443_v40  ;;  %1454 = vmatpush3.bf16.msra.mxu1 %v1443_v40 }
  0x30   : > { %1448 = vmatprep.subr.bf16.mxu0 %v1447_v47  ;;  %1452 = vmatprep.subr.bf16.mxu1 %v1447_v47 }
  0x31   : > { %526 = vrot.lane.b32.xlu1 %v1665_v44, %s1537_s27  ;;  %510 = vrot.lane.b32.xlu0 %v1668_v45, %s1537_s27 }
  0x33   : > { %1450 = vmatpush3.bf16.msra.mxu0 %v1447_v47  ;;  %1455 = vmatpush3.bf16.msra.mxu1 %v1447_v47 }
  0x34   : > { %1417 = vmatprep.subr.msk.mxu0 %vm1039_vm3, %v982_v48  ;;  %1453 = vmatprep.subr.msk.mxu1 %vm1039_vm3, %v982_v48 }
  0x35   : > { %584 = vrot.lane.b32.xlu1 %v356_v50, %s1540_s8  ;;  %568 = vrot.lane.b32.xlu0 %v336_v51, %s1540_s8 }
  0x37   : > { %1418 = vmatpush3.msk.msra.mxu0 %vm1039_vm3, %v982_v48  ;;  %1456 = vmatpush3.msk.msra.mxu1 %vm1039_vm3, %v982_v48 }
  0x39   : > { %389 = vrot.lane.b32.xlu1 %v356_v50, %s1538_s6  ;;  %373 = vrot.lane.b32.xlu0 %v336_v51, %s1538_s6  ;;  %v431_v50 = vrot.slane %v302_v29, 2  ;;  %v452_v51 = vsel %vm417_vm2, %v449_v33, %v451_v49  ;;  %v309_v29 = vsel %vm219_vm0, %v248_v1, 0.0 }
  0x3a   : > { %v367_v31 = vrot.slane %v309_v29, 1  ;;  %v456_v53 = vrot.slane %v309_v29, 2 }
  0x3b   : > { %v432_v52 = vsel %vm417_vm2, %v429_v39, %v431_v50  ;;  %v433_v39 = vrot.slane %v1811_v60, 2 }
  0x3d   : > { %586 = vrot.lane.b32.xlu1 %v358_v58, %s1540_s8  ;;  %570 = vrot.lane.b32.xlu0 %v338_v59, %s1540_s8 }
  0x41   : > { %642 = vrot.lane.b32.xlu1 %v445_v62, %s1541_s9  ;;  %626 = vrot.lane.b32.xlu0 %v425_v63, %s1541_s9 }
  0x45   : > { %391 = vrot.lane.b32.xlu1 %v358_v58, %s1538_s6  ;;  %375 = vrot.lane.b32.xlu0 %v338_v59, %s1538_s6  ;;  %v1808_v59 = vsel %vm219_vm0, 0.0, %v247_v55 }
  0x46   : > { %2401 = vst [vmem:[#allocation4_spill] sm:$0xff] %v1808_v59  ;;  %v364_v9 = vrot.slane %v1808_v59, 1  ;;  %v453_v35 = vrot.slane %v1808_v59, 2 }
  0x49   : > { %478 = vrot.lane.b32.xlu1 %v445_v62, %s1539_s7  ;;  %462 = vrot.lane.b32.xlu0 %v425_v63, %s1539_s7  ;;  %v154_v62 = vld [vmem:[%s1600_s24 + $0x28] sm:$0xff] }
  0x4a   : > { %v230_v2 = vrot.slane %v154_v62, 7 }
  0x4c   : > { %v1833_v8 = vsel %vm219_vm0, %v229_v56, %v230_v2  ;;  %v303_v30 = vsel %vm219_vm0, %v230_v2, 0.0 }
  0x4d   : > { %644 = vrot.lane.b32.xlu1 %v447_v6, %s1541_s9  ;;  %628 = vrot.lane.b32.xlu0 %v427_v7, %s1541_s9  ;;  %2404 = vst [vmem:[#allocation7_spill] sm:$0xff] %v1833_v8  ;;  %v345_v16 = vrot.slane %v1833_v8, 1  ;;  %v347_v32 = vrot.slane %v303_v30, 1  ;;  %v434_v40 = vrot.slane %v1833_v8, 2  ;;  %v436_v54 = vrot.slane %v303_v30, 2 }
  0x4f   : > { %v346_v24 = vsel %vm328_vm1, %v344_v14, %v345_v16  ;;  %v437_v62 = vsel %vm417_vm2, %v434_v40, %v436_v54 }
  0x51   : > { %692 = vrot.lane.b32.xlu1 %v1711_v11, %s1542_s10  ;;  %676 = vrot.lane.b32.xlu0 %v1714_v12, %s1542_s10 }
  0x55   : > { %480 = vrot.lane.b32.xlu1 %v447_v6, %s1539_s7  ;;  %464 = vrot.lane.b32.xlu0 %v427_v7, %s1539_s7  ;;  %v1830_v7 = vsel %vm219_vm0, %v247_v55, %v248_v1 }
  0x56   : > { %2403 = vst [vmem:[#allocation6_spill] sm:$0xff] %v1830_v7  ;;  %v365_v13 = vrot.slane %v1830_v7, 1  ;;  %v454_v36 = vrot.slane %v1830_v7, 2 }
  0x58   : > { %v366_v23 = vsel %vm328_vm1, %v364_v9, %v365_v13  ;;  %v457_v61 = vsel %vm417_vm2, %v454_v36, %v456_v53 }
  0x59   : > { %528 = vrot.lane.b32.xlu1 %v1711_v11, %s1537_s27  ;;  %512 = vrot.lane.b32.xlu0 %v1714_v12, %s1537_s27 }
  0x5d   : > { %694 = vrot.lane.b32.xlu1 %v1725_v18, %s1542_s10  ;;  %678 = vrot.lane.b32.xlu0 %v1728_v19, %s1542_s10 }
  0x61   : > { %752 = vrot.lane.b32.xlu1 %v361_v26, %s1543_s11  ;;  %736 = vrot.lane.b32.xlu0 %v341_v27, %s1543_s11 }
  0x65   : > { %530 = vrot.lane.b32.xlu1 %v1725_v18, %s1537_s27  ;;  %514 = vrot.lane.b32.xlu0 %v1728_v19, %s1537_s27 }
  0x69   : > { %588 = vrot.lane.b32.xlu1 %v361_v26, %s1540_s8  ;;  %572 = vrot.lane.b32.xlu0 %v341_v27, %s1540_s8 }
  0x6d   : > { %754 = vrot.lane.b32.xlu1 %v363_v37, %s1543_s11  ;;  %738 = vrot.lane.b32.xlu0 %v343_v38, %s1543_s11 }
  0x71   : > { %810 = vrot.lane.b32.xlu1 %v450_v43, %s1544_s30  ;;  %794 = vrot.lane.b32.xlu0 %v430_v46, %s1544_s30 }
  0x75   : > { %393 = vrot.lane.b32.xlu1 %v361_v26, %s1538_s6  ;;  %377 = vrot.lane.b32.xlu0 %v341_v27, %s1538_s6 }
  0x79   : > { %590 = vrot.lane.b32.xlu1 %v363_v37, %s1540_s8  ;;  %574 = vrot.lane.b32.xlu0 %v343_v38, %s1540_s8 }
  0x7d   : > { %646 = vrot.lane.b32.xlu1 %v450_v43, %s1541_s9  ;;  %630 = vrot.lane.b32.xlu0 %v430_v46, %s1541_s9 }
  0x81   : > { %812 = vrot.lane.b32.xlu1 %v452_v51, %s1544_s30  ;;  %796 = vrot.lane.b32.xlu0 %v432_v52, %s1544_s30 }
  0x85   : > { %395 = vrot.lane.b32.xlu1 %v363_v37, %s1538_s6  ;;  %379 = vrot.lane.b32.xlu0 %v343_v38, %s1538_s6  ;;  %v368_v37 = vsel %vm328_vm1, %v365_v13, %v367_v31  ;;  %v348_v38 = vsel %vm328_vm1, %v345_v16, %v347_v32 }
  0x89   : > { %482 = vrot.lane.b32.xlu1 %v450_v43, %s1539_s7  ;;  %466 = vrot.lane.b32.xlu0 %v430_v46, %s1539_s7  ;;  %v455_v43 = vsel %vm417_vm2, %v453_v35, %v454_v36  ;;  %v435_v46 = vsel %vm417_vm2, %v433_v39, %v434_v40  ;;  %v1944_v39 = vld [vmem:[%s1600_s24 + $0x138] sm:$0xff] }
  0x8a   : > { %v1803_v57 = vpop.permute.xlu1 %524  ;;  %v1947_v40 = vld [vmem:[%s1600_s24 + $0x38] sm:$0xff]  ;;  %v251_v53 = vrot.slane %v1944_v39, 7 }
  0x8b   : > { %v1805_v58 = vpop.permute.xlu0 %508  ;;  %v233_v54 = vrot.slane %v1947_v40, 7 }
  0x8d   : > { %648 = vrot.lane.b32.xlu1 %v452_v51, %s1541_s9  ;;  %632 = vrot.lane.b32.xlu0 %v432_v52, %s1541_s9 }
  0x91   : > { %696 = vrot.lane.b32.xlu1 %v1808_v59, %s1542_s10  ;;  %680 = vrot.lane.b32.xlu0 %v1811_v60, %s1542_s10 }
  0x93   : > { %v1819_v63 = vpop.permute.xlu1 %371  ;;  %v1821_v0 = vpop.permute.xlu0 %369 }
  0x95   : > { %484 = vrot.lane.b32.xlu1 %v452_v51, %s1539_s7  ;;  %468 = vrot.lane.b32.xlu0 %v432_v52, %s1539_s7 }
  0x97   : > { %v1825_v3 = vpop.permute.xlu1 %387  ;;  %v1827_v6 = vpop.permute.xlu0 %385 }
  0x99   : > { %532 = vrot.lane.b32.xlu1 %v1808_v59, %s1537_s27  ;;  %516 = vrot.lane.b32.xlu0 %v1811_v60, %s1537_s27 }
  0x9b   : > { %v1843_v17 = vpop.permute.xlu1 %474  ;;  %v1845_v22 = vpop.permute.xlu0 %458 }
  0x9d   : > { %698 = vrot.lane.b32.xlu1 %v1830_v7, %s1542_s10  ;;  %682 = vrot.lane.b32.xlu0 %v1833_v8, %s1542_s10 }
  0x9f   : > { %v1853_v25 = vpop.permute.xlu1 %476  ;;  %v1855_v26 = vpop.permute.xlu0 %460 }
  0xa1   : > { %756 = vrot.lane.b32.xlu1 %v366_v23, %s1543_s11  ;;  %740 = vrot.lane.b32.xlu0 %v346_v24, %s1543_s11 }
  0xa3   : > { %v1859_v27 = vpop.permute.xlu1 %526  ;;  %v1861_v28 = vpop.permute.xlu0 %510 }
  0xa5   : > { %534 = vrot.lane.b32.xlu1 %v1830_v7, %s1537_s27  ;;  %518 = vrot.lane.b32.xlu0 %v1833_v8, %s1537_s27 }
  0xa7   : > { %v1869_v33 = vpop.permute.xlu1 %584  ;;  %v1871_v34 = vpop.permute.xlu0 %568 }
  0xa9   : > { %592 = vrot.lane.b32.xlu1 %v366_v23, %s1540_s8  ;;  %576 = vrot.lane.b32.xlu0 %v346_v24, %s1540_s8 }
  0xab   : > { %v1881_v41 = vpop.permute.xlu1 %389  ;;  %v1883_v42 = vpop.permute.xlu0 %373 }
  0xad   : > { %758 = vrot.lane.b32.xlu1 %v368_v37, %s1543_s11  ;;  %742 = vrot.lane.b32.xlu0 %v348_v38, %s1543_s11 }
  0xaf   : > { %v1889_v47 = vpop.permute.xlu1 %586  ;;  %v1891_v48 = vpop.permute.xlu0 %570 }
  0xb1   : > { %814 = vrot.lane.b32.xlu1 %v455_v43, %s1544_s30  ;;  %798 = vrot.lane.b32.xlu0 %v435_v46, %s1544_s30 }
  0xb3   : > { %v1895_v49 = vpop.permute.xlu1 %642  ;;  %v1897_v50 = vpop.permute.xlu0 %626 }
  0xb5   : > { %397 = vrot.lane.b32.xlu1 %v366_v23, %s1538_s6  ;;  %381 = vrot.lane.b32.xlu0 %v346_v24, %s1538_s6  ;;  %v163_v23 = vld [vmem:[%s1600_s24 + $0x130] sm:$0xff] }
  0xb6   : > { %v155_v24 = vld [vmem:[%s1600_s24 + $0x30] sm:$0xff]  ;;  %v250_v29 = vrot.slane %v163_v23, 7  ;;  %s182_s24 = scalar_select %p181_p9, %s1793_s14, 15 }
  0xb7   : > { %v1901_v51 = vpop.permute.xlu1 %391  ;;  %v1903_v52 = vpop.permute.xlu0 %375  ;;  %v232_v30 = vrot.slane %v155_v24, 7 }
  0xb8   : > { %v1934_v35 = vsel %vm219_vm0, 0.0, %v250_v29  ;;  %v1962_v8 = vsel %vm219_vm0, %v250_v29, %v251_v53  ;;  %s1360_s25 = sshll.u32 %s182_s24, 4 }
  0xb9   : > { %594 = vrot.lane.b32.xlu1 %v368_v37, %s1540_s8  ;;  %578 = vrot.lane.b32.xlu0 %v348_v38, %s1540_s8  ;;  %v1937_v36 = vsel %vm219_vm0, 0.0, %v232_v30  ;;  %v1965_v7 = vsel %vm219_vm0, %v232_v30, %v233_v54  ;;  %v563_v39 = vrot.slane %v1934_v35, 1 }
  0xba   : > { %v558_v29 = vrot.slane %v1937_v36, 1 }
  0xbb   : > { %v479_v55 = vpop.permute.xlu1 %478  ;;  %v463_v56 = vpop.permute.xlu0 %462 }
  0xbd   : > { %650 = vrot.lane.b32.xlu1 %v455_v43, %s1541_s9  ;;  %634 = vrot.lane.b32.xlu0 %v435_v46, %s1541_s9 }
  0xbf   : > { %v1911_v1 = vpop.permute.xlu1 %644  ;;  %v1913_v2 = vpop.permute.xlu0 %628 }
  0xc1   : > { %816 = vrot.lane.b32.xlu1 %v457_v61, %s1544_s30  ;;  %800 = vrot.lane.b32.xlu0 %v437_v62, %s1544_s30 }
  0xc3   : > { %v1917_v9 = vpop.permute.xlu1 %692  ;;  %v1919_v13 = vpop.permute.xlu0 %676 }
  0xc5   : > { %399 = vrot.lane.b32.xlu1 %v368_v37, %s1538_s6  ;;  %383 = vrot.lane.b32.xlu0 %v348_v38, %s1538_s6 }
  0xc7   : > { %v1923_v14 = vpop.permute.xlu1 %480  ;;  %v1925_v16 = vpop.permute.xlu0 %464 }
  0xc9   : > { %486 = vrot.lane.b32.xlu1 %v455_v43, %s1539_s7  ;;  %470 = vrot.lane.b32.xlu0 %v435_v46, %s1539_s7 }
  0xcb   : > { %v529_v31 = vpop.permute.xlu1 %528  ;;  %v513_v32 = vpop.permute.xlu0 %512 }
  0xcd   : > { %652 = vrot.lane.b32.xlu1 %v457_v61, %s1541_s9  ;;  %636 = vrot.lane.b32.xlu0 %v437_v62, %s1541_s9 }
  0xcf   : > { %v1939_v37 = vpop.permute.xlu1 %694  ;;  %v1941_v38 = vpop.permute.xlu0 %678 }
  0xd1   : > { %700 = vrot.lane.b32.xlu1 %v1934_v35, %s1542_s10  ;;  %684 = vrot.lane.b32.xlu0 %v1937_v36, %s1542_s10 }
  0xd3   : > { %v753_v43 = vpop.permute.xlu1 %752  ;;  %v737_v46 = vpop.permute.xlu0 %736 }
  0xd5   : > { %488 = vrot.lane.b32.xlu1 %v457_v61, %s1539_s7  ;;  %472 = vrot.lane.b32.xlu0 %v437_v62, %s1539_s7  ;;  %v853_v61 = vsel %vm842_vm4, %v1614_v4, %v1881_v41  ;;  %v845_v62 = vsel %vm842_vm4, %v1617_v5, %v1883_v42  ;;  %v564_v4 = vrot.slane %v1962_v8, 1  ;;  %v559_v41 = vrot.slane %v1965_v7, 1  ;;  %s184_s7 = scalar_lea.vmem %s2390_s0, %s1360_s25 }
  0xd6   : > { %v870_v30 = vsel %vm859_vm5, %v853_v61, %v479_v55  ;;  %v862_v40 = vsel %vm859_vm5, %v845_v62, %v463_v56  ;;  %v843_v5 = vsel %vm842_vm4, %v1627_v10, %v1821_v0  ;;  %v851_v42 = vsel %vm842_vm4, %v1636_v20, %v1827_v6 }
  0xd7   : > { %v1957_v23 = vpop.permute.xlu1 %530  ;;  %v1959_v24 = vpop.permute.xlu0 %514  ;;  %v887_v60 = vsel %vm876_vm6, %v870_v30, %v529_v31  ;;  %v879_v59 = vsel %vm876_vm6, %v862_v40, %v513_v32  ;;  %v868_v56 = vsel %vm859_vm5, %v851_v42, %v1843_v17  ;;  %v860_v61 = vsel %vm859_vm5, %v843_v5, %v1845_v22 }
  0xd8   : > { %v565_v20 = vsel %vm328_vm1, %v563_v39, %v564_v4  ;;  %v560_v0 = vsel %vm328_vm1, %v558_v29, %v559_v41  ;;  %v885_v6 = vsel %vm876_vm6, %v868_v56, %v1803_v57  ;;  %v2035_v29 = vsel %vm219_vm0, %v233_v54, 0.0 }
  0xd9   : > { %536 = vrot.lane.b32.xlu1 %v1934_v35, %s1537_s27  ;;  %520 = vrot.lane.b32.xlu0 %v1937_v36, %s1537_s27  ;;  %v902_v17 = vsel %vm893_vm7, %v885_v6, %v1869_v33  ;;  %v621_v54 = vrot.slane %v1934_v35, 2  ;;  %v616_v40 = vrot.slane %v1937_v36, 2  ;;  %v854_v5 = vsel %vm842_vm4, %v1665_v44, %v1901_v51 }
  0xda   : > { %v919_v31 = vsel %vm910_vm8, %v902_v17, %v1895_v49  ;;  %v846_v42 = vsel %vm842_vm4, %v1668_v45, %v1903_v52  ;;  %v617_v56 = vrot.slane %v1965_v7, 2  ;;  %v871_v35 = vsel %vm859_vm5, %v854_v5, %v1923_v14 }
  0xdb   : > { %v589_v19 = vpop.permute.xlu1 %588  ;;  %v573_v55 = vpop.permute.xlu0 %572  ;;  %v863_v36 = vsel %vm859_vm5, %v846_v42, %v1925_v16  ;;  %v888_v45 = vsel %vm876_vm6, %v871_v35, %v1957_v23 }
  0xdc   : > { %v1996_v62 = vsel %vm893_vm7, %v887_v60, %v589_v19  ;;  %v1999_v10 = vsel %vm893_vm7, %v879_v59, %v573_v55  ;;  %v877_v19 = vsel %vm876_vm6, %v860_v61, %v1805_v58  ;;  %v936_v58 = vsel %vm927_vm9, %v919_v31, %v1917_v9 }
  0xdd   : > { %702 = vrot.lane.b32.xlu1 %v1962_v8, %s1542_s10  ;;  %686 = vrot.lane.b32.xlu0 %v1965_v7, %s1542_s10  ;;  %v894_v22 = vsel %vm893_vm7, %v877_v19, %v1871_v34  ;;  %v953_v34 = vsel %vm944_vm10, %v936_v58, %v753_v43  ;;  %v561_v43 = vrot.slane %v2035_v29, 1  ;;  %v622_v55 = vrot.slane %v1962_v8, 2 }
  0xde   : > { %v911_v57 = vsel %vm910_vm8, %v894_v22, %v1897_v50  ;;  %v2032_v50 = vsel %vm219_vm0, %v251_v53, 0.0 }
  0xdf   : > { %v2011_v59 = vpop.permute.xlu1 %754  ;;  %v2013_v60 = vpop.permute.xlu0 %738  ;;  %v928_v33 = vsel %vm927_vm9, %v911_v57, %v1919_v13  ;;  %v566_v13 = vrot.slane %v2032_v50, 1  ;;  %v562_v51 = vsel %vm328_vm1, %v559_v41, %v561_v43  ;;  %v852_v41 = vsel %vm842_vm4, %v1639_v21, %v1825_v3 }
  0xe0   : > { %v945_v32 = vsel %vm944_vm10, %v928_v33, %v737_v46  ;;  %v869_v23 = vsel %vm859_vm5, %v852_v41, %v1853_v25  ;;  %v623_v61 = vsel %vm417_vm2, %v621_v54, %v622_v55 }
  0xe1   : > { %760 = vrot.lane.b32.xlu1 %v565_v20, %s1543_s11  ;;  %744 = vrot.lane.b32.xlu0 %v560_v0, %s1543_s11  ;;  %v567_v44 = vsel %vm328_vm1, %v564_v4, %v566_v13  ;;  %v844_v4 = vsel %vm842_vm4, %v1631_v15, %v1819_v63  ;;  %v886_v15 = vsel %vm876_vm6, %v869_v23, %v1859_v27 }
  0xe2   : > { %v903_v25 = vsel %vm893_vm7, %v886_v15, %v1889_v47 }
  0xe3   : > { %v811_v49 = vpop.permute.xlu1 %810  ;;  %v795_v39 = vpop.permute.xlu0 %794 }
  0xe4   : > { %v962_v30 = vsel %vm961_vm11, %v945_v32, %v795_v39  ;;  %v970_v9 = vsel %vm961_vm11, %v953_v34, %v811_v49  ;;  %v1503_v32 = vld [vmem:[%s184_s7 + $0x100] sm:%s1502_s17] }
  0xe5   : > { %538 = vrot.lane.b32.xlu1 %v1962_v8, %s1537_s27  ;;  %522 = vrot.lane.b32.xlu0 %v1965_v7, %s1537_s27  ;;  %v880_v7 = vsel %vm876_vm6, %v863_v36, %v1959_v24  ;;  %v861_v24 = vsel %vm859_vm5, %v844_v4, %v1855_v26 }
  0xe6   : > { %1419 = vmatprep.mubr.msk.f32.mxu0 %vm990_vm12, %v962_v30  ;;  %1431 = vmatprep.mubr.msk.f32.mxu1 %vm990_vm12, %v970_v9  ;;  %v878_v21 = vsel %vm876_vm6, %v861_v24, %v1861_v28  ;;  %v1512_v30 = vld [vmem:[%s184_s7 + $0x8] sm:%s1502_s17] }
  0xe7   : > { %v2047_v46 = vpop.permute.xlu1 %393  ;;  %v2049_v53 = vpop.permute.xlu0 %377  ;;  %v895_v26 = vsel %vm893_vm7, %v878_v21, %v1891_v48 }
  0xe8   : > { %v912_v6 = vsel %vm910_vm8, %v895_v26, %v1913_v2  ;;  %v855_v31 = vsel %vm842_vm4, %v1711_v11, %v2047_v46  ;;  %v847_v57 = vsel %vm842_vm4, %v1714_v12, %v2049_v53  ;;  %v253_v11 = vrot.slane %v1503_v32, 7 }
  0xe9   : > { %596 = vrot.lane.b32.xlu1 %v565_v20, %s1540_s8  ;;  %580 = vrot.lane.b32.xlu0 %v560_v0, %s1540_s8  ;;  %v618_v20 = vsel %vm417_vm2, %v616_v40, %v617_v56  ;;  %v920_v0 = vsel %vm910_vm8, %v903_v25, %v1911_v1  ;;  %v929_v28 = vsel %vm927_vm9, %v912_v6, %v1941_v38  ;;  %v236_v46 = vrot.slane %v1512_v30, 7 }
  0xea   : > { %v937_v27 = vsel %vm927_vm9, %v920_v0, %v1939_v37  ;;  %v946_v48 = vsel %vm944_vm10, %v929_v28, %v2013_v60  ;;  %v624_v37 = vrot.slane %v2032_v50, 2  ;;  %v619_v60 = vrot.slane %v2035_v29, 2  ;;  %v1506_v50 = vld [vmem:[%s184_s7] sm:%s1502_s17]  ;;  %v1509_v29 = vld [vmem:[%s184_s7 + $0x108] sm:%s1502_s17] }
  0xeb   : > { %v591_v8 = vpop.permute.xlu1 %590  ;;  %v575_v52 = vpop.permute.xlu0 %574  ;;  %v954_v47 = vsel %vm944_vm10, %v937_v27, %v2011_v59  ;;  %v235_v13 = vrot.slane %v1506_v50, 7  ;;  %v254_v43 = vrot.slane %v1509_v29, 7  ;;  %v299_v53 = vsel %vm219_vm0, 0.0, %v253_v11 }
  0xec   : > { %v2075_v14 = vsel %vm893_vm7, %v888_v45, %v591_v8  ;;  %v2078_v16 = vsel %vm893_vm7, %v880_v7, %v575_v52  ;;  %v625_v22 = vsel %vm417_vm2, %v622_v55, %v624_v37  ;;  %v620_v34 = vsel %vm417_vm2, %v617_v56, %v619_v60 }
  0xed   : > { %762 = vrot.lane.b32.xlu1 %v567_v44, %s1543_s11  ;;  %746 = vrot.lane.b32.xlu0 %v562_v51, %s1543_s11  ;;  %v293_v5 = vsel %vm219_vm0, 0.0, %v235_v13  ;;  %v255_v42 = vsel %vm219_vm0, %v253_v11, %v254_v43  ;;  %v237_v55 = vsel %vm219_vm0, %v235_v13, %v236_v46  ;;  %v731_v56 = vrot.slane %v299_v53, 1 }
  0xee   : > { %v726_v35 = vrot.slane %v293_v5, 1  ;;  %v732_v36 = vrot.slane %v255_v42, 1  ;;  %v727_v52 = vrot.slane %v237_v55, 1  ;;  %v311_v4 = vsel %vm219_vm0, %v254_v43, 0.0 }
  0xef   : > { %v2101_v63 = vpop.permute.xlu1 %646  ;;  %v2103_v3 = vpop.permute.xlu0 %630  ;;  %v305_v24 = vsel %vm219_vm0, %v236_v46, 0.0  ;;  %v789_v6 = vrot.slane %v299_v53, 2  ;;  %v790_v27 = vrot.slane %v255_v42, 2  ;;  %v792_v37 = vrot.slane %v311_v4, 2 }
  0xf0   : > { %v728_v21 = vsel %vm328_vm1, %v726_v35, %v727_v52  ;;  %v729_v25 = vrot.slane %v305_v24, 1  ;;  %v921_v13 = vsel %vm910_vm8, %v1996_v62, %v2101_v63  ;;  %v913_v43 = vsel %vm910_vm8, %v1999_v10, %v2103_v3 }
  0xf1   : > { %818 = vrot.lane.b32.xlu1 %v623_v61, %s1544_s30  ;;  %802 = vrot.lane.b32.xlu0 %v618_v20, %s1544_s30 }
  0xf3   : > { %v813_v1 = vpop.permute.xlu1 %812  ;;  %v797_v2 = vpop.permute.xlu0 %796 }
  0xf4   : > { %v971_v19 = vsel %vm961_vm11, %v954_v47, %v813_v1  ;;  %v963_v17 = vsel %vm961_vm11, %v946_v48, %v797_v2  ;;  %v784_v47 = vrot.slane %v293_v5, 2  ;;  %v785_v48 = vrot.slane %v237_v55, 2 }
  0xf5   : > { %598 = vrot.lane.b32.xlu1 %v567_v44, %s1540_s8  ;;  %1432 = vmatmul.mubr.msk.f32.vlgmr.msra.gmra.mrb[0].mxu1 %vm990_vm12, %v971_v19  ;;  %v730_v19 = vsel %vm328_vm1, %v727_v52, %v729_v25 }
  0xf6   : > { %582 = vrot.lane.b32.xlu0 %v562_v51, %s1540_s8  ;;  %1420 = vmatmul.mubr.msk.f32.vlgmr.msra.gmra.mrb[0].mxu0 %vm990_vm12, %v963_v17  ;;  %v2405_v51 = vld [vmem:[#allocation3_spill] sm:$0xff]  ;;  %v791_v17 = vsel %vm417_vm2, %v789_v6, %v790_v27  ;;  %v786_v60 = vsel %vm417_vm2, %v784_v47, %v785_v48  ;;  %s142_s8 = sand.u32 1, %s1527_s12  }
  0xf7   : > { %v396_v38 = vpop.permute.xlu1 %395  ;;  %v380_v59 = vpop.permute.xlu0 %379 }
  0xf8   : > { %v856_v44 = vsel %vm842_vm4, %v1725_v18, %v396_v38  ;;  %v848_v45 = vsel %vm842_vm4, %v2405_v51, %v380_v59  ;;  %v733_v18 = vsel %vm328_vm1, %v731_v56, %v732_v36 }
  0xf9   : > { %654 = vrot.lane.b32.xlu1 %v623_v61, %s1541_s9  ;;  %v734_v61 = vrot.slane %v311_v4, 1 }
  0xfa   : > { %638 = vrot.lane.b32.xlu0 %v618_v20, %s1541_s9 }
  0xfb   : > { %v483_v58 = vpop.permute.xlu1 %482  ;;  %v467_v33 = vpop.permute.xlu0 %466  ;;  %v735_v28 = vsel %vm328_vm1, %v732_v36, %v734_v61 }
  0xfc   : > { %v872_v49 = vsel %vm859_vm5, %v855_v31, %v483_v58  ;;  %v864_v39 = vsel %vm859_vm5, %v847_v57, %v467_v33  ;;  %v793_v31 = vsel %vm417_vm2, %v790_v27, %v792_v37 }
  0xfd   : > { %820 = vrot.lane.b32.xlu1 %v625_v22, %s1544_s30 }
  0xfe   : > { %804 = vrot.lane.b32.xlu0 %v620_v34, %s1544_s30 }
  0xff   : > { %v2149_v9 = vpop.permute.xlu1 %648  ;;  %v2151_v12 = vpop.permute.xlu0 %632 }
 0x101   : > { %656 = vrot.lane.b32.xlu1 %v625_v22, %s1541_s9  ;;  %v787_v22 = vrot.slane %v305_v24, 2 }
 0x102   : > { %640 = vrot.lane.b32.xlu0 %v620_v34, %s1541_s9  ;;  %s1355_s9 = sshll.u32 %s142_s8, 7 }
 0x103   : > { %v2156_v54 = vpop.permute.xlu1 %696  ;;  %v2158_v40 = vpop.permute.xlu0 %680  ;;  %v788_v33 = vsel %vm417_vm2, %v785_v48, %v787_v22  ;;  %s2305_s18 = scalar_lea.vmem [#allocation2], %s1355_s9 }
 0x104   : > { %v938_v46 = vsel %vm927_vm9, %v921_v13, %v2156_v54 }
 0x105   : > { %704 = vrot.lane.b32.xlu1 %v299_v53, %s1542_s10  ;;  %v930_v53 = vsel %vm927_vm9, %v913_v43, %v2158_v40 }
 0x106   : > { %688 = vrot.lane.b32.xlu0 %v293_v5, %s1542_s10 }
 0x107   : > { %v485_v7 = vpop.permute.xlu1 %484  ;;  %v469_v8 = vpop.permute.xlu0 %468 }
 0x108   : > { %v873_v41 = vsel %vm859_vm5, %v856_v44, %v485_v7  ;;  %v865_v23 = vsel %vm859_vm5, %v848_v45, %v469_v8  ;;  %v922_v45 = vsel %vm910_vm8, %v2075_v14, %v2149_v9  ;;  %v914_v7 = vsel %vm910_vm8, %v2078_v16, %v2151_v12  ;;  %v2406_v9 = vld [vmem:[#allocation4_spill] sm:$0xff] }
 0x109   : > { %706 = vrot.lane.b32.xlu1 %v255_v42, %s1542_s10 }
 0x10a   : > { %690 = vrot.lane.b32.xlu0 %v237_v55, %s1542_s10 }
 0x10b   : > { %v533_v20 = vpop.permute.xlu1 %532  ;;  %v517_v15 = vpop.permute.xlu0 %516 }
 0x10c   : > { %v889_v26 = vsel %vm876_vm6, %v872_v49, %v533_v20  ;;  %v881_v0 = vsel %vm876_vm6, %v864_v39, %v517_v15  ;;  %v2407_v20 = vld [vmem:[#allocation5_spill] sm:$0xff] }
 0x10d   : > { %764 = vrot.lane.b32.xlu1 %v733_v18, %s1543_s11 }
 0x10e   : > { %748 = vrot.lane.b32.xlu0 %v728_v21, %s1543_s11 }
 0x10f   : > { %v699_v1 = vpop.permute.xlu1 %698  ;;  %v683_v2 = vpop.permute.xlu0 %682 }
 0x110   : > { %v939_v8 = vsel %vm927_vm9, %v922_v45, %v699_v1  ;;  %v931_v52 = vsel %vm927_vm9, %v914_v7, %v683_v2 }
 0x111   : > { %766 = vrot.lane.b32.xlu1 %v735_v28, %s1543_s11 }
 0x112   : > { %750 = vrot.lane.b32.xlu0 %v730_v19, %s1543_s11 }
 0x113   : > { %v757_v38 = vpop.permute.xlu1 %756  ;;  %v741_v59 = vpop.permute.xlu0 %740 }
 0x114   : > { %v955_v5 = vsel %vm944_vm10, %v938_v46, %v757_v38  ;;  %v947_v42 = vsel %vm944_vm10, %v930_v53, %v741_v59 }
 0x115   : > { %822 = vrot.lane.b32.xlu1 %v791_v17, %s1544_s30 }
 0x116   : > { %806 = vrot.lane.b32.xlu0 %v786_v60, %s1544_s30 }
 0x117   : > { %v535_v57 = vpop.permute.xlu1 %534  ;;  %v519_v58 = vpop.permute.xlu0 %518 }
 0x118   : > { %v890_v34 = vsel %vm876_vm6, %v873_v41, %v535_v57  ;;  %v882_v32 = vsel %vm876_vm6, %v865_v23, %v519_v58 }
 0x119   : > { %824 = vrot.lane.b32.xlu1 %v793_v31, %s1544_s30 }
 0x11a   : > { %808 = vrot.lane.b32.xlu0 %v788_v33, %s1544_s30 }
 0x11b   : > { %v593_v49 = vpop.permute.xlu1 %592  ;;  %v577_v39 = vpop.permute.xlu0 %576 }
 0x11c   : > { %v2196_v50 = vsel %vm893_vm7, %v889_v26, %v593_v49  ;;  %v2199_v29 = vsel %vm893_vm7, %v881_v0, %v577_v39 }
 0x11f   : > { %v759_v30 = vpop.permute.xlu1 %758  ;;  %v743_v11 = vpop.permute.xlu0 %742 }
 0x120   : > { %v956_v4 = vsel %vm944_vm10, %v939_v8, %v759_v30  ;;  %v948_v41 = vsel %vm944_vm10, %v931_v52, %v743_v11 }
 0x123   : > { %v815_v55 = vpop.permute.xlu1 %814  ;;  %v799_v56 = vpop.permute.xlu0 %798 }
 0x124   : > { %v972_v35 = vsel %vm961_vm11, %v955_v5, %v815_v55  ;;  %v964_v62 = vsel %vm961_vm11, %v947_v42, %v799_v56 }
 0x125   : > { %1422 = vmatprep.mubr.msk.f32.mxu0 %vm990_vm12, %v964_v62  ;;  %1434 = vmatprep.mubr.msk.f32.mxu1 %vm990_vm12, %v972_v35 }
 0x127   : > { %v398_v10 = vpop.permute.xlu1 %397  ;;  %v382_v63 = vpop.permute.xlu0 %381 }
 0x128   : > { %v857_v12 = vsel %vm842_vm4, %v2406_v9, %v398_v10  ;;  %v849_v15 = vsel %vm842_vm4, %v2407_v20, %v382_v63 }
 0x12b   : > { %v595_v3 = vpop.permute.xlu1 %594  ;;  %v579_v54 = vpop.permute.xlu0 %578 }
 0x12c   : > { %v907_v40 = vsel %vm893_vm7, %v890_v34, %v595_v3  ;;  %v899_v36 = vsel %vm893_vm7, %v882_v32, %v579_v54 }
 0x12f   : > { %v651_v44 = vpop.permute.xlu1 %650  ;;  %v635_v51 = vpop.permute.xlu0 %634 }
 0x130   : > { %v923_v34 = vsel %vm910_vm8, %v2196_v50, %v651_v44  ;;  %v915_v32 = vsel %vm910_vm8, %v2199_v29, %v635_v51 }
 0x133   : > { %v817_v23 = vpop.permute.xlu1 %816  ;;  %v801_v24 = vpop.permute.xlu0 %800 }
 0x134   : > { %v973_v18 = vsel %vm961_vm11, %v956_v4, %v817_v23  ;;  %v965_v61 = vsel %vm961_vm11, %v948_v41, %v801_v24 }
 0x135   : > { %1423 = vmatmul.mubr.msk.f32.gmra.mrb[2].mxu0 %vm990_vm12, %v965_v61  ;;  %1435 = vmatmul.mubr.msk.f32.gmra.mrb[2].mxu1 %vm990_vm12, %v973_v18 }
 0x137   : > { %v2233_v14 = vpop.permute.xlu1 %399  ;;  %v2235_v16 = vpop.permute.xlu0 %383 }
 0x13b   : > { %v487_v21 = vpop.permute.xlu1 %486  ;;  %v471_v25 = vpop.permute.xlu0 %470 }
 0x13c   : > { %v874_v26 = vsel %vm859_vm5, %v857_v12, %v487_v21  ;;  %v866_v0 = vsel %vm859_vm5, %v849_v15, %v471_v25  ;;  %v2408_v12 = vld [vmem:[#allocation6_spill] sm:$0xff]  ;;  %v2409_v25 = vld [vmem:[#allocation7_spill] sm:$0xff] }
 0x13d   : > { %v858_v20 = vsel %vm842_vm4, %v2408_v12, %v2233_v14 }
 0x13f   : > { %v653_v6 = vpop.permute.xlu1 %652  ;;  %v637_v27 = vpop.permute.xlu0 %636 }
 0x140   : > { %v924_v55 = vsel %vm910_vm8, %v907_v40, %v653_v6  ;;  %v916_v56 = vsel %vm910_vm8, %v899_v36, %v637_v27  ;;  %v850_v6 = vsel %vm842_vm4, %v2409_v25, %v2235_v16 }
 0x143   : > { %v701_v28 = vpop.permute.xlu1 %700  ;;  %v685_v47 = vpop.permute.xlu0 %684 }
 0x144   : > { %v940_v49 = vsel %vm927_vm9, %v923_v34, %v701_v28  ;;  %v932_v39 = vsel %vm927_vm9, %v915_v32, %v685_v47 }
 0x147   : > { %v489_v48 = vpop.permute.xlu1 %488  ;;  %v473_v1 = vpop.permute.xlu0 %472 }
 0x148   : > { %v867_v28 = vsel %vm859_vm5, %v850_v6, %v473_v1 }
 0x14b   : > { %v537_v2 = vpop.permute.xlu1 %536  ;;  %v521_v19 = vpop.permute.xlu0 %520 }
 0x14c   : > { %v891_v23 = vsel %vm876_vm6, %v874_v26, %v537_v2  ;;  %v883_v18 = vsel %vm876_vm6, %v866_v0, %v521_v19  ;;  %v875_v26 = vsel %vm859_vm5, %v858_v20, %v489_v48 }
 0x14f   : > { %v703_v17 = vpop.permute.xlu1 %702  ;;  %v687_v37 = vpop.permute.xlu0 %686 }
 0x150   : > { %v941_v35 = vsel %vm927_vm9, %v924_v55, %v703_v17  ;;  %v933_v62 = vsel %vm927_vm9, %v916_v56, %v687_v37 }
 0x153   : > { %v761_v38 = vpop.permute.xlu1 %760  ;;  %v745_v59 = vpop.permute.xlu0 %744 }
 0x154   : > { %v957_v30 = vsel %vm944_vm10, %v940_v49, %v761_v38  ;;  %v949_v11 = vsel %vm944_vm10, %v932_v39, %v745_v59 }
 0x157   : > { %v539_v60 = vpop.permute.xlu1 %538  ;;  %v523_v22 = vpop.permute.xlu0 %522 }
 0x158   : > { %v892_v47 = vsel %vm876_vm6, %v875_v26, %v539_v60  ;;  %v884_v17 = vsel %vm876_vm6, %v867_v28, %v523_v22 }
 0x15b   : > { %v597_v31 = vpop.permute.xlu1 %596  ;;  %v581_v57 = vpop.permute.xlu0 %580 }
 0x15c   : > { %v908_v61 = vsel %vm893_vm7, %v891_v23, %v597_v31  ;;  %v900_v15 = vsel %vm893_vm7, %v883_v18, %v581_v57 }
 0x15f   : > { %v763_v58 = vpop.permute.xlu1 %762  ;;  %v747_v33 = vpop.permute.xlu0 %746 }
 0x160   : > { %v958_v10 = vsel %vm944_vm10, %v941_v35, %v763_v58  ;;  %v950_v3 = vsel %vm944_vm10, %v933_v62, %v747_v33 }
 0x163   : > { %v819_v13 = vpop.permute.xlu1 %818  ;;  %v803_v43 = vpop.permute.xlu0 %802 }
 0x164   : > { %v974_v46 = vsel %vm961_vm11, %v957_v30, %v819_v13  ;;  %v966_v53 = vsel %vm961_vm11, %v949_v11, %v803_v43  ;;  %v1361_v30 = vld [vmem:[%s2392_s2] ss:$0 sm:$0xff] }
 0x165   : > { %1425 = vmatprep.mubr.msk.f32.mxu0 %vm990_vm12, %v966_v53  ;;  %1437 = vmatprep.mubr.msk.f32.mxu1 %vm990_vm12, %v974_v46 }
 0x167   : > { %v599_v50 = vpop.permute.xlu1 %598 }
 0x168   : > { %v583_v29 = vpop.permute.xlu0 %582  ;;  %v909_v37 = vsel %vm893_vm7, %v892_v47, %v599_v50 }
 0x169   : > { %v901_v59 = vsel %vm893_vm7, %v884_v17, %v583_v29 }
 0x16b   : > { %v655_v5 = vpop.permute.xlu1 %654 }
 0x16c   : > { %v639_v42 = vpop.permute.xlu0 %638  ;;  %v925_v21 = vsel %vm910_vm8, %v908_v61, %v655_v5 }
 0x16d   : > { %v917_v27 = vsel %vm910_vm8, %v900_v15, %v639_v42 }
 0x16f   : > { %v821_v63 = vpop.permute.xlu1 %820 }
 0x170   : > { %v975_v54 = vsel %vm961_vm11, %v958_v10, %v821_v63  ;;  %v805_v44 = vpop.permute.xlu0 %804 }
 0x171   : > { %v967_v51 = vsel %vm961_vm11, %v950_v3, %v805_v44  ;;  %1438 = vmatmul.mubr.msk.f32.gmra.mrb[4].mxu1 %vm990_vm12, %v975_v54 }
 0x172   : > { %1426 = vmatmul.mubr.msk.f32.gmra.mrb[4].mxu0 %vm990_vm12, %v967_v51 }
 0x173   : > { %v657_v40 = vpop.permute.xlu1 %656 }
 0x174   : > { %v641_v36 = vpop.permute.xlu0 %640  ;;  %v926_v1 = vsel %vm910_vm8, %v909_v37, %v657_v40 }
 0x175   : > { %v918_v31 = vsel %vm910_vm8, %v901_v59, %v641_v36 }
 0x177   : > { %v705_v45 = vpop.permute.xlu1 %704 }
 0x178   : > { %v689_v7 = vpop.permute.xlu0 %688  ;;  %v942_v0 = vsel %vm927_vm9, %v925_v21, %v705_v45 }
 0x179   : > { %v934_v14 = vsel %vm927_vm9, %v917_v27, %v689_v7 }
 0x17b   : > { %v707_v8 = vpop.permute.xlu1 %706 }
 0x17c   : > { %v691_v52 = vpop.permute.xlu0 %690  ;;  %v943_v22 = vsel %vm927_vm9, %v926_v1, %v707_v8 }
 0x17d   : > { %v935_v57 = vsel %vm927_vm9, %v918_v31, %v691_v52 }
 0x17f   : > { %v765_v4 = vpop.permute.xlu1 %764 }
 0x180   : > { %v749_v41 = vpop.permute.xlu0 %748  ;;  %v959_v2 = vsel %vm944_vm10, %v942_v0, %v765_v4 }
 0x181   : > { %v951_v16 = vsel %vm944_vm10, %v934_v14, %v749_v41 }
 0x183   : > { %v767_v24 = vpop.permute.xlu1 %766 }
 0x184   : > { %v751_v9 = vpop.permute.xlu0 %750  ;;  %v960_v58 = vsel %vm944_vm10, %v943_v22, %v767_v24 }
 0x185   : > { %v952_v34 = vsel %vm944_vm10, %v935_v57, %v751_v9 }
 0x187   : > { %v823_v19 = vpop.permute.xlu1 %822 }
 0x188   : > { %v976_v48 = vsel %vm961_vm11, %v959_v2, %v823_v19  ;;  %v807_v38 = vpop.permute.xlu0 %806 }
 0x189   : > { %v968_v60 = vsel %vm961_vm11, %v951_v16, %v807_v38  ;;  %1440 = vmatprep.mubr.msk.f32.mxu1 %vm990_vm12, %v976_v48 }
 0x18a   : > { %1428 = vmatprep.mubr.msk.f32.mxu0 %vm990_vm12, %v968_v60 }
 0x18b   : > { %v825_v33 = vpop.permute.xlu1 %824 }
 0x18c   : > { %v977_v32 = vsel %vm961_vm11, %v960_v58, %v825_v33  ;;  %v809_v49 = vpop.permute.xlu0 %808 }
 0x18d   : > { %v969_v39 = vsel %vm961_vm11, %v952_v34, %v809_v49  ;;  %1441 = vmatmul.mubr.msk.f32.gmra.mrb[6].mxu1 %vm990_vm12, %v977_v32 }
 0x18e   : > { %1429 = vmatmul.mubr.msk.f32.gmra.mrb[6].mxu0 %vm990_vm12, %v969_v39 }
 0x1c8   : > { %v1433_v11 = vpop.f32.mrb[0].mxu1 }
 0x1c9   : > { %v1421_v13 = vpop.f32.mrb[0].mxu0  ;;  %v1155_v43 = vadd.f32 %v1433_v11, %v1361_v30  ;;  %v1149_v46 = vpop.f32.mrb[1].mxu1 }
 0x1ca   : > { %v1115_v53 = vadd.f32 %v1421_v13, %v1361_v30  ;;  %v1109_v50 = vpop.f32.mrb[1].mxu0  ;;  %v1150_v29 = vadd.f32 %v1361_v30, %v1149_v46 }
 0x1cb   : > { %1197 = vst.msk [vmem:[%s2305_s18 + $0x48] sm:$0xff] %vm859_vm5, %v1155_v43  ;;  %v1110_v5 = vadd.f32 %v1361_v30, %v1109_v50 }
 0x1cc   : > { %1189 = vst.msk [vmem:[%s2305_s18 + $0x8] sm:$0xff] %vm859_vm5, %v1115_v53  ;;  %1196 = vst.msk [vmem:[%s2305_s18 + $0x40] sm:$0xff] %vm859_vm5, %v1150_v29 }
 0x1cd   : > { %1188 = vst.msk [vmem:[%s2305_s18] sm:$0xff] %vm859_vm5, %v1110_v5 }
 0x1d2   : > { %v1290_v28 = vld [vmem:[%s2305_s18 + $0x48] sm:$0xff] (%p1590_p4) }
 0x1d3   : > { %v1274_v20 = vld [vmem:[%s2305_s18 + $0x8] sm:$0xff] (%p1590_p4)  ;;  %v1288_v0 = vld [vmem:[%s2305_s18 + $0x40] sm:$0xff] (%p1590_p4)  ;;  %1291 = vst [vmem:[%s2346_s23 + $0x108] sm:$0xff] (%p1590_p4), %v1290_v28 }
 0x1d4   : > { %v1272_v12 = vld [vmem:[%s2305_s18] sm:$0xff] (%p1590_p4)  ;;  %1275 = vst [vmem:[%s2346_s23 + $0x8] sm:$0xff] (%p1590_p4), %v1274_v20  ;;  %1289 = vst [vmem:[%s2346_s23 + $0x100] sm:$0xff] (%p1590_p4), %v1288_v0 }
 0x1d5   : > { %1273 = vst [vmem:[%s2346_s23] sm:$0xff] (%p1590_p4), %v1272_v12 }
 0x208   : > { %v1424_v42 = vpop.f32.mrb[2].mxu0  ;;  %v1436_v55 = vpop.f32.mrb[2].mxu1 }
 0x209   : > { %v1125_v56 = vadd.f32 %v1424_v42, %v1361_v30  ;;  %v1165_v35 = vadd.f32 %v1436_v55, %v1361_v30  ;;  %v1119_v62 = vpop.f32.mrb[3].mxu0  ;;  %v1159_v10 = vpop.f32.mrb[3].mxu1 }
 0x20a   : > { %v1120_v63 = vadd.f32 %v1361_v30, %v1119_v62  ;;  %v1160_v3 = vadd.f32 %v1361_v30, %v1159_v10 }
 0x20b   : > { %1191 = vst.msk [vmem:[%s2305_s18 + $0x18] sm:$0xff] %vm859_vm5, %v1125_v56  ;;  %1199 = vst.msk [vmem:[%s2305_s18 + $0x58] sm:$0xff] %vm859_vm5, %v1165_v35 }
 0x20c   : > { %1190 = vst.msk [vmem:[%s2305_s18 + $0x10] sm:$0xff] %vm859_vm5, %v1120_v63  ;;  %1198 = vst.msk [vmem:[%s2305_s18 + $0x50] sm:$0xff] %vm859_vm5, %v1160_v3 }
 0x212   : > { %v1278_v21 = vld [vmem:[%s2305_s18 + $0x18] sm:$0xff] (%p1590_p4) }
 0x213   : > { %v1276_v15 = vld [vmem:[%s2305_s18 + $0x10] sm:$0xff] (%p1590_p4)  ;;  %1279 = vst [vmem:[%s2346_s23 + $0x18] sm:$0xff] (%p1590_p4), %v1278_v21  ;;  %v1294_v14 = vld [vmem:[%s2305_s18 + $0x58] sm:$0xff] (%p1590_p4) }
 0x214   : > { %1277 = vst [vmem:[%s2346_s23 + $0x10] sm:$0xff] (%p1590_p4), %v1276_v15  ;;  %v1292_v47 = vld [vmem:[%s2305_s18 + $0x50] sm:$0xff] (%p1590_p4)  ;;  %1295 = vst [vmem:[%s2346_s23 + $0x118] sm:$0xff] (%p1590_p4), %v1294_v14 }
 0x215   : > { %1293 = vst [vmem:[%s2346_s23 + $0x110] sm:$0xff] (%p1590_p4), %v1292_v47 }
 0x244   : > { %v1439_v54 = vpop.f32.mrb[4].mxu1 }
 0x245   : > { %v1427_v44 = vpop.f32.mrb[4].mxu0  ;;  %v1175_v51 = vadd.f32 %v1439_v54, %v1361_v30  ;;  %v1169_v40 = vpop.f32.mrb[5].mxu1 }
 0x246   : > { %v1135_v36 = vadd.f32 %v1427_v44, %v1361_v30  ;;  %v1129_v45 = vpop.f32.mrb[5].mxu0  ;;  %v1170_v7 = vadd.f32 %v1361_v30, %v1169_v40 }
 0x247   : > { %1201 = vst.msk [vmem:[%s2305_s18 + $0x68] sm:$0xff] %vm859_vm5, %v1175_v51  ;;  %v1130_v8 = vadd.f32 %v1361_v30, %v1129_v45 }
 0x248   : > { %1193 = vst.msk [vmem:[%s2305_s18 + $0x28] sm:$0xff] %vm859_vm5, %v1135_v36  ;;  %1200 = vst.msk [vmem:[%s2305_s18 + $0x60] sm:$0xff] %vm859_vm5, %v1170_v7 }
 0x249   : > { %1192 = vst.msk [vmem:[%s2305_s18 + $0x20] sm:$0xff] %vm859_vm5, %v1130_v8 }
 0x24e   : > { %v1298_v19 = vld [vmem:[%s2305_s18 + $0x68] sm:$0xff] (%p1590_p4) }
 0x24f   : > { %v1282_v6 = vld [vmem:[%s2305_s18 + $0x28] sm:$0xff] (%p1590_p4)  ;;  %v1296_v2 = vld [vmem:[%s2305_s18 + $0x60] sm:$0xff] (%p1590_p4)  ;;  %1299 = vst [vmem:[%s2346_s23 + $0x128] sm:$0xff] (%p1590_p4), %v1298_v19 }
 0x250   : > { %v1280_v25 = vld [vmem:[%s2305_s18 + $0x20] sm:$0xff] (%p1590_p4)  ;;  %1283 = vst [vmem:[%s2346_s23 + $0x28] sm:$0xff] (%p1590_p4), %v1282_v6  ;;  %1297 = vst [vmem:[%s2346_s23 + $0x120] sm:$0xff] (%p1590_p4), %v1296_v2 }
 0x251   : > { %1281 = vst [vmem:[%s2346_s23 + $0x20] sm:$0xff] (%p1590_p4), %v1280_v25 }
 0x25f   : > { %1210 = sbr.rel (!%p1590_p4) target bundleno = 622 (0x26e), region = 36 }
 0x260   : > { %v1442_v52 = vpop.f32.mrb[6].mxu1 }
 0x261   : > { %v1430_v4 = vpop.f32.mrb[6].mxu0  ;;  %v1185_v41 = vadd.f32 %v1442_v52, %v1361_v30  ;;  %v1179_v23 = vpop.f32.mrb[7].mxu1 }
 0x262   : > { %v1145_v24 = vadd.f32 %v1430_v4, %v1361_v30  ;;  %v1139_v18 = vpop.f32.mrb[7].mxu0  ;;  %v1180_v61 = vadd.f32 %v1361_v30, %v1179_v23 }
 0x263   : > { %1203 = vst.msk [vmem:[%s2305_s18 + $0x78] sm:$0xff] %vm859_vm5, %v1185_v41  ;;  %v1140_v9 = vadd.f32 %v1361_v30, %v1139_v18 }
 0x264   : > { %1195 = vst.msk [vmem:[%s2305_s18 + $0x38] sm:$0xff] %vm859_vm5, %v1145_v24  ;;  %1202 = vst.msk [vmem:[%s2305_s18 + $0x70] sm:$0xff] %vm859_vm5, %v1180_v61 }
 0x265   : > { %1194 = vst.msk [vmem:[%s2305_s18 + $0x30] sm:$0xff] %vm859_vm5, %v1140_v9 }
 0x26a   : > { %v1302_v37 = vld [vmem:[%s2305_s18 + $0x78] sm:$0xff] }
 0x26b   : > { %v1286_v27 = vld [vmem:[%s2305_s18 + $0x38] sm:$0xff]  ;;  %v1300_v17 = vld [vmem:[%s2305_s18 + $0x70] sm:$0xff]  ;;  %1303 = vst [vmem:[%s2346_s23 + $0x138] sm:$0xff] %v1302_v37 }
 0x26c   : > { %v1284_v26 = vld [vmem:[%s2305_s18 + $0x30] sm:$0xff]  ;;  %1287 = vst [vmem:[%s2346_s23 + $0x38] sm:$0xff] %v1286_v27  ;;  %1301 = vst [vmem:[%s2346_s23 + $0x130] sm:$0xff] %v1300_v17 }
 0x26d   : > { %1285 = vst [vmem:[%s2346_s23 + $0x30] sm:$0xff] %v1284_v26 }
 0x26e PF: > { %p10_p11 = scmp.ge.s32.totalorder %s1580_s16, 6   ;;  %s2410_s12 = smov %s1531_s13 }
 0x26f   : > { %s2411_s13 = smov %s1588_s19  ;;  %s2412_s14 = smov %s1580_s16 }
 0x270   :  { %12 = sbr.rel (!%p10_p11) target bundleno = 2 (0x2), region = 100 }

// kernel: inception_forward.6
= control target key start
LH: loop header
LB: loop body
LE: loop exit
PB: predicated region body
PF: predicated region fallthrough
CT: control target
= control target key end

     0   :  { %s3169_s12 = smov 0   ;;  %s3171_s13 = smov 0   ;;  %s6520_s0 = inlined_call_operand.vmem [shape: f32[2,16,16,4], index: 0, kind: input, shape index: {}]   ;;  %s6521_s1 = inlined_call_operand.vmem [shape: f32[100,8], index: 1, kind: input, shape index: {}]   ;;  %s6522_s2 = inlined_call_operand.vmem [shape: f32[1,8], index: 2, kind: input, shape index: {}]   ;;  %s6523_s3 = inlined_call_operand.vmem [shape: f32[2,16,16,8], index: 3, kind: output, shape index: {}]  }
   0x1   :  { %s3173_s14 = smov 0  }
   0x2 LB: > { %s3182_s15 = sadd.s32 4294967295, %s3131_s14   ;;  %s3184_s16 = sadd.s32 1, %s3131_s14   ;;  %s3131_s14 = sphi %s3173_s14, %s7361_s14   ;;  %s3127_s13 = sphi %s3171_s13, %s7360_s13   ;;  %s3123_s12 = sphi %s3169_s12, %s7359_s12  }
   0x3   : > { %s80_s17 = ssub.s32 %s3131_s14, %s3184_s16  ;;  %s83_s18 = sadd.s32 1, %s3127_s13 }
   0x4   : > { %p81_p0 = scmp.eq.s32.totalorder %s80_s17, 0  ;;  %p93_p1 = scmp.ne.s32.totalorder %s3127_s13, %s3123_s12 }
   0x5   : > { %p94_p2 = scmp.eq.s32.totalorder %s3182_s15, 3  ;;  %p2894_p3 = scmp.ge.s32.totalorder %s3131_s14, 1 }
   0x6   : > { %s3192_s19 = scalar_select %p81_p0, %s3127_s13, %s83_s18  }
   0x7   : > { %p3194_p4 = por %p94_p2, %p93_p1  ;;  %p127_p5 = scmp.lt.s32.totalorder %s3131_s14, 5 }
   0x9   : > { %p128_p6 = pnand %p2894_p3, %p127_p5 }
   0xb   : > { %131 = sbr.rel (%p128_p6) target bundleno = 1291 (0x50b), region = 32 }
  0x12   : > { %s2925_s21 = sshll.u32 %s3182_s15, 6  ;;  %s2896_s25 = sshll.u32 %s3182_s15, 2  ;;  %vm247_vm0 = vcmask 1041408   ;;  %vm390_vm1 = vcmask 1046528   ;;  %vm479_vm3 = vcmask 1045504   ;;  %vm568_vm4 = vcmask 1044480  }
  0x13   : > { %s3204_s24 = scalar_lea.vmem %s6520_s0, %s2925_s21  ;;  %s2898_s26 = sadd.s32 4294967294, %s2896_s25  ;;  %vm657_vm5 = vcmask 1043456   ;;  %vm1364_vm6 = vcmask 31744   ;;  %vm1381_vm7 = vcmask 64512   ;;  %vm1398_vm8 = vcmask 97280  }
  0x14   : > { %v149_v0 = vld [vmem:[%s3204_s24] sm:$0xff]  ;;  %v150_v1 = vld [vmem:[%s3204_s24 + $0x8] sm:$0xff]  ;;  %v151_v2 = vld [vmem:[%s3204_s24 + $0x10] sm:$0xff]  ;;  %p166_p7 = scmp.gt.s32.totalorder %s2898_s26, 0  ;;  %v178_v7 = vstv %s2898_s26  ;;  %p3085_p8 = scmp.ge.s32.totalorder %s2898_s26, 0  ;;  %vm1415_vm9 = vcmask 130048  }
  0x15   : > { %v254_v3 = vrot.slane %v149_v0, 6  ;;  %v255_v4 = vrot.slane %v150_v1, 6  ;;  %v152_v5 = vld [vmem:[%s3204_s24 + $0x18] sm:$0xff]  ;;  %v257_v6 = vrot.slane %v151_v2, 6  ;;  %v179_v9 = vadd.s32 1, %v178_v7  ;;  %v3249_v24 = vld [vmem:[%s3204_s24 + $0x100] sm:$0xff] }
  0x16   : > { %v258_v8 = vrot.slane %v152_v5, 6  ;;  %s7363_s26 = smov (!%p166_p7, %s2898_s26), 0  ;;  %s3133_s5 = smov 4   ;;  %v278_v41 = vrot.slane %v3249_v24, 6  ;;  %v158_v51 = vld [vmem:[%s3204_s24 + $0x108] sm:$0xff]  ;;  %vm1432_vm10 = vcmask 162816  }
  0x17   : > { %v3214_v10 = vsel %vm247_vm0, %v254_v3, %v255_v4  ;;  %v3217_v11 = vsel %vm247_vm0, %v255_v4, 0.0  ;;  %v3220_v12 = vsel %vm247_vm0, 0.0, %v254_v3  ;;  %v3223_v13 = vsel %vm247_vm0, 0.0, %v257_v6  ;;  %s3231_s27 = scalar_select %p3085_p8, 255, 0  ;;  %v159_v4 = vld [vmem:[%s3204_s24 + $0x110] sm:$0xff] }
  0x18   : > { %6650 = vst [vmem:[#allocation3_spill] sm:$0xff] %v3220_v12  ;;  %v402_v14 = vrot.slane %v3214_v10, 1  ;;  %v404_v15 = vrot.slane %v3217_v11, 1  ;;  %v401_v16 = vrot.slane %v3220_v12, 1  ;;  %v3229_v17 = vsel %vm247_vm0, %v257_v6, %v258_v8  ;;  %s2899_s28 = sshll.u32 %s7363_s26, 4  ;;  %s3134_s6 = smov 8  }
  0x19   : > { %v3234_v18 = vsel %vm247_vm0, %v258_v8, 0.0  ;;  %v407_v19 = vrot.slane %v3229_v17, 1  ;;  %v406_v20 = vrot.slane %v3223_v13, 1  ;;  %vm181_vm2 = vcmp.ge.s32.totalorder %v179_v9, 0  ;;  %s169_s4 = scalar_lea.vmem %s6520_s0, %s2899_s28  ;;  %s3135_s7 = smov 12  }
  0x1a   : > { %6651 = vst [vmem:[#allocation4_spill] sm:$0xff] %v3234_v18  ;;  %v3239_v21 = vsel %vm390_vm1, %v402_v14, %v404_v15  ;;  %v3242_v22 = vsel %vm390_vm1, %v401_v16, %v402_v14  ;;  %v6528_v23 = vrot.slane %v3234_v18, 1  ;;  %v172_v25 = vld [vmem:[%s169_s4 + $0x10] sm:$0xff]  ;;  %v173_v26 = vld [vmem:[%s169_s4 + $0x18] sm:$0xff]  ;;  %v3087_v31 = vld [vmem:[%s169_s4] sm:%s3231_s27]  ;;  %v279_v63 = vrot.slane %v158_v51, 6 }
  0x1b   : > { %441 = vrot.lane.b32.xlu1 %v3239_v21, %s3133_s5  ;;  %439 = vrot.lane.b32.xlu0 %v3242_v22, %s3133_s5  ;;  %v3261_v28 = vsel %vm390_vm1, %v406_v20, %v407_v19  ;;  %v184_v29 = vsel %vm181_vm2, %v172_v25, 0.0  ;;  %v185_v30 = vsel %vm181_vm2, %v173_v26, 0.0  ;;  %v176_v32 = vld [vmem:[%s169_s4 + $0x110] sm:$0xff]  ;;  %v248_v36 = vrot.slane %v3087_v31, 6  ;;  %v177_v39 = vld [vmem:[%s169_s4 + $0x118] sm:$0xff]  ;;  %s3136_s8 = smov 16  }
  0x1c   : > { %v3258_v27 = vsel %vm390_vm1, %v407_v19, %v6528_v23  ;;  %v251_v33 = vrot.slane %v184_v29, 6  ;;  %v252_v34 = vrot.slane %v185_v30, 6  ;;  %v3090_v35 = vld [vmem:[%s169_s4 + $0x8] sm:%s3231_s27]  ;;  %v3093_v38 = vld [vmem:[%s169_s4 + $0x100] sm:%s3231_s27]  ;;  %v188_v40 = vsel %vm181_vm2, %v176_v32, 0.0  ;;  %s3137_s9 = smov 20  }
  0x1d   : > { %v249_v37 = vrot.slane %v3090_v35, 6  ;;  %v3281_v44 = vsel %vm247_vm0, 0.0, %v248_v36  ;;  %v3096_v46 = vld [vmem:[%s169_s4 + $0x108] sm:%s3231_s27]  ;;  %v272_v55 = vrot.slane %v3093_v38, 6  ;;  %v189_v59 = vsel %vm181_vm2, %v177_v39, 0.0  ;;  %v160_v14 = vld [vmem:[%s3204_s24 + $0x118] sm:$0xff] }
  0x1e   : > { %v3275_v42 = vsel %vm247_vm0, %v251_v33, %v252_v34  ;;  %v3278_v43 = vsel %vm247_vm0, 0.0, %v251_v33  ;;  %6654 = vst [vmem:[#allocation7_spill] sm:$0xff] %v3281_v44  ;;  %v3284_v45 = vsel %vm247_vm0, %v252_v34, 0.0  ;;  %v391_v50 = vrot.slane %v3281_v44, 1  ;;  %s3138_s10 = smov 24   ;;  %s3139_s11 = smov 28  }
  0x1f   : > { %445 = vrot.lane.b32.xlu1 %v3258_v27, %s3133_s5  ;;  %443 = vrot.lane.b32.xlu0 %v3261_v28, %s3133_s5  ;;  %6652 = vst [vmem:[#allocation5_spill] sm:$0xff] %v3275_v42  ;;  %6653 = vst [vmem:[#allocation6_spill] sm:$0xff] %v3278_v43  ;;  %v396_v47 = vrot.slane %v3278_v43, 1  ;;  %v397_v48 = vrot.slane %v3275_v42, 1  ;;  %v3290_v49 = vsel %vm247_vm0, %v248_v36, %v249_v37  ;;  %v399_v53 = vrot.slane %v3284_v45, 1  ;;  %s3140_s14 = smov 32  }
  0x20   : > { %6655 = vst [vmem:[#allocation8_spill] sm:$0xff] %v3290_v49  ;;  %v392_v52 = vrot.slane %v3290_v49, 1  ;;  %v3297_v54 = vsel %vm247_vm0, %v249_v37, 0.0  ;;  %v273_v58 = vrot.slane %v3096_v46, 6  ;;  %v3308_v61 = vsel %vm247_vm0, 0.0, %v272_v55  ;;  %s3141_s17 = smov 36  }
  0x21   : > { %v3300_v56 = vsel %vm390_vm1, %v396_v47, %v397_v48  ;;  %v394_v57 = vrot.slane %v3297_v54, 1  ;;  %6656 = vst [vmem:[#allocation9_spill] sm:$0xff] %v3308_v61  ;;  %v275_v62 = vrot.slane %v188_v40, 6  ;;  %v3312_v0 = vsel %vm390_vm1, %v397_v48, %v399_v53  ;;  %s3142_s18 = smov 40   ;;  %s3143_s22 = smov 44  }
  0x22   : > { %v393_v60 = vsel %vm390_vm1, %v391_v50, %v392_v52  ;;  %v3316_v2 = vsel %vm247_vm0, %v272_v55, %v273_v58  ;;  %v3319_v3 = vsel %vm247_vm0, %v273_v58, 0.0  ;;  %v411_v7 = vrot.slane %v3308_v61, 1  ;;  %s4254_s23 = sadd.s32 4, %s2896_s25  ;;  %s3145_s25 = smov 52  }
  0x23   : > { %435 = vrot.lane.b32.xlu1 %v3300_v56, %s3133_s5  ;;  %431 = vrot.lane.b32.xlu0 %v393_v60, %s3133_s5  ;;  %v395_v1 = vsel %vm390_vm1, %v392_v52, %v394_v57  ;;  %6657 = vst [vmem:[#allocation10_spill] sm:$0xff] %v3316_v2  ;;  %v412_v5 = vrot.slane %v3316_v2, 1  ;;  %v414_v6 = vrot.slane %v3319_v3, 1  ;;  %v276_v8 = vrot.slane %v189_v59, 6  ;;  %s3146_s26 = smov 56   ;;  %p191_p9 = scmp.lt.s32.totalorder %s4254_s23, 14 }
  0x24   : > { %v3326_v9 = vsel %vm247_vm0, 0.0, %v275_v62  ;;  %v281_v19 = vrot.slane %v159_v4, 6  ;;  %v3342_v26 = vsel %vm247_vm0, %v278_v41, %v279_v63  ;;  %v3347_v31 = vsel %vm247_vm0, %v279_v63, 0.0  ;;  %p3097_p10 = scmp.lt.s32.totalorder %s4254_s23, 16 }
  0x25   : > { %6658 = vst [vmem:[#allocation11_spill] sm:$0xff] %v3326_v9  ;;  %v3332_v15 = vsel %vm247_vm0, %v275_v62, %v276_v8  ;;  %v3335_v16 = vsel %vm247_vm0, %v276_v8, 0.0  ;;  %v415_v20 = vsel %vm390_vm1, %v412_v5, %v414_v6  ;;  %v413_v29 = vsel %vm390_vm1, %v411_v7, %v412_v5  ;;  %s192_s27 = scalar_select %p191_p9, %s4254_s23, 14 }
  0x26   : > { %6659 = vst [vmem:[#allocation12_spill] sm:$0xff] %v3332_v15  ;;  %v417_v24 = vrot.slane %v3332_v15, 1  ;;  %v419_v25 = vrot.slane %v3335_v16, 1  ;;  %v416_v30 = vrot.slane %v3326_v9, 1  ;;  %v282_v32 = vrot.slane %v160_v14, 6 }
  0x27   : > { %437 = vrot.lane.b32.xlu1 %v3312_v0, %s3133_s5  ;;  %433 = vrot.lane.b32.xlu0 %v395_v1, %s3133_s5  ;;  %v3350_v33 = vsel %vm247_vm0, 0.0, %v278_v41  ;;  %v422_v35 = vrot.slane %v3342_v26, 1  ;;  %v424_v36 = vrot.slane %v3347_v31, 1  ;;  %v3370_v41 = vsel %vm247_vm0, 0.0, %v281_v19  ;;  %s2900_s28 = sshll.u32 %s192_s27, 4 }
  0x28   : > { %6660 = vst [vmem:[#allocation13_spill] sm:$0xff] %v3350_v33  ;;  %v3355_v34 = vsel %vm390_vm1, %v417_v24, %v419_v25  ;;  %v3360_v37 = vsel %vm390_vm1, %v416_v30, %v417_v24  ;;  %v421_v38 = vrot.slane %v3350_v33, 1  ;;  %v3364_v39 = vsel %vm247_vm0, %v281_v19, %v282_v32  ;;  %s4685_s29 = scalar_select %p3097_p10, 255, 0 }
  0x29   : > { %v3367_v40 = vsel %vm247_vm0, %v282_v32, 0.0  ;;  %v3377_v46 = vsel %vm390_vm1, %v422_v35, %v424_v36  ;;  %v427_v47 = vrot.slane %v3364_v39, 1  ;;  %v426_v51 = vrot.slane %v3370_v41, 1 }
  0x2a   : > { %6661 = vst [vmem:[#allocation14_spill] sm:$0xff] %v3367_v40  ;;  %v6527_v48 = vrot.slane %v3367_v40, 1  ;;  %v3382_v50 = vsel %vm390_vm1, %v421_v38, %v422_v35  ;;  %v481_v53 = vrot.slane %v3290_v49, 2  ;;  %v483_v55 = vrot.slane %v3297_v54, 2 }
  0x2b   : > { %449 = vrot.lane.b32.xlu1 %v415_v20, %s3133_s5  ;;  %447 = vrot.lane.b32.xlu0 %v413_v29, %s3133_s5  ;;  %v3397_v57 = vsel %vm390_vm1, %v426_v51, %v427_v47  ;;  %v480_v58 = vrot.slane %v3281_v44, 2  ;;  %v486_v60 = vrot.slane %v3275_v42, 2  ;;  %v488_v62 = vrot.slane %v3284_v45, 2 }
  0x2c   : > { %v3392_v52 = vsel %vm390_vm1, %v427_v47, %v6527_v48  ;;  %v484_v59 = vsel %vm479_vm3, %v481_v53, %v483_v55  ;;  %v485_v1 = vrot.slane %v3278_v43, 2  ;;  %v491_v5 = vrot.slane %v3214_v10, 2 }
  0x2d   : > { %v482_v63 = vsel %vm479_vm3, %v480_v58, %v481_v53  ;;  %v3412_v4 = vsel %vm479_vm3, %v486_v60, %v488_v62  ;;  %v493_v6 = vrot.slane %v3217_v11, 2  ;;  %v490_v8 = vrot.slane %v3220_v12, 2 }
  0x2e   : > { %v3417_v7 = vsel %vm479_vm3, %v485_v1, %v486_v60  ;;  %v496_v19 = vrot.slane %v3229_v17, 2  ;;  %v6524_v20 = vrot.slane %v3234_v18, 2  ;;  %v495_v25 = vrot.slane %v3223_v13, 2 }
  0x2f   : > { %453 = vrot.lane.b32.xlu1 %v3355_v34, %s3133_s5  ;;  %451 = vrot.lane.b32.xlu0 %v3360_v37, %s3133_s5  ;;  %v3425_v14 = vsel %vm479_vm3, %v491_v5, %v493_v6  ;;  %v3430_v24 = vsel %vm479_vm3, %v490_v8, %v491_v5  ;;  %v501_v30 = vrot.slane %v3316_v2, 2  ;;  %v503_v32 = vrot.slane %v3319_v3, 2 }
  0x30   : > { %v3440_v29 = vsel %vm479_vm3, %v496_v19, %v6524_v20  ;;  %v3445_v35 = vsel %vm479_vm3, %v495_v25, %v496_v19  ;;  %v500_v36 = vrot.slane %v3308_v61, 2  ;;  %v506_v47 = vrot.slane %v3332_v15, 2 }
  0x31   : > { %v504_v38 = vsel %vm479_vm3, %v501_v30, %v503_v32  ;;  %v508_v51 = vrot.slane %v3335_v16, 2  ;;  %v505_v55 = vrot.slane %v3326_v9, 2  ;;  %v513_v60 = vrot.slane %v3347_v31, 2 }
  0x32   : > { %v502_v53 = vsel %vm479_vm3, %v500_v36, %v501_v30  ;;  %v516_v5 = vrot.slane %v3364_v39, 2  ;;  %v6526_v6 = vrot.slane %v3367_v40, 2  ;;  %v515_v19 = vrot.slane %v3370_v41, 2 }
  0x33   : > { %457 = vrot.lane.b32.xlu1 %v3377_v46, %s3133_s5  ;;  %455 = vrot.lane.b32.xlu0 %v3382_v50, %s3133_s5  ;;  %v3460_v58 = vsel %vm479_vm3, %v506_v47, %v508_v51  ;;  %v3465_v62 = vsel %vm479_vm3, %v505_v55, %v506_v47  ;;  %v570_v30 = vrot.slane %v3290_v49, 3  ;;  %v572_v32 = vrot.slane %v3297_v54, 3 }
  0x34   : > { %v3488_v25 = vsel %vm479_vm3, %v516_v5, %v6526_v6  ;;  %v3493_v36 = vsel %vm479_vm3, %v515_v19, %v516_v5  ;;  %v575_v51 = vrot.slane %v3275_v42, 3  ;;  %v582_v5 = vrot.slane %v3217_v11, 3 }
  0x35   : > { %v573_v47 = vsel %vm568_vm4, %v570_v30, %v572_v32  ;;  %v579_v32 = vrot.slane %v3220_v12, 3  ;;  %v597_v6 = vrot.slane %v3335_v16, 3  ;;  %v594_v23 = vrot.slane %v3326_v9, 3 }
  0x36   : > { %vm1449_vm11 = vcmask 195584   ;;  %vm6648_vm12 = vcmask 228352   ;;  %vm6647_vm13 = vcmask 261120   ;;  %vm1500_vm14 = vcmask 293888  }
  0x37   : > { %461 = vrot.lane.b32.xlu1 %v3392_v52, %s3133_s5  ;;  %459 = vrot.lane.b32.xlu0 %v3397_v57, %s3133_s5  ;;  %vm6628_vm15 = vcmask 326656   ;;  %vm6626_vm2 = vcmask 359424  }
  0x3b   : > { %522 = vrot.lane.b32.xlu1 %v484_v59, %s3134_s6  ;;  %520 = vrot.lane.b32.xlu0 %v482_v63, %s3134_s6  ;;  %v511_v59 = vrot.slane %v3342_v26, 2  ;;  %v510_v63 = vrot.slane %v3350_v33, 2 }
  0x3d   : > { %v3473_v1 = vsel %vm479_vm3, %v511_v59, %v513_v60  ;;  %v3478_v8 = vsel %vm479_vm3, %v510_v63, %v511_v59  ;;  %v574_v59 = vrot.slane %v3278_v43, 3  ;;  %v580_v63 = vrot.slane %v3214_v10, 3 }
  0x3f   : > { %526 = vrot.lane.b32.xlu1 %v3412_v4, %s3134_s6  ;;  %524 = vrot.lane.b32.xlu0 %v3417_v7, %s3134_s6  ;;  %v3513_v19 = vsel %vm568_vm4, %v574_v59, %v575_v51  ;;  %v590_v59 = vrot.slane %v3316_v2, 3 }
  0x43   : > { %530 = vrot.lane.b32.xlu1 %v3425_v14, %s3134_s6  ;;  %528 = vrot.lane.b32.xlu0 %v3430_v24, %s3134_s6 }
  0x47   : > { %534 = vrot.lane.b32.xlu1 %v3440_v29, %s3134_s6  ;;  %532 = vrot.lane.b32.xlu0 %v3445_v35, %s3134_s6 }
  0x4b   : > { %538 = vrot.lane.b32.xlu1 %v504_v38, %s3134_s6  ;;  %536 = vrot.lane.b32.xlu0 %v502_v53, %s3134_s6  ;;  %v569_v38 = vrot.slane %v3281_v44, 3  ;;  %v577_v53 = vrot.slane %v3284_v45, 3 }
  0x4d   : > { %v571_v55 = vsel %vm568_vm4, %v569_v38, %v570_v30  ;;  %v3508_v60 = vsel %vm568_vm4, %v575_v51, %v577_v53  ;;  %v3521_v30 = vsel %vm568_vm4, %v580_v63, %v582_v5  ;;  %v585_v38 = vrot.slane %v3229_v17, 3 }
  0x4e   : > { %v3526_v53 = vsel %vm568_vm4, %v579_v32, %v580_v63  ;;  %v584_v51 = vrot.slane %v3223_v13, 3  ;;  %v592_v5 = vrot.slane %v3319_v3, 3  ;;  %v589_v32 = vrot.slane %v3308_v61, 3 }
  0x4f   : > { %542 = vrot.lane.b32.xlu1 %v3460_v58, %s3134_s6  ;;  %540 = vrot.lane.b32.xlu0 %v3465_v62, %s3134_s6  ;;  %6662 = vst [vmem:[#allocation15_spill] sm:$0xff] %v3526_v53 }
  0x50   : > { %v3541_v63 = vsel %vm568_vm4, %v584_v51, %v585_v38  ;;  %v593_v20 = vsel %vm568_vm4, %v590_v59, %v592_v5  ;;  %v591_v48 = vsel %vm568_vm4, %v589_v32, %v590_v59  ;;  %v600_v51 = vrot.slane %v3342_v26, 3 }
  0x51   : > { %6664 = vst [vmem:[#allocation17_spill] sm:$0xff] %v3541_v63  ;;  %v661_v32 = vrot.slane %v3297_v54, 4 }
  0x53   : > { %546 = vrot.lane.b32.xlu1 %v3473_v1, %s3134_s6  ;;  %544 = vrot.lane.b32.xlu0 %v3478_v8, %s3134_s6 }
  0x57   : > { %550 = vrot.lane.b32.xlu1 %v3488_v25, %s3134_s6  ;;  %548 = vrot.lane.b32.xlu0 %v3493_v36, %s3134_s6 }
  0x5b   : > { %611 = vrot.lane.b32.xlu1 %v573_v47, %s3135_s7  ;;  %609 = vrot.lane.b32.xlu0 %v571_v55, %s3135_s7  ;;  %v6525_v47 = vrot.slane %v3234_v18, 3 }
  0x5d   : > { %v3536_v55 = vsel %vm568_vm4, %v585_v38, %v6525_v47  ;;  %v595_v47 = vrot.slane %v3332_v15, 3 }
  0x5e   : > { %6663 = vst [vmem:[#allocation16_spill] sm:$0xff] %v3536_v55 }
  0x5f   : > { %615 = vrot.lane.b32.xlu1 %v3508_v60, %s3135_s7  ;;  %613 = vrot.lane.b32.xlu0 %v3513_v19, %s3135_s7  ;;  %v3556_v38 = vsel %vm568_vm4, %v595_v47, %v597_v6  ;;  %v3561_v5 = vsel %vm568_vm4, %v594_v23, %v595_v47  ;;  %v6535_v6 = vrot.slane %v3367_v40, 3  ;;  %v604_v23 = vrot.slane %v3370_v41, 3 }
  0x63   : > { %619 = vrot.lane.b32.xlu1 %v3521_v30, %s3135_s7  ;;  %617 = vrot.lane.b32.xlu0 %v3526_v53, %s3135_s7 }
  0x67   : > { %623 = vrot.lane.b32.xlu1 %v3536_v55, %s3135_s7  ;;  %621 = vrot.lane.b32.xlu0 %v3541_v63, %s3135_s7  ;;  %v602_v63 = vrot.slane %v3347_v31, 3  ;;  %v599_v55 = vrot.slane %v3350_v33, 3 }
  0x69   : > { %v3574_v59 = vsel %vm568_vm4, %v599_v55, %v600_v51 }
  0x6a   : > { %6665 = vst [vmem:[#allocation18_spill] sm:$0xff] %v3574_v59 }
  0x6b   : > { %627 = vrot.lane.b32.xlu1 %v593_v20, %s3135_s7  ;;  %625 = vrot.lane.b32.xlu0 %v591_v48, %s3135_s7  ;;  %v3569_v48 = vsel %vm568_vm4, %v600_v51, %v602_v63  ;;  %v605_v20 = vrot.slane %v3364_v39, 3  ;;  %v659_v63 = vrot.slane %v3290_v49, 4  ;;  %v658_v51 = vrot.slane %v3281_v44, 4 }
  0x6c   : > { %v666_v49 = vrot.slane %v3284_v45, 4  ;;  %v669_v44 = vrot.slane %v3214_v10, 4  ;;  %v668_v45 = vrot.slane %v3220_v12, 4 }
  0x6d   : > { %v3584_v47 = vsel %vm568_vm4, %v605_v20, %v6535_v6  ;;  %v3589_v55 = vsel %vm568_vm4, %v604_v23, %v605_v20  ;;  %v664_v6 = vrot.slane %v3275_v42, 4  ;;  %v660_v54 = vsel %vm657_vm5, %v658_v51, %v659_v63 }
  0x6e   : > { %6666 = vst [vmem:[#allocation19_spill] sm:$0xff] %v3589_v55  ;;  %v663_v20 = vrot.slane %v3278_v43, 4 }
  0x6f   : > { %631 = vrot.lane.b32.xlu1 %v3556_v38, %s3135_s7  ;;  %629 = vrot.lane.b32.xlu0 %v3561_v5, %s3135_s7  ;;  %v3604_v23 = vsel %vm657_vm5, %v664_v6, %v666_v49  ;;  %v674_v49 = vrot.slane %v3229_v17, 4 }
  0x73   : > { %635 = vrot.lane.b32.xlu1 %v3569_v48, %s3135_s7  ;;  %633 = vrot.lane.b32.xlu0 %v3574_v59, %s3135_s7  ;;  %v662_v59 = vsel %vm657_vm5, %v659_v63, %v661_v32  ;;  %v671_v32 = vrot.slane %v3217_v11, 4  ;;  %v676_v63 = vrot.slane %v3234_v18, 4  ;;  %v3622_v11 = vsel %vm657_vm5, %v668_v45, %v669_v44 }
  0x74   : > { %6667 = vst [vmem:[#allocation20_spill] sm:$0xff] %v3622_v11  ;;  %v686_v18 = vrot.slane %v3335_v16, 4 }
  0x75   : > { %v3630_v51 = vsel %vm657_vm5, %v674_v49, %v676_v63  ;;  %v684_v63 = vrot.slane %v3332_v15, 4 }
  0x77   : > { %639 = vrot.lane.b32.xlu1 %v3584_v47, %s3135_s7  ;;  %637 = vrot.lane.b32.xlu0 %v3589_v55, %s3135_s7  ;;  %v3609_v55 = vsel %vm657_vm5, %v663_v20, %v664_v6  ;;  %v673_v6 = vrot.slane %v3223_v13, 4  ;;  %v681_v20 = vrot.slane %v3319_v3, 4  ;;  %v683_v3 = vrot.slane %v3326_v9, 4 }
  0x79   : > { %v3659_v16 = vsel %vm657_vm5, %v683_v3, %v684_v63  ;;  %v693_v3 = vrot.slane %v3370_v41, 4 }
  0x7b   : > { %700 = vrot.lane.b32.xlu1 %v662_v59, %s3136_s8  ;;  %698 = vrot.lane.b32.xlu0 %v660_v54, %s3136_s8  ;;  %v3617_v59 = vsel %vm657_vm5, %v669_v44, %v671_v32  ;;  %v679_v54 = vrot.slane %v3316_v2, 4  ;;  %v3635_v32 = vsel %vm657_vm5, %v673_v6, %v674_v49  ;;  %v678_v44 = vrot.slane %v3308_v61, 4 }
  0x7c   : > { %6668 = vst [vmem:[#allocation21_spill] sm:$0xff] %v3635_v32  ;;  %v3650_v49 = vsel %vm657_vm5, %v684_v63, %v686_v18  ;;  %v689_v6 = vrot.slane %v3342_v26, 4  ;;  %v691_v61 = vrot.slane %v3347_v31, 4  ;;  %v696_v31 = vrot.slane %v3367_v40, 4 }
  0x7d   : > { %v682_v45 = vsel %vm657_vm5, %v679_v54, %v681_v20  ;;  %v680_v2 = vsel %vm657_vm5, %v678_v44, %v679_v54  ;;  %v688_v54 = vrot.slane %v3350_v33, 4 }
  0x7e   : > { %v3667_v18 = vsel %vm657_vm5, %v689_v6, %v691_v61 }
  0x7f   : > { %704 = vrot.lane.b32.xlu1 %v3604_v23, %s3136_s8  ;;  %702 = vrot.lane.b32.xlu0 %v3609_v55, %s3136_s8  ;;  %6671 = vst [vmem:[#allocation24_spill] sm:$0xff] %v3667_v18  ;;  %v3676_v63 = vsel %vm657_vm5, %v688_v54, %v689_v6 }
  0x80   : > { %6674 = vst [vmem:[#allocation27_spill] sm:$0xff] %v3676_v63 }
  0x83   : > { %708 = vrot.lane.b32.xlu1 %v3617_v59, %s3136_s8  ;;  %706 = vrot.lane.b32.xlu0 %v3622_v11, %s3136_s8 }
  0x87   : > { %712 = vrot.lane.b32.xlu1 %v3630_v51, %s3136_s8  ;;  %710 = vrot.lane.b32.xlu0 %v3635_v32, %s3136_s8 }
  0x8b   : > { %716 = vrot.lane.b32.xlu1 %v682_v45, %s3136_s8  ;;  %714 = vrot.lane.b32.xlu0 %v680_v2, %s3136_s8  ;;  %v694_v2 = vrot.slane %v3364_v39, 4 }
  0x8d   : > { %v3654_v20 = vpop.permute.xlu1 %441  ;;  %v3656_v32 = vpop.permute.xlu0 %439  ;;  %v3684_v61 = vsel %vm657_vm5, %v694_v2, %v696_v31  ;;  %v3689_v40 = vsel %vm657_vm5, %v693_v3, %v694_v2  ;;  %v153_v31 = vld [vmem:[%s3204_s24 + $0x20] sm:$0xff]  ;;  %v154_v3 = vld [vmem:[%s3204_s24 + $0x28] sm:$0xff] }
  0x8e   : > { %6669 = vst [vmem:[#allocation22_spill] sm:$0xff] %v3654_v20  ;;  %6670 = vst [vmem:[#allocation23_spill] sm:$0xff] %v3656_v32 }
  0x8f   : > { %720 = vrot.lane.b32.xlu1 %v3650_v49, %s3136_s8  ;;  %718 = vrot.lane.b32.xlu0 %v3659_v16, %s3136_s8  ;;  %6675 = vst [vmem:[#allocation28_spill] sm:$0xff] %v3684_v61  ;;  %6677 = vst [vmem:[#allocation30_spill] sm:$0xff] %v3689_v40 }
  0x91   : > { %v3671_v44 = vpop.permute.xlu1 %445  ;;  %v3673_v45 = vpop.permute.xlu0 %443 }
  0x92   : > { %6672 = vst [vmem:[#allocation25_spill] sm:$0xff] %v3671_v44  ;;  %6673 = vst [vmem:[#allocation26_spill] sm:$0xff] %v3673_v45 }
  0x93   : > { %724 = vrot.lane.b32.xlu1 %v3667_v18, %s3136_s8  ;;  %722 = vrot.lane.b32.xlu0 %v3676_v63, %s3136_s8 }
  0x95   : > { %v3686_v32 = vpop.permute.xlu1 %435  ;;  %v3691_v6 = vpop.permute.xlu0 %431 }
  0x96   : > { %6676 = vst [vmem:[#allocation29_spill] sm:$0xff] %v3686_v32  ;;  %6678 = vst [vmem:[#allocation31_spill] sm:$0xff] %v3691_v6 }
  0x97   : > { %728 = vrot.lane.b32.xlu1 %v3684_v61, %s3136_s8  ;;  %726 = vrot.lane.b32.xlu0 %v3689_v40, %s3136_s8 }
  0x99   : > { %v3697_v54 = vpop.permute.xlu1 %437  ;;  %v3699_v45 = vpop.permute.xlu0 %433 }
  0x9a   : > { %6679 = vst [vmem:[#allocation32_spill] sm:$0xff] %v3697_v54  ;;  %6680 = vst [vmem:[#allocation33_spill] sm:$0xff] %v3699_v45  ;;  %v260_v45 = vrot.slane %v153_v31, 6  ;;  %v261_v54 = vrot.slane %v154_v3, 6 }
  0x9b   : > { %750 = vrot.lane.b32.xlu1 %v3275_v42, %s3137_s9  ;;  %748 = vrot.lane.b32.xlu0 %v3278_v43, %s3137_s9  ;;  %v161_v43 = vld [vmem:[%s3204_s24 + $0x120] sm:$0xff] }
  0x9c   : > { %v3729_v31 = vsel %vm247_vm0, 0.0, %v260_v45 }
  0x9d   : > { %v3705_v2 = vpop.permute.xlu1 %449  ;;  %v3709_v6 = vpop.permute.xlu0 %447  ;;  %6687 = vst [vmem:[#allocation40_spill] sm:$0xff] %v3729_v31 }
  0x9e   : > { %6681 = vst [vmem:[#allocation34_spill] sm:$0xff] %v3705_v2  ;;  %6682 = vst [vmem:[#allocation35_spill] sm:$0xff] %v3709_v6  ;;  %v3724_v6 = vsel %vm247_vm0, %v260_v45, %v261_v54 }
  0x9f   : > { %754 = vrot.lane.b32.xlu1 %v3214_v10, %s3137_s9  ;;  %752 = vrot.lane.b32.xlu0 %v3220_v12, %s3137_s9  ;;  %6685 = vst [vmem:[#allocation38_spill] sm:$0xff] %v3724_v6 }
  0xa1   : > { %v3715_v32 = vpop.permute.xlu1 %453  ;;  %v3717_v42 = vpop.permute.xlu0 %451 }
  0xa2   : > { %6683 = vst [vmem:[#allocation36_spill] sm:$0xff] %v3715_v32  ;;  %6684 = vst [vmem:[#allocation37_spill] sm:$0xff] %v3717_v42 }
  0xa3   : > { %758 = vrot.lane.b32.xlu1 %v3229_v17, %s3137_s9  ;;  %756 = vrot.lane.b32.xlu0 %v3223_v13, %s3137_s9 }
  0xa5   : > { %v3726_v2 = vpop.permute.xlu1 %457  ;;  %v3731_v3 = vpop.permute.xlu0 %455 }
  0xa6   : > { %6686 = vst [vmem:[#allocation39_spill] sm:$0xff] %v3726_v2  ;;  %6688 = vst [vmem:[#allocation41_spill] sm:$0xff] %v3731_v3  ;;  %v162_v3 = vld [vmem:[%s3204_s24 + $0x128] sm:$0xff] }
  0xa7   : > { %762 = vrot.lane.b32.xlu1 %v3724_v6, %s3137_s9  ;;  %760 = vrot.lane.b32.xlu0 %v3729_v31, %s3137_s9 }
  0xa9   : > { %v3737_v42 = vpop.permute.xlu1 %461  ;;  %v3739_v32 = vpop.permute.xlu0 %459 }
  0xaa   : > { %6689 = vst [vmem:[#allocation42_spill] sm:$0xff] %v3737_v42  ;;  %6690 = vst [vmem:[#allocation43_spill] sm:$0xff] %v3739_v32  ;;  %v284_v42 = vrot.slane %v161_v43, 6  ;;  %v285_v32 = vrot.slane %v162_v3, 6 }
  0xab   : > { %766 = vrot.lane.b32.xlu1 %v3332_v15, %s3137_s9  ;;  %764 = vrot.lane.b32.xlu0 %v3326_v9, %s3137_s9 }
  0xac   : > { %v3769_v9 = vsel %vm247_vm0, 0.0, %v284_v42 }
  0xad   : > { %v3745_v45 = vpop.permute.xlu1 %522  ;;  %v3749_v2 = vpop.permute.xlu0 %520  ;;  %6697 = vst [vmem:[#allocation50_spill] sm:$0xff] %v3769_v9 }
  0xae   : > { %6691 = vst [vmem:[#allocation44_spill] sm:$0xff] %v3745_v45  ;;  %6692 = vst [vmem:[#allocation45_spill] sm:$0xff] %v3749_v2  ;;  %v3764_v2 = vsel %vm247_vm0, %v284_v42, %v285_v32 }
  0xaf   : > { %770 = vrot.lane.b32.xlu1 %v3342_v26, %s3137_s9  ;;  %768 = vrot.lane.b32.xlu0 %v3350_v33, %s3137_s9  ;;  %6695 = vst [vmem:[#allocation48_spill] sm:$0xff] %v3764_v2 }
  0xb1   : > { %v3755_v44 = vpop.permute.xlu1 %526  ;;  %v3757_v15 = vpop.permute.xlu0 %524 }
  0xb2   : > { %6693 = vst [vmem:[#allocation46_spill] sm:$0xff] %v3755_v44  ;;  %6694 = vst [vmem:[#allocation47_spill] sm:$0xff] %v3757_v15 }
  0xb3   : > { %774 = vrot.lane.b32.xlu1 %v3364_v39, %s3137_s9  ;;  %772 = vrot.lane.b32.xlu0 %v3370_v41, %s3137_s9 }
  0xb5   : > { %v3766_v45 = vpop.permute.xlu1 %530  ;;  %v3771_v43 = vpop.permute.xlu0 %528 }
  0xb6   : > { %6696 = vst [vmem:[#allocation49_spill] sm:$0xff] %v3766_v45  ;;  %6698 = vst [vmem:[#allocation51_spill] sm:$0xff] %v3771_v43  ;;  %v3788_v43 = vsel %vm247_vm0, %v261_v54, 0.0 }
  0xb7   : > { %778 = vrot.lane.b32.xlu1 %v3764_v2, %s3137_s9  ;;  %776 = vrot.lane.b32.xlu0 %v3769_v9, %s3137_s9  ;;  %6702 = vst [vmem:[#allocation55_spill] sm:$0xff] %v3788_v43 }
  0xb9   : > { %v3777_v3 = vpop.permute.xlu1 %534  ;;  %v3779_v15 = vpop.permute.xlu0 %532 }
  0xba   : > { %6699 = vst [vmem:[#allocation52_spill] sm:$0xff] %v3777_v3  ;;  %6700 = vst [vmem:[#allocation53_spill] sm:$0xff] %v3779_v15  ;;  %v799_v15 = vrot.slane %v3724_v6, 1 }
  0xbb   : > { %810 = vrot.lane.b32.xlu1 %v3312_v0, %s3138_s10  ;;  %808 = vrot.lane.b32.xlu0 %v3300_v56, %s3138_s10  ;;  %v3798_v0 = vrot.slane %v3788_v43, 1  ;;  %v798_v56 = vrot.slane %v3729_v31, 1 }
  0xbd   : > { %v3785_v42 = vpop.permute.xlu1 %538  ;;  %v3790_v44 = vpop.permute.xlu0 %536  ;;  %6704 = vst [vmem:[#allocation57_spill] sm:$0xff] %v3798_v0  ;;  %v3811_v54 = vsel %vm390_vm1, %v799_v15, %v3798_v0  ;;  %v3816_v45 = vsel %vm390_vm1, %v798_v56, %v799_v15  ;;  %v3835_v56 = vsel %vm247_vm0, %v285_v32, 0.0  ;;  %v804_v0 = vrot.slane %v3764_v2, 1 }
  0xbe   : > { %6701 = vst [vmem:[#allocation54_spill] sm:$0xff] %v3785_v42  ;;  %6703 = vst [vmem:[#allocation56_spill] sm:$0xff] %v3790_v44 }
  0xbf   : > { %814 = vrot.lane.b32.xlu1 %v3239_v21, %s3138_s10  ;;  %812 = vrot.lane.b32.xlu0 %v3242_v22, %s3138_s10  ;;  %6712 = vst [vmem:[#allocation65_spill] sm:$0xff] %v3835_v56 }
  0xc1   : > { %v3800_v3 = vpop.permute.xlu1 %542  ;;  %v3803_v42 = vpop.permute.xlu0 %540 }
  0xc2   : > { %6705 = vst [vmem:[#allocation58_spill] sm:$0xff] %v3800_v3  ;;  %6706 = vst [vmem:[#allocation59_spill] sm:$0xff] %v3803_v42 }
  0xc3   : > { %818 = vrot.lane.b32.xlu1 %v3258_v27, %s3138_s10  ;;  %816 = vrot.lane.b32.xlu0 %v3261_v28, %s3138_s10 }
  0xc5   : > { %v3813_v44 = vpop.permute.xlu1 %546  ;;  %v3818_v3 = vpop.permute.xlu0 %544 }
  0xc6   : > { %6707 = vst [vmem:[#allocation60_spill] sm:$0xff] %v3813_v44  ;;  %6708 = vst [vmem:[#allocation61_spill] sm:$0xff] %v3818_v3 }
  0xc7   : > { %822 = vrot.lane.b32.xlu1 %v3811_v54, %s3138_s10  ;;  %820 = vrot.lane.b32.xlu0 %v3816_v45, %s3138_s10 }
  0xc9   : > { %v3824_v42 = vpop.permute.xlu1 %550  ;;  %v3826_v20 = vpop.permute.xlu0 %548 }
  0xca   : > { %6709 = vst [vmem:[#allocation62_spill] sm:$0xff] %v3824_v42  ;;  %6710 = vst [vmem:[#allocation63_spill] sm:$0xff] %v3826_v20 }
  0xcb   : > { %826 = vrot.lane.b32.xlu1 %v3355_v34, %s3138_s10  ;;  %824 = vrot.lane.b32.xlu0 %v3360_v37, %s3138_s10  ;;  %v3845_v34 = vrot.slane %v3835_v56, 1  ;;  %v803_v37 = vrot.slane %v3769_v9, 1 }
  0xcd   : > { %v3832_v15 = vpop.permute.xlu1 %611  ;;  %v3837_v3 = vpop.permute.xlu0 %609  ;;  %6714 = vst [vmem:[#allocation67_spill] sm:$0xff] %v3845_v34  ;;  %v3858_v32 = vsel %vm390_vm1, %v804_v0, %v3845_v34  ;;  %v3863_v42 = vsel %vm390_vm1, %v803_v37, %v804_v0  ;;  %v3889_v34 = vrot.slane %v3788_v43, 2 }
  0xce   : > { %6711 = vst [vmem:[#allocation64_spill] sm:$0xff] %v3832_v15  ;;  %6713 = vst [vmem:[#allocation66_spill] sm:$0xff] %v3837_v3 }
  0xcf   : > { %830 = vrot.lane.b32.xlu1 %v3377_v46, %s3138_s10  ;;  %828 = vrot.lane.b32.xlu0 %v3382_v50, %s3138_s10  ;;  %6723 = vst [vmem:[#allocation76_spill] sm:$0xff] %v3889_v34 }
  0xd1   : > { %v3847_v20 = vpop.permute.xlu1 %615  ;;  %v3850_v15 = vpop.permute.xlu0 %613 }
  0xd2   : > { %6715 = vst [vmem:[#allocation68_spill] sm:$0xff] %v3847_v20  ;;  %6716 = vst [vmem:[#allocation69_spill] sm:$0xff] %v3850_v15 }
  0xd3   : > { %834 = vrot.lane.b32.xlu1 %v3392_v52, %s3138_s10  ;;  %832 = vrot.lane.b32.xlu0 %v3397_v57, %s3138_s10 }
  0xd5   : > { %v3860_v3 = vpop.permute.xlu1 %619  ;;  %v3865_v20 = vpop.permute.xlu0 %617 }
  0xd6   : > { %6717 = vst [vmem:[#allocation70_spill] sm:$0xff] %v3860_v3  ;;  %6718 = vst [vmem:[#allocation71_spill] sm:$0xff] %v3865_v20  ;;  %v857_v20 = vrot.slane %v3724_v6, 2 }
  0xd7   : > { %838 = vrot.lane.b32.xlu1 %v3858_v32, %s3138_s10  ;;  %836 = vrot.lane.b32.xlu0 %v3863_v42, %s3138_s10 }
  0xd9   : > { %v3871_v15 = vpop.permute.xlu1 %623  ;;  %v3873_v44 = vpop.permute.xlu0 %621 }
  0xda   : > { %6719 = vst [vmem:[#allocation72_spill] sm:$0xff] %v3871_v15  ;;  %6720 = vst [vmem:[#allocation73_spill] sm:$0xff] %v3873_v44 }
  0xdb   : > { %868 = vrot.lane.b32.xlu1 %v3412_v4, %s3139_s11  ;;  %866 = vrot.lane.b32.xlu0 %v3417_v7, %s3139_s11  ;;  %v856_v4 = vrot.slane %v3729_v31, 2 }
  0xdd   : > { %v3879_v0 = vpop.permute.xlu1 %627  ;;  %v3881_v37 = vpop.permute.xlu0 %625  ;;  %v3907_v15 = vsel %vm479_vm3, %v856_v4, %v857_v20 }
  0xde   : > { %6721 = vst [vmem:[#allocation74_spill] sm:$0xff] %v3879_v0  ;;  %6722 = vst [vmem:[#allocation75_spill] sm:$0xff] %v3881_v37  ;;  %v3902_v37 = vsel %vm479_vm3, %v857_v20, %v3889_v34  ;;  %v3933_v34 = vrot.slane %v3835_v56, 2 }
  0xdf   : > { %872 = vrot.lane.b32.xlu1 %v3425_v14, %s3139_s11  ;;  %870 = vrot.lane.b32.xlu0 %v3430_v24, %s3139_s11 }
  0xe0   : > { %6732 = vst [vmem:[#allocation85_spill] sm:$0xff] %v3933_v34 }
  0xe1   : > { %v3891_v44 = vpop.permute.xlu1 %631  ;;  %v3894_v7 = vpop.permute.xlu0 %629 }
  0xe2   : > { %6724 = vst [vmem:[#allocation77_spill] sm:$0xff] %v3891_v44  ;;  %6725 = vst [vmem:[#allocation78_spill] sm:$0xff] %v3894_v7 }
  0xe3   : > { %876 = vrot.lane.b32.xlu1 %v3440_v29, %s3139_s11  ;;  %874 = vrot.lane.b32.xlu0 %v3445_v35, %s3139_s11 }
  0xe5   : > { %v3904_v0 = vpop.permute.xlu1 %635  ;;  %v3909_v44 = vpop.permute.xlu0 %633 }
  0xe6   : > { %6726 = vst [vmem:[#allocation79_spill] sm:$0xff] %v3904_v0  ;;  %6727 = vst [vmem:[#allocation80_spill] sm:$0xff] %v3909_v44  ;;  %v862_v44 = vrot.slane %v3764_v2, 2 }
  0xe7   : > { %880 = vrot.lane.b32.xlu1 %v3902_v37, %s3139_s11  ;;  %878 = vrot.lane.b32.xlu0 %v3907_v15, %s3139_s11 }
  0xe9   : > { %v3915_v7 = vpop.permute.xlu1 %639  ;;  %v3917_v3 = vpop.permute.xlu0 %637 }
  0xea   : > { %6728 = vst [vmem:[#allocation81_spill] sm:$0xff] %v3915_v7  ;;  %6729 = vst [vmem:[#allocation82_spill] sm:$0xff] %v3917_v3 }
  0xeb   : > { %884 = vrot.lane.b32.xlu1 %v3460_v58, %s3139_s11  ;;  %882 = vrot.lane.b32.xlu0 %v3465_v62, %s3139_s11  ;;  %v861_v58 = vrot.slane %v3769_v9, 2 }
  0xed   : > { %v3923_v20 = vpop.permute.xlu1 %700  ;;  %v3925_v4 = vpop.permute.xlu0 %698  ;;  %v3951_v7 = vsel %vm479_vm3, %v861_v58, %v862_v44 }
  0xee   : > { %6730 = vst [vmem:[#allocation83_spill] sm:$0xff] %v3923_v20  ;;  %6731 = vst [vmem:[#allocation84_spill] sm:$0xff] %v3925_v4  ;;  %v3946_v4 = vsel %vm479_vm3, %v862_v44, %v3933_v34  ;;  %v3977_v34 = vrot.slane %v3788_v43, 3 }
  0xef   : > { %888 = vrot.lane.b32.xlu1 %v3473_v1, %s3139_s11  ;;  %886 = vrot.lane.b32.xlu0 %v3478_v8, %s3139_s11  ;;  %6735 = vst [vmem:[#allocation88_spill] sm:$0xff] %v3946_v4  ;;  %6737 = vst [vmem:[#allocation90_spill] sm:$0xff] %v3951_v7 }
  0xf0   : > { %6743 = vst [vmem:[#allocation96_spill] sm:$0xff] %v3977_v34 }
  0xf1   : > { %v3935_v3 = vpop.permute.xlu1 %704  ;;  %v3938_v62 = vpop.permute.xlu0 %702 }
  0xf2   : > { %6733 = vst [vmem:[#allocation86_spill] sm:$0xff] %v3935_v3  ;;  %6734 = vst [vmem:[#allocation87_spill] sm:$0xff] %v3938_v62 }
  0xf3   : > { %892 = vrot.lane.b32.xlu1 %v3488_v25, %s3139_s11  ;;  %890 = vrot.lane.b32.xlu0 %v3493_v36, %s3139_s11 }
  0xf5   : > { %v3948_v20 = vpop.permute.xlu1 %708  ;;  %v3953_v3 = vpop.permute.xlu0 %706 }
  0xf6   : > { %6736 = vst [vmem:[#allocation89_spill] sm:$0xff] %v3948_v20  ;;  %6738 = vst [vmem:[#allocation91_spill] sm:$0xff] %v3953_v3  ;;  %v915_v3 = vrot.slane %v3724_v6, 3 }
  0xf7   : > { %896 = vrot.lane.b32.xlu1 %v3946_v4, %s3139_s11  ;;  %894 = vrot.lane.b32.xlu0 %v3951_v7, %s3139_s11 }
  0xf9   : > { %v3959_v62 = vpop.permute.xlu1 %712  ;;  %v3961_v0 = vpop.permute.xlu0 %710 }
  0xfa   : > { %6739 = vst [vmem:[#allocation92_spill] sm:$0xff] %v3959_v62  ;;  %6740 = vst [vmem:[#allocation93_spill] sm:$0xff] %v3961_v0  ;;  %v3990_v62 = vsel %vm568_vm4, %v915_v3, %v3977_v34  ;;  %v920_v34 = vrot.slane %v3764_v2, 3 }
  0xfb   : > { %926 = vrot.lane.b32.xlu1 %v3508_v60, %s3140_s14  ;;  %924 = vrot.lane.b32.xlu0 %v3513_v19, %s3140_s14  ;;  %v914_v60 = vrot.slane %v3729_v31, 3 }
  0xfd   : > { %v3967_v44 = vpop.permute.xlu1 %716  ;;  %v3969_v58 = vpop.permute.xlu0 %714 }
  0xfe   : > { %6741 = vst [vmem:[#allocation94_spill] sm:$0xff] %v3967_v44  ;;  %6742 = vst [vmem:[#allocation95_spill] sm:$0xff] %v3969_v58  ;;  %v6746_v44 = vld [vmem:[#allocation16_spill] sm:$0xff]  ;;  %v6747_v58 = vld [vmem:[#allocation17_spill] sm:$0xff] }
  0xff   : > { %930 = vrot.lane.b32.xlu1 %v3521_v30, %s3140_s14  ;;  %928 = vrot.lane.b32.xlu0 %v3526_v53, %s3140_s14  ;;  %6748 = vst [vmem:[#allocation16_spill] sm:$0xff] %v3990_v62  ;;  %v3995_v53 = vsel %vm568_vm4, %v914_v60, %v915_v3 }
 0x100   : > { %6750 = vst [vmem:[#allocation100_spill] sm:$0xff] %v3995_v53 }
 0x101   : > { %v3979_v0 = vpop.permute.xlu1 %720  ;;  %v3982_v19 = vpop.permute.xlu0 %718 }
 0x102   : > { %6744 = vst [vmem:[#allocation97_spill] sm:$0xff] %v3979_v0  ;;  %6745 = vst [vmem:[#allocation98_spill] sm:$0xff] %v3982_v19 }
 0x103   : > { %934 = vrot.lane.b32.xlu1 %v6746_v44, %s3140_s14  ;;  %932 = vrot.lane.b32.xlu0 %v6747_v58, %s3140_s14 }
 0x105   : > { %v3992_v20 = vpop.permute.xlu1 %724  ;;  %v3997_v0 = vpop.permute.xlu0 %722 }
 0x106   : > { %6749 = vst [vmem:[#allocation99_spill] sm:$0xff] %v3992_v20  ;;  %6751 = vst [vmem:[#allocation101_spill] sm:$0xff] %v3997_v0  ;;  %v6756_v0 = vld [vmem:[#allocation18_spill] sm:$0xff] }
 0x107   : > { %938 = vrot.lane.b32.xlu1 %v3990_v62, %s3140_s14  ;;  %936 = vrot.lane.b32.xlu0 %v3995_v53, %s3140_s14 }
 0x109   : > { %v4003_v19 = vpop.permute.xlu1 %728  ;;  %v4005_v58 = vpop.permute.xlu0 %726 }
 0x10a   : > { %6752 = vst [vmem:[#allocation102_spill] sm:$0xff] %v4003_v19  ;;  %6753 = vst [vmem:[#allocation103_spill] sm:$0xff] %v4005_v58  ;;  %v4021_v58 = vrot.slane %v3835_v56, 3 }
 0x10b   : > { %942 = vrot.lane.b32.xlu1 %v3556_v38, %s3140_s14  ;;  %940 = vrot.lane.b32.xlu0 %v3561_v5, %s3140_s14  ;;  %v919_v38 = vrot.slane %v3769_v9, 3 }
 0x10c   : > { %6757 = vst [vmem:[#allocation106_spill] sm:$0xff] %v4021_v58 }
 0x10d   : > { %v4011_v3 = vpop.permute.xlu1 %750  ;;  %v4013_v60 = vpop.permute.xlu0 %748 }
 0x10e   : > { %6754 = vst [vmem:[#allocation104_spill] sm:$0xff] %v4011_v3  ;;  %6755 = vst [vmem:[#allocation105_spill] sm:$0xff] %v4013_v60  ;;  %v6760_v60 = vld [vmem:[#allocation19_spill] sm:$0xff]  ;;  %v4034_v3 = vsel %vm568_vm4, %v920_v34, %v4021_v58  ;;  %v975_v58 = vrot.slane %v3788_v43, 4 }
 0x10f   : > { %946 = vrot.lane.b32.xlu1 %v3569_v48, %s3140_s14  ;;  %944 = vrot.lane.b32.xlu0 %v6756_v0, %s3140_s14  ;;  %v4039_v0 = vsel %vm568_vm4, %v919_v38, %v920_v34 }
 0x111   : > { %v4023_v19 = vpop.permute.xlu1 %754  ;;  %v4026_v5 = vpop.permute.xlu0 %752 }
 0x112   : > { %6758 = vst [vmem:[#allocation107_spill] sm:$0xff] %v4023_v19  ;;  %6759 = vst [vmem:[#allocation108_spill] sm:$0xff] %v4026_v5 }
 0x113   : > { %950 = vrot.lane.b32.xlu1 %v3584_v47, %s3140_s14  ;;  %948 = vrot.lane.b32.xlu0 %v6760_v60, %s3140_s14 }
 0x115   : > { %v4036_v20 = vpop.permute.xlu1 %758  ;;  %v4041_v19 = vpop.permute.xlu0 %756 }
 0x116   : > { %6761 = vst [vmem:[#allocation109_spill] sm:$0xff] %v4041_v19  ;;  %v973_v19 = vrot.slane %v3724_v6, 4 }
 0x117   : > { %954 = vrot.lane.b32.xlu1 %v4034_v3, %s3140_s14  ;;  %952 = vrot.lane.b32.xlu0 %v4039_v0, %s3140_s14 }
 0x119   : > { %v4047_v5 = vpop.permute.xlu1 %762  ;;  %v4049_v60 = vpop.permute.xlu0 %760 }
 0x11a   : > { %6762 = vst [vmem:[#allocation110_spill] sm:$0xff] %v4047_v5  ;;  %6763 = vst [vmem:[#allocation111_spill] sm:$0xff] %v4049_v60 }
 0x11b   : > { %984 = vrot.lane.b32.xlu1 %v3604_v23, %s3141_s17  ;;  %982 = vrot.lane.b32.xlu0 %v3609_v55, %s3141_s17  ;;  %v972_v23 = vrot.slane %v3729_v31, 4  ;;  %v6768_v55 = vld [vmem:[#allocation21_spill] sm:$0xff] }
 0x11d   : > { %v4055_v34 = vpop.permute.xlu1 %766  ;;  %v4057_v38 = vpop.permute.xlu0 %764 }
 0x11e   : > { %6764 = vst [vmem:[#allocation112_spill] sm:$0xff] %v4055_v34  ;;  %6765 = vst [vmem:[#allocation113_spill] sm:$0xff] %v4057_v38  ;;  %v4075_v38 = vsel %vm657_vm5, %v973_v19, %v975_v58 }
 0x11f   : > { %988 = vrot.lane.b32.xlu1 %v3617_v59, %s3141_s17  ;;  %986 = vrot.lane.b32.xlu0 %v3622_v11, %s3141_s17  ;;  %v4080_v11 = vsel %vm657_vm5, %v972_v23, %v973_v19  ;;  %v978_v23 = vrot.slane %v3764_v2, 4 }
 0x121   : > { %v4065_v60 = vpop.permute.xlu1 %770  ;;  %v4068_v5 = vpop.permute.xlu0 %768 }
 0x122   : > { %6766 = vst [vmem:[#allocation114_spill] sm:$0xff] %v4065_v60  ;;  %6767 = vst [vmem:[#allocation115_spill] sm:$0xff] %v4068_v5 }
 0x123   : > { %992 = vrot.lane.b32.xlu1 %v3630_v51, %s3141_s17  ;;  %990 = vrot.lane.b32.xlu0 %v6768_v55, %s3141_s17 }
 0x125   : > { %v4077_v34 = vpop.permute.xlu1 %774  ;;  %v4082_v43 = vpop.permute.xlu0 %772 }
 0x126   : > { %6769 = vst [vmem:[#allocation21_spill] sm:$0xff] %v4082_v43  ;;  %v980_v43 = vrot.slane %v3835_v56, 4 }
 0x127   : > { %996 = vrot.lane.b32.xlu1 %v4075_v38, %s3141_s17  ;;  %994 = vrot.lane.b32.xlu0 %v4080_v11, %s3141_s17 }
 0x129   : > { %v4088_v5 = vpop.permute.xlu1 %778  ;;  %v4090_v60 = vpop.permute.xlu0 %776 }
 0x12a   : > { %6770 = vst [vmem:[#allocation116_spill] sm:$0xff] %v4090_v60 }
 0x12b   : > { %1000 = vrot.lane.b32.xlu1 %v3650_v49, %s3141_s17  ;;  %998 = vrot.lane.b32.xlu0 %v3659_v16, %s3141_s17  ;;  %v977_v49 = vrot.slane %v3769_v9, 4 }
 0x12d   : > { %v4096_v58 = vpop.permute.xlu1 %810  ;;  %v4098_v19 = vpop.permute.xlu0 %808  ;;  %v4121_v56 = vsel %vm657_vm5, %v977_v49, %v978_v23  ;;  %v156_v49 = vld [vmem:[%s3204_s24 + $0x38] sm:$0xff] }
 0x12e   : > { %6771 = vst [vmem:[#allocation117_spill] sm:$0xff] %v4096_v58  ;;  %6772 = vst [vmem:[#allocation118_spill] sm:$0xff] %v4098_v19  ;;  %v4116_v19 = vsel %vm657_vm5, %v978_v23, %v980_v43  ;;  %v155_v23 = vld [vmem:[%s3204_s24 + $0x30] sm:$0xff] }
 0x12f   : > { %1004 = vrot.lane.b32.xlu1 %v3667_v18, %s3141_s17  ;;  %1002 = vrot.lane.b32.xlu0 %v3676_v63, %s3141_s17  ;;  %6775 = vst [vmem:[#allocation121_spill] sm:$0xff] %v4116_v19  ;;  %6776 = vst [vmem:[#allocation122_spill] sm:$0xff] %v4121_v56 }
 0x131   : > { %v4106_v60 = vpop.permute.xlu1 %814  ;;  %v4109_v16 = vpop.permute.xlu0 %812 }
 0x132   : > { %6773 = vst [vmem:[#allocation119_spill] sm:$0xff] %v4106_v60  ;;  %6774 = vst [vmem:[#allocation120_spill] sm:$0xff] %v4109_v16 }
 0x133   : > { %1008 = vrot.lane.b32.xlu1 %v3684_v61, %s3141_s17  ;;  %1006 = vrot.lane.b32.xlu0 %v3689_v40, %s3141_s17 }
 0x135   : > { %v4118_v58 = vpop.permute.xlu1 %818  ;;  %v4123_v60 = vpop.permute.xlu0 %816 }
 0x136   : > { %6777 = vst [vmem:[#allocation123_spill] sm:$0xff] %v4123_v60 }
 0x137   : > { %1012 = vrot.lane.b32.xlu1 %v4116_v19, %s3141_s17  ;;  %1010 = vrot.lane.b32.xlu0 %v4121_v56, %s3141_s17  ;;  %v263_v56 = vrot.slane %v155_v23, 6  ;;  %v264_v19 = vrot.slane %v156_v49, 6  ;;  %s4692_s17 = scalar_lea.vmem %s6520_s0, %s2900_s28 }
 0x139   : > { %v4129_v16 = vpop.permute.xlu1 %822  ;;  %v4131_v61 = vpop.permute.xlu0 %820  ;;  %v4161_v23 = vsel %vm247_vm0, 0.0, %v263_v56 }
 0x13a   : > { %6783 = vst [vmem:[#allocation129_spill] sm:$0xff] %v4161_v23 }
 0x13b   : > { %1034 = vrot.lane.b32.xlu1 %v3214_v10, %s3142_s18  ;;  %1032 = vrot.lane.b32.xlu0 %v3220_v12, %s3142_s18  ;;  %v4156_v12 = vsel %vm247_vm0, %v263_v56, %v264_v19 }
 0x13c   : > { %6782 = vst [vmem:[#allocation128_spill] sm:$0xff] %v4156_v12 }
 0x13d   : > { %v4137_v43 = vpop.permute.xlu1 %826  ;;  %v4141_v60 = vpop.permute.xlu0 %824 }
 0x13e   : > { %6778 = vst [vmem:[#allocation124_spill] sm:$0xff] %v4137_v43  ;;  %6779 = vst [vmem:[#allocation125_spill] sm:$0xff] %v4141_v60  ;;  %v163_v43 = vld [vmem:[%s3204_s24 + $0x130] sm:$0xff] }
 0x13f   : > { %1038 = vrot.lane.b32.xlu1 %v3229_v17, %s3142_s18  ;;  %1036 = vrot.lane.b32.xlu0 %v3223_v13, %s3142_s18 }
 0x141   : > { %v4147_v40 = vpop.permute.xlu1 %830  ;;  %v4149_v63 = vpop.permute.xlu0 %828 }
 0x142   : > { %6780 = vst [vmem:[#allocation126_spill] sm:$0xff] %v4147_v40  ;;  %6781 = vst [vmem:[#allocation127_spill] sm:$0xff] %v4149_v63 }
 0x143   : > { %1042 = vrot.lane.b32.xlu1 %v3724_v6, %s3142_s18  ;;  %1040 = vrot.lane.b32.xlu0 %v3729_v31, %s3142_s18  ;;  %v287_v6 = vrot.slane %v163_v43, 6 }
 0x145   : > { %v4158_v60 = vpop.permute.xlu1 %834  ;;  %v4163_v49 = vpop.permute.xlu0 %832 }
 0x146   : > { %6784 = vst [vmem:[#allocation130_spill] sm:$0xff] %v4163_v49  ;;  %v164_v49 = vld [vmem:[%s3204_s24 + $0x138] sm:$0xff]  ;;  %s3144_s24 = smov 48  }
 0x147   : > { %1046 = vrot.lane.b32.xlu1 %v4156_v12, %s3142_s18  ;;  %1044 = vrot.lane.b32.xlu0 %v4161_v23, %s3142_s18  ;;  %v288_v18 = vrot.slane %v164_v49, 6 }
 0x149   : > { %v4169_v63 = vpop.permute.xlu1 %838  ;;  %v4171_v40 = vpop.permute.xlu0 %836 }
 0x14a   : > { %6785 = vst [vmem:[#allocation131_spill] sm:$0xff] %v4169_v63  ;;  %6786 = vst [vmem:[#allocation132_spill] sm:$0xff] %v4171_v40 }
 0x14b   : > { %1050 = vrot.lane.b32.xlu1 %v3342_v26, %s3142_s18  ;;  %1048 = vrot.lane.b32.xlu0 %v3350_v33, %s3142_s18  ;;  %v4196_v33 = vsel %vm247_vm0, %v287_v6, %v288_v18 }
 0x14c   : > { %6791 = vst [vmem:[#allocation137_spill] sm:$0xff] %v4196_v33 }
 0x14d   : > { %v4177_v56 = vpop.permute.xlu1 %868  ;;  %v4181_v31 = vpop.permute.xlu0 %866 }
 0x14e   : > { %6787 = vst [vmem:[#allocation133_spill] sm:$0xff] %v4177_v56  ;;  %6788 = vst [vmem:[#allocation134_spill] sm:$0xff] %v4181_v31  ;;  %v4201_v56 = vsel %vm247_vm0, 0.0, %v287_v6 }
 0x14f   : > { %1054 = vrot.lane.b32.xlu1 %v3364_v39, %s3142_s18  ;;  %1052 = vrot.lane.b32.xlu0 %v3370_v41, %s3142_s18  ;;  %6792 = vst [vmem:[#allocation138_spill] sm:$0xff] %v4201_v56 }
 0x151   : > { %v4187_v40 = vpop.permute.xlu1 %872  ;;  %v4189_v63 = vpop.permute.xlu0 %870 }
 0x152   : > { %6789 = vst [vmem:[#allocation135_spill] sm:$0xff] %v4187_v40  ;;  %6790 = vst [vmem:[#allocation136_spill] sm:$0xff] %v4189_v63 }
 0x153   : > { %1058 = vrot.lane.b32.xlu1 %v3764_v2, %s3142_s18  ;;  %1056 = vrot.lane.b32.xlu0 %v3769_v9, %s3142_s18  ;;  %v1083_v9 = vrot.slane %v4156_v12, 1 }
 0x155   : > { %v4198_v31 = vpop.permute.xlu1 %876  ;;  %v4203_v43 = vpop.permute.xlu0 %874 }
 0x156   : > { %6793 = vst [vmem:[#allocation139_spill] sm:$0xff] %v4203_v43  ;;  %v4220_v43 = vsel %vm247_vm0, %v264_v19, 0.0 }
 0x157   : > { %1062 = vrot.lane.b32.xlu1 %v4196_v33, %s3142_s18  ;;  %1060 = vrot.lane.b32.xlu0 %v4201_v56, %s3142_s18  ;;  %6795 = vst [vmem:[#allocation141_spill] sm:$0xff] %v4220_v43  ;;  %s3147_s18 = smov 60  }
 0x159   : > { %v4209_v49 = vpop.permute.xlu1 %880  ;;  %v4211_v63 = vpop.permute.xlu0 %878 }
 0x15b   : > { %1094 = vrot.lane.b32.xlu1 %v3239_v21, %s3143_s22  ;;  %1092 = vrot.lane.b32.xlu0 %v3242_v22, %s3143_s22  ;;  %v4230_v21 = vrot.slane %v4220_v43, 1 }
 0x15d   : > { %v4217_v6 = vpop.permute.xlu1 %884  ;;  %v4222_v40 = vpop.permute.xlu0 %882  ;;  %6797 = vst [vmem:[#allocation143_spill] sm:$0xff] %v4230_v21 }
 0x15e   : > { %6794 = vst [vmem:[#allocation140_spill] sm:$0xff] %v4217_v6  ;;  %6796 = vst [vmem:[#allocation142_spill] sm:$0xff] %v4222_v40  ;;  %v1082_v6 = vrot.slane %v4161_v23, 1 }
 0x15f   : > { %1098 = vrot.lane.b32.xlu1 %v3258_v27, %s3143_s22  ;;  %1096 = vrot.lane.b32.xlu0 %v3261_v28, %s3143_s22  ;;  %v4243_v27 = vsel %vm390_vm1, %v1083_v9, %v4230_v21 }
 0x160   : > { %6800 = vst [vmem:[#allocation146_spill] sm:$0xff] %v4243_v27  ;;  %v4248_v19 = vsel %vm390_vm1, %v1082_v6, %v1083_v9  ;;  %v4272_v6 = vsel %vm247_vm0, %v288_v18, 0.0 }
 0x161   : > { %v4232_v22 = vpop.permute.xlu1 %888  ;;  %v4235_v2 = vpop.permute.xlu0 %886  ;;  %6801 = vst [vmem:[#allocation147_spill] sm:$0xff] %v4248_v19  ;;  %6804 = vst [vmem:[#allocation150_spill] sm:$0xff] %v4272_v6 }
 0x162   : > { %6798 = vst [vmem:[#allocation144_spill] sm:$0xff] %v4232_v22  ;;  %6799 = vst [vmem:[#allocation145_spill] sm:$0xff] %v4235_v2  ;;  %v1088_v2 = vrot.slane %v4196_v33, 1 }
 0x163   : > { %1102 = vrot.lane.b32.xlu1 %v3811_v54, %s3143_s22  ;;  %1100 = vrot.lane.b32.xlu0 %v3816_v45, %s3143_s22 }
 0x165   : > { %v4245_v28 = vpop.permute.xlu1 %892  ;;  %v4250_v22 = vpop.permute.xlu0 %890 }
 0x166   : > { %6802 = vst [vmem:[#allocation148_spill] sm:$0xff] %v4250_v22 }
 0x167   : > { %1106 = vrot.lane.b32.xlu1 %v4243_v27, %s3143_s22  ;;  %1104 = vrot.lane.b32.xlu0 %v4248_v19, %s3143_s22  ;;  %v6843_v27 = vld [vmem:[#allocation25_spill] sm:$0xff] }
 0x169   : > { %v4261_v40 = vpop.permute.xlu1 %896  ;;  %v4263_v21 = vpop.permute.xlu0 %894 }
 0x16b   : > { %1110 = vrot.lane.b32.xlu1 %v3377_v46, %s3143_s22  ;;  %1108 = vrot.lane.b32.xlu0 %v3382_v50, %s3143_s22  ;;  %v4282_v46 = vrot.slane %v4272_v6, 1  ;;  %v1087_v50 = vrot.slane %v4201_v56, 1 }
 0x16d   : > { %v4269_v9 = vpop.permute.xlu1 %926  ;;  %v4274_v22 = vpop.permute.xlu0 %924  ;;  %6806 = vst [vmem:[#allocation152_spill] sm:$0xff] %v4282_v46  ;;  %v4300_v18 = vsel %vm390_vm1, %v1087_v50, %v1088_v2 }
 0x16e   : > { %6803 = vst [vmem:[#allocation149_spill] sm:$0xff] %v4269_v9  ;;  %6805 = vst [vmem:[#allocation151_spill] sm:$0xff] %v4274_v22 }
 0x16f   : > { %1114 = vrot.lane.b32.xlu1 %v3392_v52, %s3143_s22  ;;  %1112 = vrot.lane.b32.xlu0 %v3397_v57, %s3143_s22  ;;  %v4295_v52 = vsel %vm390_vm1, %v1088_v2, %v4282_v46  ;;  %6810 = vst [vmem:[#allocation156_spill] sm:$0xff] %v4300_v18  ;;  %v4326_v46 = vrot.slane %v4220_v43, 2 }
 0x170   : > { %6809 = vst [vmem:[#allocation155_spill] sm:$0xff] %v4295_v52 }
 0x171   : > { %v4284_v19 = vpop.permute.xlu1 %930  ;;  %v4287_v9 = vpop.permute.xlu0 %928  ;;  %6814 = vst [vmem:[#allocation160_spill] sm:$0xff] %v4326_v46 }
 0x172   : > { %6807 = vst [vmem:[#allocation153_spill] sm:$0xff] %v4284_v19  ;;  %6808 = vst [vmem:[#allocation154_spill] sm:$0xff] %v4287_v9 }
 0x173   : > { %1118 = vrot.lane.b32.xlu1 %v3858_v32, %s3143_s22  ;;  %1116 = vrot.lane.b32.xlu0 %v3863_v42, %s3143_s22 }
 0x175   : > { %v4297_v57 = vpop.permute.xlu1 %934  ;;  %v4302_v19 = vpop.permute.xlu0 %932 }
 0x176   : > { %6811 = vst [vmem:[#allocation157_spill] sm:$0xff] %v4302_v19  ;;  %v1141_v19 = vrot.slane %v4156_v12, 2 }
 0x177   : > { %1122 = vrot.lane.b32.xlu1 %v4295_v52, %s3143_s22  ;;  %1120 = vrot.lane.b32.xlu0 %v4300_v18, %s3143_s22 }
 0x179   : > { %v4308_v9 = vpop.permute.xlu1 %938  ;;  %v4310_v22 = vpop.permute.xlu0 %936 }
 0x17b   : > { %1152 = vrot.lane.b32.xlu1 %v3425_v14, %s3144_s24  ;;  %1150 = vrot.lane.b32.xlu0 %v3430_v24, %s3144_s24  ;;  %v1140_v14 = vrot.slane %v4161_v23, 2 }
 0x17d   : > { %v4316_v2 = vpop.permute.xlu1 %942  ;;  %v4318_v50 = vpop.permute.xlu0 %940 }
 0x17e   : > { %6812 = vst [vmem:[#allocation158_spill] sm:$0xff] %v4316_v2  ;;  %6813 = vst [vmem:[#allocation159_spill] sm:$0xff] %v4318_v50  ;;  %v4344_v50 = vsel %vm479_vm3, %v1140_v14, %v1141_v19 }
 0x17f   : > { %1156 = vrot.lane.b32.xlu1 %v3440_v29, %s3144_s24  ;;  %1154 = vrot.lane.b32.xlu0 %v3445_v35, %s3144_s24  ;;  %v4339_v29 = vsel %vm479_vm3, %v1141_v19, %v4326_v46  ;;  %6818 = vst [vmem:[#allocation164_spill] sm:$0xff] %v4344_v50  ;;  %v4370_v46 = vrot.slane %v4272_v6, 2 }
 0x180   : > { %6817 = vst [vmem:[#allocation163_spill] sm:$0xff] %v4339_v29 }
 0x181   : > { %v4328_v18 = vpop.permute.xlu1 %946  ;;  %v4331_v24 = vpop.permute.xlu0 %944  ;;  %6822 = vst [vmem:[#allocation168_spill] sm:$0xff] %v4370_v46 }
 0x182   : > { %6815 = vst [vmem:[#allocation161_spill] sm:$0xff] %v4328_v18  ;;  %6816 = vst [vmem:[#allocation162_spill] sm:$0xff] %v4331_v24 }
 0x183   : > { %1160 = vrot.lane.b32.xlu1 %v3902_v37, %s3144_s24  ;;  %1158 = vrot.lane.b32.xlu0 %v3907_v15, %s3144_s24 }
 0x185   : > { %v4341_v35 = vpop.permute.xlu1 %950  ;;  %v4346_v18 = vpop.permute.xlu0 %948 }
 0x186   : > { %6819 = vst [vmem:[#allocation165_spill] sm:$0xff] %v4346_v18  ;;  %v1146_v18 = vrot.slane %v4196_v33, 2 }
 0x187   : > { %1164 = vrot.lane.b32.xlu1 %v4339_v29, %s3144_s24  ;;  %1162 = vrot.lane.b32.xlu0 %v4344_v50, %s3144_s24 }
 0x189   : > { %v4352_v24 = vpop.permute.xlu1 %954  ;;  %v4354_v2 = vpop.permute.xlu0 %952 }
 0x18b   : > { %1168 = vrot.lane.b32.xlu1 %v3473_v1, %s3144_s24  ;;  %1166 = vrot.lane.b32.xlu0 %v3478_v8, %s3144_s24  ;;  %v1145_v1 = vrot.slane %v4201_v56, 2 }
 0x18d   : > { %v4360_v19 = vpop.permute.xlu1 %984  ;;  %v4362_v14 = vpop.permute.xlu0 %982 }
 0x18e   : > { %6820 = vst [vmem:[#allocation166_spill] sm:$0xff] %v4360_v19  ;;  %6821 = vst [vmem:[#allocation167_spill] sm:$0xff] %v4362_v14  ;;  %v4388_v14 = vsel %vm479_vm3, %v1145_v1, %v1146_v18 }
 0x18f   : > { %1172 = vrot.lane.b32.xlu1 %v3488_v25, %s3144_s24  ;;  %1170 = vrot.lane.b32.xlu0 %v3493_v36, %s3144_s24  ;;  %v4383_v25 = vsel %vm479_vm3, %v1146_v18, %v4370_v46  ;;  %6826 = vst [vmem:[#allocation172_spill] sm:$0xff] %v4388_v14  ;;  %v6828_v46 = vld [vmem:[#allocation15_spill] sm:$0xff] }
 0x190   : > { %6825 = vst [vmem:[#allocation171_spill] sm:$0xff] %v4383_v25 }
 0x191   : > { %v4372_v50 = vpop.permute.xlu1 %988  ;;  %v4375_v8 = vpop.permute.xlu0 %986 }
 0x192   : > { %6823 = vst [vmem:[#allocation169_spill] sm:$0xff] %v4372_v50  ;;  %6824 = vst [vmem:[#allocation170_spill] sm:$0xff] %v4375_v8 }
 0x193   : > { %1176 = vrot.lane.b32.xlu1 %v3946_v4, %s3144_s24  ;;  %1174 = vrot.lane.b32.xlu0 %v3951_v7, %s3144_s24 }
 0x195   : > { %v4385_v36 = vpop.permute.xlu1 %992  ;;  %v4390_v50 = vpop.permute.xlu0 %990 }
 0x196   : > { %6827 = vst [vmem:[#allocation173_spill] sm:$0xff] %v4390_v50  ;;  %v6831_v50 = vld [vmem:[#allocation17_spill] sm:$0xff] }
 0x197   : > { %1180 = vrot.lane.b32.xlu1 %v4383_v25, %s3144_s24  ;;  %1178 = vrot.lane.b32.xlu0 %v4388_v14, %s3144_s24  ;;  %v1199_v14 = vrot.slane %v4156_v12, 3  ;;  %v4414_v25 = vrot.slane %v4220_v43, 3  ;;  %s142_s24 = sand.u32 1, %s3123_s12  }
 0x199   : > { %v4396_v8 = vpop.permute.xlu1 %996  ;;  %v4398_v19 = vpop.permute.xlu0 %994  ;;  %6832 = vst [vmem:[#allocation17_spill] sm:$0xff] %v4414_v25 }
 0x19b   : > { %1210 = vrot.lane.b32.xlu1 %v3521_v30, %s3145_s25  ;;  %1208 = vrot.lane.b32.xlu0 %v6828_v46, %s3145_s25  ;;  %v1198_v30 = vrot.slane %v4161_v23, 3 }
 0x19d   : > { %v4404_v18 = vpop.permute.xlu1 %1000  ;;  %v4406_v1 = vpop.permute.xlu0 %998 }
 0x19e   : > { %6829 = vst [vmem:[#allocation15_spill] sm:$0xff] %v4404_v18  ;;  %6830 = vst [vmem:[#allocation174_spill] sm:$0xff] %v4406_v1  ;;  %v4432_v1 = vsel %vm568_vm4, %v1198_v30, %v1199_v14 }
 0x19f   : > { %1214 = vrot.lane.b32.xlu1 %v6746_v44, %s3145_s25  ;;  %1212 = vrot.lane.b32.xlu0 %v6831_v50, %s3145_s25  ;;  %v4427_v44 = vsel %vm568_vm4, %v1199_v14, %v4414_v25  ;;  %6836 = vst [vmem:[#allocation178_spill] sm:$0xff] %v4432_v1  ;;  %v6838_v25 = vld [vmem:[#allocation18_spill] sm:$0xff] }
 0x1a0   : > { %6835 = vst [vmem:[#allocation177_spill] sm:$0xff] %v4427_v44  ;;  %v6839_v14 = vld [vmem:[#allocation22_spill] sm:$0xff] }
 0x1a1   : > { %v4416_v29 = vpop.permute.xlu1 %1004  ;;  %v4419_v46 = vpop.permute.xlu0 %1002  ;;  %v1370_v30 = vsel %vm1364_vm6, %v3214_v10, %v6839_v14  ;;  %v6845_v10 = vld [vmem:[#allocation26_spill] sm:$0xff] }
 0x1a2   : > { %6833 = vst [vmem:[#allocation175_spill] sm:$0xff] %v4416_v29  ;;  %6834 = vst [vmem:[#allocation176_spill] sm:$0xff] %v4419_v46  ;;  %v1371_v14 = vsel %vm1364_vm6, %v3223_v13, %v6845_v10  ;;  %v1203_v10 = vrot.slane %v4201_v56, 3 }
 0x1a3   : > { %1218 = vrot.lane.b32.xlu1 %v3990_v62, %s3145_s25  ;;  %1216 = vrot.lane.b32.xlu0 %v3995_v53, %s3145_s25  ;;  %v6844_v53 = vld [vmem:[#allocation70_spill] sm:$0xff] }
 0x1a5   : > { %v4429_v50 = vpop.permute.xlu1 %1008  ;;  %v4434_v29 = vpop.permute.xlu0 %1006 }
 0x1a6   : > { %6837 = vst [vmem:[#allocation179_spill] sm:$0xff] %v4434_v29 }
 0x1a7   : > { %1222 = vrot.lane.b32.xlu1 %v4427_v44, %s3145_s25  ;;  %1220 = vrot.lane.b32.xlu0 %v4432_v1, %s3145_s25  ;;  %v6841_v44 = vld [vmem:[#allocation49_spill] sm:$0xff] }
 0x1a8   : > { %v1387_v1 = vsel %vm1381_vm7, %v1370_v30, %v6841_v44  ;;  %v6846_v44 = vld [vmem:[#allocation89_spill] sm:$0xff] }
 0x1a9   : > { %v4440_v46 = vpop.permute.xlu1 %1012  ;;  %v4442_v18 = vpop.permute.xlu0 %1010 }
 0x1ab   : > { %1226 = vrot.lane.b32.xlu1 %v3569_v48, %s3145_s25  ;;  %1224 = vrot.lane.b32.xlu0 %v6838_v25, %s3145_s25  ;;  %v1372_v48 = vsel %vm1364_vm6, %v3229_v17, %v6843_v27  ;;  %v1404_v25 = vsel %vm1398_vm8, %v1387_v1, %v6844_v53  ;;  %v1204_v27 = vrot.slane %v4196_v33, 3  ;;  %v6848_v53 = vld [vmem:[#allocation52_spill] sm:$0xff] }
 0x1ac   : > { %v1421_v30 = vsel %vm1415_vm9, %v1404_v25, %v6846_v44  ;;  %v1389_v1 = vsel %vm1381_vm7, %v1372_v48, %v6848_v53  ;;  %v6850_v25 = vld [vmem:[#allocation53_spill] sm:$0xff] }
 0x1ad   : > { %v4451_v29 = vpop.permute.xlu1 %1034  ;;  %v4455_v52 = vpop.permute.xlu0 %1032  ;;  %v1388_v44 = vsel %vm1381_vm7, %v1371_v14, %v6850_v25  ;;  %v6853_v53 = vld [vmem:[#allocation73_spill] sm:$0xff] }
 0x1ae   : > { %6840 = vst [vmem:[#allocation18_spill] sm:$0xff] %v4451_v29  ;;  %6842 = vst [vmem:[#allocation22_spill] sm:$0xff] %v4455_v52  ;;  %v6847_v52 = vld [vmem:[#allocation19_spill] sm:$0xff]  ;;  %v4473_v29 = vrot.slane %v4272_v6, 3 }
 0x1af   : > { %1230 = vrot.lane.b32.xlu1 %v3584_v47, %s3145_s25  ;;  %1228 = vrot.lane.b32.xlu0 %v6847_v52, %s3145_s25  ;;  %v1438_v47 = vsel %vm1432_vm10, %v1421_v30, %v4036_v20  ;;  %v6851_v52 = vld [vmem:[#allocation72_spill] sm:$0xff]  ;;  %v4494_v20 = vsel %vm1398_vm8, %v1388_v44, %v6853_v53  ;;  %v4519_v53 = vsel %vm568_vm4, %v1203_v10, %v1204_v27 }
 0x1b0   : > { %v4486_v7 = vsel %vm1398_vm8, %v1389_v1, %v6851_v52  ;;  %v1455_v4 = vsel %vm1449_vm11, %v1438_v47, %v4118_v58  ;;  %v6854_v30 = vld [vmem:[#allocation92_spill] sm:$0xff]  ;;  %v6855_v1 = vld [vmem:[#allocation93_spill] sm:$0xff]  ;;  %v4512_v25 = vsel %vm568_vm4, %v1204_v27, %v4473_v29 }
 0x1b1   : > { %v4479_v62 = vpop.permute.xlu1 %1038  ;;  %v4490_v48 = vpop.permute.xlu0 %1036  ;;  %v1472_v14 = vsel %vm6648_vm12, %v1455_v4, %v4198_v31  ;;  %v1422_v58 = vsel %vm1415_vm9, %v4494_v20, %v6855_v1  ;;  %v6856_v31 = vld [vmem:[#allocation110_spill] sm:$0xff] }
 0x1b2   : > { %6849 = vst [vmem:[#allocation49_spill] sm:$0xff] %v4479_v62  ;;  %6852 = vst [vmem:[#allocation25_spill] sm:$0xff] %v4490_v48  ;;  %v1423_v62 = vsel %vm1415_vm9, %v4486_v7, %v6854_v30  ;;  %v1489_v47 = vsel %vm6647_vm13, %v1472_v14, %v4297_v57  ;;  %v6857_v57 = vld [vmem:[#allocation111_spill] sm:$0xff] }
 0x1b3   : > { %1234 = vrot.lane.b32.xlu1 %v4034_v3, %s3145_s25  ;;  %1232 = vrot.lane.b32.xlu0 %v4039_v0, %s3145_s25  ;;  %v1440_v4 = vsel %vm1432_vm10, %v1423_v62, %v6856_v31  ;;  %v1506_v44 = vsel %vm1500_vm14, %v1489_v47, %v4385_v36  ;;  %v1439_v30 = vsel %vm1432_vm10, %v1422_v58, %v6857_v57 }
 0x1b4   : > { %v1457_v14 = vsel %vm1449_vm11, %v1440_v4, %v4129_v16  ;;  %v1456_v62 = vsel %vm1449_vm11, %v1439_v30, %v4131_v61 }
 0x1b5   : > { %v1043_v52 = vpop.permute.xlu1 %1042  ;;  %v4528_v48 = vpop.permute.xlu0 %1040  ;;  %v1474_v36 = vsel %vm6648_vm12, %v1457_v14, %v4209_v49  ;;  %v1473_v27 = vsel %vm6648_vm12, %v1456_v62, %v4211_v63  ;;  %v6859_v62 = vld [vmem:[#allocation20_spill] sm:$0xff] }
 0x1b6   : > { %v4526_v1 = vsel %vm6628_vm15, %v1506_v44, %v1043_v52  ;;  %6858 = vst [vmem:[#allocation70_spill] sm:$0xff] %v4528_v48  ;;  %v1491_v10 = vsel %vm6647_vm13, %v1474_v36, %v4308_v9  ;;  %v1490_v58 = vsel %vm6647_vm13, %v1473_v27, %v4310_v22  ;;  %v6860_v36 = vld [vmem:[#allocation39_spill] sm:$0xff] }
 0x1b7   : > { %1238 = vrot.lane.b32.xlu1 %v4512_v25, %s3145_s25  ;;  %1236 = vrot.lane.b32.xlu0 %v4519_v53, %s3145_s25  ;;  %v1508_v47 = vsel %vm1500_vm14, %v1491_v10, %v4396_v8  ;;  %v1507_v44 = vsel %vm1500_vm14, %v1490_v58, %v4398_v19  ;;  %v1378_v8 = vsel %vm1364_vm6, %v3342_v26, %v6860_v36  ;;  %v6862_v19 = vld [vmem:[#allocation60_spill] sm:$0xff]  ;;  %v1257_v26 = vrot.slane %v4156_v12, 4  ;;  %s2895_s25 = sshll.u32 %s142_s24, 7 }
 0x1b8   : > { %v1395_v10 = vsel %vm1381_vm7, %v1378_v8, %v6862_v19  ;;  %s6435_s28 = scalar_lea.vmem [#allocation2], %s2895_s25 }
 0x1b9   : > { %v1047_v4 = vpop.permute.xlu1 %1046  ;;  %v1045_v30 = vpop.permute.xlu0 %1044 }
 0x1ba   : > { %v4549_v52 = vsel %vm6628_vm15, %v1508_v47, %v1047_v4  ;;  %v4552_v14 = vsel %vm6628_vm15, %v1507_v44, %v1045_v30  ;;  %v6864_v47 = vld [vmem:[#allocation79_spill] sm:$0xff]  ;;  %v1259_v30 = vrot.slane %v4220_v43, 4 }
 0x1bb   : > { %1268 = vrot.lane.b32.xlu1 %v3617_v59, %s3146_s26  ;;  %1266 = vrot.lane.b32.xlu0 %v6859_v62, %s3146_s26  ;;  %v1412_v4 = vsel %vm1398_vm8, %v1395_v10, %v6864_v47  ;;  %v6865_v59 = vld [vmem:[#allocation99_spill] sm:$0xff]  ;;  %v6866_v62 = vld [vmem:[#allocation42_spill] sm:$0xff] }
 0x1bc   : > { %v1429_v44 = vsel %vm1415_vm9, %v1412_v4, %v6865_v59  ;;  %v1380_v36 = vsel %vm1364_vm6, %v3364_v39, %v6866_v62  ;;  %v6868_v10 = vld [vmem:[#allocation43_spill] sm:$0xff] }
 0x1bd   : > { %v4561_v27 = vpop.permute.xlu1 %1050  ;;  %v4565_v58 = vpop.permute.xlu0 %1048  ;;  %v1446_v8 = vsel %vm1432_vm10, %v1429_v44, %v4077_v34  ;;  %v1379_v47 = vsel %vm1364_vm6, %v3370_v41, %v6868_v10  ;;  %v6871_v62 = vld [vmem:[#allocation63_spill] sm:$0xff]  ;;  %v6872_v34 = vld [vmem:[#allocation81_spill] sm:$0xff]  ;;  %v6873_v10 = vld [vmem:[#allocation82_spill] sm:$0xff] }
 0x1be   : > { %6861 = vst [vmem:[#allocation26_spill] sm:$0xff] %v4561_v27  ;;  %6863 = vst [vmem:[#allocation89_spill] sm:$0xff] %v4565_v58  ;;  %v1463_v59 = vsel %vm1449_vm11, %v1446_v8, %v4158_v60  ;;  %v1396_v58 = vsel %vm1381_vm7, %v1379_v47, %v6871_v62  ;;  %v6874_v60 = vld [vmem:[#allocation102_spill] sm:$0xff] }
 0x1bf   : > { %1272 = vrot.lane.b32.xlu1 %v3630_v51, %s3146_s26  ;;  %1270 = vrot.lane.b32.xlu0 %v6768_v55, %s3146_s26  ;;  %v1256_v51 = vrot.slane %v4161_v23, 4  ;;  %v6869_v55 = vld [vmem:[#allocation62_spill] sm:$0xff] }
 0x1c0   : > { %v1397_v4 = vsel %vm1381_vm7, %v1380_v36, %v6869_v55  ;;  %v4606_v36 = vsel %vm1398_vm8, %v1396_v58, %v6873_v10  ;;  %v1260_v55 = vsel %vm657_vm5, %v1257_v26, %v1259_v30 }
 0x1c1   : > { %v4582_v19 = vpop.permute.xlu1 %1054  ;;  %v4592_v48 = vpop.permute.xlu0 %1052  ;;  %v4598_v44 = vsel %vm1398_vm8, %v1397_v4, %v6872_v34  ;;  %v1258_v62 = vsel %vm657_vm5, %v1256_v51, %v1257_v26  ;;  %v6876_v34 = vld [vmem:[#allocation116_spill] sm:$0xff] }
 0x1c2   : > { %6867 = vst [vmem:[#allocation19_spill] sm:$0xff] %v4582_v19  ;;  %6870 = vst [vmem:[#allocation52_spill] sm:$0xff] %v4592_v48  ;;  %v1480_v19 = vsel %vm6648_vm12, %v1463_v59, %v4245_v28  ;;  %v1431_v8 = vsel %vm1415_vm9, %v4598_v44, %v6874_v60  ;;  %v6875_v28 = vld [vmem:[#allocation103_spill] sm:$0xff]  ;;  %v6879_v60 = vld [vmem:[#allocation132_spill] sm:$0xff] }
 0x1c3   : > { %1276 = vrot.lane.b32.xlu1 %v4075_v38, %s3146_s26  ;;  %v1497_v47 = vsel %vm6647_vm13, %v1480_v19, %v4341_v35  ;;  %1274 = vrot.lane.b32.xlu0 %v4080_v11, %s3146_s26  ;;  %v1430_v38 = vsel %vm1415_vm9, %v4606_v36, %v6875_v28  ;;  %v1448_v58 = vsel %vm1432_vm10, %v1431_v8, %v4088_v5  ;;  %v6877_v19 = vld [vmem:[#allocation131_spill] sm:$0xff]  ;;  %v6902_v48 = vld [vmem:[#allocation48_spill] sm:$0xff] }
 0x1c4   : > { %v1514_v4 = vsel %vm1500_vm14, %v1497_v47, %v4429_v50  ;;  %v1447_v35 = vsel %vm1432_vm10, %v1430_v38, %v6876_v34  ;;  %v1465_v11 = vsel %vm1449_vm11, %v1448_v58, %v6877_v19 }
 0x1c5   : > { %v1059_v59 = vpop.permute.xlu1 %1058  ;;  %v4631_v10 = vpop.permute.xlu0 %1056  ;;  %v1464_v8 = vsel %vm1449_vm11, %v1447_v35, %v6879_v60  ;;  %v1482_v50 = vsel %vm6648_vm12, %v1465_v11, %v4261_v40  ;;  %v6880_v35 = vld [vmem:[#allocation24_spill] sm:$0xff] }
 0x1c6   : > { %v4629_v30 = vsel %vm6628_vm15, %v1514_v4, %v1059_v59  ;;  %6878 = vst [vmem:[#allocation53_spill] sm:$0xff] %v4631_v10  ;;  %v1481_v26 = vsel %vm6648_vm12, %v1464_v8, %v4263_v21  ;;  %v1499_v51 = vsel %vm6647_vm13, %v1482_v50, %v4352_v24  ;;  %v6884_v8 = vld [vmem:[#allocation28_spill] sm:$0xff]  ;;  %v1262_v50 = vrot.slane %v4196_v33, 4 }
 0x1c7   : > { %1280 = vrot.lane.b32.xlu1 %v1260_v55, %s3146_s26  ;;  %1278 = vrot.lane.b32.xlu0 %v1258_v62, %s3146_s26  ;;  %v1498_v47 = vsel %vm6647_vm13, %v1481_v26, %v4354_v2  ;;  %v1516_v28 = vsel %vm1500_vm14, %v1499_v51, %v4440_v46  ;;  %v6881_v62 = vld [vmem:[#allocation27_spill] sm:$0xff]  ;;  %v1264_v26 = vrot.slane %v4272_v6, 4 }
 0x1c8   : > { %v1515_v58 = vsel %vm1500_vm14, %v1498_v47, %v4442_v18  ;;  %v6885_v18 = vld [vmem:[#allocation30_spill] sm:$0xff]  ;;  %v1261_v47 = vrot.slane %v4201_v56, 4 }
 0x1c9   : > { %v1063_v38 = vpop.permute.xlu1 %1062  ;;  %v1061_v4 = vpop.permute.xlu0 %1060 }
 0x1ca   : > { %v1533_v55 = vsel %vm6628_vm15, %v1516_v28, %v1063_v38  ;;  %v1532_v59 = vsel %vm6628_vm15, %v1515_v58, %v1061_v4  ;;  %v6888_v38 = vld [vmem:[#allocation121_spill] sm:$0xff]  ;;  %v6889_v58 = vld [vmem:[#allocation122_spill] sm:$0xff]  ;;  %v1265_v4 = vsel %vm657_vm5, %v1262_v50, %v1264_v26  ;;  %vm1833_vm15 = vcmask 1040384  }
 0x1cb   : > { %1284 = vrot.lane.b32.xlu1 %v6880_v35, %s3146_s26  ;;  %1282 = vrot.lane.b32.xlu0 %v6881_v62, %s3146_s26  ;;  %v1263_v62 = vsel %vm657_vm5, %v1261_v47, %v1262_v50  ;;  %v4706_v47 = vld [vmem:[%s4692_s17 + $0x8] sm:%s4685_s29] }
 0x1cd   : > { %v4655_v11 = vpop.permute.xlu1 %1094  ;;  %v4657_v46 = vpop.permute.xlu0 %1092 }
 0x1ce   : > { %6882 = vst [vmem:[#allocation72_spill] sm:$0xff] %v4655_v11  ;;  %6883 = vst [vmem:[#allocation73_spill] sm:$0xff] %v4657_v46  ;;  %v6913_v46 = vld [vmem:[#allocation14_spill] sm:$0xff] }
 0x1cf   : > { %1288 = vrot.lane.b32.xlu1 %v6884_v8, %s3146_s26  ;;  %1286 = vrot.lane.b32.xlu0 %v6885_v18, %s3146_s26  ;;  %v6914_v11 = vrot.slane %v6913_v46, 1 }
 0x1d1   : > { %v4666_v51 = vpop.permute.xlu1 %1098  ;;  %v4669_v28 = vpop.permute.xlu0 %1096 }
 0x1d2   : > { %6886 = vst [vmem:[#allocation92_spill] sm:$0xff] %v4666_v51  ;;  %6887 = vst [vmem:[#allocation93_spill] sm:$0xff] %v4669_v28 }
 0x1d3   : > { %1292 = vrot.lane.b32.xlu1 %v6888_v38, %s3146_s26  ;;  %1290 = vrot.lane.b32.xlu0 %v6889_v58, %s3146_s26 }
 0x1d5   : > { %v1103_v35 = vpop.permute.xlu1 %1102  ;;  %v4681_v18 = vpop.permute.xlu0 %1100 }
 0x1d6   : > { %v1540_v8 = vsel %vm6626_vm2, %v4526_v1, %v1103_v35  ;;  %6890 = vst [vmem:[#allocation110_spill] sm:$0xff] %v4681_v18  ;;  %v6893_v35 = vld [vmem:[#allocation38_spill] sm:$0xff] }
 0x1d7   : > { %1296 = vrot.lane.b32.xlu1 %v1265_v4, %s3146_s26  ;;  %1294 = vrot.lane.b32.xlu0 %v1263_v62, %s3146_s26  ;;  %v6894_v62 = vld [vmem:[#allocation40_spill] sm:$0xff] }
 0x1d9   : > { %v1107_v26 = vpop.permute.xlu1 %1106  ;;  %v1105_v58 = vpop.permute.xlu0 %1104 }
 0x1da   : > { %v1542_v38 = vsel %vm6626_vm2, %v4549_v52, %v1107_v26  ;;  %v1541_v1 = vsel %vm6626_vm2, %v4552_v14, %v1105_v58  ;;  %v3099_v52 = vld [vmem:[%s4692_s17] sm:%s4685_s29]  ;;  %v6625_v26 = vrot.slane %v4706_v47, 6 }
 0x1db   : > { %1318 = vrot.lane.b32.xlu1 %v3229_v17, %s3147_s18  ;;  %1316 = vrot.lane.b32.xlu0 %v3223_v13, %s3147_s18  ;;  %v266_v14 = vrot.slane %v3099_v52, 6 }
 0x1dd   : > { %v4700_v50 = vpop.permute.xlu1 %1110  ;;  %v4708_v4 = vpop.permute.xlu0 %1108  ;;  %v4726_v13 = vsel %vm247_vm0, %v266_v14, %v6625_v26  ;;  %v4729_v10 = vsel %vm247_vm0, 0.0, %v266_v14  ;;  %v3105_v14 = vld [vmem:[%s4692_s17 + $0x100] sm:%s4685_s29] }
 0x1de   : > { %6891 = vst [vmem:[#allocation111_spill] sm:$0xff] %v4700_v50  ;;  %6892 = vst [vmem:[#allocation20_spill] sm:$0xff] %v4708_v4 }
 0x1df   : > { %1322 = vrot.lane.b32.xlu1 %v6893_v35, %s3147_s18  ;;  %1320 = vrot.lane.b32.xlu0 %v6894_v62, %s3147_s18  ;;  %6897 = vst [vmem:[#allocation79_spill] sm:$0xff] %v4726_v13  ;;  %6898 = vst [vmem:[#allocation99_spill] sm:$0xff] %v4729_v10 }
 0x1e1   : > { %v4715_v17 = vpop.permute.xlu1 %1114  ;;  %v4717_v58 = vpop.permute.xlu0 %1112 }
 0x1e2   : > { %6895 = vst [vmem:[#allocation39_spill] sm:$0xff] %v4715_v17  ;;  %6896 = vst [vmem:[#allocation60_spill] sm:$0xff] %v4717_v58 }
 0x1e3   : > { %1326 = vrot.lane.b32.xlu1 %v4156_v12, %s3147_s18  ;;  %1324 = vrot.lane.b32.xlu0 %v4161_v23, %s3147_s18 }
 0x1e5   : > { %v1119_v52 = vpop.permute.xlu1 %1118  ;;  %v4733_v51 = vpop.permute.xlu0 %1116 }
 0x1e6   : > { %v1548_v18 = vsel %vm6626_vm2, %v4629_v30, %v1119_v52  ;;  %6899 = vst [vmem:[#allocation42_spill] sm:$0xff] %v4733_v51  ;;  %v4751_v52 = vld [vmem:[%s4692_s17 + $0x108] sm:%s4685_s29]  ;;  %s6476_s29 = scalar_lea.vmem (%p3194_p4), %s6523_s3, %s2925_s21 }
 0x1e7   : > { %1330 = vrot.lane.b32.xlu1 %v4726_v13, %s3147_s18  ;;  %1328 = vrot.lane.b32.xlu0 %v4729_v10, %s3147_s18 }
 0x1e9   : > { %v1123_v17 = vpop.permute.xlu1 %1122  ;;  %v1121_v26 = vpop.permute.xlu0 %1120 }
 0x1ea   : > { %v1550_v28 = vsel %vm6626_vm2, %v1533_v55, %v1123_v17  ;;  %v1549_v58 = vsel %vm6626_vm2, %v1532_v59, %v1121_v26  ;;  %v6903_v55 = vld [vmem:[#allocation50_spill] sm:$0xff]  ;;  %v290_v59 = vrot.slane %v3105_v14, 6  ;;  %v6627_v26 = vrot.slane %v4751_v52, 6 }
 0x1eb   : > { %1334 = vrot.lane.b32.xlu1 %v3364_v39, %s3147_s18  ;;  %1332 = vrot.lane.b32.xlu0 %v3370_v41, %s3147_s18  ;;  %vm6631_vm2 = vcmask 392192  }
 0x1ec   : > { %v4771_v41 = vsel %vm247_vm0, %v290_v59, %v6627_v26  ;;  %v4774_v14 = vsel %vm247_vm0, 0.0, %v290_v59  ;;  %v6909_v59 = vld [vmem:[#allocation4_spill] sm:$0xff] }
 0x1ed   : > { %v4745_v30 = vpop.permute.xlu1 %1152  ;;  %v4753_v51 = vpop.permute.xlu0 %1150  ;;  %6906 = vst [vmem:[#allocation82_spill] sm:$0xff] %v4771_v41  ;;  %6907 = vst [vmem:[#allocation102_spill] sm:$0xff] %v4774_v14 }
 0x1ee   : > { %6900 = vst [vmem:[#allocation43_spill] sm:$0xff] %v4745_v30  ;;  %6901 = vst [vmem:[#allocation62_spill] sm:$0xff] %v4753_v51 }
 0x1ef   : > { %1338 = vrot.lane.b32.xlu1 %v6902_v48, %s3147_s18  ;;  %1336 = vrot.lane.b32.xlu0 %v6903_v55, %s3147_s18 }
 0x1f1   : > { %v4760_v39 = vpop.permute.xlu1 %1156  ;;  %v4762_v17 = vpop.permute.xlu0 %1154 }
 0x1f2   : > { %6904 = vst [vmem:[#allocation63_spill] sm:$0xff] %v4760_v39  ;;  %6905 = vst [vmem:[#allocation81_spill] sm:$0xff] %v4762_v17 }
 0x1f3   : > { %1342 = vrot.lane.b32.xlu1 %v4196_v33, %s3147_s18  ;;  %1340 = vrot.lane.b32.xlu0 %v4201_v56, %s3147_s18 }
 0x1f5   : > { %v1161_v30 = vpop.permute.xlu1 %1160  ;;  %v4777_v50 = vpop.permute.xlu0 %1158 }
 0x1f6   : > { %v1557_v39 = vsel %vm6631_vm2, %v1540_v8, %v1161_v30  ;;  %6908 = vst [vmem:[#allocation103_spill] sm:$0xff] %v4777_v50  ;;  %v6910_v8 = vrot.slane %v6909_v59, 1 }
 0x1f7   : > { %1346 = vrot.lane.b32.xlu1 %v4771_v41, %s3147_s18  ;;  %1344 = vrot.lane.b32.xlu0 %v4774_v14, %s3147_s18 }
 0x1f9   : > { %v1165_v17 = vpop.permute.xlu1 %1164  ;;  %v1163_v26 = vpop.permute.xlu0 %1162 }
 0x1fa   : > { %v1559_v51 = vsel %vm6631_vm2, %v1542_v38, %v1165_v17  ;;  %v1558_v4 = vsel %vm6631_vm2, %v1541_v1, %v1163_v26  ;;  %v6918_v26 = vrot.slane %v6909_v59, 2  ;;  %v1834_v17 = vrot.slane %v6894_v62, 7 }
 0x1fb   : > { %1633 = vrot.lane.b32.xlu1 %v3816_v45, %s3133_s5  ;;  %1631 = vrot.lane.b32.xlu0 %v6910_v8, %s3133_s5  ;;  %v6917_v45 = vrot.slane %v6913_v46, 2  ;;  %v1835_v8 = vrot.slane %v6893_v35, 7 }
 0x1fd   : > { %v4790_v30 = vpop.permute.xlu1 %1168  ;;  %v4792_v50 = vpop.permute.xlu0 %1166 }
 0x1fe   : > { %6911 = vst [vmem:[#allocation116_spill] sm:$0xff] %v4790_v30  ;;  %6912 = vst [vmem:[#allocation131_spill] sm:$0xff] %v4792_v50  ;;  %v1847_v50 = vrot.slane %v6902_v48, 7 }
 0x1ff   : > { %1651 = vrot.lane.b32.xlu1 %v6914_v11, %s3133_s5  ;;  %1635 = vrot.lane.b32.xlu0 %v3811_v54, %s3133_s5 }
 0x201   : > { %v4799_v38 = vpop.permute.xlu1 %1172  ;;  %v4801_v1 = vpop.permute.xlu0 %1170 }
 0x202   : > { %6915 = vst [vmem:[#allocation132_spill] sm:$0xff] %v4799_v38  ;;  %6916 = vst [vmem:[#allocation24_spill] sm:$0xff] %v4801_v1  ;;  %v6920_v38 = vrot.slane %v6913_v46, 3  ;;  %v1846_v1 = vrot.slane %v6903_v55, 7 }
 0x203   : > { %1721 = vrot.lane.b32.xlu1 %v6917_v45, %s3134_s6  ;;  %1701 = vrot.lane.b32.xlu0 %v6918_v26, %s3134_s6  ;;  %v6921_v45 = vrot.slane %v6909_v59, 3  ;;  %v1836_v26 = vsel %vm1833_vm15, %v1834_v17, %v1835_v8 }
 0x205   : > { %v1177_v11 = vpop.permute.xlu1 %1176  ;;  %v4812_v30 = vpop.permute.xlu0 %1174 }
 0x206   : > { %v1565_v54 = vsel %vm6631_vm2, %v1548_v18, %v1177_v11  ;;  %6919 = vst [vmem:[#allocation27_spill] sm:$0xff] %v4812_v30 }
 0x207   : > { %1791 = vrot.lane.b32.xlu1 %v6920_v38, %s3135_s7  ;;  %1771 = vrot.lane.b32.xlu0 %v6921_v45, %s3135_s7  ;;  %v1848_v38 = vsel %vm1833_vm15, %v1846_v1, %v1847_v50 }
 0x209   : > { %v1181_v27 = vpop.permute.xlu1 %1180  ;;  %v1179_v18 = vpop.permute.xlu0 %1178 }
 0x20a   : > { %v1567_v35 = vsel %vm6631_vm2, %v1550_v28, %v1181_v27  ;;  %v1566_v11 = vsel %vm6631_vm2, %v1549_v58, %v1179_v18  ;;  %vm6632_vm2 = vcmask 424960  }
 0x20b   : > { %1860 = vrot.lane.b32.xlu1 %v1836_v26, %s3136_s8  ;;  %1858 = vrot.lane.b32.xlu0 %v1834_v17, %s3136_s8 }
 0x20d   : > { %v4828_v30 = vpop.permute.xlu1 %1210  ;;  %v4830_v45 = vpop.permute.xlu0 %1208 }
 0x20e   : > { %6922 = vst [vmem:[#allocation28_spill] sm:$0xff] %v4828_v30  ;;  %6923 = vst [vmem:[#allocation30_spill] sm:$0xff] %v4830_v45  ;;  %v6943_v30 = vld [vmem:[#allocation100_spill] sm:$0xff] }
 0x20f   : > { %1884 = vrot.lane.b32.xlu1 %v1848_v38, %s3136_s8  ;;  %1882 = vrot.lane.b32.xlu0 %v1846_v1, %s3136_s8 }
 0x211   : > { %v4834_v55 = vpop.permute.xlu1 %1214  ;;  %v4836_v27 = vpop.permute.xlu0 %1212 }
 0x212   : > { %6924 = vst [vmem:[#allocation121_spill] sm:$0xff] %v4834_v55  ;;  %6925 = vst [vmem:[#allocation122_spill] sm:$0xff] %v4836_v27 }
 0x213   : > { %1655 = vrot.lane.b32.xlu1 %v3858_v32, %s3133_s5  ;;  %1653 = vrot.lane.b32.xlu0 %v3863_v42, %s3133_s5  ;;  %v6927_v32 = vld [vmem:[#allocation67_spill] sm:$0xff]  ;;  %v6928_v42 = vld [vmem:[#allocation57_spill] sm:$0xff] }
 0x215   : > { %v1219_v28 = vpop.permute.xlu1 %1218  ;;  %v4843_v17 = vpop.permute.xlu0 %1216 }
 0x216   : > { %v1574_v58 = vsel %vm6632_vm2, %v1557_v39, %v1219_v28  ;;  %6926 = vst [vmem:[#allocation40_spill] sm:$0xff] %v4843_v17 }
 0x217   : > { %1886 = vrot.lane.b32.xlu1 %v1847_v50, %s3136_s8  ;;  %1862 = vrot.lane.b32.xlu0 %v1835_v8, %s3136_s8  ;;  %v6934_v8 = vld [vmem:[#allocation90_spill] sm:$0xff] }
 0x219   : > { %v1223_v1 = vpop.permute.xlu1 %1222  ;;  %v1221_v18 = vpop.permute.xlu0 %1220 }
 0x21a   : > { %v1576_v26 = vsel %vm6632_vm2, %v1559_v51, %v1223_v1  ;;  %v1575_v38 = vsel %vm6632_vm2, %v1558_v4, %v1221_v18  ;;  %v6933_v4 = vld [vmem:[#allocation88_spill] sm:$0xff] }
 0x21b   : > { %1657 = vrot.lane.b32.xlu1 %v6927_v32, %s3133_s5  ;;  %1637 = vrot.lane.b32.xlu0 %v6928_v42, %s3133_s5 }
 0x21d   : > { %v4853_v55 = vpop.permute.xlu1 %1226  ;;  %v4855_v39 = vpop.permute.xlu0 %1224 }
 0x21e   : > { %6929 = vst [vmem:[#allocation48_spill] sm:$0xff] %v4853_v55  ;;  %6930 = vst [vmem:[#allocation4_spill] sm:$0xff] %v4855_v39 }
 0x21f   : > { %1705 = vrot.lane.b32.xlu1 %v3902_v37, %s3134_s6  ;;  %1703 = vrot.lane.b32.xlu0 %v3907_v15, %s3134_s6  ;;  %v6936_v37 = vld [vmem:[#allocation65_spill] sm:$0xff]  ;;  %v6937_v15 = vld [vmem:[#allocation55_spill] sm:$0xff] }
 0x221   : > { %v4861_v51 = vpop.permute.xlu1 %1230  ;;  %v4863_v50 = vpop.permute.xlu0 %1228 }
 0x222   : > { %6931 = vst [vmem:[#allocation14_spill] sm:$0xff] %v4861_v51  ;;  %6932 = vst [vmem:[#allocation67_spill] sm:$0xff] %v4863_v50  ;;  %v6938_v50 = vld [vmem:[#allocation85_spill] sm:$0xff] }
 0x223   : > { %1725 = vrot.lane.b32.xlu1 %v6933_v4, %s3134_s6  ;;  %1723 = vrot.lane.b32.xlu0 %v6934_v8, %s3134_s6  ;;  %v6939_v8 = vld [vmem:[#allocation76_spill] sm:$0xff] }
 0x225   : > { %v1235_v28 = vpop.permute.xlu1 %1234  ;;  %v4870_v18 = vpop.permute.xlu0 %1232 }
 0x226   : > { %v1582_v1 = vsel %vm6632_vm2, %v1565_v54, %v1235_v28  ;;  %6935 = vst [vmem:[#allocation57_spill] sm:$0xff] %v4870_v18  ;;  %v6942_v18 = vld [vmem:[#allocation16_spill] sm:$0xff] }
 0x227   : > { %1952 = vrot.lane.b32.xlu1 %v6936_v37, %s3137_s9  ;;  %1932 = vrot.lane.b32.xlu0 %v6937_v15, %s3137_s9 }
 0x229   : > { %v1239_v17 = vpop.permute.xlu1 %1238  ;;  %v1237_v27 = vpop.permute.xlu0 %1236 }
 0x22a   : > { %v1584_v51 = vsel %vm6632_vm2, %v1567_v35, %v1239_v17  ;;  %v1583_v4 = vsel %vm6632_vm2, %v1566_v11, %v1237_v27  ;;  %vm6633_vm2 = vcmask 457728  }
 0x22b   : > { %1727 = vrot.lane.b32.xlu1 %v6938_v50, %s3134_s6  ;;  %1707 = vrot.lane.b32.xlu0 %v6939_v8, %s3134_s6 }
 0x22d   : > { %v4882_v54 = vpop.permute.xlu1 %1268  ;;  %v4884_v28 = vpop.permute.xlu0 %1266 }
 0x22e   : > { %6940 = vst [vmem:[#allocation88_spill] sm:$0xff] %v4882_v54  ;;  %6941 = vst [vmem:[#allocation90_spill] sm:$0xff] %v4884_v28 }
 0x22f   : > { %1775 = vrot.lane.b32.xlu1 %v6942_v18, %s3135_s7  ;;  %1773 = vrot.lane.b32.xlu0 %v6943_v30, %s3135_s7  ;;  %v1837_v30 = vrot.slane %v4161_v23, 7  ;;  %v1838_v18 = vrot.slane %v4156_v12, 7 }
 0x231   : > { %v4890_v35 = vpop.permute.xlu1 %1272  ;;  %v4892_v17 = vpop.permute.xlu0 %1270 }
 0x232   : > { %6944 = vst [vmem:[#allocation85_spill] sm:$0xff] %v4890_v35  ;;  %6945 = vst [vmem:[#allocation76_spill] sm:$0xff] %v4892_v17 }
 0x233   : > { %1795 = vrot.lane.b32.xlu1 %v4034_v3, %s3135_s7  ;;  %1793 = vrot.lane.b32.xlu0 %v4039_v0, %s3135_s7 }
 0x235   : > { %v1277_v11 = vpop.permute.xlu1 %1276  ;;  %v4899_v54 = vpop.permute.xlu0 %1274 }
 0x236   : > { %v1591_v27 = vsel %vm6633_vm2, %v1574_v58, %v1277_v11  ;;  %6946 = vst [vmem:[#allocation16_spill] sm:$0xff] %v4899_v54  ;;  %v6947_v58 = vld [vmem:[#allocation106_spill] sm:$0xff]  ;;  %v6948_v11 = vld [vmem:[#allocation96_spill] sm:$0xff]  ;;  %v1850_v54 = vrot.slane %v4196_v33, 7 }
 0x237   : > { %2022 = vrot.lane.b32.xlu1 %v6927_v32, %s3138_s10  ;;  %2002 = vrot.lane.b32.xlu0 %v6928_v42, %s3138_s10  ;;  %v1839_v32 = vsel %vm1833_vm15, %v1837_v30, %v1838_v18  ;;  %v1849_v42 = vrot.slane %v4201_v56, 7 }
 0x239   : > { %v1281_v3 = vpop.permute.xlu1 %1280  ;;  %v1279_v0 = vpop.permute.xlu0 %1278 }
 0x23a   : > { %v1593_v35 = vsel %vm6633_vm2, %v1576_v26, %v1281_v3  ;;  %v1592_v17 = vsel %vm6633_vm2, %v1575_v38, %v1279_v0  ;;  %v1851_v26 = vsel %vm1833_vm15, %v1849_v42, %v1850_v54 }
 0x23b   : > { %1797 = vrot.lane.b32.xlu1 %v6947_v58, %s3135_s7  ;;  %1777 = vrot.lane.b32.xlu0 %v6948_v11, %s3135_s7 }
 0x23d   : > { %v4916_v55 = vpop.permute.xlu1 %1284  ;;  %v4918_v28 = vpop.permute.xlu0 %1282 }
 0x23e   : > { %6949 = vst [vmem:[#allocation100_spill] sm:$0xff] %v4916_v55  ;;  %6950 = vst [vmem:[#allocation106_spill] sm:$0xff] %v4918_v28 }
 0x23f   : > { %1866 = vrot.lane.b32.xlu1 %v1839_v32, %s3136_s8  ;;  %1864 = vrot.lane.b32.xlu0 %v1837_v30, %s3136_s8 }
 0x241   : > { %v4923_v38 = vpop.permute.xlu1 %1288  ;;  %v4925_v3 = vpop.permute.xlu0 %1286 }
 0x242   : > { %6951 = vst [vmem:[#allocation96_spill] sm:$0xff] %v4923_v38  ;;  %6952 = vst [vmem:[#allocation180_spill] sm:$0xff] %v4925_v3 }
 0x243   : > { %1890 = vrot.lane.b32.xlu1 %v1851_v26, %s3136_s8  ;;  %1888 = vrot.lane.b32.xlu0 %v1849_v42, %s3136_s8  ;;  %v6954_v26 = vld [vmem:[#allocation146_spill] sm:$0xff]  ;;  %v6955_v42 = vld [vmem:[#allocation147_spill] sm:$0xff] }
 0x245   : > { %v1293_v0 = vpop.permute.xlu1 %1292  ;;  %v4930_v55 = vpop.permute.xlu0 %1290 }
 0x246   : > { %v1599_v45 = vsel %vm6633_vm2, %v1582_v1, %v1293_v0  ;;  %6953 = vst [vmem:[#allocation181_spill] sm:$0xff] %v4930_v55 }
 0x247   : > { %2092 = vrot.lane.b32.xlu1 %v6938_v50, %s3139_s11  ;;  %2072 = vrot.lane.b32.xlu0 %v6939_v8, %s3139_s11  ;;  %v6958_v50 = vld [vmem:[#allocation155_spill] sm:$0xff]  ;;  %v6959_v8 = vld [vmem:[#allocation156_spill] sm:$0xff] }
 0x249   : > { %v1297_v30 = vpop.permute.xlu1 %1296  ;;  %v1295_v38 = vpop.permute.xlu0 %1294 }
 0x24a   : > { %v1601_v32 = vsel %vm6633_vm2, %v1584_v51, %v1297_v30  ;;  %v1600_v3 = vsel %vm6633_vm2, %v1583_v4, %v1295_v38  ;;  %vm6644_vm2 = vcmask 490496  }
 0x24b   : > { %1641 = vrot.lane.b32.xlu1 %v6954_v26, %s3133_s5  ;;  %1639 = vrot.lane.b32.xlu0 %v6955_v42, %s3133_s5 }
 0x24d   : > { %v4942_v1 = vpop.permute.xlu1 %1318  ;;  %v4944_v0 = vpop.permute.xlu0 %1316 }
 0x24e   : > { %6956 = vst [vmem:[#allocation146_spill] sm:$0xff] %v4942_v1  ;;  %6957 = vst [vmem:[#allocation147_spill] sm:$0xff] %v4944_v0 }
 0x24f   : > { %1661 = vrot.lane.b32.xlu1 %v6958_v50, %s3133_s5  ;;  %1659 = vrot.lane.b32.xlu0 %v6959_v8, %s3133_s5 }
 0x251   : > { %v4950_v51 = vpop.permute.xlu1 %1322  ;;  %v4952_v30 = vpop.permute.xlu0 %1320 }
 0x252   : > { %6960 = vst [vmem:[#allocation155_spill] sm:$0xff] %v4950_v51  ;;  %6961 = vst [vmem:[#allocation156_spill] sm:$0xff] %v4952_v30 }
 0x253   : > { %1892 = vrot.lane.b32.xlu1 %v1850_v54, %s3136_s8  ;;  %1868 = vrot.lane.b32.xlu0 %v1838_v18, %s3136_s8 }
 0x255   : > { %v1327_v4 = vpop.permute.xlu1 %1326  ;;  %v4959_v55 = vpop.permute.xlu0 %1324 }
 0x256   : > { %v4957_v38 = vsel %vm6644_vm2, %v1591_v27, %v1327_v4  ;;  %6963 = vst [vmem:[#allocation183_spill] sm:$0xff] %v4959_v55 }
 0x257   : > { %6962 = vst [vmem:[#allocation182_spill] sm:$0xff] %v4957_v38  ;;  %1936 = vrot.lane.b32.xlu1 %v4156_v12, %s3137_s9  ;;  %1934 = vrot.lane.b32.xlu0 %v4161_v23, %s3137_s9 }
 0x259   : > { %v1331_v51 = vpop.permute.xlu1 %1330  ;;  %v1329_v54 = vpop.permute.xlu0 %1328 }
 0x25a   : > { %v4966_v30 = vsel %vm6644_vm2, %v1593_v35, %v1331_v51  ;;  %v4969_v18 = vsel %vm6644_vm2, %v1592_v17, %v1329_v54  ;;  %v6970_v51 = vld [vmem:[#allocation152_spill] sm:$0xff]  ;;  %v6971_v54 = vld [vmem:[#allocation143_spill] sm:$0xff] }
 0x25b   : > { %6964 = vst [vmem:[#allocation184_spill] sm:$0xff] %v4966_v30  ;;  %6965 = vst [vmem:[#allocation185_spill] sm:$0xff] %v4969_v18  ;;  %1956 = vrot.lane.b32.xlu1 %v4196_v33, %s3137_s9  ;;  %1954 = vrot.lane.b32.xlu0 %v4201_v56, %s3137_s9 }
 0x25d   : > { %v4975_v27 = vpop.permute.xlu1 %1334  ;;  %v4977_v4 = vpop.permute.xlu0 %1332 }
 0x25e   : > { %6966 = vst [vmem:[#allocation186_spill] sm:$0xff] %v4975_v27  ;;  %6967 = vst [vmem:[#allocation187_spill] sm:$0xff] %v4977_v4  ;;  %v6978_v27 = vld [vmem:[#allocation171_spill] sm:$0xff]  ;;  %v6982_v4 = vld [vmem:[#allocation177_spill] sm:$0xff] }
 0x25f   : > { %2162 = vrot.lane.b32.xlu1 %v6947_v58, %s3140_s14  ;;  %2142 = vrot.lane.b32.xlu0 %v6948_v11, %s3140_s14  ;;  %v6974_v58 = vld [vmem:[#allocation163_spill] sm:$0xff]  ;;  %v6975_v11 = vld [vmem:[#allocation164_spill] sm:$0xff] }
 0x261   : > { %v4983_v35 = vpop.permute.xlu1 %1338  ;;  %v4985_v17 = vpop.permute.xlu0 %1336 }
 0x262   : > { %6968 = vst [vmem:[#allocation188_spill] sm:$0xff] %v4983_v35  ;;  %6969 = vst [vmem:[#allocation189_spill] sm:$0xff] %v4985_v17 }
 0x263   : > { %1663 = vrot.lane.b32.xlu1 %v6970_v51, %s3133_s5  ;;  %1643 = vrot.lane.b32.xlu0 %v6971_v54, %s3133_s5 }
 0x265   : > { %v1343_v30 = vpop.permute.xlu1 %1342  ;;  %v4994_v38 = vpop.permute.xlu0 %1340 }
 0x266   : > { %v4992_v18 = vsel %vm6644_vm2, %v1599_v45, %v1343_v30  ;;  %6973 = vst [vmem:[#allocation143_spill] sm:$0xff] %v4994_v38  ;;  %v6979_v45 = vld [vmem:[#allocation172_spill] sm:$0xff] }
 0x267   : > { %6972 = vst [vmem:[#allocation152_spill] sm:$0xff] %v4992_v18  ;;  %1711 = vrot.lane.b32.xlu1 %v6974_v58, %s3134_s6  ;;  %1709 = vrot.lane.b32.xlu0 %v6975_v11, %s3134_s6  ;;  %v6980_v38 = vld [vmem:[#allocation168_spill] sm:$0xff] }
 0x269   : > { %v1347_v55 = vpop.permute.xlu1 %1346  ;;  %v1345_v17 = vpop.permute.xlu0 %1344 }
 0x26a   : > { %v5001_v35 = vsel %vm6644_vm2, %v1601_v32, %v1347_v55  ;;  %v5004_v1 = vsel %vm6644_vm2, %v1600_v3, %v1345_v17 }
 0x26b   : > { %6976 = vst [vmem:[#allocation163_spill] sm:$0xff] %v5001_v35  ;;  %6977 = vst [vmem:[#allocation164_spill] sm:$0xff] %v5004_v1  ;;  %1731 = vrot.lane.b32.xlu1 %v6978_v27, %s3134_s6  ;;  %1729 = vrot.lane.b32.xlu0 %v6979_v45, %s3134_s6 }
 0x26d   : > { %v5010_v30 = vpop.permute.xlu1 %1633  ;;  %v5012_v18 = vpop.permute.xlu0 %1631 }
 0x26f   : > { %1958 = vrot.lane.b32.xlu1 %v4272_v6, %s3137_s9  ;;  %1938 = vrot.lane.b32.xlu0 %v4220_v43, %s3137_s9 }
 0x271   : > { %v5018_v55 = vpop.permute.xlu1 %1651  ;;  %v5020_v3 = vpop.permute.xlu0 %1635 }
 0x273   : > { %2006 = vrot.lane.b32.xlu1 %v6954_v26, %s3138_s10  ;;  %2004 = vrot.lane.b32.xlu0 %v6955_v42, %s3138_s10  ;;  %v6981_v26 = vld [vmem:[#allocation160_spill] sm:$0xff] }
 0x275   : > { %v5026_v32 = vpop.permute.xlu1 %1721  ;;  %v5028_v17 = vpop.permute.xlu0 %1701 }
 0x277   : > { %2026 = vrot.lane.b32.xlu1 %v6958_v50, %s3138_s10  ;;  %2024 = vrot.lane.b32.xlu0 %v6959_v8, %s3138_s10  ;;  %v6983_v50 = vld [vmem:[#allocation178_spill] sm:$0xff] }
 0x279   : > { %v5034_v35 = vpop.permute.xlu1 %1791  ;;  %v5036_v1 = vpop.permute.xlu0 %1771 }
 0x27b   : > { %1733 = vrot.lane.b32.xlu1 %v6980_v38, %s3134_s6  ;;  %1713 = vrot.lane.b32.xlu0 %v6981_v26, %s3134_s6 }
 0x27d   : > { %v5042_v42 = vpop.permute.xlu1 %1860  ;;  %v5044_v0 = vpop.permute.xlu0 %1858 }
 0x27f   : > { %1781 = vrot.lane.b32.xlu1 %v6982_v4, %s3135_s7  ;;  %1779 = vrot.lane.b32.xlu0 %v6983_v50, %s3135_s7 }
 0x281   : > { %v5050_v8 = vpop.permute.xlu1 %1884  ;;  %v5052_v28 = vpop.permute.xlu0 %1882 }
 0x283   : > { %1801 = vrot.lane.b32.xlu1 %v4512_v25, %s3135_s7  ;;  %1799 = vrot.lane.b32.xlu0 %v4519_v53, %s3135_s7 }
 0x285   : > { %v5058_v39 = vpop.permute.xlu1 %1655  ;;  %v5060_v56 = vpop.permute.xlu0 %1653 }
 0x287   : > { %2028 = vrot.lane.b32.xlu1 %v6970_v51, %s3138_s10  ;;  %2008 = vrot.lane.b32.xlu0 %v6971_v54, %s3138_s10  ;;  %v1840_v51 = vrot.slane %v4729_v10, 7  ;;  %v1841_v54 = vrot.slane %v4726_v13, 7 }
 0x289   : > { %v5066_v33 = vpop.permute.xlu1 %1886  ;;  %v5068_v23 = vpop.permute.xlu0 %1862  ;;  %v1842_v15 = vsel %vm1833_vm15, %v1840_v51, %v1841_v54 }
 0x28a   : > { %6984 = vst [vmem:[#allocation171_spill] sm:$0xff] %v5066_v33  ;;  %6985 = vst [vmem:[#allocation172_spill] sm:$0xff] %v5068_v23 }
 0x28b   : > { %2076 = vrot.lane.b32.xlu1 %v6974_v58, %s3139_s11  ;;  %2074 = vrot.lane.b32.xlu0 %v6975_v11, %s3139_s11  ;;  %v6990_v11 = vld [vmem:[#allocation17_spill] sm:$0xff] }
 0x28d   : > { %v5074_v12 = vpop.permute.xlu1 %1657  ;;  %v5076_v43 = vpop.permute.xlu0 %1637 }
 0x28e   : > { %6986 = vst [vmem:[#allocation168_spill] sm:$0xff] %v5074_v12  ;;  %6987 = vst [vmem:[#allocation160_spill] sm:$0xff] %v5076_v43 }
 0x28f   : > { %2096 = vrot.lane.b32.xlu1 %v6978_v27, %s3139_s11  ;;  %2094 = vrot.lane.b32.xlu0 %v6979_v45, %s3139_s11  ;;  %v1852_v27 = vrot.slane %v4774_v14, 7  ;;  %v1853_v45 = vrot.slane %v4771_v41, 7 }
 0x291   : > { %v5084_v6 = vpop.permute.xlu1 %1705  ;;  %v5086_v58 = vpop.permute.xlu0 %1703 }
 0x292   : > { %6988 = vst [vmem:[#allocation177_spill] sm:$0xff] %v5084_v6  ;;  %6989 = vst [vmem:[#allocation178_spill] sm:$0xff] %v5086_v58  ;;  %v1854_v58 = vsel %vm1833_vm15, %v1852_v27, %v1853_v45 }
 0x293   : > { %1803 = vrot.lane.b32.xlu1 %v4473_v29, %s3135_s7  ;;  %1783 = vrot.lane.b32.xlu0 %v6990_v11, %s3135_s7 }
 0x295   : > { %v5095_v43 = vpop.permute.xlu1 %1725  ;;  %v5097_v37 = vpop.permute.xlu0 %1723 }
 0x296   : > { %6991 = vst [vmem:[#allocation17_spill] sm:$0xff] %v5095_v43  ;;  %6992 = vst [vmem:[#allocation190_spill] sm:$0xff] %v5097_v37 }
 0x297   : > { %1872 = vrot.lane.b32.xlu1 %v1842_v15, %s3136_s8  ;;  %1870 = vrot.lane.b32.xlu0 %v1840_v51, %s3136_s8  ;;  %v6998_v51 = vrot.slane %v4706_v47, 6  ;;  %v1621_v47 = vrot.slane %v4729_v10, 1 }
 0x299   : > { %v5102_v6 = vpop.permute.xlu1 %1952  ;;  %v5104_v12 = vpop.permute.xlu0 %1932 }
 0x29a   : > { %6993 = vst [vmem:[#allocation191_spill] sm:$0xff] %v5102_v6  ;;  %6994 = vst [vmem:[#allocation192_spill] sm:$0xff] %v5104_v12  ;;  %v5121_v12 = vsel %vm247_vm0, %v6998_v51, 0.0  ;;  %v7002_v51 = vrot.slane %v4751_v52, 6 }
 0x29b   : > { %1896 = vrot.lane.b32.xlu1 %v1854_v58, %s3136_s8  ;;  %1894 = vrot.lane.b32.xlu0 %v1852_v27, %s3136_s8  ;;  %6999 = vst [vmem:[#allocation196_spill] sm:$0xff] %v5121_v12  ;;  %v5131_v27 = vrot.slane %v5121_v12, 1 }
 0x29d   : > { %v5108_v23 = vpop.permute.xlu1 %1727  ;;  %v5110_v33 = vpop.permute.xlu0 %1707 }
 0x29e   : > { %6995 = vst [vmem:[#allocation193_spill] sm:$0xff] %v5108_v23  ;;  %6996 = vst [vmem:[#allocation194_spill] sm:$0xff] %v5110_v33 }
 0x29f   : > { %2098 = vrot.lane.b32.xlu1 %v6980_v38, %s3139_s11  ;;  %2078 = vrot.lane.b32.xlu0 %v6981_v26, %s3139_s11  ;;  %v1622_v38 = vrot.slane %v4726_v13, 1 }
 0x2a1   : > { %v5116_v15 = vpop.permute.xlu1 %1775  ;;  %v5123_v58 = vpop.permute.xlu0 %1773 }
 0x2a2   : > { %6997 = vst [vmem:[#allocation195_spill] sm:$0xff] %v5116_v15  ;;  %7000 = vst [vmem:[#allocation197_spill] sm:$0xff] %v5123_v58  ;;  %v5139_v15 = vsel %vm247_vm0, %v7002_v51, 0.0  ;;  %v1623_v51 = vsel %vm390_vm1, %v1621_v47, %v1622_v38 }
 0x2a3   : > { %2146 = vrot.lane.b32.xlu1 %v6982_v4, %s3140_s14  ;;  %2144 = vrot.lane.b32.xlu0 %v6983_v50, %s3140_s14  ;;  %7003 = vst [vmem:[#allocation199_spill] sm:$0xff] %v5139_v15  ;;  %v1625_v4 = vsel %vm390_vm1, %v1622_v38, %v5131_v27  ;;  %v1627_v50 = vrot.slane %v4771_v41, 1 }
 0x2a5   : > { %v5133_v26 = vpop.permute.xlu1 %1795  ;;  %v5141_v58 = vpop.permute.xlu0 %1793 }
 0x2a6   : > { %7001 = vst [vmem:[#allocation198_spill] sm:$0xff] %v5133_v26  ;;  %7004 = vst [vmem:[#allocation200_spill] sm:$0xff] %v5141_v58  ;;  %v5151_v26 = vrot.slane %v5139_v15, 1  ;;  %v1626_v58 = vrot.slane %v4774_v14, 1 }
 0x2a7   : > { %2166 = vrot.lane.b32.xlu1 %v4512_v25, %s3140_s14  ;;  %2164 = vrot.lane.b32.xlu0 %v4519_v53, %s3140_s14 }
 0x2a8   : > { %v1630_v25 = vsel %vm390_vm1, %v1627_v50, %v5151_v26  ;;  %v1628_v23 = vsel %vm390_vm1, %v1626_v58, %v1627_v50 }
 0x2a9   : > { %v5153_v52 = vpop.permute.xlu1 %2022  ;;  %v5157_v33 = vpop.permute.xlu0 %2002 }
 0x2aa   : > { %7005 = vst [vmem:[#allocation201_spill] sm:$0xff] %v5153_v52  ;;  %7006 = vst [vmem:[#allocation202_spill] sm:$0xff] %v5157_v33 }
 0x2ab   : > { %1647 = vrot.lane.b32.xlu1 %v1625_v4, %s3133_s5  ;;  %1645 = vrot.lane.b32.xlu0 %v1623_v51, %s3133_s5 }
 0x2ad   : > { %v5163_v53 = vpop.permute.xlu1 %1797  ;;  %v5166_v6 = vpop.permute.xlu0 %1777 }
 0x2ae   : > { %7007 = vst [vmem:[#allocation203_spill] sm:$0xff] %v5163_v53  ;;  %7008 = vst [vmem:[#allocation204_spill] sm:$0xff] %v5166_v6 }
 0x2af   : > { %1667 = vrot.lane.b32.xlu1 %v1630_v25, %s3133_s5  ;;  %1665 = vrot.lane.b32.xlu0 %v1628_v23, %s3133_s5 }
 0x2b1   : > { %v5170_v38 = vpop.permute.xlu1 %1866  ;;  %v5172_v47 = vpop.permute.xlu0 %1864 }
 0x2b2   : > { %7009 = vst [vmem:[#allocation205_spill] sm:$0xff] %v5170_v38  ;;  %7010 = vst [vmem:[#allocation206_spill] sm:$0xff] %v5172_v47 }
 0x2b3   : > { %1898 = vrot.lane.b32.xlu1 %v1853_v45, %s3136_s8  ;;  %1874 = vrot.lane.b32.xlu0 %v1841_v54, %s3136_s8 }
 0x2b5   : > { %v5176_v33 = vpop.permute.xlu1 %1890  ;;  %v5178_v52 = vpop.permute.xlu0 %1888 }
 0x2b6   : > { %7011 = vst [vmem:[#allocation207_spill] sm:$0xff] %v5176_v33  ;;  %7012 = vst [vmem:[#allocation208_spill] sm:$0xff] %v5178_v52  ;;  %v1692_v52 = vrot.slane %v4726_v13, 2  ;;  %v1691_v33 = vrot.slane %v4729_v10, 2 }
 0x2b7   : > { %1942 = vrot.lane.b32.xlu1 %v4726_v13, %s3137_s9  ;;  %1940 = vrot.lane.b32.xlu0 %v4729_v10, %s3137_s9 }
 0x2b9   : > { %v5184_v58 = vpop.permute.xlu1 %2092  ;;  %v5186_v50 = vpop.permute.xlu0 %2072 }
 0x2ba   : > { %7013 = vst [vmem:[#allocation209_spill] sm:$0xff] %v5184_v58  ;;  %7014 = vst [vmem:[#allocation210_spill] sm:$0xff] %v5186_v50  ;;  %v5202_v50 = vrot.slane %v5121_v12, 2 }
 0x2bb   : > { %1962 = vrot.lane.b32.xlu1 %v4771_v41, %s3137_s9  ;;  %1960 = vrot.lane.b32.xlu0 %v4774_v14, %s3137_s9 }
 0x2bd   : > { %v5192_v54 = vpop.permute.xlu1 %1641  ;;  %v5194_v45 = vpop.permute.xlu0 %1639 }
 0x2be   : > { %7015 = vst [vmem:[#allocation211_spill] sm:$0xff] %v5192_v54  ;;  %7016 = vst [vmem:[#allocation212_spill] sm:$0xff] %v5194_v45  ;;  %v5219_v45 = vrot.slane %v5139_v15, 2  ;;  %v5224_v54 = vsel %vm479_vm3, %v1691_v33, %v1692_v52 }
 0x2bf   : > { %2168 = vrot.lane.b32.xlu1 %v4473_v29, %s3140_s14  ;;  %2148 = vrot.lane.b32.xlu0 %v6990_v11, %s3140_s14  ;;  %v5215_v29 = vsel %vm479_vm3, %v1692_v52, %v5202_v50  ;;  %v1697_v11 = vrot.slane %v4771_v41, 2 }
 0x2c1   : > { %v5204_v58 = vpop.permute.xlu1 %1661  ;;  %v5207_v47 = vpop.permute.xlu0 %1659  ;;  %v5235_v6 = vsel %vm479_vm3, %v1697_v11, %v5219_v45 }
 0x2c2   : > { %7017 = vst [vmem:[#allocation213_spill] sm:$0xff] %v5204_v58  ;;  %7018 = vst [vmem:[#allocation214_spill] sm:$0xff] %v5207_v47  ;;  %v1696_v47 = vrot.slane %v4774_v14, 2 }
 0x2c3   : > { %1669 = vrot.lane.b32.xlu1 %v5151_v26, %s3133_s5  ;;  %1649 = vrot.lane.b32.xlu0 %v5131_v27, %s3133_s5 }
 0x2c5   : > { %v5221_v58 = vpop.permute.xlu1 %1892  ;;  %v5227_v38 = vpop.permute.xlu0 %1868 }
 0x2c6   : > { %7019 = vst [vmem:[#allocation215_spill] sm:$0xff] %v5221_v58  ;;  %7020 = vst [vmem:[#allocation216_spill] sm:$0xff] %v5227_v38  ;;  %v5240_v58 = vsel %vm479_vm3, %v1696_v47, %v1697_v11 }
 0x2c7   : > { %1717 = vrot.lane.b32.xlu1 %v5215_v29, %s3134_s6  ;;  %1715 = vrot.lane.b32.xlu0 %v5224_v54, %s3134_s6 }
 0x2c9   : > { %v5237_v53 = vpop.permute.xlu1 %1936  ;;  %v5242_v33 = vpop.permute.xlu0 %1934 }
 0x2ca   : > { %7021 = vst [vmem:[#allocation217_spill] sm:$0xff] %v5237_v53  ;;  %7022 = vst [vmem:[#allocation218_spill] sm:$0xff] %v5242_v33 }
 0x2cb   : > { %1737 = vrot.lane.b32.xlu1 %v5235_v6, %s3134_s6  ;;  %1735 = vrot.lane.b32.xlu0 %v5240_v58, %s3134_s6 }
 0x2cd   : > { %v5248_v52 = vpop.permute.xlu1 %1956  ;;  %v5250_v38 = vpop.permute.xlu0 %1954 }
 0x2ce   : > { %7023 = vst [vmem:[#allocation219_spill] sm:$0xff] %v5248_v52  ;;  %7024 = vst [vmem:[#allocation220_spill] sm:$0xff] %v5250_v38  ;;  %v1762_v38 = vrot.slane %v4726_v13, 3  ;;  %v5270_v52 = vrot.slane %v5121_v12, 3 }
 0x2cf   : > { %1964 = vrot.lane.b32.xlu1 %v5139_v15, %s3137_s9  ;;  %1944 = vrot.lane.b32.xlu0 %v5121_v12, %s3137_s9  ;;  %v1766_v12 = vrot.slane %v4774_v14, 3  ;;  %v198_v14 = vld [vmem:[%s4692_s17 + $0x18] sm:$0xff] }
 0x2d1   : > { %v5256_v47 = vpop.permute.xlu1 %2162  ;;  %v5258_v11 = vpop.permute.xlu0 %2142 }
 0x2d2   : > { %7025 = vst [vmem:[#allocation221_spill] sm:$0xff] %v5256_v47  ;;  %7026 = vst [vmem:[#allocation222_spill] sm:$0xff] %v5258_v11 }
 0x2d3   : > { %2012 = vrot.lane.b32.xlu1 %v1625_v4, %s3138_s10  ;;  %2010 = vrot.lane.b32.xlu0 %v1623_v51, %s3138_s10  ;;  %v1761_v4 = vrot.slane %v4729_v10, 3  ;;  %v1767_v51 = vrot.slane %v4771_v41, 3 }
 0x2d5   : > { %v5262_v33 = vpop.permute.xlu1 %1663  ;;  %v5264_v53 = vpop.permute.xlu0 %1643 }
 0x2d6   : > { %7027 = vst [vmem:[#allocation223_spill] sm:$0xff] %v5262_v33  ;;  %7028 = vst [vmem:[#allocation224_spill] sm:$0xff] %v5264_v53  ;;  %v7033_v33 = vstv %s4254_s23 }
 0x2d7   : > { %2032 = vrot.lane.b32.xlu1 %v1630_v25, %s3138_s10  ;;  %2030 = vrot.lane.b32.xlu0 %v1628_v23, %s3138_s10  ;;  %v5283_v23 = vsel %vm568_vm4, %v1762_v38, %v5270_v52  ;;  %v5287_v25 = vrot.slane %v5139_v15, 3  ;;  %v204_v10 = vadd.s32 1, %v7033_v33 }
 0x2d9   : > { %v5272_v47 = vpop.permute.xlu1 %1711  ;;  %v5275_v11 = vpop.permute.xlu0 %1709  ;;  %vm206_vm2 = vcmp.lt.s32.totalorder %v204_v10, 16 }
 0x2da   : > { %7029 = vst [vmem:[#allocation225_spill] sm:$0xff] %v5272_v47  ;;  %7030 = vst [vmem:[#allocation226_spill] sm:$0xff] %v5275_v11  ;;  %v5292_v11 = vsel %vm568_vm4, %v1761_v4, %v1762_v38  ;;  %v1768_v38 = vsel %vm568_vm4, %v1766_v12, %v1767_v51  ;;  %v5318_v37 = vsel %vm206_vm2, %v198_v14, 0.0  ;;  %v201_v12 = vld [vmem:[%s4692_s17 + $0x110] sm:$0xff] }
 0x2db   : > { %1739 = vrot.lane.b32.xlu1 %v5219_v45, %s3134_s6  ;;  %1719 = vrot.lane.b32.xlu0 %v5202_v50, %s3134_s6 }
 0x2dd   : > { %v5289_v47 = vpop.permute.xlu1 %1731  ;;  %v5295_v53 = vpop.permute.xlu0 %1729 }
 0x2de   : > { %7031 = vst [vmem:[#allocation227_spill] sm:$0xff] %v5289_v47  ;;  %7032 = vst [vmem:[#allocation228_spill] sm:$0xff] %v5295_v53  ;;  %v1770_v47 = vsel %vm568_vm4, %v1767_v51, %v5287_v25  ;;  %v197_v53 = vld [vmem:[%s4692_s17 + $0x10] sm:$0xff]  ;;  %v202_v51 = vld [vmem:[%s4692_s17 + $0x118] sm:$0xff] }
 0x2df   : > { %1787 = vrot.lane.b32.xlu1 %v5283_v23, %s3135_s7  ;;  %1785 = vrot.lane.b32.xlu0 %v5292_v11, %s3135_s7  ;;  %v209_v13 = vsel %vm206_vm2, %v197_v53, 0.0 }
 0x2e0   : > { %v269_v10 = vrot.slane %v209_v13, 6 }
 0x2e1   : > { %v5305_v15 = vpop.permute.xlu1 %1958  ;;  %v5308_v4 = vpop.permute.xlu0 %1938 }
 0x2e2   : > { %7034 = vst [vmem:[#allocation229_spill] sm:$0xff] %v5305_v15  ;;  %7035 = vst [vmem:[#allocation230_spill] sm:$0xff] %v5308_v4  ;;  %v270_v15 = vrot.slane %v5318_v37, 6 }
 0x2e3   : > { %1807 = vrot.lane.b32.xlu1 %v1770_v47, %s3135_s7  ;;  %1805 = vrot.lane.b32.xlu0 %v1768_v38, %s3135_s7 }
 0x2e5   : > { %v5314_v33 = vpop.permute.xlu1 %2006  ;;  %v5316_v41 = vpop.permute.xlu0 %2004 }
 0x2e6   : > { %7036 = vst [vmem:[#allocation231_spill] sm:$0xff] %v5314_v33  ;;  %7037 = vst [vmem:[#allocation232_spill] sm:$0xff] %v5316_v41  ;;  %v213_v33 = vsel %vm206_vm2, %v201_v12, 0.0  ;;  %v214_v41 = vsel %vm206_vm2, %v202_v51, 0.0 }
 0x2e7   : > { %2034 = vrot.lane.b32.xlu1 %v5151_v26, %s3138_s10  ;;  %2014 = vrot.lane.b32.xlu0 %v5131_v27, %s3138_s10  ;;  %v5338_v26 = vsel %vm247_vm0, %v269_v10, %v270_v15  ;;  %v5341_v27 = vsel %vm247_vm0, 0.0, %v269_v10  ;;  %v293_v13 = vrot.slane %v213_v33, 6  ;;  %v294_v37 = vrot.slane %v214_v41, 6 }
 0x2e9   : > { %v5326_v4 = vpop.permute.xlu1 %2026  ;;  %v5329_v43 = vpop.permute.xlu0 %2024  ;;  %v5354_v51 = vsel %vm247_vm0, %v293_v13, %v294_v37  ;;  %v5357_v33 = vsel %vm247_vm0, 0.0, %v293_v13 }
 0x2ea   : > { %7038 = vst [vmem:[#allocation233_spill] sm:$0xff] %v5326_v4  ;;  %7039 = vst [vmem:[#allocation234_spill] sm:$0xff] %v5329_v43  ;;  %v1856_v10 = vrot.slane %v5354_v51, 7 }
 0x2eb   : > { %2082 = vrot.lane.b32.xlu1 %v5215_v29, %s3139_s11  ;;  %2080 = vrot.lane.b32.xlu0 %v5224_v54, %s3139_s11  ;;  %v1843_v54 = vrot.slane %v5341_v27, 7  ;;  %v1844_v29 = vrot.slane %v5338_v26, 7 }
 0x2ed   : > { %v5335_v14 = vpop.permute.xlu1 %1733  ;;  %v5343_v53 = vpop.permute.xlu0 %1713 }
 0x2ee   : > { %7040 = vst [vmem:[#allocation235_spill] sm:$0xff] %v5335_v14  ;;  %7041 = vst [vmem:[#allocation236_spill] sm:$0xff] %v5343_v53 }
 0x2ef   : > { %2102 = vrot.lane.b32.xlu1 %v5235_v6, %s3139_s11  ;;  %2100 = vrot.lane.b32.xlu0 %v5240_v58, %s3139_s11  ;;  %v1845_v6 = vsel %vm1833_vm15, %v1843_v54, %v1844_v29  ;;  %v1855_v58 = vrot.slane %v5357_v33, 7 }
 0x2f1   : > { %v5351_v12 = vpop.permute.xlu1 %1781  ;;  %v5359_v41 = vpop.permute.xlu0 %1779  ;;  %v1857_v13 = vsel %vm1833_vm15, %v1855_v58, %v1856_v10  ;;  %vm7219_vm15 = vcmask 359424  }
 0x2f2   : > { %7042 = vst [vmem:[#allocation237_spill] sm:$0xff] %v5351_v12  ;;  %7043 = vst [vmem:[#allocation238_spill] sm:$0xff] %v5359_v41 }
 0x2f3   : > { %1809 = vrot.lane.b32.xlu1 %v5287_v25, %s3135_s7  ;;  %1789 = vrot.lane.b32.xlu0 %v5270_v52, %s3135_s7  ;;  %vm7221_vm2 = vmmov %vm7219_vm15 }
 0x2f5   : > { %v5368_v12 = vpop.permute.xlu1 %1801  ;;  %v5370_v43 = vpop.permute.xlu0 %1799 }
 0x2f6   : > { %7044 = vst [vmem:[#allocation239_spill] sm:$0xff] %v5368_v12  ;;  %7045 = vst [vmem:[#allocation240_spill] sm:$0xff] %v5370_v43  ;;  %v1993_v12 = vrot.slane %v5338_v26, 1 }
 0x2f7   : > { %1878 = vrot.lane.b32.xlu1 %v1845_v6, %s3136_s8  ;;  %1876 = vrot.lane.b32.xlu0 %v1843_v54, %s3136_s8 }
 0x2f9   : > { %v5375_v41 = vpop.permute.xlu1 %2028  ;;  %v5377_v53 = vpop.permute.xlu0 %2008 }
 0x2fb   : > { %1902 = vrot.lane.b32.xlu1 %v1857_v13, %s3136_s8  ;;  %1900 = vrot.lane.b32.xlu0 %v1855_v58, %s3136_s8 }
 0x2fd   : > { %v5381_v4 = vpop.permute.xlu1 %2076  ;;  %v5383_v14 = vpop.permute.xlu0 %2074 }
 0x2ff   : > { %2104 = vrot.lane.b32.xlu1 %v5219_v45, %s3139_s11  ;;  %2084 = vrot.lane.b32.xlu0 %v5202_v50, %s3139_s11 }
 0x301   : > { %v5389_v54 = vpop.permute.xlu1 %2096  ;;  %v5391_v6 = vpop.permute.xlu0 %2094 }
 0x303   : > { %2152 = vrot.lane.b32.xlu1 %v5283_v23, %s3140_s14  ;;  %2150 = vrot.lane.b32.xlu0 %v5292_v11, %s3140_s14 }
 0x305   : > { %v5397_v58 = vpop.permute.xlu1 %1803  ;;  %v5399_v13 = vpop.permute.xlu0 %1783 }
 0x307   : > { %2172 = vrot.lane.b32.xlu1 %v1770_v47, %s3140_s14  ;;  %2170 = vrot.lane.b32.xlu0 %v1768_v38, %s3140_s14 }
 0x309   : > { %v5403_v45 = vpop.permute.xlu1 %1872  ;;  %v5405_v50 = vpop.permute.xlu0 %1870 }
 0x30a   : > { %7046 = vst [vmem:[#allocation241_spill] sm:$0xff] %v5403_v45  ;;  %7047 = vst [vmem:[#allocation242_spill] sm:$0xff] %v5405_v50  ;;  %v1992_v45 = vrot.slane %v5341_v27, 1 }
 0x30b   : > { %1904 = vrot.lane.b32.xlu1 %v1856_v10, %s3136_s8  ;;  %1880 = vrot.lane.b32.xlu0 %v1844_v29, %s3136_s8  ;;  %v5428_v29 = vsel %vm247_vm0, %v270_v15, 0.0  ;;  %v2263_v15 = vsel %vm1415_vm9, %v4486_v7, %v5042_v42 }
 0x30c   : > { %v2287_v7 = vsel %vm1432_vm10, %v2263_v15, %v6856_v31  ;;  %v1994_v31 = vsel %vm390_vm1, %v1992_v45, %v1993_v12  ;;  %v1997_v15 = vrot.slane %v5357_v33, 1 }
 0x30d   : > { %v5409_v23 = vpop.permute.xlu1 %1896  ;;  %v5411_v43 = vpop.permute.xlu0 %1894 }
 0x30e   : > { %7048 = vst [vmem:[#allocation243_spill] sm:$0xff] %v5409_v23  ;;  %7049 = vst [vmem:[#allocation244_spill] sm:$0xff] %v5411_v43  ;;  %v5437_v43 = vsel %vm247_vm0, %v294_v37, 0.0  ;;  %v2274_v23 = vsel %vm1415_vm9, %v4606_v36, %v5052_v28  ;;  %vm7211_vm0 = vcmask 326656  }
 0x30f   : > { %1948 = vrot.lane.b32.xlu1 %v5338_v26, %s3137_s9  ;;  %1946 = vrot.lane.b32.xlu0 %v5341_v27, %s3137_s9  ;;  %v2000_v42 = vrot.slane %v5437_v43, 1 }
 0x311   : > { %v5417_v47 = vpop.permute.xlu1 %2098  ;;  %v5419_v11 = vpop.permute.xlu0 %2078 }
 0x312   : > { %7050 = vst [vmem:[#allocation245_spill] sm:$0xff] %v5417_v47  ;;  %7051 = vst [vmem:[#allocation246_spill] sm:$0xff] %v5419_v11  ;;  %v2298_v11 = vsel %vm1432_vm10, %v2274_v23, %v6876_v34 }
 0x313   : > { %1968 = vrot.lane.b32.xlu1 %v5354_v51, %s3137_s9  ;;  %1966 = vrot.lane.b32.xlu0 %v5357_v33, %s3137_s9  ;;  %v2322_v23 = vsel %vm1449_vm11, %v2298_v11, %v6879_v60  ;;  %v2513_v60 = vld [vmem:[%s6521_s1 + $0x10] sm:$0xff]  ;;  %v2514_v11 = vld [vmem:[%s6521_s1 + $0x18] sm:$0xff] }
 0x315   : > { %v5425_v38 = vpop.permute.xlu1 %2146  ;;  %v5430_v10 = vpop.permute.xlu0 %2144 }
 0x317   : > { %2174 = vrot.lane.b32.xlu1 %v5287_v25, %s3140_s14  ;;  %2154 = vrot.lane.b32.xlu0 %v5270_v52, %s3140_s14  ;;  %v2262_v25 = vsel %vm1415_vm9, %v4494_v20, %v5044_v0  ;;  %v2275_v52 = vsel %vm1415_vm9, %v4598_v44, %v5050_v8  ;;  %v7052_v20 = vrot.slane %v5428_v29, 1  ;;  %v1998_v0 = vrot.slane %v5354_v51, 1 }
 0x318   : > { %v2286_v36 = vsel %vm1432_vm10, %v2262_v25, %v6857_v57  ;;  %v2299_v28 = vsel %vm1432_vm10, %v2275_v52, %v4088_v5  ;;  %v2511_v5 = vld [vmem:[%s6521_s1] sm:$0xff]  ;;  %v2512_v57 = vld [vmem:[%s6521_s1 + $0x8] sm:$0xff] }
 0x319   : > { %v5444_v50 = vpop.permute.xlu1 %2166  ;;  %v5453_v37 = vpop.permute.xlu0 %2164  ;;  %v1996_v44 = vsel %vm390_vm1, %v1993_v12, %v7052_v20  ;;  %v2311_v20 = vsel %vm1449_vm11, %v2287_v7, %v4129_v16  ;;  %v2310_v12 = vsel %vm1449_vm11, %v2286_v36, %v4131_v61  ;;  %v2323_v34 = vsel %vm1449_vm11, %v2299_v28, %v6877_v19 }
 0x31a   : > { %v2001_v16 = vsel %vm390_vm1, %v1998_v0, %v2000_v42  ;;  %v3007_v45 = vpack.c.bf16 %v2512_v57, %v2511_v5  ;;  %v1999_v52 = vsel %vm390_vm1, %v1997_v15, %v1998_v0  ;;  %v2335_v61 = vsel %vm6648_vm12, %v2311_v20, %v4209_v49  ;;  %v2516_v57 = vld [vmem:[%s6521_s1 + $0x28] sm:$0xff] }
 0x31b   : > { %1970 = vrot.lane.b32.xlu1 %v5437_v43, %s3137_s9  ;;  %1950 = vrot.lane.b32.xlu0 %v5428_v29, %s3137_s9  ;;  %v2334_v19 = vsel %vm6648_vm12, %v2310_v12, %v4211_v63  ;;  %v2346_v49 = vsel %vm6648_vm12, %v2322_v23, %v4263_v21  ;;  %v2065_v0 = vrot.slane %v5428_v29, 2  ;;  %v3011_v63 = vpack.c.bf16 %v2514_v11, %v2513_v60 }
 0x31c   : > { %3008 = vmatprep.subr.bf16.mxu0 %v3007_v45  ;;  %3031 = vmatprep.subr.bf16.mxu1 %v3007_v45  ;;  %v2062_v28 = vrot.slane %v5341_v27, 2  ;;  %v5528_v15 = vsel %vm6647_vm13, %v2335_v61, %v4308_v9  ;;  %v2370_v21 = vsel %vm6647_vm13, %v2346_v49, %v4354_v2  ;;  %v2358_v5 = vsel %vm6647_vm13, %v2334_v19, %v4310_v22  ;;  %v2515_v9 = vld [vmem:[%s6521_s1 + $0x20] sm:$0xff]  ;;  %v7054_v49 = vld [vmem:[#allocation38_spill] sm:$0xff] }
 0x31d   : > { %v5473_v8 = vpop.permute.xlu1 %1647  ;;  %v5479_v47 = vpop.permute.xlu0 %1645  ;;  %3010 = vmatpush3.bf16.msra.mxu0 %v3007_v45  ;;  %3038 = vmatpush3.bf16.msra.mxu1 %v3007_v45  ;;  %v7053_v2 = vrot.slane %v5428_v29, 1  ;;  %v2068_v22 = vrot.slane %v5354_v51, 2  ;;  %v3015_v12 = vpack.c.bf16 %v2516_v57, %v2515_v9  ;;  %v2067_v45 = vrot.slane %v5357_v33, 2  ;;  %v7055_v9 = vld [vmem:[#allocation50_spill] sm:$0xff] }
 0x31e   : > { %3012 = vmatprep.subr.bf16.mxu0 %v3011_v63  ;;  %3032 = vmatprep.subr.bf16.mxu1 %v3011_v63  ;;  %v2203_v23 = vsel %vm1364_vm6, %v6894_v62, %v5010_v30  ;;  %v2406_v19 = vrot.slane %v2358_v5, 1  ;;  %v2202_v60 = vsel %vm1364_vm6, %v6909_v59, %v5012_v18  ;;  %v2426_v62 = vrot.slane %v2370_v21, 1 }
 0x31f   : > { %2018 = vrot.lane.b32.xlu1 %v1996_v44, %s3138_s10  ;;  %2016 = vrot.lane.b32.xlu0 %v1994_v31, %s3138_s10  ;;  %v2347_v44 = vsel %vm6648_vm12, %v2323_v34, %v4261_v40  ;;  %v2063_v40 = vrot.slane %v5338_v26, 2  ;;  %v2222_v59 = vsel %vm1381_vm7, %v2202_v60, %v5028_v17  ;;  %v2069_v17 = vsel %vm479_vm3, %v2067_v45, %v2068_v22 }
 0x320   : > { %v5535_v20 = vsel %vm6647_vm13, %v2347_v44, %v4352_v24  ;;  %v2407_v44 = vrot.slane %v5528_v15, 1  ;;  %v2214_v5 = vsel %vm1364_vm6, %v6902_v48, %v5058_v39  ;;  %v2213_v57 = vsel %vm1364_vm6, %v7055_v9, %v5060_v56  ;;  %v2519_v48 = vld [vmem:[%s6521_s1 + $0x40] sm:$0xff]  ;;  %v2520_v39 = vld [vmem:[%s6521_s1 + $0x48] sm:$0xff]  ;;  %v7064_v9 = vld [vmem:[#allocation17_spill] sm:$0xff] }
 0x321   : > { %v5498_v25 = vpop.permute.xlu1 %1667  ;;  %v5501_v7 = vpop.permute.xlu0 %1665  ;;  %3014 = vmatpush3.bf16.msra.mxu0 %v3011_v63  ;;  %v2066_v24 = vsel %vm479_vm3, %v2063_v40, %v2065_v0  ;;  %3039 = vmatpush3.bf16.msra.mxu1 %v3011_v63  ;;  %v2427_v30 = vrot.slane %v5535_v20, 1  ;;  %v3023_v60 = vpack.c.bf16 %v2520_v39, %v2519_v48  ;;  %v7068_v39 = vld [vmem:[#allocation193_spill] sm:$0xff] }
 0x322   : > { %3016 = vmatprep.subr.bf16.mxu0 %v3015_v12  ;;  %3033 = vmatprep.subr.bf16.mxu1 %v3015_v12 }
 0x323   : > { %2038 = vrot.lane.b32.xlu1 %v2001_v16, %s3138_s10  ;;  %2036 = vrot.lane.b32.xlu0 %v1999_v52, %s3138_s10  ;;  %v2064_v16 = vsel %vm479_vm3, %v2062_v28, %v2063_v40  ;;  %v2212_v52 = vsel %vm1364_vm6, %v6913_v46, %v5018_v55  ;;  %v2517_v46 = vld [vmem:[%s6521_s1 + $0x30] sm:$0xff]  ;;  %v2518_v55 = vld [vmem:[%s6521_s1 + $0x38] sm:$0xff]  ;;  %v2204_v40 = vsel %vm1364_vm6, %v7054_v49, %v5020_v3 }
 0x324   : > { %v2232_v11 = vsel %vm1381_vm7, %v2212_v52, %v5026_v32  ;;  %v3019_v32 = vpack.c.bf16 %v2518_v55, %v2517_v46  ;;  %v2242_v28 = vsel %vm1398_vm8, %v2222_v59, %v5036_v1  ;;  %v7056_v1 = vld [vmem:[#allocation171_spill] sm:$0xff]  ;;  %v5616_v56 = vsel %vm390_vm1, %v2426_v62, %v2427_v30  ;;  %v7062_v55 = vld [vmem:[#allocation177_spill] sm:$0xff] }
 0x325   : > { %v5521_v36 = vpop.permute.xlu1 %1898  ;;  %v5524_v31 = vpop.permute.xlu0 %1874  ;;  %3018 = vmatpush3.bf16.msra.mxu0 %v3015_v12  ;;  %3040 = vmatpush3.bf16.msra.mxu1 %v3015_v12  ;;  %v2252_v63 = vsel %vm1398_vm8, %v2232_v11, %v5034_v35  ;;  %v5606_v35 = vsel %vm390_vm1, %v2406_v19, %v2407_v44  ;;  %v7058_v12 = vld [vmem:[#allocation168_spill] sm:$0xff]  ;;  %v2135_v52 = vrot.slane %v5428_v29, 3  ;;  %v2133_v19 = vrot.slane %v5338_v26, 3  ;;  %v7061_v62 = vld [vmem:[#allocation55_spill] sm:$0xff]  ;;  %v7065_v26 = vld [vmem:[#allocation190_spill] sm:$0xff] }
 0x326   : > { %3020 = vmatprep.subr.bf16.mxu0 %v3019_v32  ;;  %3034 = vmatprep.subr.bf16.mxu1 %v3019_v32  ;;  %v2276_v3 = vsel %vm1415_vm9, %v2252_v63, %v7056_v1  ;;  %v7060_v11 = vld [vmem:[#allocation160_spill] sm:$0xff]  ;;  %v2224_v59 = vsel %vm1381_vm7, %v2204_v40, %v7062_v55  ;;  %v7066_v1 = vld [vmem:[#allocation191_spill] sm:$0xff] }
 0x327   : > { %2040 = vrot.lane.b32.xlu1 %v2000_v42, %s3138_s10  ;;  %v2070_v42 = vrot.slane %v5437_v43, 2  ;;  %2020 = vrot.lane.b32.xlu0 %v7053_v2, %s3138_s10  ;;  %v2205_v46 = vsel %vm1364_vm6, %v7061_v62, %v7060_v11  ;;  %v7067_v40 = vld [vmem:[#allocation192_spill] sm:$0xff]  ;;  %v2138_v11 = vrot.slane %v5354_v51, 3 }
 0x329   : > { %v5553_v34 = vpop.permute.xlu1 %1942  ;;  %v5563_v61 = vpop.permute.xlu0 %1940  ;;  %v2071_v18 = vsel %vm479_vm3, %v2068_v22, %v2070_v42  ;;  %3022 = vmatpush3.bf16.msra.mxu0 %v3019_v32  ;;  %3041 = vmatpush3.bf16.msra.mxu1 %v3019_v32  ;;  %v2233_v32 = vsel %vm1381_vm7, %v2213_v57, %v7065_v26  ;;  %v2521_v57 = vld [vmem:[%s6521_s1 + $0x50] sm:$0xff]  ;;  %vm7213_vm3 = vmmov %vm7211_vm0 }
 0x32a   : > { %3024 = vmatprep.subr.bf16.mxu0 %v3023_v60  ;;  %3035 = vmatprep.subr.bf16.mxu1 %v3023_v60 }
 0x32b   : > { %2088 = vrot.lane.b32.xlu1 %v2066_v24, %s3139_s11  ;;  %2086 = vrot.lane.b32.xlu0 %v2064_v16, %s3139_s11  ;;  %v7057_v24 = vld [vmem:[#allocation172_spill] sm:$0xff]  ;;  %v7059_v16 = vld [vmem:[#allocation65_spill] sm:$0xff] }
 0x32c   : > { %v2264_v22 = vsel %vm1415_vm9, %v2242_v28, %v7057_v24  ;;  %v2215_v45 = vsel %vm1364_vm6, %v7059_v16, %v7058_v12  ;;  %v2132_v28 = vrot.slane %v5341_v27, 3  ;;  %v2300_v24 = vsel %vm1432_vm10, %v2276_v3, %v7066_v1  ;;  %v7069_v27 = vld [vmem:[#allocation194_spill] sm:$0xff]  ;;  %v7073_v1 = vld [vmem:[#allocation200_spill] sm:$0xff] }
 0x32d   : > { %v5592_v21 = vpop.permute.xlu1 %1962  ;;  %v5601_v2 = vpop.permute.xlu0 %1960  ;;  %v2235_v12 = vsel %vm1381_vm7, %v2215_v45, %v7068_v39  ;;  %v2225_v16 = vsel %vm1381_vm7, %v2205_v46, %v7069_v27  ;;  %3026 = vmatpush3.bf16.msra.mxu0 %v3023_v60  ;;  %v2522_v3 = vld [vmem:[%s6521_s1 + $0x58] sm:$0xff]  ;;  %3042 = vmatpush3.bf16.msra.mxu1 %v3023_v60  ;;  %v7071_v46 = vld [vmem:[#allocation197_spill] sm:$0xff] }
 0x32e   : > { %v3027_v62 = vpack.c.bf16 %v2522_v3, %v2521_v57  ;;  %v7074_v39 = vld [vmem:[#allocation201_spill] sm:$0xff]  ;;  %v7075_v60 = vld [vmem:[#allocation202_spill] sm:$0xff]  ;;  %v7077_v3 = vld [vmem:[#allocation204_spill] sm:$0xff] }
 0x32f   : > { %2108 = vrot.lane.b32.xlu1 %v2071_v18, %s3139_s11  ;;  %2106 = vrot.lane.b32.xlu0 %v2069_v17, %s3139_s11  ;;  %v7063_v18 = vld [vmem:[#allocation178_spill] sm:$0xff]  ;;  %v2234_v17 = vsel %vm1381_vm7, %v2214_v5, %v7064_v9  ;;  %v2140_v5 = vrot.slane %v5437_v43, 3  ;;  %v2324_v51 = vsel %vm1449_vm11, %v2300_v24, %v7074_v39 }
 0x330   : > { %v2223_v49 = vsel %vm1381_vm7, %v2203_v23, %v7063_v18  ;;  %v2288_v23 = vsel %vm1432_vm10, %v2264_v22, %v7067_v40  ;;  %v7070_v22 = vld [vmem:[#allocation195_spill] sm:$0xff]  ;;  %v7072_v18 = vld [vmem:[#allocation198_spill] sm:$0xff]  ;;  %v2253_v40 = vsel %vm1398_vm8, %v2233_v32, %v7073_v1  ;;  %3028 = vmatprep.subr.bf16.mxu0 %v3027_v62  ;;  %3036 = vmatprep.subr.bf16.mxu1 %v3027_v62  ;;  %v7084_v1 = vld [vmem:[#allocation221_spill] sm:$0xff] }
 0x331   : > { %v5637_v63 = vpop.permute.xlu1 %2168  ;;  %v5646_v48 = vpop.permute.xlu0 %2148  ;;  %v2244_v45 = vsel %vm1398_vm8, %v2224_v59, %v7070_v22  ;;  %v2243_v55 = vsel %vm1398_vm8, %v2223_v49, %v7071_v46  ;;  %v2254_v9 = vsel %vm1398_vm8, %v2234_v17, %v7072_v18  ;;  %v2134_v59 = vsel %vm568_vm4, %v2132_v28, %v2133_v19  ;;  %v7076_v49 = vld [vmem:[#allocation203_spill] sm:$0xff]  ;;  %3030 = vmatpush3.bf16.msra.mxu0 %v3027_v62  ;;  %v7079_v32 = vld [vmem:[#allocation206_spill] sm:$0xff] }
 0x332   : > { %v2312_v27 = vsel %vm1449_vm11, %v2288_v23, %v7075_v60  ;;  %v2255_v17 = vsel %vm1398_vm8, %v2235_v12, %v7076_v49  ;;  %v2265_v24 = vsel %vm1415_vm9, %v2243_v55, %v7079_v32  ;;  %v7080_v23 = vld [vmem:[#allocation207_spill] sm:$0xff]  ;;  %v2141_v12 = vsel %vm568_vm4, %v2138_v11, %v2140_v5  ;;  %3043 = vmatpush3.bf16.msra.mxu1 %v3027_v62 }
 0x333   : > { %2110 = vrot.lane.b32.xlu1 %v2070_v42, %s3139_s11  ;;  %2090 = vrot.lane.b32.xlu0 %v2065_v0, %s3139_s11  ;;  %v2136_v42 = vsel %vm568_vm4, %v2133_v19, %v2135_v52  ;;  %v2137_v0 = vrot.slane %v5357_v33, 3  ;;  %v5693_v19 = vsel %vm1398_vm8, %v2225_v16, %v7077_v3  ;;  %v7078_v33 = vld [vmem:[#allocation205_spill] sm:$0xff]  ;;  %v2278_v22 = vsel %vm1415_vm9, %v2254_v9, %v7080_v23  ;;  %v2523_v16 = vld [vmem:[%s6521_s1 + $0x60] sm:$0xf]  ;;  %v7086_v3 = vld [vmem:[#allocation208_spill] sm:$0xff] }
 0x334   : > { %v2266_v28 = vsel %vm1415_vm9, %v2244_v45, %v7078_v33  ;;  %v7081_v45 = vld [vmem:[#allocation209_spill] sm:$0xff]  ;;  %v7082_v46 = vld [vmem:[#allocation79_spill] sm:$0xff]  ;;  %2981 = vmatprep.subr.msk.mxu0 %vm657_vm5, %v2523_v16  ;;  %3037 = vmatprep.subr.msk.mxu1 %vm657_vm5, %v2523_v16 }
 0x335   : > { %v5677_v26 = vpop.permute.xlu1 %1669  ;;  %v5687_v57 = vpop.permute.xlu0 %1649  ;;  %v2210_v55 = vsel %vm1364_vm6, %v7082_v46, %v5473_v8  ;;  %v2139_v9 = vsel %vm568_vm4, %v2137_v0, %v2138_v11  ;;  %v7085_v60 = vld [vmem:[#allocation99_spill] sm:$0xff]  ;;  %v2277_v11 = vsel %vm1415_vm9, %v2253_v40, %v7086_v3  ;;  %v7087_v0 = vld [vmem:[#allocation222_spill] sm:$0xff]  ;;  %2982 = vmatpush3.msk.msra.mxu0 %vm657_vm5, %v2523_v16  ;;  %v7089_v23 = vld [vmem:[#allocation217_spill] sm:$0xff] }
 0x336   : > { %3044 = vmatpush3.msk.msra.mxu1 %vm657_vm5, %v2523_v16  ;;  %v7091_v40 = vld [vmem:[#allocation219_spill] sm:$0xff]  ;;  %v7097_v3 = vld [vmem:[#allocation224_spill] sm:$0xff]  ;;  %vm7215_vm4 = vmmov %vm7211_vm0 }
 0x337   : > { %2158 = vrot.lane.b32.xlu1 %v2136_v42, %s3140_s14  ;;  %2156 = vrot.lane.b32.xlu0 %v2134_v59, %s3140_s14  ;;  %v2348_v42 = vsel %vm6648_vm12, %v2324_v51, %v7081_v45  ;;  %v7083_v59 = vld [vmem:[#allocation210_spill] sm:$0xff]  ;;  %v2209_v51 = vsel %vm1364_vm6, %v7085_v60, %v5479_v47  ;;  %v2290_v45 = vsel %vm1432_vm10, %v2266_v28, %v7089_v23  ;;  %v7094_v60 = vld [vmem:[#allocation223_spill] sm:$0xff]  ;;  %vm7217_vm5 = vmmov %vm7211_vm0 }
 0x338   : > { %v2336_v62 = vsel %vm6648_vm12, %v2312_v27, %v7083_v59  ;;  %v2372_v39 = vsel %vm6647_vm13, %v2348_v42, %v7084_v1  ;;  %v7088_v27 = vld [vmem:[#allocation215_spill] sm:$0xff]  ;;  %v7090_v42 = vld [vmem:[#allocation218_spill] sm:$0xff] }
 0x339   : > { %v1718_v18 = vpop.permute.xlu1 %1717  ;;  %v1716_v8 = vpop.permute.xlu0 %1715  ;;  %v2360_v33 = vsel %vm6647_vm13, %v2336_v62, %v7087_v0  ;;  %v2279_v47 = vsel %vm1415_vm9, %v2255_v17, %v7088_v27  ;;  %v2289_v46 = vsel %vm1432_vm10, %v2265_v24, %v7090_v42  ;;  %v2429_v59 = vrot.slane %v2372_v39, 1  ;;  %v7093_v62 = vld [vmem:[#allocation82_spill] sm:$0xff]  ;;  %v7098_v39 = vld [vmem:[#allocation141_spill] sm:$0xff]  ;;  %v7099_v0 = vld [vmem:[#allocation231_spill] sm:$0xff] }
 0x33a   : > { %v5725_v49 = vsel %vm1381_vm7, %v2210_v55, %v1718_v18  ;;  %v5732_v32 = vsel %vm1381_vm7, %v2209_v51, %v1716_v8  ;;  %v2302_v55 = vsel %vm1432_vm10, %v2278_v22, %v7091_v40  ;;  %v7092_v18 = vld [vmem:[#allocation220_spill] sm:$0xff]  ;;  %v2220_v17 = vsel %vm1364_vm6, %v7093_v62, %v5498_v25  ;;  %v7095_v51 = vld [vmem:[#allocation150_spill] sm:$0xff]  ;;  %v7102_v40 = vld [vmem:[#allocation233_spill] sm:$0xff] }
 0x33b   : > { %2178 = vrot.lane.b32.xlu1 %v2141_v12, %s3140_s14  ;;  %2176 = vrot.lane.b32.xlu0 %v2139_v9, %s3140_s14  ;;  %v2301_v12 = vsel %vm1432_vm10, %v2277_v11, %v7092_v18  ;;  %v2409_v28 = vrot.slane %v2360_v33, 1  ;;  %v2218_v24 = vsel %vm1364_vm6, %v7095_v51, %v7094_v60  ;;  %v7096_v9 = vld [vmem:[#allocation102_spill] sm:$0xff]  ;;  %v2208_v11 = vsel %vm1364_vm6, %v7098_v39, %v7097_v3  ;;  %v7100_v33 = vld [vmem:[#allocation235_spill] sm:$0xff]  ;;  %v7103_v62 = vld [vmem:[#allocation236_spill] sm:$0xff] }
 0x33c   : > { %v2219_v16 = vsel %vm1364_vm6, %v7096_v9, %v5501_v7  ;;  %v2314_v25 = vsel %vm1449_vm11, %v2290_v45, %v7099_v0  ;;  %v2238_v27 = vsel %vm1381_vm7, %v2218_v24, %v7100_v33  ;;  %v7101_v7 = vld [vmem:[#allocation232_spill] sm:$0xff]  ;;  %v2326_v18 = vsel %vm1449_vm11, %v2302_v55, %v7102_v40  ;;  %v7106_v24 = vld [vmem:[#allocation229_spill] sm:$0xff]  ;;  %v7107_v9 = vld [vmem:[#allocation230_spill] sm:$0xff] }
 0x33d   : > { %v1738_v1 = vpop.permute.xlu1 %1737  ;;  %v1736_v8 = vpop.permute.xlu0 %1735  ;;  %v2313_v42 = vsel %vm1449_vm11, %v2289_v46, %v7101_v7  ;;  %v2258_v45 = vsel %vm1398_vm8, %v2238_v27, %v5397_v58  ;;  %v2350_v58 = vsel %vm6648_vm12, %v2326_v18, %v5389_v54 }
 0x33e   : > { %v5758_v22 = vsel %vm1381_vm7, %v2220_v17, %v1738_v1  ;;  %v5768_v23 = vsel %vm1381_vm7, %v2219_v16, %v1736_v8  ;;  %v2228_v17 = vsel %vm1381_vm7, %v2208_v11, %v7103_v62  ;;  %v7104_v1 = vld [vmem:[#allocation234_spill] sm:$0xff]  ;;  %v2282_v55 = vsel %vm1415_vm9, %v2258_v45, %v5521_v36 }
 0x33f   : > { %2180 = vrot.lane.b32.xlu1 %v2140_v5, %s3140_s14  ;;  %2160 = vrot.lane.b32.xlu0 %v2135_v52, %s3140_s14  ;;  %v2325_v43 = vsel %vm1449_vm11, %v2301_v12, %v7104_v1  ;;  %v2338_v5 = vsel %vm6648_vm12, %v2314_v25, %v5381_v4  ;;  %v2248_v46 = vsel %vm1398_vm8, %v2228_v17, %v5399_v13  ;;  %s3148_s14 = smov 64  }
 0x340   : > { %v2349_v29 = vsel %vm6648_vm12, %v2325_v43, %v5391_v6  ;;  %v2270_v52 = vsel %vm1415_vm9, %v2248_v46, %v5524_v31  ;;  %v2337_v13 = vsel %vm6648_vm12, %v2313_v42, %v5383_v14  ;;  %v2374_v36 = vsel %vm6647_vm13, %v2350_v58, %v5444_v50  ;;  %v7105_v6 = vld [vmem:[#allocation216_spill] sm:$0xff] }
 0x341   : > { %v1965_v60 = vpop.permute.xlu1 %1964  ;;  %v1945_v4 = vpop.permute.xlu0 %1944  ;;  %v2373_v51 = vsel %vm6647_vm13, %v2349_v29, %v5453_v37  ;;  %v2267_v31 = vsel %vm1415_vm9, %v5693_v19, %v7105_v6  ;;  %v2303_v14 = vsel %vm1432_vm10, %v2279_v47, %v7106_v24  ;;  %v2362_v50 = vsel %vm6647_vm13, %v2338_v5, %v5425_v38  ;;  %v7111_v42 = vld [vmem:[#allocation196_spill] sm:$0xff] }
 0x342   : > { %v5799_v12 = vsel %vm1432_vm10, %v2282_v55, %v1965_v60  ;;  %v5808_v54 = vsel %vm1432_vm10, %v2270_v52, %v1945_v4  ;;  %v2361_v37 = vsel %vm6647_vm13, %v2337_v13, %v5430_v10  ;;  %v2291_v16 = vsel %vm1432_vm10, %v2267_v31, %v7107_v9 }
 0x343   : > { %2462 = vrot.lane.b32.xlu1 %v5616_v56, %s3148_s14  ;;  %2446 = vrot.lane.b32.xlu0 %v5606_v35, %s3148_s14  ;;  %v2327_v56 = vsel %vm1449_vm11, %v2303_v14, %v5375_v41  ;;  %v2430_v19 = vsel %vm390_vm1, %v2427_v30, %v2429_v59  ;;  %v2410_v38 = vsel %vm390_vm1, %v2407_v44, %v2409_v28  ;;  %v7108_v35 = vld [vmem:[#allocation245_spill] sm:$0xff]  ;;  %v2432_v3 = vrot.slane %v2374_v36, 1  ;;  %v7109_v41 = vld [vmem:[#allocation246_spill] sm:$0xff] }
 0x344   : > { %v2315_v10 = vsel %vm1449_vm11, %v2291_v16, %v5377_v53  ;;  %v2351_v47 = vsel %vm6648_vm12, %v2327_v56, %v7108_v35  ;;  %v2431_v39 = vrot.slane %v2373_v51, 1  ;;  %v2412_v20 = vrot.slane %v2362_v50, 1  ;;  %v7112_v50 = vld [vmem:[#allocation211_spill] sm:$0xff]  ;;  %v7114_v16 = vld [vmem:[#allocation212_spill] sm:$0xff]  ;;  %v7115_v56 = vld [vmem:[#allocation129_spill] sm:$0xff] }
 0x345   : > { %v5827_v8 = vpop.permute.xlu1 %2012  ;;  %v5839_v11 = vpop.permute.xlu0 %2010  ;;  %v2339_v0 = vsel %vm6648_vm12, %v2315_v10, %v7109_v41  ;;  %v2411_v25 = vrot.slane %v2361_v37, 1  ;;  %v2375_v15 = vsel %vm6647_vm13, %v2351_v47, %v5637_v63  ;;  %v7110_v63 = vld [vmem:[#allocation199_spill] sm:$0xff]  ;;  %v2211_v40 = vsel %vm1364_vm6, %v7111_v42, %v5687_v57  ;;  %v7113_v37 = vld [vmem:[#allocation128_spill] sm:$0xff]  ;;  %v7117_v35 = vld [vmem:[#allocation226_spill] sm:$0xff] }
 0x346   : > { %v2363_v53 = vsel %vm6647_vm13, %v2339_v0, %v5646_v48  ;;  %v2434_v30 = vrot.slane %v2375_v15, 1  ;;  %v2433_v28 = vsel %vm390_vm1, %v2431_v39, %v2432_v3  ;;  %v2221_v48 = vsel %vm1364_vm6, %v7110_v63, %v5677_v26  ;;  %v7119_v0 = vld [vmem:[#allocation238_spill] sm:$0xff] }
 0x347   : > { %2464 = vrot.lane.b32.xlu1 %v2430_v19, %s3148_s14  ;;  %2448 = vrot.lane.b32.xlu0 %v2410_v38, %s3148_s14  ;;  %v2414_v33 = vrot.slane %v2363_v53, 1  ;;  %v2413_v27 = vsel %vm390_vm1, %v2411_v25, %v2412_v20  ;;  %v2207_v9 = vsel %vm1364_vm6, %v7113_v37, %v7112_v50  ;;  %v2206_v19 = vsel %vm1364_vm6, %v7115_v56, %v7114_v16  ;;  %v7116_v38 = vld [vmem:[#allocation225_spill] sm:$0xff]  ;;  %v7125_v42 = vld [vmem:[#allocation138_spill] sm:$0xff]  ;;  %v7130_v37 = vld [vmem:[#allocation243_spill] sm:$0xff] }
 0x348   : > { %v2435_v17 = vsel %vm390_vm1, %v2432_v3, %v2434_v30  ;;  %v2227_v10 = vsel %vm1381_vm7, %v2207_v9, %v7116_v38  ;;  %v2226_v47 = vsel %vm1381_vm7, %v2206_v19, %v7117_v35  ;;  %v7118_v3 = vld [vmem:[#allocation237_spill] sm:$0xff]  ;;  %v7131_v56 = vld [vmem:[#allocation244_spill] sm:$0xff] }
 0x349   : > { %v5849_v44 = vpop.permute.xlu1 %2032  ;;  %v5851_v59 = vpop.permute.xlu0 %2030  ;;  %v2415_v1 = vsel %vm390_vm1, %v2412_v20, %v2414_v33  ;;  %v2247_v39 = vsel %vm1398_vm8, %v2227_v10, %v7118_v3  ;;  %v2246_v20 = vsel %vm1398_vm8, %v2226_v47, %v7119_v0  ;;  %v7120_v25 = vld [vmem:[#allocation241_spill] sm:$0xff] }
 0x34a   : > { %v2269_v15 = vsel %vm1415_vm9, %v2247_v39, %v7120_v25  ;;  %v7121_v30 = vld [vmem:[#allocation213_spill] sm:$0xff] }
 0x34b   : > { %2466 = vrot.lane.b32.xlu1 %v2433_v28, %s3148_s14  ;;  %2450 = vrot.lane.b32.xlu0 %v2413_v27, %s3148_s14  ;;  %v7122_v28 = vld [vmem:[#allocation137_spill] sm:$0xff]  ;;  %v7123_v27 = vld [vmem:[#allocation242_spill] sm:$0xff] }
 0x34c   : > { %v2217_v33 = vsel %vm1364_vm6, %v7122_v28, %v7121_v30  ;;  %v2268_v63 = vsel %vm1415_vm9, %v2246_v20, %v7123_v27 }
 0x34d   : > { %v1740_v7 = vpop.permute.xlu1 %1739  ;;  %v1720_v62 = vpop.permute.xlu0 %1719 }
 0x34e   : > { %v2241_v18 = vsel %vm1381_vm7, %v2221_v48, %v1740_v7  ;;  %v2231_v45 = vsel %vm1381_vm7, %v2211_v40, %v1720_v62  ;;  %v2293_v48 = vsel %vm1432_vm10, %v2269_v15, %v5553_v34  ;;  %v7124_v7 = vld [vmem:[#allocation214_spill] sm:$0xff] }
 0x34f   : > { %2468 = vrot.lane.b32.xlu1 %v2435_v17, %s3148_s14  ;;  %2452 = vrot.lane.b32.xlu0 %v2415_v1, %s3148_s14  ;;  %v2216_v40 = vsel %vm1364_vm6, %v7125_v42, %v7124_v7  ;;  %v2292_v17 = vsel %vm1432_vm10, %v2268_v63, %v5563_v61  ;;  %v7127_v1 = vld [vmem:[#allocation228_spill] sm:$0xff] }
 0x350   : > { %v2316_v34 = vsel %vm1449_vm11, %v2292_v17, %v5839_v11 }
 0x351   : > { %v1788_v43 = vpop.permute.xlu1 %1787  ;;  %v1786_v5 = vpop.permute.xlu0 %1785 }
 0x352   : > { %v5871_v26 = vsel %vm1398_vm8, %v5725_v49, %v1788_v43  ;;  %v5875_v57 = vsel %vm1398_vm8, %v5732_v32, %v1786_v5  ;;  %v2236_v43 = vsel %vm1381_vm7, %v2216_v40, %v7127_v1  ;;  %v7128_v5 = vld [vmem:[#allocation239_spill] sm:$0xff] }
 0x355   : > { %v1808_v46 = vpop.permute.xlu1 %1807  ;;  %v1806_v60 = vpop.permute.xlu0 %1805 }
 0x356   : > { %v5879_v55 = vsel %vm1398_vm8, %v5758_v22, %v1808_v46  ;;  %v5883_v58 = vsel %vm1398_vm8, %v5768_v23, %v1806_v60 }
 0x359   : > { %v5885_v29 = vpop.permute.xlu1 %2034  ;;  %v5887_v52 = vpop.permute.xlu0 %2014 }
 0x35a   : > { %v2330_v63 = vsel %vm1449_vm11, %v5799_v12, %v5885_v29 }
 0x35d   : > { %v2083_v49 = vpop.permute.xlu1 %2082  ;;  %v2081_v4 = vpop.permute.xlu0 %2080 }
 0x361   : > { %v2103_v13 = vpop.permute.xlu1 %2102  ;;  %v2101_v36 = vpop.permute.xlu0 %2100 }
 0x365   : > { %v1810_v32 = vpop.permute.xlu1 %1809  ;;  %v1790_v6 = vpop.permute.xlu0 %1789 }
 0x366   : > { %v5890_v51 = vsel %vm1398_vm8, %v2241_v18, %v1810_v32  ;;  %v5893_v22 = vsel %vm1398_vm8, %v2231_v45, %v1790_v6  ;;  %v7126_v18 = vld [vmem:[#allocation227_spill] sm:$0xff]  ;;  %v2317_v45 = vsel %vm1449_vm11, %v2293_v48, %v5827_v8  ;;  %v7129_v6 = vld [vmem:[#allocation240_spill] sm:$0xff]  ;;  %v2340_v8 = vsel %vm6648_vm12, %v2316_v34, %v2081_v4 }
 0x367   : > { %v2237_v62 = vsel %vm1381_vm7, %v2217_v33, %v7126_v18  ;;  %v2341_v60 = vsel %vm6648_vm12, %v2317_v45, %v2083_v49  ;;  %v2256_v50 = vsel %vm1398_vm8, %v2236_v43, %v7129_v6  ;;  %v2318_v48 = vsel %vm1449_vm11, %v5808_v54, %v5887_v52 }
 0x368   : > { %v2257_v46 = vsel %vm1398_vm8, %v2237_v62, %v7128_v5  ;;  %v2280_v19 = vsel %vm1415_vm9, %v2256_v50, %v7131_v56  ;;  %v7132_v5 = vld [vmem:[#allocation29_spill] sm:$0xff] }
 0x369   : > { %v5895_v31 = vpop.permute.xlu1 %1878  ;;  %v5897_v23 = vpop.permute.xlu0 %1876  ;;  %v2281_v61 = vsel %vm1415_vm9, %v2257_v46, %v7130_v37  ;;  %v2304_v10 = vsel %vm1432_vm10, %v2280_v19, %v5601_v2  ;;  %v7133_v46 = vld [vmem:[#allocation6_spill] sm:$0xff]  ;;  %v7136_v37 = vld [vmem:[#allocation32_spill] sm:$0xff] }
 0x36a   : > { %v2305_v11 = vsel %vm1432_vm10, %v2281_v61, %v5592_v21  ;;  %v2328_v4 = vsel %vm1449_vm11, %v2304_v10, %v5851_v59  ;;  %v1367_v34 = vsel %vm1364_vm6, %v7133_v46, %v7132_v5  ;;  %v7137_v61 = vld [vmem:[#allocation5_spill] sm:$0xff]  ;;  %v7140_v19 = vld [vmem:[#allocation34_spill] sm:$0xff] }
 0x36b   : > { %v2329_v35 = vsel %vm1449_vm11, %v2305_v11, %v5849_v44  ;;  %v2352_v0 = vsel %vm6648_vm12, %v2328_v4, %v2101_v36  ;;  %v7141_v11 = vld [vmem:[#allocation10_spill] sm:$0xff]  ;;  %v7143_v10 = vld [vmem:[#allocation9_spill] sm:$0xff]  ;;  %v7145_v4 = vld [vmem:[#allocation12_spill] sm:$0xff] }
 0x36c   : > { %v2353_v3 = vsel %vm6648_vm12, %v2329_v35, %v2103_v13  ;;  %v7157_v46 = vld [vmem:[#allocation66_spill] sm:$0xff] }
 0x36d   : > { %v5899_v24 = vpop.permute.xlu1 %1902  ;;  %v5901_v14 = vpop.permute.xlu0 %1900 }
 0x371   : > { %v2105_v41 = vpop.permute.xlu1 %2104  ;;  %v2085_v53 = vpop.permute.xlu0 %2084 }
 0x372   : > { %v2354_v7 = vsel %vm6648_vm12, %v2330_v63, %v2105_v41  ;;  %v2342_v40 = vsel %vm6648_vm12, %v2318_v48, %v2085_v53  ;;  %v7151_v63 = vld [vmem:[#allocation47_spill] sm:$0xff] }
 0x373   : > { %v1384_v48 = vsel %vm1381_vm7, %v1367_v34, %v7151_v63 }
 0x375   : > { %v2153_v32 = vpop.permute.xlu1 %2152  ;;  %v2151_v16 = vpop.permute.xlu0 %2150 }
 0x376   : > { %v2365_v9 = vsel %vm6647_vm13, %v2341_v60, %v2153_v32  ;;  %v2364_v49 = vsel %vm6647_vm13, %v2340_v8, %v2151_v16  ;;  %v7134_v60 = vld [vmem:[#allocation31_spill] sm:$0xff]  ;;  %v1368_v8 = vsel %vm1364_vm6, %v7137_v61, %v7136_v37  ;;  %v7139_v16 = vld [vmem:[#allocation8_spill] sm:$0xff]  ;;  %v7159_v37 = vld [vmem:[#allocation69_spill] sm:$0xff] }
 0x377   : > { %v2417_v38 = vrot.slane %v2365_v9, 1  ;;  %v2416_v47 = vrot.slane %v2364_v49, 1  ;;  %v7135_v32 = vld [vmem:[#allocation7_spill] sm:$0xff]  ;;  %v7138_v9 = vld [vmem:[#allocation33_spill] sm:$0xff]  ;;  %v1401_v61 = vsel %vm1398_vm8, %v1384_v48, %v7159_v37  ;;  %v7171_v48 = vld [vmem:[#allocation98_spill] sm:$0xff] }
 0x378   : > { %v1365_v6 = vsel %vm1364_vm6, %v7135_v32, %v7134_v60  ;;  %v1366_v56 = vsel %vm1364_vm6, %v7139_v16, %v7138_v9  ;;  %v7142_v49 = vld [vmem:[#allocation35_spill] sm:$0xff]  ;;  %v7158_v32 = vld [vmem:[#allocation68_spill] sm:$0xff]  ;;  %v7178_v37 = vld [vmem:[#allocation114_spill] sm:$0xff] }
 0x379   : > { %v2173_v39 = vpop.permute.xlu1 %2172  ;;  %v2171_v20 = vpop.permute.xlu0 %2170  ;;  %v2418_v25 = vsel %vm390_vm1, %v2416_v47, %v2417_v38  ;;  %v1373_v35 = vsel %vm1364_vm6, %v7143_v10, %v7142_v49  ;;  %v7144_v47 = vld [vmem:[#allocation36_spill] sm:$0xff]  ;;  %v7161_v16 = vld [vmem:[#allocation75_spill] sm:$0xff] }
 0x37a   : > { %v2377_v21 = vsel %vm6647_vm13, %v2353_v3, %v2173_v39  ;;  %v2376_v2 = vsel %vm6647_vm13, %v2352_v0, %v2171_v20  ;;  %2454 = vrot.lane.b32.xlu0 %v2418_v25, %s3148_s14  ;;  %v1376_v3 = vsel %vm1364_vm6, %v7145_v4, %v7144_v47  ;;  %v7146_v39 = vld [vmem:[#allocation37_spill] sm:$0xff]  ;;  %v7147_v0 = vld [vmem:[#allocation11_spill] sm:$0xff]  ;;  %v7148_v20 = vld [vmem:[#allocation44_spill] sm:$0xff] }
 0x37b   : > { %v2437_v15 = vrot.slane %v2377_v21, 1  ;;  %v2436_v44 = vrot.slane %v2376_v2, 1  ;;  %v1375_v21 = vsel %vm1364_vm6, %v7147_v0, %v7146_v39  ;;  %v1383_v25 = vsel %vm1381_vm7, %v1366_v56, %v7148_v20  ;;  %v7164_v10 = vld [vmem:[#allocation83_spill] sm:$0xff]  ;;  %v7165_v47 = vld [vmem:[#allocation84_spill] sm:$0xff]  ;;  %v7168_v20 = vld [vmem:[#allocation94_spill] sm:$0xff] }
 0x37c   : > { %v7167_v0 = vld [vmem:[#allocation87_spill] sm:$0xff] }
 0x37d   : > { %v5965_v30 = vpop.permute.xlu1 %1904  ;;  %v5967_v28 = vpop.permute.xlu0 %1880  ;;  %v2438_v59 = vsel %vm390_vm1, %v2436_v44, %v2437_v15  ;;  %v7150_v44 = vld [vmem:[#allocation46_spill] sm:$0xff] }
 0x37e   : > { %2470 = vrot.lane.b32.xlu1 %v2438_v59, %s3148_s14  ;;  %v1385_v59 = vsel %vm1381_vm7, %v1368_v8, %v7150_v44  ;;  %v7160_v8 = vld [vmem:[#allocation74_spill] sm:$0xff] }
 0x381   : > { %v5971_v13 = vpop.permute.xlu1 %1948  ;;  %v5973_v36 = vpop.permute.xlu0 %1946 }
 0x385   : > { %v5975_v33 = vpop.permute.xlu1 %1968  ;;  %v5977_v27 = vpop.permute.xlu0 %1966 }
 0x389   : > { %v2175_v42 = vpop.permute.xlu1 %2174  ;;  %v2155_v62 = vpop.permute.xlu0 %2154 }
 0x38a   : > { %v2378_v18 = vsel %vm6647_vm13, %v2354_v7, %v2175_v42  ;;  %v2366_v45 = vsel %vm6647_vm13, %v2342_v40, %v2155_v62  ;;  %v7152_v7 = vld [vmem:[#allocation54_spill] sm:$0xff]  ;;  %v7153_v40 = vld [vmem:[#allocation56_spill] sm:$0xff] }
 0x38b   : > { %v2439_v17 = vrot.slane %v2378_v18, 1  ;;  %v2419_v1 = vrot.slane %v2366_v45, 1  ;;  %v1390_v18 = vsel %vm1381_vm7, %v1373_v35, %v7153_v40 }
 0x38c   : > { %v1407_v56 = vsel %vm1398_vm8, %v1390_v18, %v7161_v16  ;;  %v7173_v18 = vld [vmem:[#allocation105_spill] sm:$0xff] }
 0x38d   : > { %v5989_v43 = vpop.permute.xlu1 %1970  ;;  %v2440_v12 = vsel %vm390_vm1, %v2437_v15, %v2439_v17  ;;  %v5992_v29 = vpop.permute.xlu0 %1950  ;;  %v2420_v54 = vsel %vm390_vm1, %v2417_v38, %v2419_v1  ;;  %v1374_v38 = vsel %vm1364_vm6, %v7141_v11, %v7140_v19  ;;  %v7149_v15 = vld [vmem:[#allocation45_spill] sm:$0xff]  ;;  %v7154_v17 = vld [vmem:[#allocation58_spill] sm:$0xff]  ;;  %v7155_v1 = vld [vmem:[#allocation59_spill] sm:$0xff] }
 0x38e   : > { %2472 = vrot.lane.b32.xlu1 %v2440_v12, %s3148_s14  ;;  %2456 = vrot.lane.b32.xlu0 %v2420_v54, %s3148_s14  ;;  %v1382_v2 = vsel %vm1381_vm7, %v1365_v6, %v7149_v15  ;;  %v1391_v42 = vsel %vm1381_vm7, %v1374_v38, %v7152_v7  ;;  %v1393_v45 = vsel %vm1381_vm7, %v1376_v3, %v7154_v17  ;;  %v7156_v54 = vld [vmem:[#allocation64_spill] sm:$0xff]  ;;  %v7162_v19 = vld [vmem:[#allocation77_spill] sm:$0xff]  ;;  %v7163_v38 = vld [vmem:[#allocation78_spill] sm:$0xff] }
 0x38f   : > { %v1392_v12 = vsel %vm1381_vm7, %v1375_v21, %v7155_v1  ;;  %v1400_v5 = vsel %vm1398_vm8, %v1383_v25, %v7156_v54  ;;  %v1399_v34 = vsel %vm1398_vm8, %v1382_v2, %v7157_v46  ;;  %v1402_v6 = vsel %vm1398_vm8, %v1385_v59, %v7158_v32  ;;  %v7166_v3 = vld [vmem:[#allocation86_spill] sm:$0xff]  ;;  %v7169_v15 = vld [vmem:[#allocation95_spill] sm:$0xff]  ;;  %v7170_v59 = vld [vmem:[#allocation97_spill] sm:$0xff] }
 0x390   : > { %v1408_v9 = vsel %vm1398_vm8, %v1391_v42, %v7160_v8  ;;  %v1410_v11 = vsel %vm1398_vm8, %v1393_v45, %v7162_v19  ;;  %v1409_v49 = vsel %vm1398_vm8, %v1392_v12, %v7163_v38  ;;  %v1417_v35 = vsel %vm1415_vm9, %v1400_v5, %v7164_v10  ;;  %v7172_v42 = vld [vmem:[#allocation104_spill] sm:$0xff]  ;;  %v7174_v1 = vld [vmem:[#allocation107_spill] sm:$0xff]  ;;  %v7177_v32 = vld [vmem:[#allocation113_spill] sm:$0xff] }
 0x391   : > { %v5997_v52 = vpop.permute.xlu1 %2018  ;;  %v5999_v41 = vpop.permute.xlu0 %2016  ;;  %v1416_v4 = vsel %vm1415_vm9, %v1399_v34, %v7165_v47  ;;  %v1419_v39 = vsel %vm1415_vm9, %v1402_v6, %v7166_v3  ;;  %v1418_v21 = vsel %vm1415_vm9, %v1401_v61, %v7167_v0  ;;  %v1425_v25 = vsel %vm1415_vm9, %v1408_v9, %v7168_v20  ;;  %v7175_v54 = vld [vmem:[#allocation108_spill] sm:$0xff]  ;;  %v7179_v8 = vld [vmem:[#allocation115_spill] sm:$0xff]  ;;  %v7180_v16 = vld [vmem:[#allocation117_spill] sm:$0xff] }
 0x392   : > { %v1424_v2 = vsel %vm1415_vm9, %v1407_v56, %v7169_v15  ;;  %v1427_v63 = vsel %vm1415_vm9, %v1410_v11, %v7170_v59  ;;  %v1426_v7 = vsel %vm1415_vm9, %v1409_v49, %v7171_v48  ;;  %v1434_v40 = vsel %vm1432_vm10, %v1417_v35, %v7172_v42  ;;  %v7176_v46 = vld [vmem:[#allocation112_spill] sm:$0xff]  ;;  %v7181_v19 = vld [vmem:[#allocation118_spill] sm:$0xff]  ;;  %v7182_v38 = vld [vmem:[#allocation119_spill] sm:$0xff] }
 0x393   : > { %v1433_v17 = vsel %vm1432_vm10, %v1416_v4, %v7173_v18  ;;  %v1436_v12 = vsel %vm1432_vm10, %v1419_v39, %v7174_v1  ;;  %v1435_v5 = vsel %vm1432_vm10, %v1418_v21, %v7175_v54  ;;  %v1442_v34 = vsel %vm1432_vm10, %v1425_v25, %v7176_v46  ;;  %v7183_v10 = vld [vmem:[#allocation120_spill] sm:$0xff]  ;;  %v7185_v3 = vld [vmem:[#allocation125_spill] sm:$0xff]  ;;  %v7186_v21 = vld [vmem:[#allocation126_spill] sm:$0xff] }
 0x394   : > { %v1441_v6 = vsel %vm1432_vm10, %v1424_v2, %v7177_v32  ;;  %v1444_v61 = vsel %vm1432_vm10, %v1427_v63, %v7178_v37  ;;  %v1443_v9 = vsel %vm1432_vm10, %v1426_v7, %v7179_v8  ;;  %v1451_v56 = vsel %vm1449_vm11, %v1434_v40, %v7180_v16  ;;  %v7184_v47 = vld [vmem:[#allocation124_spill] sm:$0xff]  ;;  %v7187_v25 = vld [vmem:[#allocation127_spill] sm:$0xff]  ;;  %v7188_v2 = vld [vmem:[#allocation133_spill] sm:$0xff] }
 0x395   : > { %v6001_v53 = vpop.permute.xlu1 %2038  ;;  %v6009_v50 = vpop.permute.xlu0 %2036  ;;  %v1450_v11 = vsel %vm1449_vm11, %v1433_v17, %v7181_v19  ;;  %v1453_v49 = vsel %vm1449_vm11, %v1436_v12, %v7182_v38  ;;  %v1452_v35 = vsel %vm1449_vm11, %v1435_v5, %v7183_v10  ;;  %v1459_v4 = vsel %vm1449_vm11, %v1442_v34, %v7184_v47  ;;  %v7189_v63 = vld [vmem:[#allocation134_spill] sm:$0xff]  ;;  %v7190_v42 = vld [vmem:[#allocation135_spill] sm:$0xff]  ;;  %v7191_v18 = vld [vmem:[#allocation136_spill] sm:$0xff] }
 0x396   : > { %v1458_v39 = vsel %vm1449_vm11, %v1441_v6, %v7185_v3  ;;  %v1461_v20 = vsel %vm1449_vm11, %v1444_v61, %v7186_v21  ;;  %v1460_v15 = vsel %vm1449_vm11, %v1443_v9, %v7187_v25  ;;  %v1468_v59 = vsel %vm6648_vm12, %v1451_v56, %v7188_v2  ;;  %v7192_v1 = vld [vmem:[#allocation140_spill] sm:$0xff]  ;;  %v7193_v54 = vld [vmem:[#allocation142_spill] sm:$0xff]  ;;  %v7195_v32 = vld [vmem:[#allocation145_spill] sm:$0xff] }
 0x397   : > { %v1467_v48 = vsel %vm6648_vm12, %v1450_v11, %v7189_v63  ;;  %v1470_v40 = vsel %vm6648_vm12, %v1453_v49, %v7190_v42  ;;  %v1469_v17 = vsel %vm6648_vm12, %v1452_v35, %v7191_v18  ;;  %v1476_v12 = vsel %vm6648_vm12, %v1459_v4, %v7192_v1  ;;  %v7194_v46 = vld [vmem:[#allocation144_spill] sm:$0xff]  ;;  %v7196_v37 = vld [vmem:[#allocation149_spill] sm:$0xff]  ;;  %v7197_v8 = vld [vmem:[#allocation151_spill] sm:$0xff] }
 0x398   : > { %v1475_v5 = vsel %vm6648_vm12, %v1458_v39, %v7193_v54  ;;  %v1478_v34 = vsel %vm6648_vm12, %v1461_v20, %v7194_v46  ;;  %v1477_v6 = vsel %vm6648_vm12, %v1460_v15, %v7195_v32  ;;  %v1485_v61 = vsel %vm6647_vm13, %v1468_v59, %v7196_v37  ;;  %v7198_v16 = vld [vmem:[#allocation153_spill] sm:$0xff]  ;;  %v7199_v19 = vld [vmem:[#allocation154_spill] sm:$0xff]  ;;  %v7201_v10 = vld [vmem:[#allocation159_spill] sm:$0xff] }
 0x399   : > { %v6041_v62 = vpop.permute.xlu1 %2040  ;;  %v6051_v60 = vpop.permute.xlu0 %2020  ;;  %v1484_v9 = vsel %vm6647_vm13, %v1467_v48, %v7197_v8  ;;  %v6135_v56 = vsel %vm6647_vm13, %v1470_v40, %v7198_v16  ;;  %v1486_v11 = vsel %vm6647_vm13, %v1469_v17, %v7199_v19  ;;  %v7200_v38 = vld [vmem:[#allocation158_spill] sm:$0xff]  ;;  %v1492_v35 = vsel %vm6647_vm13, %v1475_v5, %v7201_v10  ;;  %v7202_v4 = vld [vmem:[#allocation161_spill] sm:$0xff]  ;;  %v7205_v59 = vld [vmem:[#allocation167_spill] sm:$0xff] }
 0x39a   : > { %v1493_v49 = vsel %vm6647_vm13, %v1476_v12, %v7200_v38  ;;  %v6145_v3 = vsel %vm6647_vm13, %v1478_v34, %v7202_v4  ;;  %v7203_v39 = vld [vmem:[#allocation162_spill] sm:$0xff]  ;;  %v2272_v15 = vsel %vm1415_vm9, %v5871_v26, %v5895_v31  ;;  %v1501_v63 = vsel %vm1500_vm14, %v1484_v9, %v7205_v59  ;;  %v7207_v17 = vld [vmem:[#allocation15_spill] sm:$0xff]  ;;  %v7209_v5 = vld [vmem:[#allocation176_spill] sm:$0xff] }
 0x39b   : > { %v1494_v21 = vsel %vm6647_vm13, %v1477_v6, %v7203_v39  ;;  %v7204_v20 = vld [vmem:[#allocation166_spill] sm:$0xff]  ;;  %v2271_v40 = vsel %vm1415_vm9, %v5875_v57, %v5897_v23  ;;  %v2296_v18 = vsel %vm1432_vm10, %v2272_v15, %v5971_v13  ;;  %v1510_v1 = vsel %vm1500_vm14, %v1493_v49, %v7207_v17  ;;  %v7216_v38 = vld [vmem:[#allocation89_spill] sm:$0xff]  ;;  %v7226_v17 = vld [vmem:[#allocation131_spill] sm:$0xff] }
 0x39c   : > { %v1502_v25 = vsel %vm1500_vm14, %v1485_v61, %v7204_v20  ;;  %v7206_v48 = vld [vmem:[#allocation170_spill] sm:$0xff]  ;;  %v2295_v31 = vsel %vm1432_vm10, %v2271_v40, %v5973_v36  ;;  %v2320_v54 = vsel %vm1449_vm11, %v2296_v18, %v5997_v52  ;;  %v6175_v46 = vsel %vm1500_vm14, %v1494_v21, %v7209_v5 }
 0x39d   : > { %v2089_v44 = vpop.permute.xlu1 %2088  ;;  %v2087_v45 = vpop.permute.xlu0 %2086  ;;  %v6158_v42 = vsel %vm1500_vm14, %v1486_v11, %v7206_v48  ;;  %v7208_v12 = vld [vmem:[#allocation174_spill] sm:$0xff]  ;;  %v2319_v13 = vsel %vm1449_vm11, %v2295_v31, %v5999_v41  ;;  %v2284_v36 = vsel %vm1415_vm9, %v5879_v55, %v5899_v24  ;;  %v2283_v9 = vsel %vm1415_vm9, %v5883_v58, %v5901_v14  ;;  %v7218_v58 = vld [vmem:[#allocation72_spill] sm:$0xff] }
 0x39e   : > { %v1509_v26 = vsel %vm1500_vm14, %v1492_v35, %v7208_v12  ;;  %v7210_v57 = vld [vmem:[#allocation18_spill] sm:$0xff]  ;;  %v2344_v34 = vsel %vm6648_vm12, %v2320_v54, %v2089_v44  ;;  %v2343_v52 = vsel %vm6648_vm12, %v2319_v13, %v2087_v45  ;;  %v2308_v41 = vsel %vm1432_vm10, %v2284_v36, %v5975_v33  ;;  %v7228_v31 = vld [vmem:[#allocation4_spill] sm:$0xff]  ;;  %v7238_v36 = vld [vmem:[#allocation187_spill] sm:$0xff] }
 0x39f   : > { %v1519_v23 = vsel %vm7211_vm0, %v1502_v25, %v7210_v57  ;;  %v7212_v6 = vld [vmem:[#allocation22_spill] sm:$0xff]  ;;  %v2307_v55 = vsel %vm1432_vm10, %v2283_v9, %v5977_v27  ;;  %v2332_v24 = vsel %vm1449_vm11, %v2308_v41, %v6001_v53  ;;  %v1526_v49 = vsel %vm7217_vm5, %v1509_v26, %v7216_v38  ;;  %vm7223_vm0 = vmmov %vm7221_vm2  ;;  %v7240_v9 = vld [vmem:[#allocation116_spill] sm:$0xff] }
 0x3a0   : > { %v1518_v37 = vsel %vm7213_vm3, %v1501_v63, %v7212_v6  ;;  %v7214_v19 = vld [vmem:[#allocation26_spill] sm:$0xff]  ;;  %v1536_v14 = vsel %vm7219_vm15, %v1519_v23, %v7218_v58  ;;  %v2331_v33 = vsel %vm1449_vm11, %v2307_v55, %v6009_v50  ;;  %v2285_v27 = vsel %vm1415_vm9, %v5890_v51, %v5965_v30  ;;  %v7220_v51 = vld [vmem:[#allocation73_spill] sm:$0xff]  ;;  %v7222_v63 = vld [vmem:[#allocation20_spill] sm:$0xff] }
 0x3a1   : > { %v2109_v0 = vpop.permute.xlu1 %2108  ;;  %v2107_v7 = vpop.permute.xlu0 %2106  ;;  %v1527_v11 = vsel %vm7215_vm4, %v1510_v1, %v7214_v19  ;;  %v2273_v20 = vsel %vm1415_vm9, %v5893_v22, %v5967_v28  ;;  %v2309_v50 = vsel %vm1432_vm10, %v2285_v27, %v5989_v43  ;;  %v1535_v30 = vsel %vm7221_vm2, %v1518_v37, %v7220_v51  ;;  %v7224_v28 = vld [vmem:[#allocation62_spill] sm:$0xff]  ;;  %vm7231_vm2 = vmmov %vm7223_vm0  ;;  %v7250_v27 = vld [vmem:[#allocation28_spill] sm:$0xff] }
 0x3a2   : > { %v2356_v10 = vsel %vm6648_vm12, %v2332_v24, %v2109_v0  ;;  %v2355_v4 = vsel %vm6648_vm12, %v2331_v33, %v2107_v7  ;;  %v2297_v7 = vsel %vm1432_vm10, %v2273_v20, %v5992_v29  ;;  %v2333_v15 = vsel %vm1449_vm11, %v2309_v50, %v6041_v62  ;;  %v7232_v23 = vld [vmem:[#allocation30_spill] sm:$0xff]  ;;  %v7257_v50 = vld [vmem:[#allocation88_spill] sm:$0xff] }
 0x3a3   : > { %v1543_v22 = vsel %vm7223_vm0, %v1526_v49, %v7222_v63  ;;  %vm7225_vm3 = vcmask 392192   ;;  %v2321_v48 = vsel %vm1449_vm11, %v2297_v7, %v6051_v60  ;;  %vm7229_vm5 = vcmask 424960   ;;  %v7230_v60 = vld [vmem:[#allocation111_spill] sm:$0xff]  ;;  %v7234_v13 = vld [vmem:[#allocation106_spill] sm:$0xff]  ;;  %v7246_v49 = vld [vmem:[#allocation48_spill] sm:$0xff] }
 0x3a4   : > { %v1552_v43 = vsel %vm7225_vm3, %v1535_v30, %v7224_v28  ;;  %vm7227_vm4 = vmmov %vm7225_vm3  ;;  %vm2494_vm15 = vcmask 523264   ;;  %vm7235_vm3 = vcmask 457728   ;;  %v7236_v6 = vld [vmem:[#allocation90_spill] sm:$0xff]  ;;  %v7261_v30 = vld [vmem:[#allocation93_spill] sm:$0xff] }
 0x3a5   : > { %v2111_v47 = vpop.permute.xlu1 %2110  ;;  %v2091_v2 = vpop.permute.xlu0 %2090  ;;  %v1560_v1 = vsel %vm7227_vm4, %v1543_v22, %v7226_v17  ;;  %vm7233_vm0 = vmmov %vm7229_vm5  ;;  %v7265_v63 = vld [vmem:[#allocation146_spill] sm:$0xff]  ;;  %v7270_v17 = vld [vmem:[#allocation67_spill] sm:$0xff] }
 0x3a6   : > { %v2357_v40 = vsel %vm6648_vm12, %v2333_v15, %v2111_v47  ;;  %v2345_v29 = vsel %vm6648_vm12, %v2321_v48, %v2091_v2  ;;  %v1577_v54 = vsel %vm7229_vm5, %v1560_v1, %v7228_v31  ;;  %v1544_v47 = vsel %vm7231_vm2, %v1527_v11, %v7230_v60  ;;  %vm7237_vm4 = vmmov %vm7235_vm3  ;;  %v7263_v15 = vld [vmem:[#allocation24_spill] sm:$0xff]  ;;  %v7279_v60 = vld [vmem:[#allocation49_spill] sm:$0xff] }
 0x3a7   : > { %v1569_v2 = vsel %vm7233_vm0, %v1552_v43, %v7232_v23  ;;  %vm7239_vm5 = vcmask 490496   ;;  %vm7241_vm12 = vcmask 392192   ;;  %v7267_v43 = vld [vmem:[#allocation175_spill] sm:$0xff] }
 0x3a8   : > { %v1586_v37 = vsel %vm7237_vm4, %v1569_v2, %v7236_v6  ;;  %v1561_v41 = vsel %vm7241_vm12, %v1544_v47, %v7240_v9  ;;  %vm7243_vm2 = vmmov %vm7239_vm5  ;;  %v1512_v48 = vsel %vm1500_vm14, %v6145_v3, %v7267_v43  ;;  %v7281_v23 = vld [vmem:[#allocation39_spill] sm:$0xff] }
 0x3a9   : > { %v2159_v32 = vpop.permute.xlu1 %2158  ;;  %v2157_v8 = vpop.permute.xlu0 %2156  ;;  %vm7245_vm0 = vmmov %vm7241_vm12  ;;  %vm7249_vm12 = vcmask 326656  }
 0x3aa   : > { %v2368_v61 = vsel %vm6647_vm13, %v2344_v34, %v2159_v32  ;;  %v2367_v16 = vsel %vm6647_vm13, %v2343_v52, %v2157_v8  ;;  %v1594_v34 = vsel %vm7235_vm3, %v1577_v54, %v7234_v13  ;;  %vm7247_vm3 = vcmask 424960   ;;  %v7275_v54 = vld [vmem:[#allocation122_spill] sm:$0xff]  ;;  %v7283_v13 = vld [vmem:[#allocation76_spill] sm:$0xff] }
 0x3ab   : > { %v2422_v44 = vrot.slane %v2368_v61, 1  ;;  %v2421_v45 = vrot.slane %v2367_v16, 1  ;;  %v1611_v52 = vsel %vm7239_vm5, %v1594_v34, %v7238_v36  ;;  %v7242_v16 = vld [vmem:[#allocation147_spill] sm:$0xff]  ;;  %v1578_v58 = vsel %vm7247_vm3, %v1561_v41, %v7246_v49  ;;  %vm7254_vm5 = vmmov %vm7249_vm12  ;;  %v7285_v34 = vld [vmem:[#allocation189_spill] sm:$0xff] }
 0x3ac   : > { %v1603_v19 = vsel %vm7243_vm2, %v1586_v37, %v7242_v16  ;;  %vm7256_vm2 = vcmask 359424   ;;  %v7287_v37 = vld [vmem:[#allocation92_spill] sm:$0xff] }
 0x3ad   : > { %v2179_v35 = vpop.permute.xlu1 %2178  ;;  %v2177_v39 = vpop.permute.xlu0 %2176  ;;  %v2423_v21 = vsel %vm390_vm1, %v2421_v45, %v2422_v44  ;;  %v7244_v45 = vld [vmem:[#allocation43_spill] sm:$0xff] }
 0x3ae   : > { %v2380_v53 = vsel %vm6647_vm13, %v2356_v10, %v2179_v35  ;;  %v2379_v25 = vsel %vm6647_vm13, %v2355_v4, %v2177_v39  ;;  %2458 = vrot.lane.b32.xlu0 %v2423_v21, %s3148_s14  ;;  %v1553_v38 = vsel %vm7245_vm0, %v1536_v14, %v7244_v45  ;;  %v7248_v10 = vld [vmem:[#allocation52_spill] sm:$0xff]  ;;  %v7253_v14 = vld [vmem:[#allocation25_spill] sm:$0xff]  ;;  %vm7258_vm0 = vmmov %vm7237_vm4 }
 0x3af   : > { %v2442_v0 = vrot.slane %v2380_v53, 1  ;;  %v2441_v59 = vrot.slane %v2379_v25, 1  ;;  %v1528_v35 = vsel %vm7249_vm12, %v6175_v46, %v7248_v10  ;;  %v7252_v4 = vld [vmem:[#allocation100_spill] sm:$0xff]  ;;  %v1520_v39 = vsel %vm7254_vm5, %v6158_v42, %v7253_v14  ;;  %vm7262_vm12 = vmmov %vm7256_vm2  ;;  %v7301_v10 = vld [vmem:[#allocation85_spill] sm:$0xff] }
 0x3b0   : > { %v1595_v53 = vsel %vm7237_vm4, %v1578_v58, %v7252_v4  ;;  %v7255_v21 = vld [vmem:[#allocation60_spill] sm:$0xff]  ;;  %v1537_v7 = vsel %vm7262_vm12, %v1520_v39, %v7261_v30  ;;  %vm7278_vm12 = vcmask 457728   ;;  %v7310_v30 = vld [vmem:[#allocation71_spill] sm:$0xff] }
 0x3b1   : > { %v2181_v18 = vpop.permute.xlu1 %2180  ;;  %v2161_v12 = vpop.permute.xlu0 %2160  ;;  %v2443_v26 = vsel %vm390_vm1, %v2441_v59, %v2442_v0  ;;  %v1545_v20 = vsel %vm7256_vm2, %v1528_v35, %v7255_v21  ;;  %vm7271_vm2 = vcmask 424960   ;;  %v7299_v58 = vld [vmem:[#allocation96_spill] sm:$0xff] }
 0x3b2   : > { %v2381_v62 = vsel %vm6647_vm13, %v2357_v40, %v2181_v18  ;;  %v2369_v57 = vsel %vm6647_vm13, %v2345_v29, %v2161_v12  ;;  %2474 = vrot.lane.b32.xlu1 %v2443_v26, %s3148_s14  ;;  %vm2531_vm13 = vcmask 818176   ;;  %v7268_v40 = vld [vmem:[#allocation81_spill] sm:$0xff]  ;;  %v7273_v26 = vld [vmem:[#allocation19_spill] sm:$0xff] }
 0x3b3   : > { %v2444_v5 = vrot.slane %v2381_v62, 1  ;;  %v2424_v32 = vrot.slane %v2369_v57, 1  ;;  %v7272_v62 = vld [vmem:[#allocation169_spill] sm:$0xff] }
 0x3b4   : > { %v1504_v12 = vsel %vm1500_vm14, %v6135_v56, %v7272_v62  ;;  %v7318_v62 = vld [vmem:[#allocation139_spill] sm:$0xff] }
 0x3b5   : > { %v2463_v61 = vpop.permute.xlu1 %2462  ;;  %v2445_v8 = vsel %vm390_vm1, %v2442_v0, %v2444_v5  ;;  %v2447_v11 = vpop.permute.xlu0 %2446  ;;  %v2425_v55 = vsel %vm390_vm1, %v2422_v44, %v2424_v32  ;;  %vm7251_vm1 = vmmov %vm7247_vm3  ;;  %v7259_v0 = vld [vmem:[#allocation186_spill] sm:$0xff]  ;;  %vm7260_vm3 = vcmask 490496   ;;  %v7277_v5 = vld [vmem:[#allocation180_spill] sm:$0xff] }
 0x3b6   : > { %v2503_v24 = vsel %vm2494_vm15, %v1611_v52, %v2463_v61  ;;  %2476 = vrot.lane.b32.xlu1 %v2445_v8, %s3148_s14  ;;  %2460 = vrot.lane.b32.xlu0 %v2425_v55, %s3148_s14  ;;  %v2495_v33 = vsel %vm2494_vm15, %v1603_v19, %v2447_v11  ;;  %v1570_v44 = vsel %vm7251_vm1, %v1553_v38, %v7250_v27  ;;  %vm7264_vm1 = vcmask 392192   ;;  %vm7266_vm4 = vmmov %vm7260_vm3  ;;  %v7289_v52 = vld [vmem:[#allocation132_spill] sm:$0xff]  ;;  %v7293_v19 = vld [vmem:[#allocation63_spill] sm:$0xff] }
 0x3b7   : > { %2983 = vmatprep.mubr.msk.f32.mxu0 %vm2531_vm13, %v2495_v33  ;;  %2995 = vmatprep.mubr.msk.f32.mxu1 %vm2531_vm13, %v2503_v24  ;;  %v1587_v46 = vsel %vm7258_vm0, %v1570_v44, %v7257_v50  ;;  %v1612_v25 = vsel %vm7260_vm3, %v1595_v53, %v7259_v0  ;;  %v1562_v59 = vsel %vm7264_vm1, %v1545_v20, %v7263_v15  ;;  %vm7269_vm5 = vmmov %vm7264_vm1  ;;  %vm7274_vm0 = vcmask 326656   ;;  %v7291_v8 = vld [vmem:[#allocation156_spill] sm:$0xff]  ;;  %v7295_v55 = vld [vmem:[#allocation14_spill] sm:$0xff] }
 0x3b8   : > { %v1604_v22 = vsel %vm7266_vm4, %v1587_v46, %v7265_v63  ;;  %v1554_v18 = vsel %vm7269_vm5, %v1537_v7, %v7268_v40  ;;  %v1579_v1 = vsel %vm7271_vm2, %v1562_v59, %v7270_v17  ;;  %v1529_v31 = vsel %vm7274_vm0, %v1512_v48, %v7273_v26  ;;  %vm7276_vm3 = vmmov %vm7271_vm2  ;;  %v7297_v38 = vld [vmem:[#allocation121_spill] sm:$0xff]  ;;  %v7303_v27 = vld [vmem:[#allocation188_spill] sm:$0xff] }
 0x3b9   : > { %v2465_v51 = vpop.permute.xlu1 %2464  ;;  %v2449_v28 = vpop.permute.xlu0 %2448  ;;  %v1571_v3 = vsel %vm7276_vm3, %v1554_v18, %v7275_v54  ;;  %v1596_v57 = vsel %vm7278_vm12, %v1579_v1, %v7277_v5  ;;  %vm7280_vm1 = vmmov %vm7274_vm0  ;;  %vm7282_vm4 = vcmask 359424   ;;  %vm7286_vm2 = vcmask 490496   ;;  %v7305_v53 = vld [vmem:[#allocation155_spill] sm:$0xff]  ;;  %v7312_v63 = vld [vmem:[#allocation41_spill] sm:$0xff] }
 0x3ba   : > { %v2504_v42 = vsel %vm2494_vm15, %v1612_v25, %v2465_v51  ;;  %v2496_v29 = vsel %vm2494_vm15, %v1604_v22, %v2449_v28  ;;  %v1521_v47 = vsel %vm7280_vm1, %v1504_v12, %v7279_v60  ;;  %v1546_v2 = vsel %vm7282_vm4, %v1529_v31, %v7281_v23  ;;  %vm7284_vm5 = vmmov %vm7278_vm12  ;;  %v7307_v50 = vld [vmem:[#allocation23_spill] sm:$0xff]  ;;  %v7313_v22 = vld [vmem:[#allocation13_spill] sm:$0xff] }
 0x3bb   : > { %2996 = vmatmul.mubr.msk.f32.vlgmr.msra.gmra.mrb[0].mxu1 %vm2531_vm13, %v2504_v42  ;;  %2984 = vmatmul.mubr.msk.f32.vlgmr.msra.gmra.mrb[0].mxu0 %vm2531_vm13, %v2496_v29  ;;  %v1588_v56 = vsel %vm7284_vm5, %v1571_v3, %v7283_v13  ;;  %v1613_v32 = vsel %vm7286_vm2, %v1596_v57, %v7285_v34  ;;  %vm7288_vm0 = vmmov %vm7282_vm4  ;;  %vm7290_vm3 = vcmask 392192   ;;  %vm7296_vm4 = vcmask 424960   ;;  %v7308_v46 = vld [vmem:[#allocation3_spill] sm:$0xff]  ;;  %v7314_v28 = vld [vmem:[#allocation109_spill] sm:$0xff] }
 0x3bc   : > { %v1538_v36 = vsel %vm7288_vm0, %v1521_v47, %v7287_v37  ;;  %v1563_v61 = vsel %vm7290_vm3, %v1546_v2, %v7289_v52  ;;  %vm7292_vm12 = vmmov %vm7286_vm2  ;;  %vm7300_vm2 = vcmask 457728   ;;  %v1369_v0 = vsel %vm1364_vm6, %v7308_v46, %v7307_v50  ;;  %v7309_v25 = vld [vmem:[#allocation51_spill] sm:$0xff]  ;;  %v7315_v48 = vld [vmem:[#allocation61_spill] sm:$0xff] }
 0x3bd   : > { %v2467_v6 = vpop.permute.xlu1 %2466  ;;  %v1605_v9 = vsel %vm7292_vm12, %v1588_v56, %v7291_v8  ;;  %v2451_v16 = vpop.permute.xlu0 %2450  ;;  %vm7294_vm1 = vmmov %vm7290_vm3  ;;  %v1580_v24 = vsel %vm7296_vm4, %v1563_v61, %v7295_v55  ;;  %v1386_v51 = vsel %vm1381_vm7, %v1369_v0, %v7309_v25  ;;  %v7311_v15 = vld [vmem:[#allocation91_spill] sm:$0xff]  ;;  %v1377_v42 = vsel %vm1364_vm6, %v7313_v22, %v7312_v63  ;;  %v7317_v1 = vld [vmem:[#allocation80_spill] sm:$0xff] }
 0x3be   : > { %v2505_v41 = vsel %vm2494_vm15, %v1613_v32, %v2467_v6  ;;  %v1555_v11 = vsel %vm7294_vm1, %v1538_v36, %v7293_v19  ;;  %v2497_v45 = vsel %vm2494_vm15, %v1605_v9, %v2451_v16  ;;  %vm7298_vm5 = vmmov %vm7296_vm4  ;;  %v1597_v33 = vsel %vm7300_vm2, %v1580_v24, %v7299_v58  ;;  %v7316_v18 = vld [vmem:[#allocation123_spill] sm:$0xff]  ;;  %v7320_v26 = vld [vmem:[#allocation101_spill] sm:$0xff] }
 0x3bf   : > { %2998 = vmatprep.mubr.msk.f32.mxu1 %vm2531_vm13, %v2505_v41  ;;  %v1572_v49 = vsel %vm7298_vm5, %v1555_v11, %v7297_v38  ;;  %2986 = vmatprep.mubr.msk.f32.mxu0 %vm2531_vm13, %v2497_v45  ;;  %vm7302_vm0 = vmmov %vm7300_vm2  ;;  %v1403_v7 = vsel %vm1398_vm8, %v1386_v51, %v7310_v30  ;;  %v1394_v40 = vsel %vm1381_vm7, %v1377_v42, %v7315_v48  ;;  %vm7319_vm1 = vcmask 228352   ;;  %v7321_v54 = vld [vmem:[#allocation157_spill] sm:$0xff]  ;;  %v7325_v23 = vld [vmem:[#allocation130_spill] sm:$0xff] }
 0x3c0   : > { %v1589_v35 = vsel %vm7302_vm0, %v1572_v49, %v7301_v10  ;;  %vm7304_vm3 = vmmov %vm7292_vm12  ;;  %v1420_v59 = vsel %vm1415_vm9, %v1403_v7, %v7311_v15  ;;  %v1411_v29 = vsel %vm1398_vm8, %v1394_v40, %v7317_v1  ;;  %vm7322_vm6 = vcmask 261120   ;;  %v7323_v5 = vld [vmem:[#allocation21_spill] sm:$0xff]  ;;  %v7326_v13 = vld [vmem:[#allocation70_spill] sm:$0xff] }
 0x3c1   : > { %v1614_v44 = vsel %vm7304_vm3, %v1597_v33, %v7303_v27  ;;  %v2469_v4 = vpop.permute.xlu1 %2468  ;;  %vm7306_vm12 = vmmov %vm7304_vm3  ;;  %v2453_v21 = vpop.permute.xlu0 %2452  ;;  %v1437_v43 = vsel %vm1432_vm10, %v1420_v59, %v7314_v28  ;;  %v1428_v31 = vsel %vm1415_vm9, %v1411_v29, %v7320_v26  ;;  %v7324_v60 = vld [vmem:[#allocation173_spill] sm:$0xff]  ;;  %vm7327_vm8 = vcmask 326656   ;;  %v7328_v34 = vld [vmem:[#allocation148_spill] sm:$0xff] }
 0x3c2   : > { %v1606_v14 = vsel %vm7306_vm12, %v1589_v35, %v7305_v53  ;;  %v2506_v39 = vsel %vm2494_vm15, %v1614_v44, %v2469_v4  ;;  %v1454_v17 = vsel %vm1449_vm11, %v1437_v43, %v7316_v18  ;;  %v1445_v57 = vsel %vm1432_vm10, %v1428_v31, %v7323_v5  ;;  %vm7329_vm4 = vmmov %vm7319_vm1  ;;  %v7330_v6 = vld [vmem:[#allocation110_spill] sm:$0xff]  ;;  %v7332_v36 = vld [vmem:[#allocation165_spill] sm:$0xff] }
 0x3c3   : > { %v2498_v20 = vsel %vm2494_vm15, %v1606_v14, %v2453_v21  ;;  %2999 = vmatmul.mubr.msk.f32.gmra.mrb[2].mxu1 %vm2531_vm13, %v2506_v39  ;;  %v1471_v12 = vsel %vm7319_vm1, %v1454_v17, %v7318_v62  ;;  %v1462_v2 = vsel %vm1449_vm11, %v1445_v57, %v7325_v23  ;;  %vm7331_vm9 = vcmask 359424   ;;  %vm7333_vm5 = vmmov %vm7322_vm6  ;;  %v7334_v61 = vld [vmem:[#allocation103_spill] sm:$0xff]  ;;  %v7337_v16 = vld [vmem:[#allocation40_spill] sm:$0xff] }
 0x3c4   : > { %2987 = vmatmul.mubr.msk.f32.gmra.mrb[2].mxu0 %vm2531_vm13, %v2498_v20  ;;  %v1488_v3 = vsel %vm7322_vm6, %v1471_v12, %v7321_v54  ;;  %v1479_v32 = vsel %vm7329_vm4, %v1462_v2, %v7328_v34  ;;  %vm7335_vm10 = vcmask 392192   ;;  %v7336_v9 = vld [vmem:[#allocation179_spill] sm:$0xff]  ;;  %vm7338_vm11 = vcmask 424960   ;;  %v7339_v11 = vld [vmem:[#allocation53_spill] sm:$0xff]  ;;  %vm7340_vm2 = vmmov %vm7327_vm8 }
 0x3c5   : > { %v1505_v47 = vsel %vm1500_vm14, %v1488_v3, %v7324_v60  ;;  %v1496_v52 = vsel %vm7333_vm5, %v1479_v32, %v7332_v36  ;;  %v7341_v24 = vld [vmem:[#allocation16_spill] sm:$0xff]  ;;  %v7342_v38 = vld [vmem:[#allocation42_spill] sm:$0xff]  ;;  %vm7343_vm3 = vmmov %vm7331_vm9 }
 0x3c6   : > { %v1522_v56 = vsel %vm7327_vm8, %v1505_v47, %v7326_v13  ;;  %v1513_v41 = vsel %vm1500_vm14, %v1496_v52, %v7336_v9  ;;  %v7344_v58 = vld [vmem:[#allocation183_spill] sm:$0xff]  ;;  %vm7346_vm1 = vmmov %vm7335_vm10  ;;  %v7347_v4 = vld [vmem:[#allocation57_spill] sm:$0xff] }
 0x3c7   : > { %v1539_v37 = vsel %vm7331_vm9, %v1522_v56, %v7330_v6  ;;  %v1530_v55 = vsel %vm7340_vm2, %v1513_v41, %v7339_v11  ;;  %v7345_v35 = vld [vmem:[#allocation27_spill] sm:$0xff]  ;;  %vm7348_vm14 = vmmov %vm7338_vm11  ;;  %v7349_v14 = vld [vmem:[#allocation181_spill] sm:$0xff] }
 0x3c8   : > { %v1556_v8 = vsel %vm7335_vm10, %v1539_v37, %v7334_v61  ;;  %v1547_v49 = vsel %vm7343_vm3, %v1530_v55, %v7342_v38  ;;  %vm7350_vm6 = vmmov %vm7302_vm0  ;;  %v7351_v21 = vld [vmem:[#allocation143_spill] sm:$0xff]  ;;  %v7353_v25 = vld [vmem:[#allocation152_spill] sm:$0xff] }
 0x3c9   : > { %v1573_v19 = vsel %vm7338_vm11, %v1556_v8, %v7337_v16  ;;  %v1564_v27 = vsel %vm7346_vm1, %v1547_v49, %v7345_v35  ;;  %vm7352_vm8 = vmmov %vm7306_vm12  ;;  %v7354_v7 = vld [vmem:[#allocation182_spill] sm:$0xff]  ;;  %v7355_v63 = vld [vmem:[#allocation185_spill] sm:$0xff] }
 0x3ca   : > { %v1590_v45 = vsel %vm7302_vm0, %v1573_v19, %v7341_v24  ;;  %v1581_v53 = vsel %vm7348_vm14, %v1564_v27, %v7347_v4  ;;  %v7356_v28 = vld [vmem:[#allocation164_spill] sm:$0xff]  ;;  %v7357_v18 = vld [vmem:[#allocation163_spill] sm:$0xff] }
 0x3cb   : > { %v1607_v33 = vsel %vm7306_vm12, %v1590_v45, %v7344_v58  ;;  %v1598_v39 = vsel %vm7350_vm6, %v1581_v53, %v7349_v14  ;;  %v7358_v1 = vld [vmem:[#allocation184_spill] sm:$0xff]  ;;  %v2901_v62 = vld [vmem:[%s6522_s2] ss:$0 sm:$0xff] }
 0x3cc   : > { %v1615_v20 = vsel %vm7352_vm8, %v1598_v39, %v7351_v21 }
 0x3ec   : > { %v2455_v10 = vpop.permute.xlu0 %2454 }
 0x3ed   : > { %v2499_v44 = vsel %vm2494_vm15, %v1607_v33, %v2455_v10 }
 0x3ee   : > { %2989 = vmatprep.mubr.msk.f32.mxu0 %vm2531_vm13, %v2499_v44 }
 0x3f0   : > { %v2471_v50 = vpop.permute.xlu1 %2470 }
 0x3f1   : > { %v2507_v46 = vsel %vm2494_vm15, %v1615_v20, %v2471_v50 }
 0x3f2   : > { %3001 = vmatprep.mubr.msk.f32.mxu1 %vm2531_vm13, %v2507_v46 }
 0x400   : > { %v2473_v0 = vpop.permute.xlu1 %2472  ;;  %v2457_v30 = vpop.permute.xlu0 %2456 }
 0x401   : > { %v2508_v51 = vsel %vm2494_vm15, %v7353_v25, %v2473_v0  ;;  %v2500_v15 = vsel %vm2494_vm15, %v7354_v7, %v2457_v30 }
 0x402   : > { %3002 = vmatmul.mubr.msk.f32.gmra.mrb[4].mxu1 %vm2531_vm13, %v2508_v51  ;;  %2990 = vmatmul.mubr.msk.f32.gmra.mrb[4].mxu0 %vm2531_vm13, %v2500_v15 }
 0x420   : > { %v2459_v59 = vpop.permute.xlu0 %2458 }
 0x421   : > { %v2501_v22 = vsel %vm2494_vm15, %v7355_v63, %v2459_v59 }
 0x422   : > { %2992 = vmatprep.mubr.msk.f32.mxu0 %vm2531_vm13, %v2501_v22 }
 0x424   : > { %v2475_v42 = vpop.permute.xlu1 %2474 }
 0x425   : > { %v2509_v43 = vsel %vm2494_vm15, %v7356_v28, %v2475_v42 }
 0x426   : > { %3004 = vmatprep.mubr.msk.f32.mxu1 %vm2531_vm13, %v2509_v43 }
 0x428   : > { %v2477_v48 = vpop.permute.xlu1 %2476  ;;  %v2461_v40 = vpop.permute.xlu0 %2460 }
 0x429   : > { %v2510_v17 = vsel %vm2494_vm15, %v7357_v18, %v2477_v48  ;;  %v2502_v29 = vsel %vm2494_vm15, %v7358_v1, %v2461_v40 }
 0x42a   : > { %2993 = vmatmul.mubr.msk.f32.gmra.mrb[6].mxu0 %vm2531_vm13, %v2502_v29  ;;  %3005 = vmatmul.mubr.msk.f32.gmra.mrb[6].mxu1 %vm2531_vm13, %v2510_v17 }
 0x48e   : > { %v2997_v12 = vpop.f32.mrb[0].mxu1  ;;  %v2985_v26 = vpop.f32.mrb[0].mxu0 }
 0x48f   : > { %v2695_v31 = vadd.f32 %v2997_v12, %v2901_v62  ;;  %v2689_v54 = vpop.f32.mrb[1].mxu1  ;;  %v2655_v3 = vadd.f32 %v2985_v26, %v2901_v62  ;;  %v2649_v5 = vpop.f32.mrb[1].mxu0 }
 0x490   : > { %v2690_v57 = vadd.f32 %v2901_v62, %v2689_v54  ;;  %v2650_v60 = vadd.f32 %v2901_v62, %v2649_v5 }
 0x491   : > { %2737 = vst.msk [vmem:[%s6435_s28 + $0x48] sm:$0xff] %vm1381_vm7, %v2695_v31  ;;  %2729 = vst.msk [vmem:[%s6435_s28 + $0x8] sm:$0xff] %vm1381_vm7, %v2655_v3 }
 0x492   : > { %2736 = vst.msk [vmem:[%s6435_s28 + $0x40] sm:$0xff] %vm1381_vm7, %v2690_v57  ;;  %2728 = vst.msk [vmem:[%s6435_s28] sm:$0xff] %vm1381_vm7, %v2650_v60 }
 0x496   : > { %v3000_v47 = vpop.f32.mrb[2].mxu1 }
 0x497   : > { %v2988_v23 = vpop.f32.mrb[2].mxu0  ;;  %v2705_v2 = vadd.f32 %v3000_v47, %v2901_v62  ;;  %v2699_v13 = vpop.f32.mrb[3].mxu1 }
 0x498   : > { %v2665_v56 = vadd.f32 %v2988_v23, %v2901_v62  ;;  %v2659_v34 = vpop.f32.mrb[3].mxu0  ;;  %v2700_v32 = vadd.f32 %v2901_v62, %v2699_v13  ;;  %v2814_v10 = vld [vmem:[%s6435_s28 + $0x8] sm:$0xff] (%p3194_p4) }
 0x499   : > { %2739 = vst.msk [vmem:[%s6435_s28 + $0x58] sm:$0xff] %vm1381_vm7, %v2705_v2  ;;  %v2660_v6 = vadd.f32 %v2901_v62, %v2659_v34  ;;  %v2812_v33 = vld [vmem:[%s6435_s28] sm:$0xff] (%p3194_p4)  ;;  %2815 = vst [vmem:[%s6476_s29 + $0x8] sm:$0xff] (%p3194_p4), %v2814_v10  ;;  %v2830_v21 = vld [vmem:[%s6435_s28 + $0x48] sm:$0xff] (%p3194_p4) }
 0x49a   : > { %2731 = vst.msk [vmem:[%s6435_s28 + $0x18] sm:$0xff] %vm1381_vm7, %v2665_v56  ;;  %2738 = vst.msk [vmem:[%s6435_s28 + $0x50] sm:$0xff] %vm1381_vm7, %v2700_v32  ;;  %v2828_v39 = vld [vmem:[%s6435_s28 + $0x40] sm:$0xff] (%p3194_p4) }
 0x49b   : > { %2730 = vst.msk [vmem:[%s6435_s28 + $0x10] sm:$0xff] %vm1381_vm7, %v2660_v6  ;;  %2813 = vst [vmem:[%s6476_s29] sm:$0xff] (%p3194_p4), %v2812_v33 }
 0x49c   : > { %2829 = vst [vmem:[%s6476_s29 + $0x100] sm:$0xff] (%p3194_p4), %v2828_v39  ;;  %2831 = vst [vmem:[%s6476_s29 + $0x108] sm:$0xff] (%p3194_p4), %v2830_v21 }
 0x4a0   : > { %v2834_v50 = vld [vmem:[%s6435_s28 + $0x58] sm:$0xff] (%p3194_p4) }
 0x4a1   : > { %v2818_v27 = vld [vmem:[%s6435_s28 + $0x18] sm:$0xff] (%p3194_p4)  ;;  %v2832_v20 = vld [vmem:[%s6435_s28 + $0x50] sm:$0xff] (%p3194_p4)  ;;  %2835 = vst [vmem:[%s6476_s29 + $0x118] sm:$0xff] (%p3194_p4), %v2834_v50 }
 0x4a2   : > { %v2816_v35 = vld [vmem:[%s6435_s28 + $0x10] sm:$0xff] (%p3194_p4)  ;;  %2819 = vst [vmem:[%s6476_s29 + $0x18] sm:$0xff] (%p3194_p4), %v2818_v27  ;;  %2833 = vst [vmem:[%s6476_s29 + $0x110] sm:$0xff] (%p3194_p4), %v2832_v20 }
 0x4a3   : > { %2817 = vst [vmem:[%s6476_s29 + $0x10] sm:$0xff] (%p3194_p4), %v2816_v35 }
 0x4d5   : > { %v3003_v37 = vpop.f32.mrb[4].mxu1  ;;  %v2991_v36 = vpop.f32.mrb[4].mxu0 }
 0x4d6   : > { %v2715_v52 = vadd.f32 %v3003_v37, %v2901_v62  ;;  %v2709_v61 = vpop.f32.mrb[5].mxu1  ;;  %v2675_v8 = vadd.f32 %v2991_v36, %v2901_v62  ;;  %v2669_v9 = vpop.f32.mrb[5].mxu0 }
 0x4d7   : > { %v2710_v41 = vadd.f32 %v2901_v62, %v2709_v61  ;;  %v2670_v16 = vadd.f32 %v2901_v62, %v2669_v9 }
 0x4d8   : > { %2741 = vst.msk [vmem:[%s6435_s28 + $0x68] sm:$0xff] %vm1381_vm7, %v2715_v52  ;;  %2733 = vst.msk [vmem:[%s6435_s28 + $0x28] sm:$0xff] %vm1381_vm7, %v2675_v8 }
 0x4d9   : > { %2740 = vst.msk [vmem:[%s6435_s28 + $0x60] sm:$0xff] %vm1381_vm7, %v2710_v41  ;;  %2732 = vst.msk [vmem:[%s6435_s28 + $0x20] sm:$0xff] %vm1381_vm7, %v2670_v16 }
 0x4df   : > { %v2822_v4 = vld [vmem:[%s6435_s28 + $0x28] sm:$0xff] (%p3194_p4) }
 0x4e0   : > { %v2820_v44 = vld [vmem:[%s6435_s28 + $0x20] sm:$0xff] (%p3194_p4)  ;;  %2823 = vst [vmem:[%s6476_s29 + $0x28] sm:$0xff] (%p3194_p4), %v2822_v4  ;;  %v2838_v0 = vld [vmem:[%s6435_s28 + $0x68] sm:$0xff] (%p3194_p4) }
 0x4e1   : > { %2821 = vst [vmem:[%s6476_s29 + $0x20] sm:$0xff] (%p3194_p4), %v2820_v44  ;;  %v2836_v46 = vld [vmem:[%s6435_s28 + $0x60] sm:$0xff] (%p3194_p4)  ;;  %2839 = vst [vmem:[%s6476_s29 + $0x128] sm:$0xff] (%p3194_p4), %v2838_v0 }
 0x4e2   : > { %2837 = vst [vmem:[%s6476_s29 + $0x120] sm:$0xff] (%p3194_p4), %v2836_v46 }
 0x4fb   : > { %2750 = sbr.rel (!%p3194_p4) target bundleno = 1291 (0x50b), region = 36 }
 0x4fd   : > { %v2994_v19 = vpop.f32.mrb[6].mxu0  ;;  %v3006_v11 = vpop.f32.mrb[6].mxu1 }
 0x4fe   : > { %v2685_v55 = vadd.f32 %v2994_v19, %v2901_v62  ;;  %v2725_v24 = vadd.f32 %v3006_v11, %v2901_v62  ;;  %v2679_v45 = vpop.f32.mrb[7].mxu0  ;;  %v2719_v38 = vpop.f32.mrb[7].mxu1 }
 0x4ff   : > { %v2680_v49 = vadd.f32 %v2901_v62, %v2679_v45  ;;  %v2720_v58 = vadd.f32 %v2901_v62, %v2719_v38 }
 0x500   : > { %2735 = vst.msk [vmem:[%s6435_s28 + $0x38] sm:$0xff] %vm1381_vm7, %v2685_v55  ;;  %2743 = vst.msk [vmem:[%s6435_s28 + $0x78] sm:$0xff] %vm1381_vm7, %v2725_v24 }
 0x501   : > { %2734 = vst.msk [vmem:[%s6435_s28 + $0x30] sm:$0xff] %vm1381_vm7, %v2680_v49  ;;  %2742 = vst.msk [vmem:[%s6435_s28 + $0x70] sm:$0xff] %vm1381_vm7, %v2720_v58 }
 0x507   : > { %v2826_v14 = vld [vmem:[%s6435_s28 + $0x38] sm:$0xff] }
 0x508   : > { %v2824_v53 = vld [vmem:[%s6435_s28 + $0x30] sm:$0xff]  ;;  %2827 = vst [vmem:[%s6476_s29 + $0x38] sm:$0xff] %v2826_v14  ;;  %v2842_v51 = vld [vmem:[%s6435_s28 + $0x78] sm:$0xff] }
 0x509   : > { %2825 = vst [vmem:[%s6476_s29 + $0x30] sm:$0xff] %v2824_v53  ;;  %v2840_v25 = vld [vmem:[%s6435_s28 + $0x70] sm:$0xff]  ;;  %2843 = vst [vmem:[%s6476_s29 + $0x138] sm:$0xff] %v2842_v51 }
 0x50a   : > { %2841 = vst [vmem:[%s6476_s29 + $0x130] sm:$0xff] %v2840_v25 }
 0x50b PF: > { %p10_p11 = scmp.ge.s32.totalorder %s3184_s16, 6   ;;  %s7359_s12 = smov %s3127_s13 }
 0x50c   : > { %s7360_s13 = smov %s3192_s19  ;;  %s7361_s14 = smov %s3184_s16 }
 0x50d   :  { %12 = sbr.rel (!%p10_p11) target bundleno = 2 (0x2), region = 100 }

</bundles_post_ra>
